<compile_context>
chip_gen: v6e
topology: v6e:2x2x1
jax: 0.10.0
libtpu: 0.0.40
codegen_flags: <defaults>
</compile_context>

<pallas_src>
import jax
import jax.numpy as jnp
import numpy as np
from jax.experimental import pallas as pl
from jax.experimental.pallas import tpu as pltpu

# ----------------------------- model constants ------------------------------
BATCH = 2
C = 32              # channel width of every conv layer
K1 = 32             # conv1 kernel == stride
GROUP = 16          # conv2/3/4 kernel == stride
PACK = GROUP * C    # 512: packed feature width (16 conv1 patches == 1 conv2 patch)
T2 = 256            # conv2 output length
T3 = 16             # conv3 output length (conv4 output length is 1)
# Minimum input_dim for which all four convs (k = s = 32,16,16,16) emit >= 1 step.
INPUT_DIM = T2 * PACK                                    # 131072 = 32*16*16*16
CONV_SPECS = [(1, C, K1), (C, C, GROUP), (C, C, GROUP), (C, C, GROUP)]  # (cin, cout, k)
LINEAR_SPECS = [(C, 256), (256, 64), (64, 16), (16, 1)]                 # (in, out)
BN_EPS = 1e-5       # PyTorch BatchNorm1d default


# ------------------------------ Pallas kernel --------------------------------
def _cnn2_kernel(x_ref,
                 w1_ref, b1_ref, sc1_ref, sh1_ref,
                 w2_ref, b2_ref, sc2_ref, sh2_ref,
                 w3_ref, b3_ref,
                 w4_ref, b4_ref,
                 l1w_ref, l1b_ref, l2w_ref, l2b_ref,
                 l3w_ref, l3b_ref, l4w_ref, l4b_ref,
                 o_ref):
    f32 = jnp.float32
    x = x_ref[0]                                                    # (T2, PACK)

    # conv1 (block-diagonal packed, 16 patches per row) -> ReLU -> folded BN1.
    h1 = jnp.dot(x, w1_ref[...], preferred_element_type=f32) + b1_ref[...]
    h1 = jnp.maximum(h1, 0.0) * sc1_ref[...] + sh1_ref[...]         # (T2, PACK)

    # conv2 -> ReLU -> folded BN2.  h1 rows are already (k, c_in)-ordered patches.
    h2 = jnp.dot(h1, w2_ref[...], preferred_element_type=f32) + b2_ref[...]
    h2 = jnp.maximum(h2, 0.0) * sc2_ref[...] + sh2_ref[...]         # (T2, C)

    # conv3 -> ReLU.  Row regrouping t2 = 16*t3 + k via one-hot selection matmuls
    # (all-dense; avoids sublane->lane reshapes / strided gathers).
    row3 = jax.lax.broadcasted_iota(jnp.int32, (T3, T2), 0)
    col3 = jax.lax.broadcasted_iota(jnp.int32, (T3, T2), 1)
    offset = col3 - row3 * GROUP                                    # (T3, T2)
    acc3 = jnp.zeros((T3, C), f32)
    for k in range(GROUP):
        sel = jnp.where(offset == k, 1.0, 0.0).astype(f32)          # picks rows 16*t3 + k
        rows_k = jnp.dot(sel, h2, preferred_element_type=f32)       # (T3, C)
        acc3 = acc3 + jnp.dot(rows_k, w3_ref[pl.ds(k * C, C), :],
                              preferred_element_type=f32)
    h3 = jnp.maximum(acc3 + b3_ref[...], 0.0)                       # (T3, C)

    # conv4 -> ReLU.  Single output step; masked accumulation over the 16 taps.
    rowk = jax.lax.broadcasted_iota(jnp.int32, (T3, C), 0)
    acc4 = jnp.zeros((T3, C), f32)
    for k in range(GROUP):
        contrib = jnp.dot(h3, w4_ref[pl.ds(k * C, C), :],
                          preferred_element_type=f32)               # (T3, C)
        acc4 = acc4 + jnp.where(rowk == k, contrib, 0.0)
    # Column-sum + broadcast to 8 rows with one matmul (keeps M >= 8 everywhere).
    ones8 = jnp.ones((8, T3), f32)
    h4 = jnp.dot(ones8, acc4, preferred_element_type=f32) + b4_ref[...]
    h4 = jnp.maximum(h4, 0.0)                                       # (8, C), identical rows
    # torch.flatten(x, 1) on (B, 32, 1) is exactly these 32 channel values.

    # classifier (nn.Dropout(0.2) is identity under eval-mode semantics).
    z = jnp.maximum(jnp.dot(h4, l1w_ref[...], preferred_element_type=f32)
                    + l1b_ref[...], 0.0)                            # (8, 256)
    z = jnp.maximum(jnp.dot(z, l2w_ref[...], preferred_element_type=f32)
                    + l2b_ref[...], 0.0)                            # (8, 64)
    z = jnp.maximum(jnp.dot(z, l3w_ref[...], preferred_element_type=f32)
                    + l3b_ref[...], 0.0)                            # (8, 16)
    z = jnp.sum(z * l4w_ref[...], axis=-1, keepdims=True) + l4b_ref[...]   # (8, 1)
    o_ref[0] = z[0:1, :]                                            # (1, 1)


def cnn2_forward_pallas(x, ops):
    """Fused CNN2 forward.  x: (B, INPUT_DIM) float32 -> (B, 1) float32."""
    B = x.shape[0]
    assert x.shape[1] == INPUT_DIM
    xp = x.reshape(B, T2, PACK).astype(jnp.float32)   # pure reshape (c_in == 1)

    in_specs = [pl.BlockSpec((1, T2, PACK), lambda b: (b, 0, 0))]
    for op in ops:
        assert op.ndim == 2
        in_specs.append(pl.BlockSpec(op.shape, lambda b: (0, 0)))   # resident constants

    out = pl.pallas_call(
        _cnn2_kernel,
        out_shape=jax.ShapeDtypeStruct((B, 1, 1), jnp.float32),
        grid=(B,),
        in_specs=in_specs,
        out_specs=pl.BlockSpec((1, 1, 1), lambda b: (b, 0, 0)),
        compiler_params=pltpu.CompilerParams(
            dimension_semantics=("parallel",)),  # 2 TCs on v7x; cheap 2-step seq on v5e/v6e
    )(xp, *ops)
    return out.reshape(B, 1)


# ------------------------------ parameters -----------------------------------
def init_params(key):
    """Canonical PyTorch-layout parameters (synthetic, eval-mode BN stats)."""
    keys = iter(jax.random.split(key, 32))

    def uni(shape, bound):
        return jax.random.uniform(next(keys), shape, jnp.float32, -bound, bound)

    p = {"conv_w": [], "conv_b": [], "bn_gamma": [], "bn_beta": [],
         "bn_mean": [], "bn_var": [], "lin_w": [], "lin_b": []}
    for (cin, cout, k) in CONV_SPECS:
        bound = 1.0 / np.sqrt(cin * k)
        p["conv_w"].append(uni((cout, cin, k), bound))   # (C_out, C_in, K)
        p["conv_b"].append(uni((cout,), bound))
    for _ in range(2):                                   # BN after conv1 and conv2
        p["bn_gamma"].append(1.0 + 0.2 * uni((C,), 1.0))
        p["bn_beta"].append(0.1 * uni((C,), 1.0))
        p["bn_mean"].append(0.1 * uni((C,), 1.0))
        p["bn_var"].append(1.0 + 0.5 * jnp.abs(uni((C,), 1.0)))
    for (fin, fout) in LINEAR_SPECS:
        bound = 1.0 / np.sqrt(fin)
        p["lin_w"].append(uni((fout, fin), bound))       # (out, in)
        p["lin_b"].append(uni((fout,), bound))
    return p


def pack_params(p):
    """Build the kernel operands: block-diag conv1, (k, c_in)-permuted conv2/3/4,
    folded BN scale/shift, transposed Linear weights."""
    def perm_kc(w):  # (cout, cin, k) -> (k*cin, cout), row index = k*cin + ci
        cout, cin, k = w.shape
        return jnp.transpose(w, (2, 1, 0)).reshape(k * cin, cout)

    w1_mat = jnp.transpose(p["conv_w"][0][:, 0, :])          # (K1, C) = (32, 32)
    w1_big = jnp.kron(jnp.eye(GROUP, dtype=jnp.float32), w1_mat)   # (512, 512)

    scale, shift = [], []
    for i in range(2):
        s = p["bn_gamma"][i] / jnp.sqrt(p["bn_var"][i] + BN_EPS)
        t = p["bn_beta"][i] - p["bn_mean"][i] * s
        scale.append(s)
        shift.append(t)

    ops = (
        w1_big,
        jnp.tile(p["conv_b"][0], GROUP).reshape(1, PACK),
        jnp.tile(scale[0], GROUP).reshape(1, PACK),
        jnp.tile(shift[0], GROUP).reshape(1, PACK),
        perm_kc(p["conv_w"][1]),                 # (512, 32)
        p["conv_b"][1].reshape(1, C),
        scale[1].reshape(1, C),
        shift[1].reshape(1, C),
        perm_kc(p["conv_w"][2]),                 # (512, 32)
        p["conv_b"][2].reshape(1, C),
        perm_kc(p["conv_w"][3]),                 # (512, 32)
        p["conv_b"][3].reshape(1, C),
        jnp.transpose(p["lin_w"][0]), p["lin_b"][0].reshape(1, -1),   # (32, 256)
        jnp.transpose(p["lin_w"][1]), p["lin_b"][1].reshape(1, -1),   # (256, 64)
        jnp.transpose(p["lin_w"][2]), p["lin_b"][2].reshape(1, -1),   # (64, 16)
        p["lin_w"][3],                           # (1, 16), used as a row vector
        p["lin_b"][3].reshape(1, 1),
    )
    return ops


# ------------------------------ pure-JAX reference ---------------------------
def cnn2_reference(x, params):
    """PyTorch-semantics (eval mode) forward in plain JAX, HIGHEST precision."""
    B = x.shape[0]
    hp = jax.lax.Precision.HIGHEST
    h = x.reshape(B, 1, INPUT_DIM).astype(jnp.float32)        # NCL
    for i, (cin, cout, k) in enumerate(CONV_SPECS):
        _, Cc, L = h.shape
        T = (L - k) // k + 1
        patches = h[:, :, : T * k].reshape(B, Cc, T, k)
        patches = jnp.transpose(patches, (0, 2, 1, 3)).reshape(B * T, Cc * k)
        w = params["conv_w"][i].reshape(cout, cin * k)
        y = jnp.dot(patches, w.T, precision=hp) + params["conv_b"][i]
        y = jnp.maximum(y, 0.0)
        if i < 2:  # BatchNorm1d after conv1 / conv2 (eval mode)
            s = params["bn_gamma"][i] / jnp.sqrt(params["bn_var"][i] + BN_EPS)
            t = params["bn_beta"][i] - params["bn_mean"][i] * s
            y = y * s + t
        h = jnp.transpose(y.reshape(B, T, cout), (0, 2, 1))    # back to NCL
    feat = h.reshape(B, -1)                                    # flatten (L == 1)
    for j in range(len(LINEAR_SPECS)):
        feat = jnp.dot(feat, params["lin_w"][j].T, precision=hp) + params["lin_b"][j]
        if j < len(LINEAR_SPECS) - 1:
            feat = jnp.maximum(feat, 0.0)
    return feat


# ------------------------------------ main -----------------------------------
if __name__ == "__main__":
    key = jax.random.PRNGKey(0)
    pkey, xkey = jax.random.split(key)
    params = init_params(pkey)
    ops = pack_params(params)
    x = jax.random.normal(xkey, (BATCH, INPUT_DIM), jnp.float32)

    fwd = jax.jit(cnn2_forward_pallas)
    out = jax.block_until_ready(fwd(x, ops))
    assert out.shape == (BATCH, 1), out.shape

    ref = np.asarray(cnn2_reference(x, params))
    np.testing.assert_allclose(np.asarray(out), ref, rtol=1e-2, atol=1e-2)

    print("KERNEL_OK")
</pallas_src>

<mosaic_0001>
module attributes {stable_mosaic.version = 11 : i64} {
  func.func @_cnn2_kernel(%arg0: i32, %arg1: memref<1x256x512xf32, #tpu.memory_space<vmem>>, %arg2: memref<512x512xf32, #tpu.memory_space<vmem>>, %arg3: memref<1x512xf32, #tpu.memory_space<vmem>>, %arg4: memref<1x512xf32, #tpu.memory_space<vmem>>, %arg5: memref<1x512xf32, #tpu.memory_space<vmem>>, %arg6: memref<512x32xf32, #tpu.memory_space<vmem>>, %arg7: memref<1x32xf32, #tpu.memory_space<vmem>>, %arg8: memref<1x32xf32, #tpu.memory_space<vmem>>, %arg9: memref<1x32xf32, #tpu.memory_space<vmem>>, %arg10: memref<512x32xf32, #tpu.memory_space<vmem>>, %arg11: memref<1x32xf32, #tpu.memory_space<vmem>>, %arg12: memref<512x32xf32, #tpu.memory_space<vmem>>, %arg13: memref<1x32xf32, #tpu.memory_space<vmem>>, %arg14: memref<32x256xf32, #tpu.memory_space<vmem>>, %arg15: memref<1x256xf32, #tpu.memory_space<vmem>>, %arg16: memref<256x64xf32, #tpu.memory_space<vmem>>, %arg17: memref<1x64xf32, #tpu.memory_space<vmem>>, %arg18: memref<64x16xf32, #tpu.memory_space<vmem>>, %arg19: memref<1x16xf32, #tpu.memory_space<vmem>>, %arg20: memref<1x16xf32, #tpu.memory_space<vmem>>, %arg21: memref<1x1xf32, #tpu.memory_space<vmem>>, %arg22: memref<1x1x1xf32, #tpu.memory_space<vmem>>) attributes {dimension_semantics = [#tpu.dimension_semantics<parallel>], iteration_bounds = array<i64: 2>, scalar_prefetch = 0 : i64, scratch_operands = 0 : i64, tpu.core_type = #tpu.core_type<tc>, window_params = [{transform_indices = @transform_0, window_bounds = array<i64: 1, 256, 512>}, {pipeline_mode = #tpu.pipeline_mode<synchronous>, transform_indices = @transform_1, window_bounds = array<i64: 512, 512>}, {pipeline_mode = #tpu.pipeline_mode<synchronous>, transform_indices = @transform_2, window_bounds = array<i64: 1, 512>}, {pipeline_mode = #tpu.pipeline_mode<synchronous>, transform_indices = @transform_3, window_bounds = array<i64: 1, 512>}, {pipeline_mode = #tpu.pipeline_mode<synchronous>, transform_indices = @transform_4, window_bounds = array<i64: 1, 512>}, {pipeline_mode = #tpu.pipeline_mode<synchronous>, transform_indices = @transform_5, window_bounds = array<i64: 512, 32>}, {pipeline_mode = #tpu.pipeline_mode<synchronous>, transform_indices = @transform_6, window_bounds = array<i64: 1, 32>}, {pipeline_mode = #tpu.pipeline_mode<synchronous>, transform_indices = @transform_7, window_bounds = array<i64: 1, 32>}, {pipeline_mode = #tpu.pipeline_mode<synchronous>, transform_indices = @transform_8, window_bounds = array<i64: 1, 32>}, {pipeline_mode = #tpu.pipeline_mode<synchronous>, transform_indices = @transform_9, window_bounds = array<i64: 512, 32>}, {pipeline_mode = #tpu.pipeline_mode<synchronous>, transform_indices = @transform_10, window_bounds = array<i64: 1, 32>}, {pipeline_mode = #tpu.pipeline_mode<synchronous>, transform_indices = @transform_11, window_bounds = array<i64: 512, 32>}, {pipeline_mode = #tpu.pipeline_mode<synchronous>, transform_indices = @transform_12, window_bounds = array<i64: 1, 32>}, {pipeline_mode = #tpu.pipeline_mode<synchronous>, transform_indices = @transform_13, window_bounds = array<i64: 32, 256>}, {pipeline_mode = #tpu.pipeline_mode<synchronous>, transform_indices = @transform_14, window_bounds = array<i64: 1, 256>}, {pipeline_mode = #tpu.pipeline_mode<synchronous>, transform_indices = @transform_15, window_bounds = array<i64: 256, 64>}, {pipeline_mode = #tpu.pipeline_mode<synchronous>, transform_indices = @transform_16, window_bounds = array<i64: 1, 64>}, {pipeline_mode = #tpu.pipeline_mode<synchronous>, transform_indices = @transform_17, window_bounds = array<i64: 64, 16>}, {pipeline_mode = #tpu.pipeline_mode<synchronous>, transform_indices = @transform_18, window_bounds = array<i64: 1, 16>}, {pipeline_mode = #tpu.pipeline_mode<synchronous>, transform_indices = @transform_19, window_bounds = array<i64: 1, 16>}, {pipeline_mode = #tpu.pipeline_mode<synchronous>, transform_indices = @transform_20, window_bounds = array<i64: 1, 1>}, {transform_indices = @transform_21, window_bounds = array<i64: 1, 1, 1>}]} {
    %c0 = arith.constant 0 : index
    %c0_0 = arith.constant 0 : index
    %c0_1 = arith.constant 0 : index
    %0 = vector.load %arg1[%c0, %c0_0, %c0_1] : memref<1x256x512xf32, #tpu.memory_space<vmem>>, vector<1x256x512xf32>
    %1 = vector.shape_cast %0 : vector<1x256x512xf32> to vector<256x512xf32>
    %c0_2 = arith.constant 0 : index
    %c0_3 = arith.constant 0 : index
    %2 = vector.load %arg2[%c0_2, %c0_3] : memref<512x512xf32, #tpu.memory_space<vmem>>, vector<512x512xf32>
    %cst = arith.constant dense<0.000000e+00> : vector<256x512xf32>
    %3 = tpu.matmul %1, %2, %cst {dimension_numbers = #tpu.dot_dimension_numbers<[1], [0], [0], [1], [0, 0, 1, 1], [], []>} : vector<256x512xf32>, vector<512x512xf32>, vector<256x512xf32> -> vector<256x512xf32>
    %c0_4 = arith.constant 0 : index
    %c0_5 = arith.constant 0 : index
    %4 = vector.load %arg3[%c0_4, %c0_5] : memref<1x512xf32, #tpu.memory_space<vmem>>, vector<1x512xf32>
    %5 = vector.broadcast %4 : vector<1x512xf32> to vector<256x512xf32>
    %6 = arith.addf %3, %5 : vector<256x512xf32>
    %cst_6 = arith.constant 0.000000e+00 : f32
    %7 = vector.broadcast %cst_6 : f32 to vector<256x512xf32>
    %8 = arith.maximumf %6, %7 : vector<256x512xf32>
    %c0_7 = arith.constant 0 : index
    %c0_8 = arith.constant 0 : index
    %9 = vector.load %arg4[%c0_7, %c0_8] : memref<1x512xf32, #tpu.memory_space<vmem>>, vector<1x512xf32>
    %10 = vector.broadcast %9 : vector<1x512xf32> to vector<256x512xf32>
    %11 = arith.mulf %8, %10 : vector<256x512xf32>
    %c0_9 = arith.constant 0 : index
    %c0_10 = arith.constant 0 : index
    %12 = vector.load %arg5[%c0_9, %c0_10] : memref<1x512xf32, #tpu.memory_space<vmem>>, vector<1x512xf32>
    %13 = vector.broadcast %12 : vector<1x512xf32> to vector<256x512xf32>
    %14 = arith.addf %11, %13 : vector<256x512xf32>
    %c0_11 = arith.constant 0 : index
    %c0_12 = arith.constant 0 : index
    %15 = vector.load %arg6[%c0_11, %c0_12] : memref<512x32xf32, #tpu.memory_space<vmem>>, vector<512x32xf32>
    %cst_13 = arith.constant dense<0.000000e+00> : vector<256x32xf32>
    %16 = tpu.matmul %14, %15, %cst_13 {dimension_numbers = #tpu.dot_dimension_numbers<[1], [0], [0], [1], [0, 0, 1, 1], [], []>} : vector<256x512xf32>, vector<512x32xf32>, vector<256x32xf32> -> vector<256x32xf32>
    %c0_14 = arith.constant 0 : index
    %c0_15 = arith.constant 0 : index
    %17 = vector.load %arg7[%c0_14, %c0_15] : memref<1x32xf32, #tpu.memory_space<vmem>>, vector<1x32xf32>
    %18 = vector.broadcast %17 : vector<1x32xf32> to vector<256x32xf32>
    %19 = arith.addf %16, %18 : vector<256x32xf32>
    %cst_16 = arith.constant 0.000000e+00 : f32
    %20 = vector.broadcast %cst_16 : f32 to vector<256x32xf32>
    %21 = arith.maximumf %19, %20 : vector<256x32xf32>
    %c0_17 = arith.constant 0 : index
    %c0_18 = arith.constant 0 : index
    %22 = vector.load %arg8[%c0_17, %c0_18] : memref<1x32xf32, #tpu.memory_space<vmem>>, vector<1x32xf32>
    %23 = vector.broadcast %22 : vector<1x32xf32> to vector<256x32xf32>
    %24 = arith.mulf %21, %23 : vector<256x32xf32>
    %c0_19 = arith.constant 0 : index
    %c0_20 = arith.constant 0 : index
    %25 = vector.load %arg9[%c0_19, %c0_20] : memref<1x32xf32, #tpu.memory_space<vmem>>, vector<1x32xf32>
    %26 = vector.broadcast %25 : vector<1x32xf32> to vector<256x32xf32>
    %27 = arith.addf %24, %26 : vector<256x32xf32>
    %28 = tpu.iota {dimensions = array<i32: 0>} : vector<16x256xi32>
    %29 = tpu.iota {dimensions = array<i32: 1>} : vector<16x256xi32>
    %c16_i32 = arith.constant 16 : i32
    %30 = vector.broadcast %c16_i32 : i32 to vector<16x256xi32>
    %31 = arith.muli %28, %30 : vector<16x256xi32>
    %32 = arith.subi %29, %31 : vector<16x256xi32>
    %cst_21 = arith.constant 0.000000e+00 : f32
    %33 = vector.broadcast %cst_21 : f32 to vector<16x32xf32>
    %c0_i32 = arith.constant 0 : i32
    %34 = vector.broadcast %c0_i32 : i32 to vector<16x256xi32>
    %35 = arith.cmpi eq, %32, %34 : vector<16x256xi32>
    %cst_22 = arith.constant 1.000000e+00 : f32
    %cst_23 = arith.constant 0.000000e+00 : f32
    %36 = vector.broadcast %cst_22 : f32 to vector<16x256xf32>
    %37 = vector.broadcast %cst_23 : f32 to vector<16x256xf32>
    %38 = arith.select %35, %36, %37 : vector<16x256xi1>, vector<16x256xf32>
    %cst_24 = arith.constant dense<0.000000e+00> : vector<16x32xf32>
    %39 = tpu.matmul %38, %27, %cst_24 {dimension_numbers = #tpu.dot_dimension_numbers<[1], [0], [0], [1], [0, 0, 1, 1], [], []>} : vector<16x256xf32>, vector<256x32xf32>, vector<16x32xf32> -> vector<16x32xf32>
    %c0_25 = arith.constant 0 : index
    %c0_26 = arith.constant 0 : index
    %40 = vector.load %arg10[%c0_25, %c0_26] : memref<512x32xf32, #tpu.memory_space<vmem>>, vector<32x32xf32>
    %cst_27 = arith.constant dense<0.000000e+00> : vector<16x32xf32>
    %41 = tpu.matmul %39, %40, %cst_27 {dimension_numbers = #tpu.dot_dimension_numbers<[1], [0], [0], [1], [0, 0, 1, 1], [], []>} : vector<16x32xf32>, vector<32x32xf32>, vector<16x32xf32> -> vector<16x32xf32>
    %42 = arith.addf %33, %41 : vector<16x32xf32>
    %c1_i32 = arith.constant 1 : i32
    %43 = vector.broadcast %c1_i32 : i32 to vector<16x256xi32>
    %44 = arith.cmpi eq, %32, %43 : vector<16x256xi32>
    %cst_28 = arith.constant 1.000000e+00 : f32
    %cst_29 = arith.constant 0.000000e+00 : f32
    %45 = vector.broadcast %cst_28 : f32 to vector<16x256xf32>
    %46 = vector.broadcast %cst_29 : f32 to vector<16x256xf32>
    %47 = arith.select %44, %45, %46 : vector<16x256xi1>, vector<16x256xf32>
    %cst_30 = arith.constant dense<0.000000e+00> : vector<16x32xf32>
    %48 = tpu.matmul %47, %27, %cst_30 {dimension_numbers = #tpu.dot_dimension_numbers<[1], [0], [0], [1], [0, 0, 1, 1], [], []>} : vector<16x256xf32>, vector<256x32xf32>, vector<16x32xf32> -> vector<16x32xf32>
    %c32 = arith.constant 32 : index
    %c0_31 = arith.constant 0 : index
    %49 = vector.load %arg10[%c32, %c0_31] : memref<512x32xf32, #tpu.memory_space<vmem>>, vector<32x32xf32>
    %cst_32 = arith.constant dense<0.000000e+00> : vector<16x32xf32>
    %50 = tpu.matmul %48, %49, %cst_32 {dimension_numbers = #tpu.dot_dimension_numbers<[1], [0], [0], [1], [0, 0, 1, 1], [], []>} : vector<16x32xf32>, vector<32x32xf32>, vector<16x32xf32> -> vector<16x32xf32>
    %51 = arith.addf %42, %50 : vector<16x32xf32>
    %c2_i32 = arith.constant 2 : i32
    %52 = vector.broadcast %c2_i32 : i32 to vector<16x256xi32>
    %53 = arith.cmpi eq, %32, %52 : vector<16x256xi32>
    %cst_33 = arith.constant 1.000000e+00 : f32
    %cst_34 = arith.constant 0.000000e+00 : f32
    %54 = vector.broadcast %cst_33 : f32 to vector<16x256xf32>
    %55 = vector.broadcast %cst_34 : f32 to vector<16x256xf32>
    %56 = arith.select %53, %54, %55 : vector<16x256xi1>, vector<16x256xf32>
    %cst_35 = arith.constant dense<0.000000e+00> : vector<16x32xf32>
    %57 = tpu.matmul %56, %27, %cst_35 {dimension_numbers = #tpu.dot_dimension_numbers<[1], [0], [0], [1], [0, 0, 1, 1], [], []>} : vector<16x256xf32>, vector<256x32xf32>, vector<16x32xf32> -> vector<16x32xf32>
    %c64 = arith.constant 64 : index
    %c0_36 = arith.constant 0 : index
    %58 = vector.load %arg10[%c64, %c0_36] : memref<512x32xf32, #tpu.memory_space<vmem>>, vector<32x32xf32>
    %cst_37 = arith.constant dense<0.000000e+00> : vector<16x32xf32>
    %59 = tpu.matmul %57, %58, %cst_37 {dimension_numbers = #tpu.dot_dimension_numbers<[1], [0], [0], [1], [0, 0, 1, 1], [], []>} : vector<16x32xf32>, vector<32x32xf32>, vector<16x32xf32> -> vector<16x32xf32>
    %60 = arith.addf %51, %59 : vector<16x32xf32>
    %c3_i32 = arith.constant 3 : i32
    %61 = vector.broadcast %c3_i32 : i32 to vector<16x256xi32>
    %62 = arith.cmpi eq, %32, %61 : vector<16x256xi32>
    %cst_38 = arith.constant 1.000000e+00 : f32
    %cst_39 = arith.constant 0.000000e+00 : f32
    %63 = vector.broadcast %cst_38 : f32 to vector<16x256xf32>
    %64 = vector.broadcast %cst_39 : f32 to vector<16x256xf32>
    %65 = arith.select %62, %63, %64 : vector<16x256xi1>, vector<16x256xf32>
    %cst_40 = arith.constant dense<0.000000e+00> : vector<16x32xf32>
    %66 = tpu.matmul %65, %27, %cst_40 {dimension_numbers = #tpu.dot_dimension_numbers<[1], [0], [0], [1], [0, 0, 1, 1], [], []>} : vector<16x256xf32>, vector<256x32xf32>, vector<16x32xf32> -> vector<16x32xf32>
    %c96 = arith.constant 96 : index
    %c0_41 = arith.constant 0 : index
    %67 = vector.load %arg10[%c96, %c0_41] : memref<512x32xf32, #tpu.memory_space<vmem>>, vector<32x32xf32>
    %cst_42 = arith.constant dense<0.000000e+00> : vector<16x32xf32>
    %68 = tpu.matmul %66, %67, %cst_42 {dimension_numbers = #tpu.dot_dimension_numbers<[1], [0], [0], [1], [0, 0, 1, 1], [], []>} : vector<16x32xf32>, vector<32x32xf32>, vector<16x32xf32> -> vector<16x32xf32>
    %69 = arith.addf %60, %68 : vector<16x32xf32>
    %c4_i32 = arith.constant 4 : i32
    %70 = vector.broadcast %c4_i32 : i32 to vector<16x256xi32>
    %71 = arith.cmpi eq, %32, %70 : vector<16x256xi32>
    %cst_43 = arith.constant 1.000000e+00 : f32
    %cst_44 = arith.constant 0.000000e+00 : f32
    %72 = vector.broadcast %cst_43 : f32 to vector<16x256xf32>
    %73 = vector.broadcast %cst_44 : f32 to vector<16x256xf32>
    %74 = arith.select %71, %72, %73 : vector<16x256xi1>, vector<16x256xf32>
    %cst_45 = arith.constant dense<0.000000e+00> : vector<16x32xf32>
    %75 = tpu.matmul %74, %27, %cst_45 {dimension_numbers = #tpu.dot_dimension_numbers<[1], [0], [0], [1], [0, 0, 1, 1], [], []>} : vector<16x256xf32>, vector<256x32xf32>, vector<16x32xf32> -> vector<16x32xf32>
    %c128 = arith.constant 128 : index
    %c0_46 = arith.constant 0 : index
    %76 = vector.load %arg10[%c128, %c0_46] : memref<512x32xf32, #tpu.memory_space<vmem>>, vector<32x32xf32>
    %cst_47 = arith.constant dense<0.000000e+00> : vector<16x32xf32>
    %77 = tpu.matmul %75, %76, %cst_47 {dimension_numbers = #tpu.dot_dimension_numbers<[1], [0], [0], [1], [0, 0, 1, 1], [], []>} : vector<16x32xf32>, vector<32x32xf32>, vector<16x32xf32> -> vector<16x32xf32>
    %78 = arith.addf %69, %77 : vector<16x32xf32>
    %c5_i32 = arith.constant 5 : i32
    %79 = vector.broadcast %c5_i32 : i32 to vector<16x256xi32>
    %80 = arith.cmpi eq, %32, %79 : vector<16x256xi32>
    %cst_48 = arith.constant 1.000000e+00 : f32
    %cst_49 = arith.constant 0.000000e+00 : f32
    %81 = vector.broadcast %cst_48 : f32 to vector<16x256xf32>
    %82 = vector.broadcast %cst_49 : f32 to vector<16x256xf32>
    %83 = arith.select %80, %81, %82 : vector<16x256xi1>, vector<16x256xf32>
    %cst_50 = arith.constant dense<0.000000e+00> : vector<16x32xf32>
    %84 = tpu.matmul %83, %27, %cst_50 {dimension_numbers = #tpu.dot_dimension_numbers<[1], [0], [0], [1], [0, 0, 1, 1], [], []>} : vector<16x256xf32>, vector<256x32xf32>, vector<16x32xf32> -> vector<16x32xf32>
    %c160 = arith.constant 160 : index
    %c0_51 = arith.constant 0 : index
    %85 = vector.load %arg10[%c160, %c0_51] : memref<512x32xf32, #tpu.memory_space<vmem>>, vector<32x32xf32>
    %cst_52 = arith.constant dense<0.000000e+00> : vector<16x32xf32>
    %86 = tpu.matmul %84, %85, %cst_52 {dimension_numbers = #tpu.dot_dimension_numbers<[1], [0], [0], [1], [0, 0, 1, 1], [], []>} : vector<16x32xf32>, vector<32x32xf32>, vector<16x32xf32> -> vector<16x32xf32>
    %87 = arith.addf %78, %86 : vector<16x32xf32>
    %c6_i32 = arith.constant 6 : i32
    %88 = vector.broadcast %c6_i32 : i32 to vector<16x256xi32>
    %89 = arith.cmpi eq, %32, %88 : vector<16x256xi32>
    %cst_53 = arith.constant 1.000000e+00 : f32
    %cst_54 = arith.constant 0.000000e+00 : f32
    %90 = vector.broadcast %cst_53 : f32 to vector<16x256xf32>
    %91 = vector.broadcast %cst_54 : f32 to vector<16x256xf32>
    %92 = arith.select %89, %90, %91 : vector<16x256xi1>, vector<16x256xf32>
    %cst_55 = arith.constant dense<0.000000e+00> : vector<16x32xf32>
    %93 = tpu.matmul %92, %27, %cst_55 {dimension_numbers = #tpu.dot_dimension_numbers<[1], [0], [0], [1], [0, 0, 1, 1], [], []>} : vector<16x256xf32>, vector<256x32xf32>, vector<16x32xf32> -> vector<16x32xf32>
    %c192 = arith.constant 192 : index
    %c0_56 = arith.constant 0 : index
    %94 = vector.load %arg10[%c192, %c0_56] : memref<512x32xf32, #tpu.memory_space<vmem>>, vector<32x32xf32>
    %cst_57 = arith.constant dense<0.000000e+00> : vector<16x32xf32>
    %95 = tpu.matmul %93, %94, %cst_57 {dimension_numbers = #tpu.dot_dimension_numbers<[1], [0], [0], [1], [0, 0, 1, 1], [], []>} : vector<16x32xf32>, vector<32x32xf32>, vector<16x32xf32> -> vector<16x32xf32>
    %96 = arith.addf %87, %95 : vector<16x32xf32>
    %c7_i32 = arith.constant 7 : i32
    %97 = vector.broadcast %c7_i32 : i32 to vector<16x256xi32>
    %98 = arith.cmpi eq, %32, %97 : vector<16x256xi32>
    %cst_58 = arith.constant 1.000000e+00 : f32
    %cst_59 = arith.constant 0.000000e+00 : f32
    %99 = vector.broadcast %cst_58 : f32 to vector<16x256xf32>
    %100 = vector.broadcast %cst_59 : f32 to vector<16x256xf32>
    %101 = arith.select %98, %99, %100 : vector<16x256xi1>, vector<16x256xf32>
    %cst_60 = arith.constant dense<0.000000e+00> : vector<16x32xf32>
    %102 = tpu.matmul %101, %27, %cst_60 {dimension_numbers = #tpu.dot_dimension_numbers<[1], [0], [0], [1], [0, 0, 1, 1], [], []>} : vector<16x256xf32>, vector<256x32xf32>, vector<16x32xf32> -> vector<16x32xf32>
    %c224 = arith.constant 224 : index
    %c0_61 = arith.constant 0 : index
    %103 = vector.load %arg10[%c224, %c0_61] : memref<512x32xf32, #tpu.memory_space<vmem>>, vector<32x32xf32>
    %cst_62 = arith.constant dense<0.000000e+00> : vector<16x32xf32>
    %104 = tpu.matmul %102, %103, %cst_62 {dimension_numbers = #tpu.dot_dimension_numbers<[1], [0], [0], [1], [0, 0, 1, 1], [], []>} : vector<16x32xf32>, vector<32x32xf32>, vector<16x32xf32> -> vector<16x32xf32>
    %105 = arith.addf %96, %104 : vector<16x32xf32>
    %c8_i32 = arith.constant 8 : i32
    %106 = vector.broadcast %c8_i32 : i32 to vector<16x256xi32>
    %107 = arith.cmpi eq, %32, %106 : vector<16x256xi32>
    %cst_63 = arith.constant 1.000000e+00 : f32
    %cst_64 = arith.constant 0.000000e+00 : f32
    %108 = vector.broadcast %cst_63 : f32 to vector<16x256xf32>
    %109 = vector.broadcast %cst_64 : f32 to vector<16x256xf32>
    %110 = arith.select %107, %108, %109 : vector<16x256xi1>, vector<16x256xf32>
    %cst_65 = arith.constant dense<0.000000e+00> : vector<16x32xf32>
    %111 = tpu.matmul %110, %27, %cst_65 {dimension_numbers = #tpu.dot_dimension_numbers<[1], [0], [0], [1], [0, 0, 1, 1], [], []>} : vector<16x256xf32>, vector<256x32xf32>, vector<16x32xf32> -> vector<16x32xf32>
    %c256 = arith.constant 256 : index
    %c0_66 = arith.constant 0 : index
    %112 = vector.load %arg10[%c256, %c0_66] : memref<512x32xf32, #tpu.memory_space<vmem>>, vector<32x32xf32>
    %cst_67 = arith.constant dense<0.000000e+00> : vector<16x32xf32>
    %113 = tpu.matmul %111, %112, %cst_67 {dimension_numbers = #tpu.dot_dimension_numbers<[1], [0], [0], [1], [0, 0, 1, 1], [], []>} : vector<16x32xf32>, vector<32x32xf32>, vector<16x32xf32> -> vector<16x32xf32>
    %114 = arith.addf %105, %113 : vector<16x32xf32>
    %c9_i32 = arith.constant 9 : i32
    %115 = vector.broadcast %c9_i32 : i32 to vector<16x256xi32>
    %116 = arith.cmpi eq, %32, %115 : vector<16x256xi32>
    %cst_68 = arith.constant 1.000000e+00 : f32
    %cst_69 = arith.constant 0.000000e+00 : f32
    %117 = vector.broadcast %cst_68 : f32 to vector<16x256xf32>
    %118 = vector.broadcast %cst_69 : f32 to vector<16x256xf32>
    %119 = arith.select %116, %117, %118 : vector<16x256xi1>, vector<16x256xf32>
    %cst_70 = arith.constant dense<0.000000e+00> : vector<16x32xf32>
    %120 = tpu.matmul %119, %27, %cst_70 {dimension_numbers = #tpu.dot_dimension_numbers<[1], [0], [0], [1], [0, 0, 1, 1], [], []>} : vector<16x256xf32>, vector<256x32xf32>, vector<16x32xf32> -> vector<16x32xf32>
    %c288 = arith.constant 288 : index
    %c0_71 = arith.constant 0 : index
    %121 = vector.load %arg10[%c288, %c0_71] : memref<512x32xf32, #tpu.memory_space<vmem>>, vector<32x32xf32>
    %cst_72 = arith.constant dense<0.000000e+00> : vector<16x32xf32>
    %122 = tpu.matmul %120, %121, %cst_72 {dimension_numbers = #tpu.dot_dimension_numbers<[1], [0], [0], [1], [0, 0, 1, 1], [], []>} : vector<16x32xf32>, vector<32x32xf32>, vector<16x32xf32> -> vector<16x32xf32>
    %123 = arith.addf %114, %122 : vector<16x32xf32>
    %c10_i32 = arith.constant 10 : i32
    %124 = vector.broadcast %c10_i32 : i32 to vector<16x256xi32>
    %125 = arith.cmpi eq, %32, %124 : vector<16x256xi32>
    %cst_73 = arith.constant 1.000000e+00 : f32
    %cst_74 = arith.constant 0.000000e+00 : f32
    %126 = vector.broadcast %cst_73 : f32 to vector<16x256xf32>
    %127 = vector.broadcast %cst_74 : f32 to vector<16x256xf32>
    %128 = arith.select %125, %126, %127 : vector<16x256xi1>, vector<16x256xf32>
    %cst_75 = arith.constant dense<0.000000e+00> : vector<16x32xf32>
    %129 = tpu.matmul %128, %27, %cst_75 {dimension_numbers = #tpu.dot_dimension_numbers<[1], [0], [0], [1], [0, 0, 1, 1], [], []>} : vector<16x256xf32>, vector<256x32xf32>, vector<16x32xf32> -> vector<16x32xf32>
    %c320 = arith.constant 320 : index
    %c0_76 = arith.constant 0 : index
    %130 = vector.load %arg10[%c320, %c0_76] : memref<512x32xf32, #tpu.memory_space<vmem>>, vector<32x32xf32>
    %cst_77 = arith.constant dense<0.000000e+00> : vector<16x32xf32>
    %131 = tpu.matmul %129, %130, %cst_77 {dimension_numbers = #tpu.dot_dimension_numbers<[1], [0], [0], [1], [0, 0, 1, 1], [], []>} : vector<16x32xf32>, vector<32x32xf32>, vector<16x32xf32> -> vector<16x32xf32>
    %132 = arith.addf %123, %131 : vector<16x32xf32>
    %c11_i32 = arith.constant 11 : i32
    %133 = vector.broadcast %c11_i32 : i32 to vector<16x256xi32>
    %134 = arith.cmpi eq, %32, %133 : vector<16x256xi32>
    %cst_78 = arith.constant 1.000000e+00 : f32
    %cst_79 = arith.constant 0.000000e+00 : f32
    %135 = vector.broadcast %cst_78 : f32 to vector<16x256xf32>
    %136 = vector.broadcast %cst_79 : f32 to vector<16x256xf32>
    %137 = arith.select %134, %135, %136 : vector<16x256xi1>, vector<16x256xf32>
    %cst_80 = arith.constant dense<0.000000e+00> : vector<16x32xf32>
    %138 = tpu.matmul %137, %27, %cst_80 {dimension_numbers = #tpu.dot_dimension_numbers<[1], [0], [0], [1], [0, 0, 1, 1], [], []>} : vector<16x256xf32>, vector<256x32xf32>, vector<16x32xf32> -> vector<16x32xf32>
    %c352 = arith.constant 352 : index
    %c0_81 = arith.constant 0 : index
    %139 = vector.load %arg10[%c352, %c0_81] : memref<512x32xf32, #tpu.memory_space<vmem>>, vector<32x32xf32>
    %cst_82 = arith.constant dense<0.000000e+00> : vector<16x32xf32>
    %140 = tpu.matmul %138, %139, %cst_82 {dimension_numbers = #tpu.dot_dimension_numbers<[1], [0], [0], [1], [0, 0, 1, 1], [], []>} : vector<16x32xf32>, vector<32x32xf32>, vector<16x32xf32> -> vector<16x32xf32>
    %141 = arith.addf %132, %140 : vector<16x32xf32>
    %c12_i32 = arith.constant 12 : i32
    %142 = vector.broadcast %c12_i32 : i32 to vector<16x256xi32>
    %143 = arith.cmpi eq, %32, %142 : vector<16x256xi32>
    %cst_83 = arith.constant 1.000000e+00 : f32
    %cst_84 = arith.constant 0.000000e+00 : f32
    %144 = vector.broadcast %cst_83 : f32 to vector<16x256xf32>
    %145 = vector.broadcast %cst_84 : f32 to vector<16x256xf32>
    %146 = arith.select %143, %144, %145 : vector<16x256xi1>, vector<16x256xf32>
    %cst_85 = arith.constant dense<0.000000e+00> : vector<16x32xf32>
    %147 = tpu.matmul %146, %27, %cst_85 {dimension_numbers = #tpu.dot_dimension_numbers<[1], [0], [0], [1], [0, 0, 1, 1], [], []>} : vector<16x256xf32>, vector<256x32xf32>, vector<16x32xf32> -> vector<16x32xf32>
    %c384 = arith.constant 384 : index
    %c0_86 = arith.constant 0 : index
    %148 = vector.load %arg10[%c384, %c0_86] : memref<512x32xf32, #tpu.memory_space<vmem>>, vector<32x32xf32>
    %cst_87 = arith.constant dense<0.000000e+00> : vector<16x32xf32>
    %149 = tpu.matmul %147, %148, %cst_87 {dimension_numbers = #tpu.dot_dimension_numbers<[1], [0], [0], [1], [0, 0, 1, 1], [], []>} : vector<16x32xf32>, vector<32x32xf32>, vector<16x32xf32> -> vector<16x32xf32>
    %150 = arith.addf %141, %149 : vector<16x32xf32>
    %c13_i32 = arith.constant 13 : i32
    %151 = vector.broadcast %c13_i32 : i32 to vector<16x256xi32>
    %152 = arith.cmpi eq, %32, %151 : vector<16x256xi32>
    %cst_88 = arith.constant 1.000000e+00 : f32
    %cst_89 = arith.constant 0.000000e+00 : f32
    %153 = vector.broadcast %cst_88 : f32 to vector<16x256xf32>
    %154 = vector.broadcast %cst_89 : f32 to vector<16x256xf32>
    %155 = arith.select %152, %153, %154 : vector<16x256xi1>, vector<16x256xf32>
    %cst_90 = arith.constant dense<0.000000e+00> : vector<16x32xf32>
    %156 = tpu.matmul %155, %27, %cst_90 {dimension_numbers = #tpu.dot_dimension_numbers<[1], [0], [0], [1], [0, 0, 1, 1], [], []>} : vector<16x256xf32>, vector<256x32xf32>, vector<16x32xf32> -> vector<16x32xf32>
    %c416 = arith.constant 416 : index
    %c0_91 = arith.constant 0 : index
    %157 = vector.load %arg10[%c416, %c0_91] : memref<512x32xf32, #tpu.memory_space<vmem>>, vector<32x32xf32>
    %cst_92 = arith.constant dense<0.000000e+00> : vector<16x32xf32>
    %158 = tpu.matmul %156, %157, %cst_92 {dimension_numbers = #tpu.dot_dimension_numbers<[1], [0], [0], [1], [0, 0, 1, 1], [], []>} : vector<16x32xf32>, vector<32x32xf32>, vector<16x32xf32> -> vector<16x32xf32>
    %159 = arith.addf %150, %158 : vector<16x32xf32>
    %c14_i32 = arith.constant 14 : i32
    %160 = vector.broadcast %c14_i32 : i32 to vector<16x256xi32>
    %161 = arith.cmpi eq, %32, %160 : vector<16x256xi32>
    %cst_93 = arith.constant 1.000000e+00 : f32
    %cst_94 = arith.constant 0.000000e+00 : f32
    %162 = vector.broadcast %cst_93 : f32 to vector<16x256xf32>
    %163 = vector.broadcast %cst_94 : f32 to vector<16x256xf32>
    %164 = arith.select %161, %162, %163 : vector<16x256xi1>, vector<16x256xf32>
    %cst_95 = arith.constant dense<0.000000e+00> : vector<16x32xf32>
    %165 = tpu.matmul %164, %27, %cst_95 {dimension_numbers = #tpu.dot_dimension_numbers<[1], [0], [0], [1], [0, 0, 1, 1], [], []>} : vector<16x256xf32>, vector<256x32xf32>, vector<16x32xf32> -> vector<16x32xf32>
    %c448 = arith.constant 448 : index
    %c0_96 = arith.constant 0 : index
    %166 = vector.load %arg10[%c448, %c0_96] : memref<512x32xf32, #tpu.memory_space<vmem>>, vector<32x32xf32>
    %cst_97 = arith.constant dense<0.000000e+00> : vector<16x32xf32>
    %167 = tpu.matmul %165, %166, %cst_97 {dimension_numbers = #tpu.dot_dimension_numbers<[1], [0], [0], [1], [0, 0, 1, 1], [], []>} : vector<16x32xf32>, vector<32x32xf32>, vector<16x32xf32> -> vector<16x32xf32>
    %168 = arith.addf %159, %167 : vector<16x32xf32>
    %c15_i32 = arith.constant 15 : i32
    %169 = vector.broadcast %c15_i32 : i32 to vector<16x256xi32>
    %170 = arith.cmpi eq, %32, %169 : vector<16x256xi32>
    %cst_98 = arith.constant 1.000000e+00 : f32
    %cst_99 = arith.constant 0.000000e+00 : f32
    %171 = vector.broadcast %cst_98 : f32 to vector<16x256xf32>
    %172 = vector.broadcast %cst_99 : f32 to vector<16x256xf32>
    %173 = arith.select %170, %171, %172 : vector<16x256xi1>, vector<16x256xf32>
    %cst_100 = arith.constant dense<0.000000e+00> : vector<16x32xf32>
    %174 = tpu.matmul %173, %27, %cst_100 {dimension_numbers = #tpu.dot_dimension_numbers<[1], [0], [0], [1], [0, 0, 1, 1], [], []>} : vector<16x256xf32>, vector<256x32xf32>, vector<16x32xf32> -> vector<16x32xf32>
    %c480 = arith.constant 480 : index
    %c0_101 = arith.constant 0 : index
    %175 = vector.load %arg10[%c480, %c0_101] : memref<512x32xf32, #tpu.memory_space<vmem>>, vector<32x32xf32>
    %cst_102 = arith.constant dense<0.000000e+00> : vector<16x32xf32>
    %176 = tpu.matmul %174, %175, %cst_102 {dimension_numbers = #tpu.dot_dimension_numbers<[1], [0], [0], [1], [0, 0, 1, 1], [], []>} : vector<16x32xf32>, vector<32x32xf32>, vector<16x32xf32> -> vector<16x32xf32>
    %177 = arith.addf %168, %176 : vector<16x32xf32>
    %c0_103 = arith.constant 0 : index
    %c0_104 = arith.constant 0 : index
    %178 = vector.load %arg11[%c0_103, %c0_104] : memref<1x32xf32, #tpu.memory_space<vmem>>, vector<1x32xf32>
    %179 = vector.broadcast %178 : vector<1x32xf32> to vector<16x32xf32>
    %180 = arith.addf %177, %179 : vector<16x32xf32>
    %cst_105 = arith.constant 0.000000e+00 : f32
    %181 = vector.broadcast %cst_105 : f32 to vector<16x32xf32>
    %182 = arith.maximumf %180, %181 : vector<16x32xf32>
    %183 = tpu.iota {dimensions = array<i32: 0>} : vector<16x32xi32>
    %cst_106 = arith.constant 0.000000e+00 : f32
    %184 = vector.broadcast %cst_106 : f32 to vector<16x32xf32>
    %c0_107 = arith.constant 0 : index
    %c0_108 = arith.constant 0 : index
    %185 = vector.load %arg12[%c0_107, %c0_108] : memref<512x32xf32, #tpu.memory_space<vmem>>, vector<32x32xf32>
    %cst_109 = arith.constant dense<0.000000e+00> : vector<16x32xf32>
    %186 = tpu.matmul %182, %185, %cst_109 {dimension_numbers = #tpu.dot_dimension_numbers<[1], [0], [0], [1], [0, 0, 1, 1], [], []>} : vector<16x32xf32>, vector<32x32xf32>, vector<16x32xf32> -> vector<16x32xf32>
    %c0_i32_110 = arith.constant 0 : i32
    %187 = vector.broadcast %c0_i32_110 : i32 to vector<16x32xi32>
    %188 = arith.cmpi eq, %183, %187 : vector<16x32xi32>
    %cst_111 = arith.constant 0.000000e+00 : f32
    %189 = vector.broadcast %cst_111 : f32 to vector<16x32xf32>
    %190 = arith.select %188, %186, %189 : vector<16x32xi1>, vector<16x32xf32>
    %191 = arith.addf %184, %190 : vector<16x32xf32>
    %c32_112 = arith.constant 32 : index
    %c0_113 = arith.constant 0 : index
    %192 = vector.load %arg12[%c32_112, %c0_113] : memref<512x32xf32, #tpu.memory_space<vmem>>, vector<32x32xf32>
    %cst_114 = arith.constant dense<0.000000e+00> : vector<16x32xf32>
    %193 = tpu.matmul %182, %192, %cst_114 {dimension_numbers = #tpu.dot_dimension_numbers<[1], [0], [0], [1], [0, 0, 1, 1], [], []>} : vector<16x32xf32>, vector<32x32xf32>, vector<16x32xf32> -> vector<16x32xf32>
    %c1_i32_115 = arith.constant 1 : i32
    %194 = vector.broadcast %c1_i32_115 : i32 to vector<16x32xi32>
    %195 = arith.cmpi eq, %183, %194 : vector<16x32xi32>
    %cst_116 = arith.constant 0.000000e+00 : f32
    %196 = vector.broadcast %cst_116 : f32 to vector<16x32xf32>
    %197 = arith.select %195, %193, %196 : vector<16x32xi1>, vector<16x32xf32>
    %198 = arith.addf %191, %197 : vector<16x32xf32>
    %c64_117 = arith.constant 64 : index
    %c0_118 = arith.constant 0 : index
    %199 = vector.load %arg12[%c64_117, %c0_118] : memref<512x32xf32, #tpu.memory_space<vmem>>, vector<32x32xf32>
    %cst_119 = arith.constant dense<0.000000e+00> : vector<16x32xf32>
    %200 = tpu.matmul %182, %199, %cst_119 {dimension_numbers = #tpu.dot_dimension_numbers<[1], [0], [0], [1], [0, 0, 1, 1], [], []>} : vector<16x32xf32>, vector<32x32xf32>, vector<16x32xf32> -> vector<16x32xf32>
    %c2_i32_120 = arith.constant 2 : i32
    %201 = vector.broadcast %c2_i32_120 : i32 to vector<16x32xi32>
    %202 = arith.cmpi eq, %183, %201 : vector<16x32xi32>
    %cst_121 = arith.constant 0.000000e+00 : f32
    %203 = vector.broadcast %cst_121 : f32 to vector<16x32xf32>
    %204 = arith.select %202, %200, %203 : vector<16x32xi1>, vector<16x32xf32>
    %205 = arith.addf %198, %204 : vector<16x32xf32>
    %c96_122 = arith.constant 96 : index
    %c0_123 = arith.constant 0 : index
    %206 = vector.load %arg12[%c96_122, %c0_123] : memref<512x32xf32, #tpu.memory_space<vmem>>, vector<32x32xf32>
    %cst_124 = arith.constant dense<0.000000e+00> : vector<16x32xf32>
    %207 = tpu.matmul %182, %206, %cst_124 {dimension_numbers = #tpu.dot_dimension_numbers<[1], [0], [0], [1], [0, 0, 1, 1], [], []>} : vector<16x32xf32>, vector<32x32xf32>, vector<16x32xf32> -> vector<16x32xf32>
    %c3_i32_125 = arith.constant 3 : i32
    %208 = vector.broadcast %c3_i32_125 : i32 to vector<16x32xi32>
    %209 = arith.cmpi eq, %183, %208 : vector<16x32xi32>
    %cst_126 = arith.constant 0.000000e+00 : f32
    %210 = vector.broadcast %cst_126 : f32 to vector<16x32xf32>
    %211 = arith.select %209, %207, %210 : vector<16x32xi1>, vector<16x32xf32>
    %212 = arith.addf %205, %211 : vector<16x32xf32>
    %c128_127 = arith.constant 128 : index
    %c0_128 = arith.constant 0 : index
    %213 = vector.load %arg12[%c128_127, %c0_128] : memref<512x32xf32, #tpu.memory_space<vmem>>, vector<32x32xf32>
    %cst_129 = arith.constant dense<0.000000e+00> : vector<16x32xf32>
    %214 = tpu.matmul %182, %213, %cst_129 {dimension_numbers = #tpu.dot_dimension_numbers<[1], [0], [0], [1], [0, 0, 1, 1], [], []>} : vector<16x32xf32>, vector<32x32xf32>, vector<16x32xf32> -> vector<16x32xf32>
    %c4_i32_130 = arith.constant 4 : i32
    %215 = vector.broadcast %c4_i32_130 : i32 to vector<16x32xi32>
    %216 = arith.cmpi eq, %183, %215 : vector<16x32xi32>
    %cst_131 = arith.constant 0.000000e+00 : f32
    %217 = vector.broadcast %cst_131 : f32 to vector<16x32xf32>
    %218 = arith.select %216, %214, %217 : vector<16x32xi1>, vector<16x32xf32>
    %219 = arith.addf %212, %218 : vector<16x32xf32>
    %c160_132 = arith.constant 160 : index
    %c0_133 = arith.constant 0 : index
    %220 = vector.load %arg12[%c160_132, %c0_133] : memref<512x32xf32, #tpu.memory_space<vmem>>, vector<32x32xf32>
    %cst_134 = arith.constant dense<0.000000e+00> : vector<16x32xf32>
    %221 = tpu.matmul %182, %220, %cst_134 {dimension_numbers = #tpu.dot_dimension_numbers<[1], [0], [0], [1], [0, 0, 1, 1], [], []>} : vector<16x32xf32>, vector<32x32xf32>, vector<16x32xf32> -> vector<16x32xf32>
    %c5_i32_135 = arith.constant 5 : i32
    %222 = vector.broadcast %c5_i32_135 : i32 to vector<16x32xi32>
    %223 = arith.cmpi eq, %183, %222 : vector<16x32xi32>
    %cst_136 = arith.constant 0.000000e+00 : f32
    %224 = vector.broadcast %cst_136 : f32 to vector<16x32xf32>
    %225 = arith.select %223, %221, %224 : vector<16x32xi1>, vector<16x32xf32>
    %226 = arith.addf %219, %225 : vector<16x32xf32>
    %c192_137 = arith.constant 192 : index
    %c0_138 = arith.constant 0 : index
    %227 = vector.load %arg12[%c192_137, %c0_138] : memref<512x32xf32, #tpu.memory_space<vmem>>, vector<32x32xf32>
    %cst_139 = arith.constant dense<0.000000e+00> : vector<16x32xf32>
    %228 = tpu.matmul %182, %227, %cst_139 {dimension_numbers = #tpu.dot_dimension_numbers<[1], [0], [0], [1], [0, 0, 1, 1], [], []>} : vector<16x32xf32>, vector<32x32xf32>, vector<16x32xf32> -> vector<16x32xf32>
    %c6_i32_140 = arith.constant 6 : i32
    %229 = vector.broadcast %c6_i32_140 : i32 to vector<16x32xi32>
    %230 = arith.cmpi eq, %183, %229 : vector<16x32xi32>
    %cst_141 = arith.constant 0.000000e+00 : f32
    %231 = vector.broadcast %cst_141 : f32 to vector<16x32xf32>
    %232 = arith.select %230, %228, %231 : vector<16x32xi1>, vector<16x32xf32>
    %233 = arith.addf %226, %232 : vector<16x32xf32>
    %c224_142 = arith.constant 224 : index
    %c0_143 = arith.constant 0 : index
    %234 = vector.load %arg12[%c224_142, %c0_143] : memref<512x32xf32, #tpu.memory_space<vmem>>, vector<32x32xf32>
    %cst_144 = arith.constant dense<0.000000e+00> : vector<16x32xf32>
    %235 = tpu.matmul %182, %234, %cst_144 {dimension_numbers = #tpu.dot_dimension_numbers<[1], [0], [0], [1], [0, 0, 1, 1], [], []>} : vector<16x32xf32>, vector<32x32xf32>, vector<16x32xf32> -> vector<16x32xf32>
    %c7_i32_145 = arith.constant 7 : i32
    %236 = vector.broadcast %c7_i32_145 : i32 to vector<16x32xi32>
    %237 = arith.cmpi eq, %183, %236 : vector<16x32xi32>
    %cst_146 = arith.constant 0.000000e+00 : f32
    %238 = vector.broadcast %cst_146 : f32 to vector<16x32xf32>
    %239 = arith.select %237, %235, %238 : vector<16x32xi1>, vector<16x32xf32>
    %240 = arith.addf %233, %239 : vector<16x32xf32>
    %c256_147 = arith.constant 256 : index
    %c0_148 = arith.constant 0 : index
    %241 = vector.load %arg12[%c256_147, %c0_148] : memref<512x32xf32, #tpu.memory_space<vmem>>, vector<32x32xf32>
    %cst_149 = arith.constant dense<0.000000e+00> : vector<16x32xf32>
    %242 = tpu.matmul %182, %241, %cst_149 {dimension_numbers = #tpu.dot_dimension_numbers<[1], [0], [0], [1], [0, 0, 1, 1], [], []>} : vector<16x32xf32>, vector<32x32xf32>, vector<16x32xf32> -> vector<16x32xf32>
    %c8_i32_150 = arith.constant 8 : i32
    %243 = vector.broadcast %c8_i32_150 : i32 to vector<16x32xi32>
    %244 = arith.cmpi eq, %183, %243 : vector<16x32xi32>
    %cst_151 = arith.constant 0.000000e+00 : f32
    %245 = vector.broadcast %cst_151 : f32 to vector<16x32xf32>
    %246 = arith.select %244, %242, %245 : vector<16x32xi1>, vector<16x32xf32>
    %247 = arith.addf %240, %246 : vector<16x32xf32>
    %c288_152 = arith.constant 288 : index
    %c0_153 = arith.constant 0 : index
    %248 = vector.load %arg12[%c288_152, %c0_153] : memref<512x32xf32, #tpu.memory_space<vmem>>, vector<32x32xf32>
    %cst_154 = arith.constant dense<0.000000e+00> : vector<16x32xf32>
    %249 = tpu.matmul %182, %248, %cst_154 {dimension_numbers = #tpu.dot_dimension_numbers<[1], [0], [0], [1], [0, 0, 1, 1], [], []>} : vector<16x32xf32>, vector<32x32xf32>, vector<16x32xf32> -> vector<16x32xf32>
    %c9_i32_155 = arith.constant 9 : i32
    %250 = vector.broadcast %c9_i32_155 : i32 to vector<16x32xi32>
    %251 = arith.cmpi eq, %183, %250 : vector<16x32xi32>
    %cst_156 = arith.constant 0.000000e+00 : f32
    %252 = vector.broadcast %cst_156 : f32 to vector<16x32xf32>
    %253 = arith.select %251, %249, %252 : vector<16x32xi1>, vector<16x32xf32>
    %254 = arith.addf %247, %253 : vector<16x32xf32>
    %c320_157 = arith.constant 320 : index
    %c0_158 = arith.constant 0 : index
    %255 = vector.load %arg12[%c320_157, %c0_158] : memref<512x32xf32, #tpu.memory_space<vmem>>, vector<32x32xf32>
    %cst_159 = arith.constant dense<0.000000e+00> : vector<16x32xf32>
    %256 = tpu.matmul %182, %255, %cst_159 {dimension_numbers = #tpu.dot_dimension_numbers<[1], [0], [0], [1], [0, 0, 1, 1], [], []>} : vector<16x32xf32>, vector<32x32xf32>, vector<16x32xf32> -> vector<16x32xf32>
    %c10_i32_160 = arith.constant 10 : i32
    %257 = vector.broadcast %c10_i32_160 : i32 to vector<16x32xi32>
    %258 = arith.cmpi eq, %183, %257 : vector<16x32xi32>
    %cst_161 = arith.constant 0.000000e+00 : f32
    %259 = vector.broadcast %cst_161 : f32 to vector<16x32xf32>
    %260 = arith.select %258, %256, %259 : vector<16x32xi1>, vector<16x32xf32>
    %261 = arith.addf %254, %260 : vector<16x32xf32>
    %c352_162 = arith.constant 352 : index
    %c0_163 = arith.constant 0 : index
    %262 = vector.load %arg12[%c352_162, %c0_163] : memref<512x32xf32, #tpu.memory_space<vmem>>, vector<32x32xf32>
    %cst_164 = arith.constant dense<0.000000e+00> : vector<16x32xf32>
    %263 = tpu.matmul %182, %262, %cst_164 {dimension_numbers = #tpu.dot_dimension_numbers<[1], [0], [0], [1], [0, 0, 1, 1], [], []>} : vector<16x32xf32>, vector<32x32xf32>, vector<16x32xf32> -> vector<16x32xf32>
    %c11_i32_165 = arith.constant 11 : i32
    %264 = vector.broadcast %c11_i32_165 : i32 to vector<16x32xi32>
    %265 = arith.cmpi eq, %183, %264 : vector<16x32xi32>
    %cst_166 = arith.constant 0.000000e+00 : f32
    %266 = vector.broadcast %cst_166 : f32 to vector<16x32xf32>
    %267 = arith.select %265, %263, %266 : vector<16x32xi1>, vector<16x32xf32>
    %268 = arith.addf %261, %267 : vector<16x32xf32>
    %c384_167 = arith.constant 384 : index
    %c0_168 = arith.constant 0 : index
    %269 = vector.load %arg12[%c384_167, %c0_168] : memref<512x32xf32, #tpu.memory_space<vmem>>, vector<32x32xf32>
    %cst_169 = arith.constant dense<0.000000e+00> : vector<16x32xf32>
    %270 = tpu.matmul %182, %269, %cst_169 {dimension_numbers = #tpu.dot_dimension_numbers<[1], [0], [0], [1], [0, 0, 1, 1], [], []>} : vector<16x32xf32>, vector<32x32xf32>, vector<16x32xf32> -> vector<16x32xf32>
    %c12_i32_170 = arith.constant 12 : i32
    %271 = vector.broadcast %c12_i32_170 : i32 to vector<16x32xi32>
    %272 = arith.cmpi eq, %183, %271 : vector<16x32xi32>
    %cst_171 = arith.constant 0.000000e+00 : f32
    %273 = vector.broadcast %cst_171 : f32 to vector<16x32xf32>
    %274 = arith.select %272, %270, %273 : vector<16x32xi1>, vector<16x32xf32>
    %275 = arith.addf %268, %274 : vector<16x32xf32>
    %c416_172 = arith.constant 416 : index
    %c0_173 = arith.constant 0 : index
    %276 = vector.load %arg12[%c416_172, %c0_173] : memref<512x32xf32, #tpu.memory_space<vmem>>, vector<32x32xf32>
    %cst_174 = arith.constant dense<0.000000e+00> : vector<16x32xf32>
    %277 = tpu.matmul %182, %276, %cst_174 {dimension_numbers = #tpu.dot_dimension_numbers<[1], [0], [0], [1], [0, 0, 1, 1], [], []>} : vector<16x32xf32>, vector<32x32xf32>, vector<16x32xf32> -> vector<16x32xf32>
    %c13_i32_175 = arith.constant 13 : i32
    %278 = vector.broadcast %c13_i32_175 : i32 to vector<16x32xi32>
    %279 = arith.cmpi eq, %183, %278 : vector<16x32xi32>
    %cst_176 = arith.constant 0.000000e+00 : f32
    %280 = vector.broadcast %cst_176 : f32 to vector<16x32xf32>
    %281 = arith.select %279, %277, %280 : vector<16x32xi1>, vector<16x32xf32>
    %282 = arith.addf %275, %281 : vector<16x32xf32>
    %c448_177 = arith.constant 448 : index
    %c0_178 = arith.constant 0 : index
    %283 = vector.load %arg12[%c448_177, %c0_178] : memref<512x32xf32, #tpu.memory_space<vmem>>, vector<32x32xf32>
    %cst_179 = arith.constant dense<0.000000e+00> : vector<16x32xf32>
    %284 = tpu.matmul %182, %283, %cst_179 {dimension_numbers = #tpu.dot_dimension_numbers<[1], [0], [0], [1], [0, 0, 1, 1], [], []>} : vector<16x32xf32>, vector<32x32xf32>, vector<16x32xf32> -> vector<16x32xf32>
    %c14_i32_180 = arith.constant 14 : i32
    %285 = vector.broadcast %c14_i32_180 : i32 to vector<16x32xi32>
    %286 = arith.cmpi eq, %183, %285 : vector<16x32xi32>
    %cst_181 = arith.constant 0.000000e+00 : f32
    %287 = vector.broadcast %cst_181 : f32 to vector<16x32xf32>
    %288 = arith.select %286, %284, %287 : vector<16x32xi1>, vector<16x32xf32>
    %289 = arith.addf %282, %288 : vector<16x32xf32>
    %c480_182 = arith.constant 480 : index
    %c0_183 = arith.constant 0 : index
    %290 = vector.load %arg12[%c480_182, %c0_183] : memref<512x32xf32, #tpu.memory_space<vmem>>, vector<32x32xf32>
    %cst_184 = arith.constant dense<0.000000e+00> : vector<16x32xf32>
    %291 = tpu.matmul %182, %290, %cst_184 {dimension_numbers = #tpu.dot_dimension_numbers<[1], [0], [0], [1], [0, 0, 1, 1], [], []>} : vector<16x32xf32>, vector<32x32xf32>, vector<16x32xf32> -> vector<16x32xf32>
    %c15_i32_185 = arith.constant 15 : i32
    %292 = vector.broadcast %c15_i32_185 : i32 to vector<16x32xi32>
    %293 = arith.cmpi eq, %183, %292 : vector<16x32xi32>
    %cst_186 = arith.constant 0.000000e+00 : f32
    %294 = vector.broadcast %cst_186 : f32 to vector<16x32xf32>
    %295 = arith.select %293, %291, %294 : vector<16x32xi1>, vector<16x32xf32>
    %296 = arith.addf %289, %295 : vector<16x32xf32>
    %cst_187 = arith.constant 1.000000e+00 : f32
    %297 = vector.broadcast %cst_187 : f32 to vector<8x16xf32>
    %cst_188 = arith.constant dense<0.000000e+00> : vector<8x32xf32>
    %298 = tpu.matmul %297, %296, %cst_188 {dimension_numbers = #tpu.dot_dimension_numbers<[1], [0], [0], [1], [0, 0, 1, 1], [], []>} : vector<8x16xf32>, vector<16x32xf32>, vector<8x32xf32> -> vector<8x32xf32>
    %c0_189 = arith.constant 0 : index
    %c0_190 = arith.constant 0 : index
    %299 = vector.load %arg13[%c0_189, %c0_190] : memref<1x32xf32, #tpu.memory_space<vmem>>, vector<1x32xf32>
    %300 = vector.broadcast %299 : vector<1x32xf32> to vector<8x32xf32>
    %301 = arith.addf %298, %300 : vector<8x32xf32>
    %cst_191 = arith.constant 0.000000e+00 : f32
    %302 = vector.broadcast %cst_191 : f32 to vector<8x32xf32>
    %303 = arith.maximumf %301, %302 : vector<8x32xf32>
    %c0_192 = arith.constant 0 : index
    %c0_193 = arith.constant 0 : index
    %304 = vector.load %arg14[%c0_192, %c0_193] : memref<32x256xf32, #tpu.memory_space<vmem>>, vector<32x256xf32>
    %cst_194 = arith.constant dense<0.000000e+00> : vector<8x256xf32>
    %305 = tpu.matmul %303, %304, %cst_194 {dimension_numbers = #tpu.dot_dimension_numbers<[1], [0], [0], [1], [0, 0, 1, 1], [], []>} : vector<8x32xf32>, vector<32x256xf32>, vector<8x256xf32> -> vector<8x256xf32>
    %c0_195 = arith.constant 0 : index
    %c0_196 = arith.constant 0 : index
    %306 = vector.load %arg15[%c0_195, %c0_196] : memref<1x256xf32, #tpu.memory_space<vmem>>, vector<1x256xf32>
    %307 = vector.broadcast %306 : vector<1x256xf32> to vector<8x256xf32>
    %308 = arith.addf %305, %307 : vector<8x256xf32>
    %cst_197 = arith.constant 0.000000e+00 : f32
    %309 = vector.broadcast %cst_197 : f32 to vector<8x256xf32>
    %310 = arith.maximumf %308, %309 : vector<8x256xf32>
    %c0_198 = arith.constant 0 : index
    %c0_199 = arith.constant 0 : index
    %311 = vector.load %arg16[%c0_198, %c0_199] : memref<256x64xf32, #tpu.memory_space<vmem>>, vector<256x64xf32>
    %cst_200 = arith.constant dense<0.000000e+00> : vector<8x64xf32>
    %312 = tpu.matmul %310, %311, %cst_200 {dimension_numbers = #tpu.dot_dimension_numbers<[1], [0], [0], [1], [0, 0, 1, 1], [], []>} : vector<8x256xf32>, vector<256x64xf32>, vector<8x64xf32> -> vector<8x64xf32>
    %c0_201 = arith.constant 0 : index
    %c0_202 = arith.constant 0 : index
    %313 = vector.load %arg17[%c0_201, %c0_202] : memref<1x64xf32, #tpu.memory_space<vmem>>, vector<1x64xf32>
    %314 = vector.broadcast %313 : vector<1x64xf32> to vector<8x64xf32>
    %315 = arith.addf %312, %314 : vector<8x64xf32>
    %cst_203 = arith.constant 0.000000e+00 : f32
    %316 = vector.broadcast %cst_203 : f32 to vector<8x64xf32>
    %317 = arith.maximumf %315, %316 : vector<8x64xf32>
    %c0_204 = arith.constant 0 : index
    %c0_205 = arith.constant 0 : index
    %318 = vector.load %arg18[%c0_204, %c0_205] : memref<64x16xf32, #tpu.memory_space<vmem>>, vector<64x16xf32>
    %cst_206 = arith.constant dense<0.000000e+00> : vector<8x16xf32>
    %319 = tpu.matmul %317, %318, %cst_206 {dimension_numbers = #tpu.dot_dimension_numbers<[1], [0], [0], [1], [0, 0, 1, 1], [], []>} : vector<8x64xf32>, vector<64x16xf32>, vector<8x16xf32> -> vector<8x16xf32>
    %c0_207 = arith.constant 0 : index
    %c0_208 = arith.constant 0 : index
    %320 = vector.load %arg19[%c0_207, %c0_208] : memref<1x16xf32, #tpu.memory_space<vmem>>, vector<1x16xf32>
    %321 = vector.broadcast %320 : vector<1x16xf32> to vector<8x16xf32>
    %322 = arith.addf %319, %321 : vector<8x16xf32>
    %cst_209 = arith.constant 0.000000e+00 : f32
    %323 = vector.broadcast %cst_209 : f32 to vector<8x16xf32>
    %324 = arith.maximumf %322, %323 : vector<8x16xf32>
    %c0_210 = arith.constant 0 : index
    %c0_211 = arith.constant 0 : index
    %325 = vector.load %arg20[%c0_210, %c0_211] : memref<1x16xf32, #tpu.memory_space<vmem>>, vector<1x16xf32>
    %326 = vector.broadcast %325 : vector<1x16xf32> to vector<8x16xf32>
    %327 = arith.mulf %324, %326 : vector<8x16xf32>
    %cst_212 = arith.constant dense<0.000000e+00> : vector<8xf32>
    %328 = vector.multi_reduction <add>, %327, %cst_212 [1] : vector<8x16xf32> to vector<8xf32>
    %329 = vector.shape_cast %328 : vector<8xf32> to vector<8x1xf32>
    %c0_213 = arith.constant 0 : index
    %c0_214 = arith.constant 0 : index
    %330 = vector.load %arg21[%c0_213, %c0_214] : memref<1x1xf32, #tpu.memory_space<vmem>>, vector<1x1xf32>
    %331 = vector.broadcast %330 : vector<1x1xf32> to vector<8x1xf32>
    %332 = arith.addf %329, %331 : vector<8x1xf32>
    %333 = vector.extract_strided_slice %332 {offsets = [0, 0], sizes = [1, 1], strides = [1, 1]} : vector<8x1xf32> to vector<1x1xf32>
    %c0_215 = arith.constant 0 : index
    %c0_216 = arith.constant 0 : index
    %c0_217 = arith.constant 0 : index
    %334 = vector.load %arg22[%c0_215, %c0_216, %c0_217] : memref<1x1x1xf32, #tpu.memory_space<vmem>>, vector<1x1x1xf32>
    %335 = vector.shape_cast %334 : vector<1x1x1xf32> to vector<1x1xf32>
    %336 = vector.shape_cast %333 : vector<1x1xf32> to vector<1x1x1xf32>
    tpu.vector_store %arg22[%c0_215, %c0_216, %c0_217], %336 {strides = array<i32>} : memref<1x1x1xf32, #tpu.memory_space<vmem>>, vector<1x1x1xf32>,
    return
  }
  func.func @transform_0(%arg0: i32) -> (i32, i32, i32) {
    %c0_i32 = arith.constant 0 : i32
    %c0_i32_0 = arith.constant 0 : i32
    %c0_i32_1 = arith.constant 0 : i32
    return %arg0, %c0_i32, %c0_i32_0 : i32, i32, i32
  }
  func.func @transform_1(%arg0: i32) -> (i32, i32) {
    %c0_i32 = arith.constant 0 : i32
    %c0_i32_0 = arith.constant 0 : i32
    %c0_i32_1 = arith.constant 0 : i32
    return %c0_i32, %c0_i32_0 : i32, i32
  }
  func.func @transform_2(%arg0: i32) -> (i32, i32) {
    %c0_i32 = arith.constant 0 : i32
    %c0_i32_0 = arith.constant 0 : i32
    %c0_i32_1 = arith.constant 0 : i32
    return %c0_i32, %c0_i32_0 : i32, i32
  }
  func.func @transform_3(%arg0: i32) -> (i32, i32) {
    %c0_i32 = arith.constant 0 : i32
    %c0_i32_0 = arith.constant 0 : i32
    %c0_i32_1 = arith.constant 0 : i32
    return %c0_i32, %c0_i32_0 : i32, i32
  }
  func.func @transform_4(%arg0: i32) -> (i32, i32) {
    %c0_i32 = arith.constant 0 : i32
    %c0_i32_0 = arith.constant 0 : i32
    %c0_i32_1 = arith.constant 0 : i32
    return %c0_i32, %c0_i32_0 : i32, i32
  }
  func.func @transform_5(%arg0: i32) -> (i32, i32) {
    %c0_i32 = arith.constant 0 : i32
    %c0_i32_0 = arith.constant 0 : i32
    %c0_i32_1 = arith.constant 0 : i32
    return %c0_i32, %c0_i32_0 : i32, i32
  }
  func.func @transform_6(%arg0: i32) -> (i32, i32) {
    %c0_i32 = arith.constant 0 : i32
    %c0_i32_0 = arith.constant 0 : i32
    %c0_i32_1 = arith.constant 0 : i32
    return %c0_i32, %c0_i32_0 : i32, i32
  }
  func.func @transform_7(%arg0: i32) -> (i32, i32) {
    %c0_i32 = arith.constant 0 : i32
    %c0_i32_0 = arith.constant 0 : i32
    %c0_i32_1 = arith.constant 0 : i32
    return %c0_i32, %c0_i32_0 : i32, i32
  }
  func.func @transform_8(%arg0: i32) -> (i32, i32) {
    %c0_i32 = arith.constant 0 : i32
    %c0_i32_0 = arith.constant 0 : i32
    %c0_i32_1 = arith.constant 0 : i32
    return %c0_i32, %c0_i32_0 : i32, i32
  }
  func.func @transform_9(%arg0: i32) -> (i32, i32) {
    %c0_i32 = arith.constant 0 : i32
    %c0_i32_0 = arith.constant 0 : i32
    %c0_i32_1 = arith.constant 0 : i32
    return %c0_i32, %c0_i32_0 : i32, i32
  }
  func.func @transform_10(%arg0: i32) -> (i32, i32) {
    %c0_i32 = arith.constant 0 : i32
    %c0_i32_0 = arith.constant 0 : i32
    %c0_i32_1 = arith.constant 0 : i32
    return %c0_i32, %c0_i32_0 : i32, i32
  }
  func.func @transform_11(%arg0: i32) -> (i32, i32) {
    %c0_i32 = arith.constant 0 : i32
    %c0_i32_0 = arith.constant 0 : i32
    %c0_i32_1 = arith.constant 0 : i32
    return %c0_i32, %c0_i32_0 : i32, i32
  }
  func.func @transform_12(%arg0: i32) -> (i32, i32) {
    %c0_i32 = arith.constant 0 : i32
    %c0_i32_0 = arith.constant 0 : i32
    %c0_i32_1 = arith.constant 0 : i32
    return %c0_i32, %c0_i32_0 : i32, i32
  }
  func.func @transform_13(%arg0: i32) -> (i32, i32) {
    %c0_i32 = arith.constant 0 : i32
    %c0_i32_0 = arith.constant 0 : i32
    %c0_i32_1 = arith.constant 0 : i32
    return %c0_i32, %c0_i32_0 : i32, i32
  }
  func.func @transform_14(%arg0: i32) -> (i32, i32) {
    %c0_i32 = arith.constant 0 : i32
    %c0_i32_0 = arith.constant 0 : i32
    %c0_i32_1 = arith.constant 0 : i32
    return %c0_i32, %c0_i32_0 : i32, i32
  }
  func.func @transform_15(%arg0: i32) -> (i32, i32) {
    %c0_i32 = arith.constant 0 : i32
    %c0_i32_0 = arith.constant 0 : i32
    %c0_i32_1 = arith.constant 0 : i32
    return %c0_i32, %c0_i32_0 : i32, i32
  }
  func.func @transform_16(%arg0: i32) -> (i32, i32) {
    %c0_i32 = arith.constant 0 : i32
    %c0_i32_0 = arith.constant 0 : i32
    %c0_i32_1 = arith.constant 0 : i32
    return %c0_i32, %c0_i32_0 : i32, i32
  }
  func.func @transform_17(%arg0: i32) -> (i32, i32) {
    %c0_i32 = arith.constant 0 : i32
    %c0_i32_0 = arith.constant 0 : i32
    %c0_i32_1 = arith.constant 0 : i32
    return %c0_i32, %c0_i32_0 : i32, i32
  }
  func.func @transform_18(%arg0: i32) -> (i32, i32) {
    %c0_i32 = arith.constant 0 : i32
    %c0_i32_0 = arith.constant 0 : i32
    %c0_i32_1 = arith.constant 0 : i32
    return %c0_i32, %c0_i32_0 : i32, i32
  }
  func.func @transform_19(%arg0: i32) -> (i32, i32) {
    %c0_i32 = arith.constant 0 : i32
    %c0_i32_0 = arith.constant 0 : i32
    %c0_i32_1 = arith.constant 0 : i32
    return %c0_i32, %c0_i32_0 : i32, i32
  }
  func.func @transform_20(%arg0: i32) -> (i32, i32) {
    %c0_i32 = arith.constant 0 : i32
    %c0_i32_0 = arith.constant 0 : i32
    %c0_i32_1 = arith.constant 0 : i32
    return %c0_i32, %c0_i32_0 : i32, i32
  }
  func.func @transform_21(%arg0: i32) -> (i32, i32, i32) {
    %c0_i32 = arith.constant 0 : i32
    %c0_i32_0 = arith.constant 0 : i32
    %c0_i32_1 = arith.constant 0 : i32
    return %arg0, %c0_i32, %c0_i32_0 : i32, i32, i32
  }
}

</mosaic_0001>

<bundles_post_ra>
// kernel: cnn2_forward_pallas.1
= control target key start
LH: loop header
LB: loop body
LE: loop exit
PB: predicated region body
PF: predicated region fallthrough
CT: control target
= control target key end

     0   :  { %s9216_s26 = smov 0   ;;  %s13516_s0 = inlined_call_operand.vmem [shape: f32[2,256,512], index: 0, kind: input, shape index: {}]   ;;  %s13517_s1 = inlined_call_operand.vmem [shape: f32[512,512], index: 1, kind: input, shape index: {}]   ;;  %s13518_s2 = inlined_call_operand.vmem [shape: f32[1,512], index: 2, kind: input, shape index: {}]   ;;  %s13519_s3 = inlined_call_operand.vmem [shape: f32[1,512], index: 3, kind: input, shape index: {}]   ;;  %s13520_s4 = inlined_call_operand.vmem [shape: f32[1,512], index: 4, kind: input, shape index: {}]   ;;  %s13521_s5 = inlined_call_operand.vmem [shape: f32[512,32], index: 5, kind: input, shape index: {}]   ;;  %s13522_s6 = inlined_call_operand.vmem [shape: f32[1,32], index: 6, kind: input, shape index: {}]   ;;  %s13523_s7 = inlined_call_operand.vmem [shape: f32[1,32], index: 7, kind: input, shape index: {}]   ;;  %s13524_s8 = inlined_call_operand.vmem [shape: f32[1,32], index: 8, kind: input, shape index: {}]   ;;  %s13525_s9 = inlined_call_operand.vmem [shape: f32[512,32], index: 9, kind: input, shape index: {}]   ;;  %s13526_s10 = inlined_call_operand.vmem [shape: f32[1,32], index: 10, kind: input, shape index: {}]   ;;  %s13527_s11 = inlined_call_operand.vmem [shape: f32[512,32], index: 11, kind: input, shape index: {}]   ;;  %s13528_s12 = inlined_call_operand.vmem [shape: f32[1,32], index: 12, kind: input, shape index: {}]   ;;  %s13529_s13 = inlined_call_operand.vmem [shape: f32[32,256], index: 13, kind: input, shape index: {}]   ;;  %s13530_s14 = inlined_call_operand.vmem [shape: f32[1,256], index: 14, kind: input, shape index: {}]   ;;  %s13531_s15 = inlined_call_operand.vmem [shape: f32[256,64], index: 15, kind: input, shape index: {}]   ;;  %s13532_s16 = inlined_call_operand.vmem [shape: f32[1,64], index: 16, kind: input, shape index: {}]   ;;  %s13533_s17 = inlined_call_operand.vmem [shape: f32[64,16], index: 17, kind: input, shape index: {}]   ;;  %s13534_s18 = inlined_call_operand.vmem [shape: f32[1,16], index: 18, kind: input, shape index: {}]   ;;  %s13535_s19 = inlined_call_operand.vmem [shape: f32[1,16], index: 19, kind: input, shape index: {}]   ;;  %s13536_s20 = inlined_call_operand.<no memory space> [shape: f32[1,1], index: 20, kind: input, shape index: {}]   ;;  %s13537_s21 = inlined_call_operand.vmem [shape: f32[2,1,1], index: 21, kind: output, shape index: {}]  }
   0x1   :  { %13625 = sst [smem:[#allocation72_spill]] %s13516_s0  ;;  %v26_v0 = vstv %s13536_s20 }
   0x2   :  { %13626 = sst [smem:[#allocation73_spill]] %s13517_s1  ;;  %27 = vst [vmem:[#allocation2] sm:$0x1] %v26_v0 }
   0x3   :  { %13627 = sst [smem:[#allocation74_spill]] %s13518_s2 }
   0x4   :  { %13628 = sst [smem:[#allocation75_spill]] %s13519_s3 }
   0x5   :  { %13629 = sst [smem:[#allocation76_spill]] %s13520_s4 }
   0x6   :  { %13630 = sst [smem:[#allocation77_spill]] %s13521_s5 }
   0x7 LB: > { %s7700_s27 = sadd.s32 4294967295, %s9098_s26   ;;  %p7704_p0 = scmp.ge.s32.totalorder %s9098_s26, 1  ;;  %s9098_s26 = sphi %s9216_s26, %s33_s26  }
   0x8   : > { %p589_p1 = scmp.lt.s32.totalorder %s9098_s26, 3 }
   0xa   : > { %p590_p2 = pnand %p7704_p0, %p589_p1 }
   0xc   : > { %593 = sbr.rel (%p590_p2) target bundleno = 5455 (0x154f), region = 104 }
  0x11   : > { %s13631_s29 = sld [smem:[#allocation73_spill]]  ;;  %p9526_p3 = scmp.lt.s32.totalorder %s7700_s27, 1  ;;  %vm3334_vm12 = vcmask 261120  }
  0x12   : > { %s13633_s30 = sld [smem:[#allocation72_spill]] }
  0x13   : > { %s13841_s27 = smov (!%p9526_p3, %s7700_s27), 1  ;;  %s13753_s1 = sld [smem:[#allocation74_spill]] }
  0x14   : > { %s7849_s3 = sshll.u32 %s13841_s27, 10  ;;  %s13769_s24 = sld [smem:[#allocation75_spill]] }
  0x15   : > { %s13778_s4 = sld [smem:[#allocation76_spill]]  ;;  %s654_s28 = scalar_lea.vmem %s13537_s21, %s13841_s27 }
  0x17   : > { %v844_v1 = vld [vmem:[%s13631_s29 + $0x1e8] sm:$0xff]  ;;  %v843_v3 = vld [vmem:[%s13631_s29 + $0x1e0] sm:$0xff] }
  0x18   : > { %v972_v2 = vld [vmem:[%s13631_s29 + $0x5e8] sm:$0xff]  ;;  %1061 = vmatprep.subr.mxu0 %v844_v1  ;;  %v971_v4 = vld [vmem:[%s13631_s29 + $0x5e0] sm:$0xff]  ;;  %s9606_s0 = scalar_lea.vmem %s13633_s30, %s7849_s3  ;;  %s13703_s3 = sld [smem:[#allocation77_spill]] }
  0x19   : > { %1318 = vmatprep.subr.mxu1 %v972_v2  ;;  %v840_v5 = vld [vmem:[%s13631_s29 + $0x1c8] sm:$0xff]  ;;  %1062 = vmatpush1.msra.mxu0 %v843_v3  ;;  %v839_v7 = vld [vmem:[%s13631_s29 + $0x1c0] sm:$0xff] }
  0x1a   : > { %v968_v6 = vld [vmem:[%s13631_s29 + $0x5c8] sm:$0xff]  ;;  %1319 = vmatpush1.msra.mxu1 %v971_v4  ;;  %v967_v8 = vld [vmem:[%s13631_s29 + $0x5c0] sm:$0xff]  ;;  %1063 = vmatprep.subr.mxu0 %v840_v5 }
  0x1b   : > { %v836_v9 = vld [vmem:[%s13631_s29 + $0x1a8] sm:$0xff]  ;;  %1320 = vmatprep.subr.mxu1 %v968_v6  ;;  %v835_v11 = vld [vmem:[%s13631_s29 + $0x1a0] sm:$0xff]  ;;  %1064 = vmatpush1.msra.mxu0 %v839_v7 }
  0x1c   : > { %v964_v10 = vld [vmem:[%s13631_s29 + $0x5a8] sm:$0xff]  ;;  %v963_v12 = vld [vmem:[%s13631_s29 + $0x5a0] sm:$0xff]  ;;  %1321 = vmatpush1.msra.mxu1 %v967_v8  ;;  %1065 = vmatprep.subr.mxu0 %v836_v9 }
  0x1d   : > { %v832_v13 = vld [vmem:[%s13631_s29 + $0x188] sm:$0xff]  ;;  %1322 = vmatprep.subr.mxu1 %v964_v10  ;;  %v831_v15 = vld [vmem:[%s13631_s29 + $0x180] sm:$0xff]  ;;  %1066 = vmatpush1.msra.mxu0 %v835_v11 }
  0x1e   : > { %v960_v14 = vld [vmem:[%s13631_s29 + $0x588] sm:$0xff]  ;;  %v959_v16 = vld [vmem:[%s13631_s29 + $0x580] sm:$0xff]  ;;  %1323 = vmatpush1.msra.mxu1 %v963_v12  ;;  %1067 = vmatprep.subr.mxu0 %v832_v13 }
  0x1f   : > { %v828_v17 = vld [vmem:[%s13631_s29 + $0x168] sm:$0xff]  ;;  %1324 = vmatprep.subr.mxu1 %v960_v14  ;;  %v827_v19 = vld [vmem:[%s13631_s29 + $0x160] sm:$0xff]  ;;  %1068 = vmatpush1.msra.mxu0 %v831_v15 }
  0x20   : > { %v956_v18 = vld [vmem:[%s13631_s29 + $0x568] sm:$0xff]  ;;  %v955_v20 = vld [vmem:[%s13631_s29 + $0x560] sm:$0xff]  ;;  %1325 = vmatpush1.msra.mxu1 %v959_v16  ;;  %1069 = vmatprep.subr.mxu0 %v828_v17 }
  0x21   : > { %v824_v21 = vld [vmem:[%s13631_s29 + $0x148] sm:$0xff]  ;;  %1326 = vmatprep.subr.mxu1 %v956_v18  ;;  %v823_v23 = vld [vmem:[%s13631_s29 + $0x140] sm:$0xff]  ;;  %1070 = vmatpush1.msra.mxu0 %v827_v19 }
  0x22   : > { %v952_v22 = vld [vmem:[%s13631_s29 + $0x548] sm:$0xff]  ;;  %v951_v24 = vld [vmem:[%s13631_s29 + $0x540] sm:$0xff]  ;;  %1327 = vmatpush1.msra.mxu1 %v955_v20  ;;  %1071 = vmatprep.subr.mxu0 %v824_v21 }
  0x23   : > { %v820_v25 = vld [vmem:[%s13631_s29 + $0x128] sm:$0xff]  ;;  %1328 = vmatprep.subr.mxu1 %v952_v22  ;;  %v819_v27 = vld [vmem:[%s13631_s29 + $0x120] sm:$0xff]  ;;  %1072 = vmatpush1.msra.mxu0 %v823_v23 }
  0x24   : > { %v948_v26 = vld [vmem:[%s13631_s29 + $0x528] sm:$0xff]  ;;  %v947_v28 = vld [vmem:[%s13631_s29 + $0x520] sm:$0xff]  ;;  %1329 = vmatpush1.msra.mxu1 %v951_v24  ;;  %1073 = vmatprep.subr.mxu0 %v820_v25 }
  0x25   : > { %v816_v29 = vld [vmem:[%s13631_s29 + $0x108] sm:$0xff]  ;;  %1330 = vmatprep.subr.mxu1 %v948_v26  ;;  %v815_v31 = vld [vmem:[%s13631_s29 + $0x100] sm:$0xff]  ;;  %1074 = vmatpush1.msra.mxu0 %v819_v27 }
  0x26   : > { %v944_v30 = vld [vmem:[%s13631_s29 + $0x508] sm:$0xff]  ;;  %v943_v32 = vld [vmem:[%s13631_s29 + $0x500] sm:$0xff]  ;;  %1331 = vmatpush1.msra.mxu1 %v947_v28  ;;  %1075 = vmatprep.subr.mxu0 %v816_v29 }
  0x27   : > { %v812_v33 = vld [vmem:[%s13631_s29 + $0xe8] sm:$0xff]  ;;  %1332 = vmatprep.subr.mxu1 %v944_v30  ;;  %v811_v35 = vld [vmem:[%s13631_s29 + $0xe0] sm:$0xff]  ;;  %1076 = vmatpush1.msra.mxu0 %v815_v31 }
  0x28   : > { %v940_v34 = vld [vmem:[%s13631_s29 + $0x4e8] sm:$0xff]  ;;  %v939_v36 = vld [vmem:[%s13631_s29 + $0x4e0] sm:$0xff]  ;;  %1333 = vmatpush1.msra.mxu1 %v943_v32  ;;  %1077 = vmatprep.subr.mxu0 %v812_v33 }
  0x29   : > { %v808_v37 = vld [vmem:[%s13631_s29 + $0xc8] sm:$0xff]  ;;  %1334 = vmatprep.subr.mxu1 %v940_v34  ;;  %v807_v39 = vld [vmem:[%s13631_s29 + $0xc0] sm:$0xff]  ;;  %1078 = vmatpush1.msra.mxu0 %v811_v35 }
  0x2a   : > { %v936_v38 = vld [vmem:[%s13631_s29 + $0x4c8] sm:$0xff]  ;;  %v935_v40 = vld [vmem:[%s13631_s29 + $0x4c0] sm:$0xff]  ;;  %1335 = vmatpush1.msra.mxu1 %v939_v36  ;;  %1079 = vmatprep.subr.mxu0 %v808_v37 }
  0x2b   : > { %v804_v41 = vld [vmem:[%s13631_s29 + $0xa8] sm:$0xff]  ;;  %1336 = vmatprep.subr.mxu1 %v936_v38  ;;  %v803_v43 = vld [vmem:[%s13631_s29 + $0xa0] sm:$0xff]  ;;  %1080 = vmatpush1.msra.mxu0 %v807_v39 }
  0x2c   : > { %v932_v42 = vld [vmem:[%s13631_s29 + $0x4a8] sm:$0xff]  ;;  %v931_v44 = vld [vmem:[%s13631_s29 + $0x4a0] sm:$0xff]  ;;  %1337 = vmatpush1.msra.mxu1 %v935_v40  ;;  %1081 = vmatprep.subr.mxu0 %v804_v41 }
  0x2d   : > { %v800_v45 = vld [vmem:[%s13631_s29 + $0x88] sm:$0xff]  ;;  %1338 = vmatprep.subr.mxu1 %v932_v42  ;;  %v799_v47 = vld [vmem:[%s13631_s29 + $0x80] sm:$0xff]  ;;  %1082 = vmatpush1.msra.mxu0 %v803_v43 }
  0x2e   : > { %v928_v46 = vld [vmem:[%s13631_s29 + $0x488] sm:$0xff]  ;;  %v927_v48 = vld [vmem:[%s13631_s29 + $0x480] sm:$0xff]  ;;  %1339 = vmatpush1.msra.mxu1 %v931_v44  ;;  %1083 = vmatprep.subr.mxu0 %v800_v45 }
  0x2f   : > { %v796_v49 = vld [vmem:[%s13631_s29 + $0x68] sm:$0xff]  ;;  %1340 = vmatprep.subr.mxu1 %v928_v46  ;;  %v795_v51 = vld [vmem:[%s13631_s29 + $0x60] sm:$0xff]  ;;  %1084 = vmatpush1.msra.mxu0 %v799_v47 }
  0x30   : > { %v924_v50 = vld [vmem:[%s13631_s29 + $0x468] sm:$0xff]  ;;  %v923_v52 = vld [vmem:[%s13631_s29 + $0x460] sm:$0xff]  ;;  %1341 = vmatpush1.msra.mxu1 %v927_v48  ;;  %1085 = vmatprep.subr.mxu0 %v796_v49 }
  0x31   : > { %v792_v53 = vld [vmem:[%s13631_s29 + $0x48] sm:$0xff]  ;;  %1342 = vmatprep.subr.mxu1 %v924_v50  ;;  %v791_v55 = vld [vmem:[%s13631_s29 + $0x40] sm:$0xff]  ;;  %1086 = vmatpush1.msra.mxu0 %v795_v51 }
  0x32   : > { %v920_v54 = vld [vmem:[%s13631_s29 + $0x448] sm:$0xff]  ;;  %v919_v56 = vld [vmem:[%s13631_s29 + $0x440] sm:$0xff]  ;;  %1343 = vmatpush1.msra.mxu1 %v923_v52  ;;  %1087 = vmatprep.subr.mxu0 %v792_v53 }
  0x33   : > { %v788_v57 = vld [vmem:[%s13631_s29 + $0x28] sm:$0xff]  ;;  %1344 = vmatprep.subr.mxu1 %v920_v54  ;;  %v787_v59 = vld [vmem:[%s13631_s29 + $0x20] sm:$0xff]  ;;  %1088 = vmatpush1.msra.mxu0 %v791_v55 }
  0x34   : > { %v916_v58 = vld [vmem:[%s13631_s29 + $0x428] sm:$0xff]  ;;  %v915_v60 = vld [vmem:[%s13631_s29 + $0x420] sm:$0xff]  ;;  %1345 = vmatpush1.msra.mxu1 %v919_v56  ;;  %1089 = vmatprep.subr.mxu0 %v788_v57 }
  0x35   : > { %v784_v61 = vld [vmem:[%s13631_s29 + $0x8] sm:$0xff]  ;;  %1346 = vmatprep.subr.mxu1 %v916_v58  ;;  %v783_v63 = vld [vmem:[%s13631_s29] sm:$0xff]  ;;  %1090 = vmatpush1.msra.mxu0 %v787_v59 }
  0x36   : > { %v912_v62 = vld [vmem:[%s13631_s29 + $0x408] sm:$0xff]  ;;  %v911_v0 = vld [vmem:[%s13631_s29 + $0x400] sm:$0xff]  ;;  %1347 = vmatpush1.msra.mxu1 %v915_v60  ;;  %1091 = vmatprep.subr.mxu0 %v784_v61 }
  0x37   : > { %v908_v1 = vld [vmem:[%s13631_s29 + $0x3e8] sm:$0xff]  ;;  %1348 = vmatprep.subr.mxu1 %v912_v62  ;;  %v907_v3 = vld [vmem:[%s13631_s29 + $0x3e0] sm:$0xff]  ;;  %1092 = vmatpush1.msra.mxu0 %v783_v63 }
  0x38   : > { %v1036_v2 = vld [vmem:[%s13631_s29 + $0x7e8] sm:$0xff]  ;;  %v1035_v4 = vld [vmem:[%s13631_s29 + $0x7e0] sm:$0xff]  ;;  %1349 = vmatpush1.msra.mxu1 %v911_v0  ;;  %1093 = vmatprep.subr.mxu0 %v908_v1 }
  0x39   : > { %v904_v5 = vld [vmem:[%s13631_s29 + $0x3c8] sm:$0xff]  ;;  %1350 = vmatprep.subr.mxu1 %v1036_v2  ;;  %v903_v7 = vld [vmem:[%s13631_s29 + $0x3c0] sm:$0xff]  ;;  %1094 = vmatpush2.msra.mxu0 %v907_v3  ;;  %v658_v2 = vld [vmem:[%s9606_s0 + $0x18] sm:$0xff] }
  0x3a   : > { %v1032_v6 = vld [vmem:[%s13631_s29 + $0x7c8] sm:$0xff]  ;;  %v1031_v8 = vld [vmem:[%s13631_s29 + $0x7c0] sm:$0xff]  ;;  %1351 = vmatpush2.msra.mxu1 %v1035_v4  ;;  %1095 = vmatprep.subr.mxu0 %v904_v5  ;;  %v657_v4 = vld [vmem:[%s9606_s0 + $0x10] sm:$0xff] }
  0x3b   : > { %v900_v9 = vld [vmem:[%s13631_s29 + $0x3a8] sm:$0xff]  ;;  %1352 = vmatprep.subr.mxu1 %v1032_v6  ;;  %v899_v11 = vld [vmem:[%s13631_s29 + $0x3a0] sm:$0xff]  ;;  %1096 = vmatpush2.msra.mxu0 %v903_v7  ;;  %v662_v6 = vld [vmem:[%s9606_s0 + $0x38] sm:$0xff] }
  0x3c   : > { %v1028_v10 = vld [vmem:[%s13631_s29 + $0x7a8] sm:$0xff]  ;;  %v1027_v12 = vld [vmem:[%s13631_s29 + $0x7a0] sm:$0xff]  ;;  %1353 = vmatpush2.msra.mxu1 %v1031_v8  ;;  %1097 = vmatprep.subr.mxu0 %v900_v9  ;;  %v846_v7 = vld [vmem:[%s13631_s29 + $0x1f8] sm:$0xff] }
  0x3d   : > { %v896_v13 = vld [vmem:[%s13631_s29 + $0x388] sm:$0xff]  ;;  %1354 = vmatprep.subr.mxu1 %v1028_v10  ;;  %v895_v15 = vld [vmem:[%s13631_s29 + $0x380] sm:$0xff]  ;;  %1098 = vmatpush2.msra.mxu0 %v899_v11  ;;  %v974_v8 = vld [vmem:[%s13631_s29 + $0x5f8] sm:$0xff] }
  0x3e   : > { %v1024_v14 = vld [vmem:[%s13631_s29 + $0x788] sm:$0xff]  ;;  %v1023_v16 = vld [vmem:[%s13631_s29 + $0x780] sm:$0xff]  ;;  %1355 = vmatpush2.msra.mxu1 %v1027_v12  ;;  %1099 = vmatprep.subr.mxu0 %v896_v13  ;;  %v845_v9 = vld [vmem:[%s13631_s29 + $0x1f0] sm:$0xff] }
  0x3f   : > { %v892_v17 = vld [vmem:[%s13631_s29 + $0x368] sm:$0xff]  ;;  %1356 = vmatprep.subr.mxu1 %v1024_v14  ;;  %v891_v19 = vld [vmem:[%s13631_s29 + $0x360] sm:$0xff]  ;;  %1100 = vmatpush2.msra.mxu0 %v895_v15  ;;  %v973_v10 = vld [vmem:[%s13631_s29 + $0x5f0] sm:$0xff] }
  0x40   : > { %v1020_v18 = vld [vmem:[%s13631_s29 + $0x768] sm:$0xff]  ;;  %v1019_v20 = vld [vmem:[%s13631_s29 + $0x760] sm:$0xff]  ;;  %1357 = vmatpush2.msra.mxu1 %v1023_v16  ;;  %1101 = vmatprep.subr.mxu0 %v892_v17  ;;  %v9648_v12 = vld [vmem:[%s9606_s0 + $0x30] sm:$0xff] }
  0x41   : > { %v888_v21 = vld [vmem:[%s13631_s29 + $0x348] sm:$0xff]  ;;  %1358 = vmatprep.subr.mxu1 %v1020_v18  ;;  %v887_v23 = vld [vmem:[%s13631_s29 + $0x340] sm:$0xff]  ;;  %1102 = vmatpush2.msra.mxu0 %v891_v19  ;;  %v9654_v14 = vld [vmem:[%s9606_s0 + $0x58] sm:$0xff] }
  0x42   : > { %v1016_v22 = vld [vmem:[%s13631_s29 + $0x748] sm:$0xff]  ;;  %v1015_v24 = vld [vmem:[%s13631_s29 + $0x740] sm:$0xff]  ;;  %1359 = vmatpush2.msra.mxu1 %v1019_v20  ;;  %1103 = vmatprep.subr.mxu0 %v888_v21  ;;  %v842_v15 = vld [vmem:[%s13631_s29 + $0x1d8] sm:$0xff] }
  0x43   : > { %v884_v25 = vld [vmem:[%s13631_s29 + $0x328] sm:$0xff]  ;;  %1360 = vmatprep.subr.mxu1 %v1016_v22  ;;  %v883_v27 = vld [vmem:[%s13631_s29 + $0x320] sm:$0xff]  ;;  %1104 = vmatpush2.msra.mxu0 %v887_v23  ;;  %v970_v16 = vld [vmem:[%s13631_s29 + $0x5d8] sm:$0xff] }
  0x44   : > { %v1012_v26 = vld [vmem:[%s13631_s29 + $0x728] sm:$0xff]  ;;  %v1011_v28 = vld [vmem:[%s13631_s29 + $0x720] sm:$0xff]  ;;  %1361 = vmatpush2.msra.mxu1 %v1015_v24  ;;  %1105 = vmatprep.subr.mxu0 %v884_v25  ;;  %v841_v17 = vld [vmem:[%s13631_s29 + $0x1d0] sm:$0xff] }
  0x45   : > { %v880_v29 = vld [vmem:[%s13631_s29 + $0x308] sm:$0xff]  ;;  %1362 = vmatprep.subr.mxu1 %v1012_v26  ;;  %v879_v31 = vld [vmem:[%s13631_s29 + $0x300] sm:$0xff]  ;;  %1106 = vmatpush2.msra.mxu0 %v883_v27  ;;  %v969_v18 = vld [vmem:[%s13631_s29 + $0x5d0] sm:$0xff] }
  0x46   : > { %v1008_v30 = vld [vmem:[%s13631_s29 + $0x708] sm:$0xff]  ;;  %v1007_v32 = vld [vmem:[%s13631_s29 + $0x700] sm:$0xff]  ;;  %1363 = vmatpush2.msra.mxu1 %v1011_v28  ;;  %1107 = vmatprep.subr.mxu0 %v880_v29  ;;  %v9676_v20 = vld [vmem:[%s9606_s0 + $0x50] sm:$0xff] }
  0x47   : > { %v876_v33 = vld [vmem:[%s13631_s29 + $0x2e8] sm:$0xff]  ;;  %1364 = vmatprep.subr.mxu1 %v1008_v30  ;;  %v875_v35 = vld [vmem:[%s13631_s29 + $0x2e0] sm:$0xff]  ;;  %1108 = vmatpush2.msra.mxu0 %v879_v31  ;;  %v9682_v22 = vld [vmem:[%s9606_s0 + $0x78] sm:$0xff] }
  0x48   : > { %v1004_v34 = vld [vmem:[%s13631_s29 + $0x6e8] sm:$0xff]  ;;  %v1003_v36 = vld [vmem:[%s13631_s29 + $0x6e0] sm:$0xff]  ;;  %1365 = vmatpush2.msra.mxu1 %v1007_v32  ;;  %1109 = vmatprep.subr.mxu0 %v876_v33  ;;  %v838_v23 = vld [vmem:[%s13631_s29 + $0x1b8] sm:$0xff] }
  0x49   : > { %v872_v37 = vld [vmem:[%s13631_s29 + $0x2c8] sm:$0xff]  ;;  %1366 = vmatprep.subr.mxu1 %v1004_v34  ;;  %v871_v39 = vld [vmem:[%s13631_s29 + $0x2c0] sm:$0xff]  ;;  %1110 = vmatpush2.msra.mxu0 %v875_v35  ;;  %v966_v24 = vld [vmem:[%s13631_s29 + $0x5b8] sm:$0xff] }
  0x4a   : > { %v1000_v38 = vld [vmem:[%s13631_s29 + $0x6c8] sm:$0xff]  ;;  %v999_v40 = vld [vmem:[%s13631_s29 + $0x6c0] sm:$0xff]  ;;  %1367 = vmatpush2.msra.mxu1 %v1003_v36  ;;  %1111 = vmatprep.subr.mxu0 %v872_v37  ;;  %v837_v25 = vld [vmem:[%s13631_s29 + $0x1b0] sm:$0xff] }
  0x4b   : > { %v868_v41 = vld [vmem:[%s13631_s29 + $0x2a8] sm:$0xff]  ;;  %1368 = vmatprep.subr.mxu1 %v1000_v38  ;;  %v867_v43 = vld [vmem:[%s13631_s29 + $0x2a0] sm:$0xff]  ;;  %1112 = vmatpush2.msra.mxu0 %v871_v39  ;;  %v965_v26 = vld [vmem:[%s13631_s29 + $0x5b0] sm:$0xff] }
  0x4c   : > { %v996_v42 = vld [vmem:[%s13631_s29 + $0x6a8] sm:$0xff]  ;;  %v995_v44 = vld [vmem:[%s13631_s29 + $0x6a0] sm:$0xff]  ;;  %1369 = vmatpush2.msra.mxu1 %v999_v40  ;;  %1113 = vmatprep.subr.mxu0 %v868_v41  ;;  %v9704_v28 = vld [vmem:[%s9606_s0 + $0x70] sm:$0xff] }
  0x4d   : > { %v864_v45 = vld [vmem:[%s13631_s29 + $0x288] sm:$0xff]  ;;  %1370 = vmatprep.subr.mxu1 %v996_v42  ;;  %v863_v47 = vld [vmem:[%s13631_s29 + $0x280] sm:$0xff]  ;;  %1114 = vmatpush2.msra.mxu0 %v867_v43  ;;  %v9710_v30 = vld [vmem:[%s9606_s0 + $0x98] sm:$0xff] }
  0x4e   : > { %v992_v46 = vld [vmem:[%s13631_s29 + $0x688] sm:$0xff]  ;;  %v991_v48 = vld [vmem:[%s13631_s29 + $0x680] sm:$0xff]  ;;  %1371 = vmatpush2.msra.mxu1 %v995_v44  ;;  %1115 = vmatprep.subr.mxu0 %v864_v45  ;;  %v834_v31 = vld [vmem:[%s13631_s29 + $0x198] sm:$0xff] }
  0x4f   : > { %v860_v49 = vld [vmem:[%s13631_s29 + $0x268] sm:$0xff]  ;;  %1372 = vmatprep.subr.mxu1 %v992_v46  ;;  %v859_v51 = vld [vmem:[%s13631_s29 + $0x260] sm:$0xff]  ;;  %1116 = vmatpush2.msra.mxu0 %v863_v47  ;;  %v962_v32 = vld [vmem:[%s13631_s29 + $0x598] sm:$0xff] }
  0x50   : > { %v988_v50 = vld [vmem:[%s13631_s29 + $0x668] sm:$0xff]  ;;  %v987_v52 = vld [vmem:[%s13631_s29 + $0x660] sm:$0xff]  ;;  %1373 = vmatpush2.msra.mxu1 %v991_v48  ;;  %1117 = vmatprep.subr.mxu0 %v860_v49  ;;  %v833_v33 = vld [vmem:[%s13631_s29 + $0x190] sm:$0xff] }
  0x51   : > { %v856_v53 = vld [vmem:[%s13631_s29 + $0x248] sm:$0xff]  ;;  %1374 = vmatprep.subr.mxu1 %v988_v50  ;;  %v855_v55 = vld [vmem:[%s13631_s29 + $0x240] sm:$0xff]  ;;  %1118 = vmatpush2.msra.mxu0 %v859_v51  ;;  %v961_v34 = vld [vmem:[%s13631_s29 + $0x590] sm:$0xff] }
  0x52   : > { %v984_v54 = vld [vmem:[%s13631_s29 + $0x648] sm:$0xff]  ;;  %v983_v56 = vld [vmem:[%s13631_s29 + $0x640] sm:$0xff]  ;;  %1375 = vmatpush2.msra.mxu1 %v987_v52  ;;  %1119 = vmatprep.subr.mxu0 %v856_v53  ;;  %v9732_v36 = vld [vmem:[%s9606_s0 + $0x90] sm:$0xff] }
  0x53   : > { %v852_v57 = vld [vmem:[%s13631_s29 + $0x228] sm:$0xff]  ;;  %1376 = vmatprep.subr.mxu1 %v984_v54  ;;  %v851_v59 = vld [vmem:[%s13631_s29 + $0x220] sm:$0xff]  ;;  %1120 = vmatpush2.msra.mxu0 %v855_v55  ;;  %v9738_v38 = vld [vmem:[%s9606_s0 + $0xb8] sm:$0xff] }
  0x54   : > { %v980_v58 = vld [vmem:[%s13631_s29 + $0x628] sm:$0xff]  ;;  %v979_v60 = vld [vmem:[%s13631_s29 + $0x620] sm:$0xff]  ;;  %1377 = vmatpush2.msra.mxu1 %v983_v56  ;;  %1121 = vmatprep.subr.mxu0 %v852_v57  ;;  %v830_v39 = vld [vmem:[%s13631_s29 + $0x178] sm:$0xff] }
  0x55   : > { %v848_v61 = vld [vmem:[%s13631_s29 + $0x208] sm:$0xff]  ;;  %1378 = vmatprep.subr.mxu1 %v980_v58  ;;  %v847_v63 = vld [vmem:[%s13631_s29 + $0x200] sm:$0xff]  ;;  %1122 = vmatpush2.msra.mxu0 %v851_v59  ;;  %v958_v40 = vld [vmem:[%s13631_s29 + $0x578] sm:$0xff] }
  0x56   : > { %v976_v62 = vld [vmem:[%s13631_s29 + $0x608] sm:$0xff]  ;;  %1379 = vmatpush2.msra.mxu1 %v979_v60  ;;  %v975_v1 = vld [vmem:[%s13631_s29 + $0x600] sm:$0xff]  ;;  %1123 = vmatprep.subr.mxu0 %v848_v61  ;;  %v829_v41 = vld [vmem:[%s13631_s29 + $0x170] sm:$0xff] }
  0x57   : > { %v656_v0 = vld [vmem:[%s9606_s0 + $0x8] sm:$0xff]  ;;  %1380 = vmatprep.subr.mxu1 %v976_v62  ;;  %v655_v3 = vld [vmem:[%s9606_s0] sm:$0xff]  ;;  %1124 = vmatpush2.msra.mxu0 %v847_v63  ;;  %v957_v42 = vld [vmem:[%s13631_s29 + $0x570] sm:$0xff] }
  0x58   : > { %1125 = vmatprep.mubr.f32.mxu0 %v656_v0  ;;  %v660_v5 = vld [vmem:[%s9606_s0 + $0x28] sm:$0xff]  ;;  %1381 = vmatpush2.msra.mxu1 %v975_v1  ;;  %v9645_v11 = vld [vmem:[%s9606_s0 + $0x20] sm:$0xff]  ;;  %v9760_v44 = vld [vmem:[%s9606_s0 + $0xb0] sm:$0xff] }
  0x59   : > { %1382 = vmatprep.mubr.f32.mxu1 %v658_v2  ;;  %1126 = vmatmul.mubr.f32.vlgmr.msra.gmra.mxu0 %v655_v3  ;;  %v9651_v13 = vld [vmem:[%s9606_s0 + $0x48] sm:$0xff]  ;;  %v9673_v19 = vld [vmem:[%s9606_s0 + $0x40] sm:$0xff]  ;;  %v9766_v46 = vld [vmem:[%s9606_s0 + $0xd8] sm:$0xff] }
  0x5a   : > { %1383 = vmatmul.mubr.f32.vlgmr.msra.gmra.mxu1 %v657_v4  ;;  %1131 = vmatprep.mubr.f32.mxu0 %v660_v5  ;;  %v9679_v21 = vld [vmem:[%s9606_s0 + $0x68] sm:$0xff]  ;;  %v9701_v27 = vld [vmem:[%s9606_s0 + $0x60] sm:$0xff]  ;;  %v826_v47 = vld [vmem:[%s13631_s29 + $0x158] sm:$0xff] }
  0x5b   : > { %1388 = vmatprep.mubr.f32.mxu1 %v662_v6  ;;  %1575 = vmatprep.subr.mxu0 %v846_v7  ;;  %v9707_v29 = vld [vmem:[%s9606_s0 + $0x88] sm:$0xff]  ;;  %v9729_v35 = vld [vmem:[%s9606_s0 + $0x80] sm:$0xff]  ;;  %v954_v48 = vld [vmem:[%s13631_s29 + $0x558] sm:$0xff] }
  0x5c   : > { %1832 = vmatprep.subr.mxu1 %v974_v8  ;;  %1576 = vmatpush1.msra.mxu0 %v845_v9  ;;  %v9735_v37 = vld [vmem:[%s9606_s0 + $0xa8] sm:$0xff]  ;;  %v9757_v43 = vld [vmem:[%s9606_s0 + $0xa0] sm:$0xff]  ;;  %v825_v49 = vld [vmem:[%s13631_s29 + $0x150] sm:$0xff] }
  0x5d   : > { %1833 = vmatpush1.msra.mxu1 %v973_v10  ;;  %1132 = vmatmul.mubr.f32.gmra.mxu0 %v9645_v11  ;;  %v9763_v45 = vld [vmem:[%s9606_s0 + $0xc8] sm:$0xff]  ;;  %v953_v50 = vld [vmem:[%s13631_s29 + $0x550] sm:$0xff]  ;;  %v9785_v51 = vld [vmem:[%s9606_s0 + $0xc0] sm:$0xff] }
  0x5e   : > { %1389 = vmatmul.mubr.f32.gmra.mxu1 %v9648_v12  ;;  %1137 = vmatprep.mubr.f32.mxu0 %v9651_v13  ;;  %v9788_v52 = vld [vmem:[%s9606_s0 + $0xd0] sm:$0xff]  ;;  %v9791_v53 = vld [vmem:[%s9606_s0 + $0xe8] sm:$0xff]  ;;  %v9794_v54 = vld [vmem:[%s9606_s0 + $0xf8] sm:$0xff] }
  0x5f   : > { %1394 = vmatprep.mubr.f32.mxu1 %v9654_v14  ;;  %1577 = vmatprep.subr.mxu0 %v842_v15  ;;  %v822_v55 = vld [vmem:[%s13631_s29 + $0x138] sm:$0xff]  ;;  %v821_v57 = vld [vmem:[%s13631_s29 + $0x130] sm:$0xff]  ;;  %v9813_v59 = vld [vmem:[%s9606_s0 + $0xe0] sm:$0xff] }
  0x60   : > { %1834 = vmatprep.subr.mxu1 %v970_v16  ;;  %1578 = vmatpush1.msra.mxu0 %v841_v17  ;;  %v950_v56 = vld [vmem:[%s13631_s29 + $0x538] sm:$0xff]  ;;  %v949_v58 = vld [vmem:[%s13631_s29 + $0x530] sm:$0xff]  ;;  %v9819_v61 = vld [vmem:[%s9606_s0 + $0x108] sm:$0xff] }
  0x61   : > { %1835 = vmatpush1.msra.mxu1 %v969_v18  ;;  %1138 = vmatmul.mubr.f32.gmra.mxu0 %v9673_v19  ;;  %v9816_v60 = vld [vmem:[%s9606_s0 + $0xf0] sm:$0xff]  ;;  %v9822_v62 = vld [vmem:[%s9606_s0 + $0x118] sm:$0xff]  ;;  %v9841_v3 = vld [vmem:[%s9606_s0 + $0x100] sm:$0xff] }
  0x62   : > { %1395 = vmatmul.mubr.f32.gmra.mxu1 %v9676_v20  ;;  %1143 = vmatprep.mubr.f32.mxu0 %v9679_v21  ;;  %v818_v63 = vld [vmem:[%s13631_s29 + $0x118] sm:$0xff]  ;;  %v817_v1 = vld [vmem:[%s13631_s29 + $0x110] sm:$0xff]  ;;  %v9847_v5 = vld [vmem:[%s9606_s0 + $0x128] sm:$0xff] }
  0x63   : > { %1400 = vmatprep.mubr.f32.mxu1 %v9682_v22  ;;  %1579 = vmatprep.subr.mxu0 %v838_v23  ;;  %v946_v0 = vld [vmem:[%s13631_s29 + $0x518] sm:$0xff]  ;;  %v945_v2 = vld [vmem:[%s13631_s29 + $0x510] sm:$0xff]  ;;  %v9869_v15 = vld [vmem:[%s9606_s0 + $0x120] sm:$0xff] }
  0x64   : > { %1836 = vmatprep.subr.mxu1 %v966_v24  ;;  %1580 = vmatpush1.msra.mxu0 %v837_v25  ;;  %v9844_v4 = vld [vmem:[%s9606_s0 + $0x110] sm:$0xff]  ;;  %v9850_v6 = vld [vmem:[%s9606_s0 + $0x138] sm:$0xff]  ;;  %v9875_v17 = vld [vmem:[%s9606_s0 + $0x148] sm:$0xff] }
  0x65   : > { %1837 = vmatpush1.msra.mxu1 %v965_v26  ;;  %1144 = vmatmul.mubr.f32.gmra.mxu0 %v9701_v27  ;;  %v814_v7 = vld [vmem:[%s13631_s29 + $0xf8] sm:$0xff]  ;;  %v813_v9 = vld [vmem:[%s13631_s29 + $0xf0] sm:$0xff] }
  0x66   : > { %1401 = vmatmul.mubr.f32.gmra.mxu1 %v9704_v28  ;;  %1149 = vmatprep.mubr.f32.mxu0 %v9707_v29  ;;  %v942_v8 = vld [vmem:[%s13631_s29 + $0x4f8] sm:$0xff]  ;;  %v941_v10 = vld [vmem:[%s13631_s29 + $0x4f0] sm:$0xff] }
  0x67   : > { %1406 = vmatprep.mubr.f32.mxu1 %v9710_v30  ;;  %1581 = vmatprep.subr.mxu0 %v834_v31  ;;  %v9872_v16 = vld [vmem:[%s9606_s0 + $0x130] sm:$0xff]  ;;  %v9878_v18 = vld [vmem:[%s9606_s0 + $0x158] sm:$0xff]  ;;  %v9897_v31 = vld [vmem:[%s9606_s0 + $0x140] sm:$0xff] }
  0x68   : > { %1838 = vmatprep.subr.mxu1 %v962_v32  ;;  %1582 = vmatpush1.msra.mxu0 %v833_v33  ;;  %v810_v23 = vld [vmem:[%s13631_s29 + $0xd8] sm:$0xff]  ;;  %v809_v25 = vld [vmem:[%s13631_s29 + $0xd0] sm:$0xff]  ;;  %v9903_v33 = vld [vmem:[%s9606_s0 + $0x168] sm:$0xff] }
  0x69   : > { %1839 = vmatpush1.msra.mxu1 %v961_v34  ;;  %1150 = vmatmul.mubr.f32.gmra.mxu0 %v9729_v35  ;;  %v938_v24 = vld [vmem:[%s13631_s29 + $0x4d8] sm:$0xff]  ;;  %v937_v26 = vld [vmem:[%s13631_s29 + $0x4d0] sm:$0xff] }
  0x6a   : > { %1407 = vmatmul.mubr.f32.gmra.mxu1 %v9732_v36  ;;  %1155 = vmatprep.mubr.f32.mxu0 %v9735_v37  ;;  %v9900_v32 = vld [vmem:[%s9606_s0 + $0x150] sm:$0xff]  ;;  %v9906_v34 = vld [vmem:[%s9606_s0 + $0x178] sm:$0xff] }
  0x6b   : > { %1412 = vmatprep.mubr.f32.mxu1 %v9738_v38  ;;  %1583 = vmatprep.subr.mxu0 %v830_v39  ;;  %v806_v39 = vld [vmem:[%s13631_s29 + $0xb8] sm:$0xff] }
  0x6c   : > { %1840 = vmatprep.subr.mxu1 %v958_v40  ;;  %1584 = vmatpush1.msra.mxu0 %v829_v41  ;;  %v934_v40 = vld [vmem:[%s13631_s29 + $0x4b8] sm:$0xff]  ;;  %v805_v41 = vld [vmem:[%s13631_s29 + $0xb0] sm:$0xff] }
  0x6d   : > { %1841 = vmatpush1.msra.mxu1 %v957_v42  ;;  %1156 = vmatmul.mubr.f32.gmra.mxu0 %v9757_v43  ;;  %v933_v42 = vld [vmem:[%s13631_s29 + $0x4b0] sm:$0xff] }
  0x6e   : > { %1413 = vmatmul.mubr.f32.gmra.mxu1 %v9760_v44  ;;  %1161 = vmatprep.mubr.f32.mxu0 %v9763_v45 }
  0x6f   : > { %1418 = vmatprep.mubr.f32.mxu1 %v9766_v46  ;;  %1585 = vmatprep.subr.mxu0 %v826_v47  ;;  %v9925_v47 = vld [vmem:[%s9606_s0 + $0x160] sm:$0xff] }
  0x70   : > { %1842 = vmatprep.subr.mxu1 %v954_v48  ;;  %1586 = vmatpush1.msra.mxu0 %v825_v49  ;;  %v9928_v48 = vld [vmem:[%s9606_s0 + $0x170] sm:$0xff]  ;;  %v9931_v49 = vld [vmem:[%s9606_s0 + $0x188] sm:$0xff] }
  0x71   : > { %1843 = vmatpush1.msra.mxu1 %v953_v50  ;;  %1162 = vmatmul.mubr.f32.gmra.mxu0 %v9785_v51  ;;  %v9934_v50 = vld [vmem:[%s9606_s0 + $0x198] sm:$0xff] }
  0x72   : > { %1419 = vmatmul.mubr.f32.gmra.mxu1 %v9788_v52  ;;  %1167 = vmatprep.mubr.f32.mxu0 %v9791_v53 }
  0x73   : > { %1424 = vmatprep.mubr.f32.mxu1 %v9794_v54  ;;  %1587 = vmatprep.subr.mxu0 %v822_v55  ;;  %v802_v55 = vld [vmem:[%s13631_s29 + $0x98] sm:$0xff] }
  0x74   : > { %1844 = vmatprep.subr.mxu1 %v950_v56  ;;  %1588 = vmatpush1.msra.mxu0 %v821_v57  ;;  %v930_v56 = vld [vmem:[%s13631_s29 + $0x498] sm:$0xff]  ;;  %v801_v57 = vld [vmem:[%s13631_s29 + $0x90] sm:$0xff] }
  0x75   : > { %1845 = vmatpush1.msra.mxu1 %v949_v58  ;;  %1168 = vmatmul.mubr.f32.gmra.mxu0 %v9813_v59  ;;  %v929_v58 = vld [vmem:[%s13631_s29 + $0x490] sm:$0xff] }
  0x76   : > { %1425 = vmatmul.mubr.f32.gmra.mxu1 %v9816_v60  ;;  %1173 = vmatprep.mubr.f32.mxu0 %v9819_v61 }
  0x77   : > { %1430 = vmatprep.mubr.f32.mxu1 %v9822_v62  ;;  %1589 = vmatprep.subr.mxu0 %v818_v63  ;;  %v9953_v63 = vld [vmem:[%s9606_s0 + $0x180] sm:$0xff] }
  0x78   : > { %1846 = vmatprep.subr.mxu1 %v946_v0  ;;  %1590 = vmatpush1.msra.mxu0 %v817_v1  ;;  %v9956_v0 = vld [vmem:[%s9606_s0 + $0x190] sm:$0xff]  ;;  %v9959_v1 = vld [vmem:[%s9606_s0 + $0x1a8] sm:$0xff] }
  0x79   : > { %1847 = vmatpush1.msra.mxu1 %v945_v2  ;;  %1174 = vmatmul.mubr.f32.gmra.mxu0 %v9841_v3  ;;  %v9962_v2 = vld [vmem:[%s9606_s0 + $0x1b8] sm:$0xff] }
  0x7a   : > { %1431 = vmatmul.mubr.f32.gmra.mxu1 %v9844_v4  ;;  %1179 = vmatprep.mubr.f32.mxu0 %v9847_v5 }
  0x7b   : > { %1436 = vmatprep.mubr.f32.mxu1 %v9850_v6  ;;  %1591 = vmatprep.subr.mxu0 %v814_v7  ;;  %v798_v7 = vld [vmem:[%s13631_s29 + $0x78] sm:$0xff] }
  0x7c   : > { %1848 = vmatprep.subr.mxu1 %v942_v8  ;;  %1592 = vmatpush1.msra.mxu0 %v813_v9  ;;  %v926_v8 = vld [vmem:[%s13631_s29 + $0x478] sm:$0xff]  ;;  %v797_v9 = vld [vmem:[%s13631_s29 + $0x70] sm:$0xff] }
  0x7d   : > { %1849 = vmatpush1.msra.mxu1 %v941_v10  ;;  %1180 = vmatmul.mubr.f32.gmra.mxu0 %v9869_v15  ;;  %v925_v10 = vld [vmem:[%s13631_s29 + $0x470] sm:$0xff] }
  0x7e   : > { %1437 = vmatmul.mubr.f32.gmra.mxu1 %v9872_v16  ;;  %1185 = vmatprep.mubr.f32.mxu0 %v9875_v17 }
  0x7f   : > { %1442 = vmatprep.mubr.f32.mxu1 %v9878_v18  ;;  %1593 = vmatprep.subr.mxu0 %v810_v23  ;;  %v9981_v23 = vld [vmem:[%s9606_s0 + $0x1a0] sm:$0xff] }
  0x80   : > { %1850 = vmatprep.subr.mxu1 %v938_v24  ;;  %1594 = vmatpush1.msra.mxu0 %v809_v25  ;;  %v9984_v24 = vld [vmem:[%s9606_s0 + $0x1b0] sm:$0xff]  ;;  %v9987_v25 = vld [vmem:[%s9606_s0 + $0x1c8] sm:$0xff] }
  0x81   : > { %1851 = vmatpush1.msra.mxu1 %v937_v26  ;;  %1186 = vmatmul.mubr.f32.gmra.mxu0 %v9897_v31  ;;  %v9990_v26 = vld [vmem:[%s9606_s0 + $0x1d8] sm:$0xff] }
  0x82   : > { %1443 = vmatmul.mubr.f32.gmra.mxu1 %v9900_v32  ;;  %1191 = vmatprep.mubr.f32.mxu0 %v9903_v33 }
  0x83   : > { %1448 = vmatprep.mubr.f32.mxu1 %v9906_v34  ;;  %1595 = vmatprep.subr.mxu0 %v806_v39  ;;  %v794_v39 = vld [vmem:[%s13631_s29 + $0x58] sm:$0xff] }
  0x84   : > { %1852 = vmatprep.subr.mxu1 %v934_v40  ;;  %1596 = vmatpush1.msra.mxu0 %v805_v41  ;;  %v922_v40 = vld [vmem:[%s13631_s29 + $0x458] sm:$0xff]  ;;  %v793_v41 = vld [vmem:[%s13631_s29 + $0x50] sm:$0xff] }
  0x85   : > { %1853 = vmatpush1.msra.mxu1 %v933_v42  ;;  %1192 = vmatmul.mubr.f32.gmra.mxu0 %v9925_v47  ;;  %v921_v42 = vld [vmem:[%s13631_s29 + $0x450] sm:$0xff] }
  0x86   : > { %1449 = vmatmul.mubr.f32.gmra.mxu1 %v9928_v48  ;;  %1197 = vmatprep.mubr.f32.mxu0 %v9931_v49 }
  0x87   : > { %1454 = vmatprep.mubr.f32.mxu1 %v9934_v50  ;;  %1597 = vmatprep.subr.mxu0 %v802_v55  ;;  %v10009_v55 = vld [vmem:[%s9606_s0 + $0x1c0] sm:$0xff] }
  0x88   : > { %1854 = vmatprep.subr.mxu1 %v930_v56  ;;  %1598 = vmatpush1.msra.mxu0 %v801_v57  ;;  %v10012_v56 = vld [vmem:[%s9606_s0 + $0x1d0] sm:$0xff]  ;;  %v10015_v57 = vld [vmem:[%s9606_s0 + $0x1e8] sm:$0xff] }
  0x89   : > { %1855 = vmatpush1.msra.mxu1 %v929_v58  ;;  %1198 = vmatmul.mubr.f32.gmra.mxu0 %v9953_v63  ;;  %13634 = vst [vmem:[#allocation3_spill] sm:$0xff] %v10012_v56  ;;  %13635 = vst [vmem:[#allocation4_spill] sm:$0xff] %v10015_v57  ;;  %v10018_v58 = vld [vmem:[%s9606_s0 + $0x1f8] sm:$0xff] }
  0x8a   : > { %1455 = vmatmul.mubr.f32.gmra.mxu1 %v9956_v0  ;;  %1203 = vmatprep.mubr.f32.mxu0 %v9959_v1  ;;  %13636 = vst [vmem:[#allocation5_spill] sm:$0xff] %v10018_v58 }
  0x8b   : > { %1460 = vmatprep.mubr.f32.mxu1 %v9962_v2  ;;  %1599 = vmatprep.subr.mxu0 %v798_v7  ;;  %v790_v7 = vld [vmem:[%s13631_s29 + $0x38] sm:$0xff] }
  0x8c   : > { %1856 = vmatprep.subr.mxu1 %v926_v8  ;;  %1600 = vmatpush1.msra.mxu0 %v797_v9  ;;  %v918_v8 = vld [vmem:[%s13631_s29 + $0x438] sm:$0xff]  ;;  %v789_v9 = vld [vmem:[%s13631_s29 + $0x30] sm:$0xff] }
  0x8d   : > { %1857 = vmatpush1.msra.mxu1 %v925_v10  ;;  %1204 = vmatmul.mubr.f32.gmra.mxu0 %v9981_v23  ;;  %v917_v10 = vld [vmem:[%s13631_s29 + $0x430] sm:$0xff] }
  0x8e   : > { %1461 = vmatmul.mubr.f32.gmra.mxu1 %v9984_v24  ;;  %1209 = vmatprep.mubr.f32.mxu0 %v9987_v25 }
  0x8f   : > { %1466 = vmatprep.mubr.f32.mxu1 %v9990_v26  ;;  %1601 = vmatprep.subr.mxu0 %v794_v39  ;;  %v10037_v39 = vld [vmem:[%s9606_s0 + $0x1e0] sm:$0xff] }
  0x90   : > { %1858 = vmatprep.subr.mxu1 %v922_v40  ;;  %1602 = vmatpush1.msra.mxu0 %v793_v41  ;;  %13637 = vst [vmem:[#allocation6_spill] sm:$0xff] %v10037_v39  ;;  %v10040_v40 = vld [vmem:[%s9606_s0 + $0x1f0] sm:$0xff]  ;;  %v10043_v41 = vld [vmem:[%s9606_s0 + $0x208] sm:$0xff] }
  0x91   : > { %1859 = vmatpush1.msra.mxu1 %v921_v42  ;;  %1210 = vmatmul.mubr.f32.gmra.mxu0 %v10009_v55  ;;  %13638 = vst [vmem:[#allocation7_spill] sm:$0xff] %v10040_v40  ;;  %13639 = vst [vmem:[#allocation8_spill] sm:$0xff] %v10043_v41  ;;  %v10046_v42 = vld [vmem:[%s9606_s0 + $0x218] sm:$0xff] }
  0x92   : > { %1467 = vmatmul.mubr.f32.gmra.mxu1 %v10012_v56  ;;  %1215 = vmatprep.mubr.f32.mxu0 %v10015_v57  ;;  %13640 = vst [vmem:[#allocation9_spill] sm:$0xff] %v10046_v42  ;;  %v914_v57 = vld [vmem:[%s13631_s29 + $0x418] sm:$0xff]  ;;  %v785_v56 = vld [vmem:[%s13631_s29 + $0x10] sm:$0xff] }
  0x93   : > { %1472 = vmatprep.mubr.f32.mxu1 %v10018_v58  ;;  %1603 = vmatprep.subr.mxu0 %v790_v7  ;;  %v786_v58 = vld [vmem:[%s13631_s29 + $0x18] sm:$0xff]  ;;  %v913_v7 = vld [vmem:[%s13631_s29 + $0x410] sm:$0xff] }
  0x94   : > { %1860 = vmatprep.subr.mxu1 %v918_v8  ;;  %1604 = vmatpush1.msra.mxu0 %v789_v9  ;;  %v10065_v8 = vld [vmem:[%s9606_s0 + $0x200] sm:$0xff]  ;;  %v10068_v9 = vld [vmem:[%s9606_s0 + $0x210] sm:$0xff] }
  0x95   : > { %1861 = vmatpush1.msra.mxu1 %v917_v10  ;;  %1216 = vmatmul.mubr.f32.gmra.mxu0 %v10037_v39  ;;  %13641 = vst [vmem:[#allocation10_spill] sm:$0xff] %v10065_v8  ;;  %13642 = vst [vmem:[#allocation11_spill] sm:$0xff] %v10068_v9  ;;  %v10071_v10 = vld [vmem:[%s9606_s0 + $0x228] sm:$0xff]  ;;  %v909_v39 = vld [vmem:[%s13631_s29 + $0x3f0] sm:$0xff] }
  0x96   : > { %1473 = vmatmul.mubr.f32.gmra.mxu1 %v10040_v40  ;;  %1221 = vmatprep.mubr.f32.mxu0 %v10043_v41  ;;  %13643 = vst [vmem:[#allocation12_spill] sm:$0xff] %v10071_v10  ;;  %v10074_v40 = vld [vmem:[%s9606_s0 + $0x238] sm:$0xff] }
  0x97   : > { %1478 = vmatprep.mubr.f32.mxu1 %v10046_v42  ;;  %13644 = vst [vmem:[#allocation13_spill] sm:$0xff] %v10074_v40  ;;  %1605 = vmatprep.subr.mxu0 %v786_v58  ;;  %v910_v42 = vld [vmem:[%s13631_s29 + $0x3f8] sm:$0xff]  ;;  %v10096_v58 = vld [vmem:[%s9606_s0 + $0x230] sm:$0xff] }
  0x98   : > { %1862 = vmatprep.subr.mxu1 %v914_v57  ;;  %1606 = vmatpush1.msra.mxu0 %v785_v56  ;;  %v1038_v41 = vld [vmem:[%s13631_s29 + $0x7f8] sm:$0xff]  ;;  %v1037_v56 = vld [vmem:[%s13631_s29 + $0x7f0] sm:$0xff]  ;;  %v10093_v57 = vld [vmem:[%s9606_s0 + $0x220] sm:$0xff]  ;;  %13646 = vst [vmem:[#allocation15_spill] sm:$0xff] %v10096_v58 }
  0x99   : > { %1863 = vmatpush1.msra.mxu1 %v913_v7  ;;  %1222 = vmatmul.mubr.f32.gmra.mxu0 %v10065_v8  ;;  %13645 = vst [vmem:[#allocation14_spill] sm:$0xff] %v10093_v57  ;;  %v10099_v7 = vld [vmem:[%s9606_s0 + $0x248] sm:$0xff]  ;;  %v905_v8 = vld [vmem:[%s13631_s29 + $0x3d0] sm:$0xff] }
  0x9a   : > { %1479 = vmatmul.mubr.f32.gmra.mxu1 %v10068_v9  ;;  %1227 = vmatprep.mubr.f32.mxu0 %v10071_v10  ;;  %13647 = vst [vmem:[#allocation16_spill] sm:$0xff] %v10099_v7  ;;  %v10102_v9 = vld [vmem:[%s9606_s0 + $0x258] sm:$0xff] }
  0x9b   : > { %1484 = vmatprep.mubr.f32.mxu1 %v10074_v40  ;;  %13648 = vst [vmem:[#allocation17_spill] sm:$0xff] %v10102_v9  ;;  %1607 = vmatprep.subr.mxu0 %v910_v42  ;;  %v906_v40 = vld [vmem:[%s13631_s29 + $0x3d8] sm:$0xff]  ;;  %v10124_v42 = vld [vmem:[%s9606_s0 + $0x250] sm:$0xff] }
  0x9c   : > { %1864 = vmatprep.subr.mxu1 %v1038_v41  ;;  %1608 = vmatpush2.msra.mxu0 %v909_v39  ;;  %v1034_v10 = vld [vmem:[%s13631_s29 + $0x7d8] sm:$0xff]  ;;  %v1033_v39 = vld [vmem:[%s13631_s29 + $0x7d0] sm:$0xff]  ;;  %v10121_v41 = vld [vmem:[%s9606_s0 + $0x240] sm:$0xff]  ;;  %13650 = vst [vmem:[#allocation19_spill] sm:$0xff] %v10124_v42 }
  0x9d   : > { %1865 = vmatpush2.msra.mxu1 %v1037_v56  ;;  %1228 = vmatmul.mubr.f32.gmra.mxu0 %v10093_v57  ;;  %13649 = vst [vmem:[#allocation18_spill] sm:$0xff] %v10121_v41  ;;  %v10127_v56 = vld [vmem:[%s9606_s0 + $0x268] sm:$0xff]  ;;  %v901_v57 = vld [vmem:[%s13631_s29 + $0x3b0] sm:$0xff] }
  0x9e   : > { %1485 = vmatmul.mubr.f32.gmra.mxu1 %v10096_v58  ;;  %1233 = vmatprep.mubr.f32.mxu0 %v10099_v7  ;;  %13651 = vst [vmem:[#allocation20_spill] sm:$0xff] %v10127_v56  ;;  %v10130_v58 = vld [vmem:[%s9606_s0 + $0x278] sm:$0xff] }
  0x9f   : > { %1490 = vmatprep.mubr.f32.mxu1 %v10102_v9  ;;  %13652 = vst [vmem:[#allocation21_spill] sm:$0xff] %v10130_v58  ;;  %1609 = vmatprep.subr.mxu0 %v906_v40  ;;  %v902_v9 = vld [vmem:[%s13631_s29 + $0x3b8] sm:$0xff]  ;;  %v1029_v40 = vld [vmem:[%s13631_s29 + $0x7b0] sm:$0xff] }
  0xa0   : > { %1866 = vmatprep.subr.mxu1 %v1034_v10  ;;  %1610 = vmatpush2.msra.mxu0 %v905_v8  ;;  %v1030_v7 = vld [vmem:[%s13631_s29 + $0x7b8] sm:$0xff]  ;;  %v10149_v8 = vld [vmem:[%s9606_s0 + $0x260] sm:$0xff]  ;;  %v10152_v10 = vld [vmem:[%s9606_s0 + $0x270] sm:$0xff] }
  0xa1   : > { %1867 = vmatpush2.msra.mxu1 %v1033_v39  ;;  %1234 = vmatmul.mubr.f32.gmra.mxu0 %v10121_v41  ;;  %13653 = vst [vmem:[#allocation22_spill] sm:$0xff] %v10149_v8  ;;  %13654 = vst [vmem:[#allocation23_spill] sm:$0xff] %v10152_v10  ;;  %v10155_v39 = vld [vmem:[%s9606_s0 + $0x288] sm:$0xff]  ;;  %v897_v41 = vld [vmem:[%s13631_s29 + $0x390] sm:$0xff] }
  0xa2   : > { %1491 = vmatmul.mubr.f32.gmra.mxu1 %v10124_v42  ;;  %1239 = vmatprep.mubr.f32.mxu0 %v10127_v56  ;;  %13655 = vst [vmem:[#allocation24_spill] sm:$0xff] %v10155_v39  ;;  %v10158_v42 = vld [vmem:[%s9606_s0 + $0x298] sm:$0xff] }
  0xa3   : > { %1496 = vmatprep.mubr.f32.mxu1 %v10130_v58  ;;  %13656 = vst [vmem:[#allocation25_spill] sm:$0xff] %v10158_v42  ;;  %1611 = vmatprep.subr.mxu0 %v902_v9  ;;  %v898_v58 = vld [vmem:[%s13631_s29 + $0x398] sm:$0xff]  ;;  %v1025_v9 = vld [vmem:[%s13631_s29 + $0x790] sm:$0xff] }
  0xa4   : > { %1868 = vmatprep.subr.mxu1 %v1030_v7  ;;  %1612 = vmatpush2.msra.mxu0 %v901_v57  ;;  %v1026_v56 = vld [vmem:[%s13631_s29 + $0x798] sm:$0xff]  ;;  %v10177_v57 = vld [vmem:[%s9606_s0 + $0x280] sm:$0xff]  ;;  %v10180_v7 = vld [vmem:[%s9606_s0 + $0x290] sm:$0xff] }
  0xa5   : > { %1869 = vmatpush2.msra.mxu1 %v1029_v40  ;;  %1240 = vmatmul.mubr.f32.gmra.mxu0 %v10149_v8  ;;  %13657 = vst [vmem:[#allocation26_spill] sm:$0xff] %v10177_v57  ;;  %13658 = vst [vmem:[#allocation27_spill] sm:$0xff] %v10180_v7  ;;  %v10183_v40 = vld [vmem:[%s9606_s0 + $0x2a8] sm:$0xff]  ;;  %v893_v8 = vld [vmem:[%s13631_s29 + $0x370] sm:$0xff] }
  0xa6   : > { %1497 = vmatmul.mubr.f32.gmra.mxu1 %v10152_v10  ;;  %1245 = vmatprep.mubr.f32.mxu0 %v10155_v39  ;;  %13659 = vst [vmem:[#allocation28_spill] sm:$0xff] %v10183_v40  ;;  %v10186_v10 = vld [vmem:[%s9606_s0 + $0x2b8] sm:$0xff] }
  0xa7   : > { %1502 = vmatprep.mubr.f32.mxu1 %v10158_v42  ;;  %13660 = vst [vmem:[#allocation29_spill] sm:$0xff] %v10186_v10  ;;  %1613 = vmatprep.subr.mxu0 %v898_v58  ;;  %v894_v42 = vld [vmem:[%s13631_s29 + $0x378] sm:$0xff]  ;;  %v1021_v58 = vld [vmem:[%s13631_s29 + $0x770] sm:$0xff] }
  0xa8   : > { %1870 = vmatprep.subr.mxu1 %v1026_v56  ;;  %1614 = vmatpush2.msra.mxu0 %v897_v41  ;;  %v1022_v39 = vld [vmem:[%s13631_s29 + $0x778] sm:$0xff]  ;;  %v10205_v41 = vld [vmem:[%s9606_s0 + $0x2a0] sm:$0xff]  ;;  %v10208_v56 = vld [vmem:[%s9606_s0 + $0x2b0] sm:$0xff] }
  0xa9   : > { %1871 = vmatpush2.msra.mxu1 %v1025_v9  ;;  %1246 = vmatmul.mubr.f32.gmra.mxu0 %v10177_v57  ;;  %13661 = vst [vmem:[#allocation30_spill] sm:$0xff] %v10205_v41  ;;  %13662 = vst [vmem:[#allocation31_spill] sm:$0xff] %v10208_v56  ;;  %v10211_v9 = vld [vmem:[%s9606_s0 + $0x2c8] sm:$0xff]  ;;  %v889_v57 = vld [vmem:[%s13631_s29 + $0x350] sm:$0xff] }
  0xaa   : > { %1503 = vmatmul.mubr.f32.gmra.mxu1 %v10180_v7  ;;  %1251 = vmatprep.mubr.f32.mxu0 %v10183_v40  ;;  %13663 = vst [vmem:[#allocation32_spill] sm:$0xff] %v10211_v9  ;;  %v10214_v7 = vld [vmem:[%s9606_s0 + $0x2d8] sm:$0xff] }
  0xab   : > { %1508 = vmatprep.mubr.f32.mxu1 %v10186_v10  ;;  %13664 = vst [vmem:[#allocation33_spill] sm:$0xff] %v10214_v7  ;;  %1615 = vmatprep.subr.mxu0 %v894_v42  ;;  %v890_v10 = vld [vmem:[%s13631_s29 + $0x358] sm:$0xff]  ;;  %v1017_v42 = vld [vmem:[%s13631_s29 + $0x750] sm:$0xff] }
  0xac   : > { %1872 = vmatprep.subr.mxu1 %v1022_v39  ;;  %1616 = vmatpush2.msra.mxu0 %v893_v8  ;;  %v1018_v40 = vld [vmem:[%s13631_s29 + $0x758] sm:$0xff]  ;;  %v10233_v8 = vld [vmem:[%s9606_s0 + $0x2c0] sm:$0xff]  ;;  %v10236_v39 = vld [vmem:[%s9606_s0 + $0x2d0] sm:$0xff] }
  0xad   : > { %1873 = vmatpush2.msra.mxu1 %v1021_v58  ;;  %1252 = vmatmul.mubr.f32.gmra.mxu0 %v10205_v41  ;;  %13665 = vst [vmem:[#allocation34_spill] sm:$0xff] %v10233_v8  ;;  %13666 = vst [vmem:[#allocation35_spill] sm:$0xff] %v10236_v39  ;;  %v10239_v58 = vld [vmem:[%s9606_s0 + $0x2e8] sm:$0xff]  ;;  %v885_v41 = vld [vmem:[%s13631_s29 + $0x330] sm:$0xff] }
  0xae   : > { %1509 = vmatmul.mubr.f32.gmra.mxu1 %v10208_v56  ;;  %1257 = vmatprep.mubr.f32.mxu0 %v10211_v9  ;;  %13667 = vst [vmem:[#allocation36_spill] sm:$0xff] %v10239_v58  ;;  %v10242_v56 = vld [vmem:[%s9606_s0 + $0x2f8] sm:$0xff] }
  0xaf   : > { %1514 = vmatprep.mubr.f32.mxu1 %v10214_v7  ;;  %13668 = vst [vmem:[#allocation37_spill] sm:$0xff] %v10242_v56  ;;  %1617 = vmatprep.subr.mxu0 %v890_v10  ;;  %v886_v7 = vld [vmem:[%s13631_s29 + $0x338] sm:$0xff]  ;;  %v1013_v10 = vld [vmem:[%s13631_s29 + $0x730] sm:$0xff] }
  0xb0   : > { %1874 = vmatprep.subr.mxu1 %v1018_v40  ;;  %1618 = vmatpush2.msra.mxu0 %v889_v57  ;;  %v1014_v9 = vld [vmem:[%s13631_s29 + $0x738] sm:$0xff]  ;;  %v10261_v57 = vld [vmem:[%s9606_s0 + $0x2e0] sm:$0xff]  ;;  %v10264_v40 = vld [vmem:[%s9606_s0 + $0x2f0] sm:$0xff] }
  0xb1   : > { %1875 = vmatpush2.msra.mxu1 %v1017_v42  ;;  %1258 = vmatmul.mubr.f32.gmra.mxu0 %v10233_v8  ;;  %13669 = vst [vmem:[#allocation38_spill] sm:$0xff] %v10261_v57  ;;  %13670 = vst [vmem:[#allocation39_spill] sm:$0xff] %v10264_v40  ;;  %v10267_v42 = vld [vmem:[%s9606_s0 + $0x308] sm:$0xff]  ;;  %v881_v8 = vld [vmem:[%s13631_s29 + $0x310] sm:$0xff] }
  0xb2   : > { %1515 = vmatmul.mubr.f32.gmra.mxu1 %v10236_v39  ;;  %1263 = vmatprep.mubr.f32.mxu0 %v10239_v58  ;;  %13671 = vst [vmem:[#allocation40_spill] sm:$0xff] %v10267_v42  ;;  %v10270_v39 = vld [vmem:[%s9606_s0 + $0x318] sm:$0xff] }
  0xb3   : > { %1520 = vmatprep.mubr.f32.mxu1 %v10242_v56  ;;  %13672 = vst [vmem:[#allocation41_spill] sm:$0xff] %v10270_v39  ;;  %1619 = vmatprep.subr.mxu0 %v886_v7  ;;  %v882_v56 = vld [vmem:[%s13631_s29 + $0x318] sm:$0xff]  ;;  %v1009_v7 = vld [vmem:[%s13631_s29 + $0x710] sm:$0xff] }
  0xb4   : > { %1876 = vmatprep.subr.mxu1 %v1014_v9  ;;  %1620 = vmatpush2.msra.mxu0 %v885_v41  ;;  %v1010_v58 = vld [vmem:[%s13631_s29 + $0x718] sm:$0xff]  ;;  %v10289_v41 = vld [vmem:[%s9606_s0 + $0x300] sm:$0xff]  ;;  %v10292_v9 = vld [vmem:[%s9606_s0 + $0x310] sm:$0xff] }
  0xb5   : > { %1877 = vmatpush2.msra.mxu1 %v1013_v10  ;;  %1264 = vmatmul.mubr.f32.gmra.mxu0 %v10261_v57  ;;  %13673 = vst [vmem:[#allocation42_spill] sm:$0xff] %v10289_v41  ;;  %13674 = vst [vmem:[#allocation43_spill] sm:$0xff] %v10292_v9  ;;  %v10295_v10 = vld [vmem:[%s9606_s0 + $0x328] sm:$0xff]  ;;  %v877_v57 = vld [vmem:[%s13631_s29 + $0x2f0] sm:$0xff] }
  0xb6   : > { %1521 = vmatmul.mubr.f32.gmra.mxu1 %v10264_v40  ;;  %1269 = vmatprep.mubr.f32.mxu0 %v10267_v42  ;;  %13675 = vst [vmem:[#allocation44_spill] sm:$0xff] %v10295_v10  ;;  %v10298_v40 = vld [vmem:[%s9606_s0 + $0x338] sm:$0xff] }
  0xb7   : > { %1526 = vmatprep.mubr.f32.mxu1 %v10270_v39  ;;  %13676 = vst [vmem:[#allocation45_spill] sm:$0xff] %v10298_v40  ;;  %1621 = vmatprep.subr.mxu0 %v882_v56  ;;  %v878_v39 = vld [vmem:[%s13631_s29 + $0x2f8] sm:$0xff]  ;;  %v1005_v56 = vld [vmem:[%s13631_s29 + $0x6f0] sm:$0xff] }
  0xb8   : > { %1878 = vmatprep.subr.mxu1 %v1010_v58  ;;  %1622 = vmatpush2.msra.mxu0 %v881_v8  ;;  %v1006_v42 = vld [vmem:[%s13631_s29 + $0x6f8] sm:$0xff]  ;;  %v10317_v8 = vld [vmem:[%s9606_s0 + $0x320] sm:$0xff]  ;;  %v10320_v58 = vld [vmem:[%s9606_s0 + $0x330] sm:$0xff] }
  0xb9   : > { %1879 = vmatpush2.msra.mxu1 %v1009_v7  ;;  %1270 = vmatmul.mubr.f32.gmra.mxu0 %v10289_v41  ;;  %13677 = vst [vmem:[#allocation46_spill] sm:$0xff] %v10317_v8  ;;  %13678 = vst [vmem:[#allocation47_spill] sm:$0xff] %v10320_v58  ;;  %v10323_v7 = vld [vmem:[%s9606_s0 + $0x348] sm:$0xff]  ;;  %v873_v41 = vld [vmem:[%s13631_s29 + $0x2d0] sm:$0xff] }
  0xba   : > { %1527 = vmatmul.mubr.f32.gmra.mxu1 %v10292_v9  ;;  %1275 = vmatprep.mubr.f32.mxu0 %v10295_v10  ;;  %13679 = vst [vmem:[#allocation48_spill] sm:$0xff] %v10323_v7  ;;  %v10326_v9 = vld [vmem:[%s9606_s0 + $0x358] sm:$0xff] }
  0xbb   : > { %1532 = vmatprep.mubr.f32.mxu1 %v10298_v40  ;;  %13680 = vst [vmem:[#allocation49_spill] sm:$0xff] %v10326_v9  ;;  %1623 = vmatprep.subr.mxu0 %v878_v39  ;;  %v874_v40 = vld [vmem:[%s13631_s29 + $0x2d8] sm:$0xff]  ;;  %v1001_v39 = vld [vmem:[%s13631_s29 + $0x6d0] sm:$0xff] }
  0xbc   : > { %1880 = vmatprep.subr.mxu1 %v1006_v42  ;;  %1624 = vmatpush2.msra.mxu0 %v877_v57  ;;  %v1002_v10 = vld [vmem:[%s13631_s29 + $0x6d8] sm:$0xff]  ;;  %v10345_v57 = vld [vmem:[%s9606_s0 + $0x340] sm:$0xff]  ;;  %v10348_v42 = vld [vmem:[%s9606_s0 + $0x350] sm:$0xff] }
  0xbd   : > { %1881 = vmatpush2.msra.mxu1 %v1005_v56  ;;  %1276 = vmatmul.mubr.f32.gmra.mxu0 %v10317_v8  ;;  %13681 = vst [vmem:[#allocation50_spill] sm:$0xff] %v10345_v57  ;;  %13682 = vst [vmem:[#allocation51_spill] sm:$0xff] %v10348_v42  ;;  %v10351_v56 = vld [vmem:[%s9606_s0 + $0x368] sm:$0xff]  ;;  %v869_v8 = vld [vmem:[%s13631_s29 + $0x2b0] sm:$0xff] }
  0xbe   : > { %1533 = vmatmul.mubr.f32.gmra.mxu1 %v10320_v58  ;;  %1281 = vmatprep.mubr.f32.mxu0 %v10323_v7  ;;  %13683 = vst [vmem:[#allocation52_spill] sm:$0xff] %v10351_v56  ;;  %v10354_v58 = vld [vmem:[%s9606_s0 + $0x378] sm:$0xff] }
  0xbf   : > { %1538 = vmatprep.mubr.f32.mxu1 %v10326_v9  ;;  %13684 = vst [vmem:[#allocation53_spill] sm:$0xff] %v10354_v58  ;;  %1625 = vmatprep.subr.mxu0 %v874_v40  ;;  %v870_v9 = vld [vmem:[%s13631_s29 + $0x2b8] sm:$0xff]  ;;  %v997_v40 = vld [vmem:[%s13631_s29 + $0x6b0] sm:$0xff] }
  0xc0   : > { %1882 = vmatprep.subr.mxu1 %v1002_v10  ;;  %1626 = vmatpush2.msra.mxu0 %v873_v41  ;;  %v998_v7 = vld [vmem:[%s13631_s29 + $0x6b8] sm:$0xff]  ;;  %v10373_v41 = vld [vmem:[%s9606_s0 + $0x360] sm:$0xff]  ;;  %v10376_v10 = vld [vmem:[%s9606_s0 + $0x370] sm:$0xff] }
  0xc1   : > { %1883 = vmatpush2.msra.mxu1 %v1001_v39  ;;  %1282 = vmatmul.mubr.f32.gmra.mxu0 %v10345_v57  ;;  %13685 = vst [vmem:[#allocation54_spill] sm:$0xff] %v10373_v41  ;;  %13686 = vst [vmem:[#allocation55_spill] sm:$0xff] %v10376_v10  ;;  %v10379_v39 = vld [vmem:[%s9606_s0 + $0x388] sm:$0xff]  ;;  %v865_v57 = vld [vmem:[%s13631_s29 + $0x290] sm:$0xff] }
  0xc2   : > { %1539 = vmatmul.mubr.f32.gmra.mxu1 %v10348_v42  ;;  %1287 = vmatprep.mubr.f32.mxu0 %v10351_v56  ;;  %13687 = vst [vmem:[#allocation56_spill] sm:$0xff] %v10379_v39  ;;  %v10382_v42 = vld [vmem:[%s9606_s0 + $0x398] sm:$0xff] }
  0xc3   : > { %1544 = vmatprep.mubr.f32.mxu1 %v10354_v58  ;;  %13688 = vst [vmem:[#allocation57_spill] sm:$0xff] %v10382_v42  ;;  %1627 = vmatprep.subr.mxu0 %v870_v9  ;;  %v866_v58 = vld [vmem:[%s13631_s29 + $0x298] sm:$0xff]  ;;  %v993_v9 = vld [vmem:[%s13631_s29 + $0x690] sm:$0xff] }
  0xc4   : > { %1884 = vmatprep.subr.mxu1 %v998_v7  ;;  %1628 = vmatpush2.msra.mxu0 %v869_v8  ;;  %v994_v56 = vld [vmem:[%s13631_s29 + $0x698] sm:$0xff]  ;;  %v10401_v8 = vld [vmem:[%s9606_s0 + $0x380] sm:$0xff]  ;;  %v10404_v7 = vld [vmem:[%s9606_s0 + $0x390] sm:$0xff] }
  0xc5   : > { %1885 = vmatpush2.msra.mxu1 %v997_v40  ;;  %1288 = vmatmul.mubr.f32.gmra.mxu0 %v10373_v41  ;;  %13689 = vst [vmem:[#allocation58_spill] sm:$0xff] %v10401_v8  ;;  %13690 = vst [vmem:[#allocation59_spill] sm:$0xff] %v10404_v7  ;;  %v10407_v40 = vld [vmem:[%s9606_s0 + $0x3a8] sm:$0xff]  ;;  %v861_v41 = vld [vmem:[%s13631_s29 + $0x270] sm:$0xff] }
  0xc6   : > { %1545 = vmatmul.mubr.f32.gmra.mxu1 %v10376_v10  ;;  %1293 = vmatprep.mubr.f32.mxu0 %v10379_v39  ;;  %13691 = vst [vmem:[#allocation60_spill] sm:$0xff] %v10407_v40  ;;  %v10410_v10 = vld [vmem:[%s9606_s0 + $0x3b8] sm:$0xff] }
  0xc7   : > { %1550 = vmatprep.mubr.f32.mxu1 %v10382_v42  ;;  %13692 = vst [vmem:[#allocation61_spill] sm:$0xff] %v10410_v10  ;;  %1629 = vmatprep.subr.mxu0 %v866_v58  ;;  %v862_v42 = vld [vmem:[%s13631_s29 + $0x278] sm:$0xff]  ;;  %v989_v58 = vld [vmem:[%s13631_s29 + $0x670] sm:$0xff] }
  0xc8   : > { %1886 = vmatprep.subr.mxu1 %v994_v56  ;;  %1630 = vmatpush2.msra.mxu0 %v865_v57  ;;  %v990_v39 = vld [vmem:[%s13631_s29 + $0x678] sm:$0xff]  ;;  %v10429_v57 = vld [vmem:[%s9606_s0 + $0x3a0] sm:$0xff]  ;;  %v10432_v56 = vld [vmem:[%s9606_s0 + $0x3b0] sm:$0xff] }
  0xc9   : > { %1887 = vmatpush2.msra.mxu1 %v993_v9  ;;  %1294 = vmatmul.mubr.f32.gmra.mxu0 %v10401_v8  ;;  %13693 = vst [vmem:[#allocation62_spill] sm:$0xff] %v10429_v57  ;;  %13694 = vst [vmem:[#allocation63_spill] sm:$0xff] %v10432_v56  ;;  %v10435_v9 = vld [vmem:[%s9606_s0 + $0x3c8] sm:$0xff]  ;;  %v9091_v8 = vld [vmem:[%s9606_s0 + $0x38] sm:$0xff] }
  0xca   : > { %1551 = vmatmul.mubr.f32.gmra.mxu1 %v10404_v7  ;;  %1299 = vmatprep.mubr.f32.mxu0 %v10407_v40  ;;  %13695 = vst [vmem:[#allocation64_spill] sm:$0xff] %v10435_v9  ;;  %v10438_v7 = vld [vmem:[%s9606_s0 + $0x3d8] sm:$0xff] }
  0xcb   : > { %1556 = vmatprep.mubr.f32.mxu1 %v10410_v10  ;;  %13696 = vst [vmem:[#allocation65_spill] sm:$0xff] %v10438_v7  ;;  %1631 = vmatprep.subr.mxu0 %v862_v42  ;;  %v858_v10 = vld [vmem:[%s13631_s29 + $0x258] sm:$0xff]  ;;  %v857_v42 = vld [vmem:[%s13631_s29 + $0x250] sm:$0xff] }
  0xcc   : > { %1888 = vmatprep.subr.mxu1 %v990_v39  ;;  %1632 = vmatpush2.msra.mxu0 %v861_v41  ;;  %v986_v40 = vld [vmem:[%s13631_s29 + $0x658] sm:$0xff]  ;;  %v985_v41 = vld [vmem:[%s13631_s29 + $0x650] sm:$0xff]  ;;  %v10457_v39 = vld [vmem:[%s9606_s0 + $0x3c0] sm:$0xff] }
  0xcd   : > { %1889 = vmatpush2.msra.mxu1 %v989_v58  ;;  %1300 = vmatmul.mubr.f32.gmra.mxu0 %v10429_v57  ;;  %13697 = vst [vmem:[#allocation66_spill] sm:$0xff] %v10457_v39  ;;  %v10460_v58 = vld [vmem:[%s9606_s0 + $0x3d0] sm:$0xff]  ;;  %v10466_v57 = vld [vmem:[%s9606_s0 + $0x3f8] sm:$0xff] }
  0xce   : > { %1557 = vmatmul.mubr.f32.gmra.mxu1 %v10432_v56  ;;  %1305 = vmatprep.mubr.f32.mxu0 %v10435_v9  ;;  %13698 = vst [vmem:[#allocation67_spill] sm:$0xff] %v10460_v58  ;;  %v10463_v56 = vld [vmem:[%s9606_s0 + $0x3e8] sm:$0xff]  ;;  %13700 = vst [vmem:[#allocation69_spill] sm:$0xff] %v10466_v57  ;;  %v854_v9 = vld [vmem:[%s13631_s29 + $0x238] sm:$0xff] }
  0xcf   : > { %1562 = vmatprep.mubr.f32.mxu1 %v10438_v7  ;;  %1633 = vmatprep.subr.mxu0 %v858_v10  ;;  %13699 = vst [vmem:[#allocation68_spill] sm:$0xff] %v10463_v56  ;;  %v982_v7 = vld [vmem:[%s13631_s29 + $0x638] sm:$0xff]  ;;  %v853_v10 = vld [vmem:[%s13631_s29 + $0x230] sm:$0xff] }
  0xd0   : > { %1890 = vmatprep.subr.mxu1 %v986_v40  ;;  %1634 = vmatpush2.msra.mxu0 %v857_v42  ;;  %v981_v40 = vld [vmem:[%s13631_s29 + $0x630] sm:$0xff]  ;;  %v10485_v42 = vld [vmem:[%s9606_s0 + $0x3e0] sm:$0xff] }
  0xd1   : > { %1891 = vmatpush2.msra.mxu1 %v985_v41  ;;  %1306 = vmatmul.mubr.f32.gmra.mxu0 %v10457_v39  ;;  %13701 = vst [vmem:[#allocation70_spill] sm:$0xff] %v10485_v42  ;;  %v10488_v41 = vld [vmem:[%s9606_s0 + $0x3f0] sm:$0xff]  ;;  %v978_v39 = vld [vmem:[%s13631_s29 + $0x618] sm:$0xff] }
  0xd2   : > { %1563 = vmatmul.mubr.f32.gmra.mxu1 %v10460_v58  ;;  %1311 = vmatprep.mubr.f32.mxu0 %v10463_v56  ;;  %13702 = vst [vmem:[#allocation71_spill] sm:$0xff] %v10488_v41  ;;  %v850_v58 = vld [vmem:[%s13631_s29 + $0x218] sm:$0xff]  ;;  %v9089_v56 = vld [vmem:[%s9606_s0 + $0x10] sm:$0xff] }
  0xd3   : > { %1568 = vmatprep.mubr.f32.mxu1 %v10466_v57  ;;  %1635 = vmatprep.subr.mxu0 %v854_v9  ;;  %v849_v57 = vld [vmem:[%s13631_s29 + $0x210] sm:$0xff]  ;;  %v9086_v9 = vld [vmem:[%s9606_s0 + $0x8] sm:$0xff] }
  0xd4   : > { %1892 = vmatprep.subr.mxu1 %v982_v7  ;;  %1636 = vmatpush2.msra.mxu0 %v853_v10  ;;  %v977_v7 = vld [vmem:[%s13631_s29 + $0x610] sm:$0xff]  ;;  %v9087_v10 = vld [vmem:[%s9606_s0 + $0x18] sm:$0xff] }
  0xd5   : > { %1893 = vmatpush2.msra.mxu1 %v981_v40  ;;  %1312 = vmatmul.mubr.f32.gmra.mxu0 %v10485_v42  ;;  %v9088_v40 = vld [vmem:[%s9606_s0] sm:$0xff]  ;;  %v9090_v42 = vld [vmem:[%s9606_s0 + $0x28] sm:$0xff] }
  0xd6   : > { %1569 = vmatmul.mubr.f32.gmra.mxu1 %v10488_v41  ;;  %1637 = vmatprep.subr.mxu0 %v850_v58  ;;  %v2532_v41 = vld [vmem:[%s13703_s3 + $0x78] sm:$0xff]  ;;  %v13610_v58 = vmov 0.0  }
  0xd7   : > { %1894 = vmatprep.subr.mxu1 %v978_v39  ;;  %1638 = vmatpush2.msra.mxu0 %v849_v57  ;;  %v2531_v57 = vld [vmem:[%s13703_s3 + $0x70] sm:$0xff] }
  0xd8   : > { %1639 = vmatprep.mubr.f32.mxu0 %v9086_v9  ;;  %1895 = vmatpush2.msra.mxu1 %v977_v7  ;;  %v2546_v7 = vld [vmem:[%s13703_s3 + $0xe8] sm:$0xff] }
  0xd9   : > { %1896 = vmatprep.mubr.f32.mxu1 %v9087_v10  ;;  %1640 = vmatmul.mubr.f32.vlgmr.msra.gmra.mxu0 %v9088_v40  ;;  %v13721_v9 = vld [vmem:[#allocation20_spill] sm:$0xff]  ;;  %v13722_v10 = vld [vmem:[#allocation21_spill] sm:$0xff] }
  0xda   : > { %1897 = vmatmul.mubr.f32.vlgmr.msra.gmra.mxu1 %v9089_v56  ;;  %1645 = vmatprep.mubr.f32.mxu0 %v9090_v42  ;;  %v13719_v42 = vld [vmem:[#allocation18_spill] sm:$0xff] }
  0xdb   : > { %1902 = vmatprep.mubr.f32.mxu1 %v9091_v8  ;;  %2588 = vmatprep.subr.mxu0 %v13610_v58  ;;  %v2550_v8 = vld [vmem:[%s13703_s3 + $0x108] sm:$0xff] }
  0xdc   : > { %2813 = vmatprep.subr.mxu1 %v13610_v58  ;;  %2589 = vmatpush1.msra.mxu0 %v2532_v41  ;;  %v13720_v41 = vld [vmem:[#allocation19_spill] sm:$0xff] }
  0xdd   : > { %1646 = vmatmul.mubr.f32.gmra.mxu0 %v9645_v11  ;;  %2590 = vmatprep.subr.mxu0 %v13610_v58  ;;  %v2530_v11 = vld [vmem:[%s13703_s3 + $0x68] sm:$0xff] }
  0xde   : > { %1903 = vmatmul.mubr.f32.gmra.mxu1 %v9648_v12  ;;  %1651 = vmatprep.mubr.f32.mxu0 %v9651_v13  ;;  %v2529_v12 = vld [vmem:[%s13703_s3 + $0x60] sm:$0xff]  ;;  %v2564_v13 = vld [vmem:[%s13703_s3 + $0x178] sm:$0xff] }
  0xdf   : > { %1908 = vmatprep.mubr.f32.mxu1 %v9654_v14  ;;  %2591 = vmatpush1.msra.mxu0 %v2531_v57  ;;  %v2528_v14 = vld [vmem:[%s13703_s3 + $0x58] sm:$0xff] }
  0xe0   : > { %2592 = vmatprep.subr.mxu0 %v13610_v58  ;;  %2814 = vmatpush1.msra.mxu1 %v2564_v13  ;;  %v13723_v13 = vld [vmem:[#allocation22_spill] sm:$0xff] }
  0xe1   : > { %1652 = vmatmul.mubr.f32.gmra.mxu0 %v9673_v19  ;;  %2815 = vmatprep.subr.mxu1 %v13610_v58  ;;  %v2563_v19 = vld [vmem:[%s13703_s3 + $0x170] sm:$0xff] }
  0xe2   : > { %1909 = vmatmul.mubr.f32.gmra.mxu1 %v9676_v20  ;;  %1657 = vmatprep.mubr.f32.mxu0 %v9679_v21  ;;  %v2527_v20 = vld [vmem:[%s13703_s3 + $0x50] sm:$0xff]  ;;  %v2562_v21 = vld [vmem:[%s13703_s3 + $0x168] sm:$0xff] }
  0xe3   : > { %1914 = vmatprep.mubr.f32.mxu1 %v9682_v22  ;;  %2593 = vmatpush1.msra.mxu0 %v2530_v11  ;;  %v2526_v22 = vld [vmem:[%s13703_s3 + $0x48] sm:$0xff] }
  0xe4   : > { %2594 = vmatprep.subr.mxu0 %v13610_v58  ;;  %2816 = vmatpush1.msra.mxu1 %v2563_v19  ;;  %v2545_v19 = vld [vmem:[%s13703_s3 + $0xe0] sm:$0xff] }
  0xe5   : > { %1658 = vmatmul.mubr.f32.gmra.mxu0 %v9701_v27  ;;  %2817 = vmatprep.subr.mxu1 %v13610_v58  ;;  %v2561_v27 = vld [vmem:[%s13703_s3 + $0x160] sm:$0xff] }
  0xe6   : > { %1915 = vmatmul.mubr.f32.gmra.mxu1 %v9704_v28  ;;  %1663 = vmatprep.mubr.f32.mxu0 %v9707_v29  ;;  %v2525_v28 = vld [vmem:[%s13703_s3 + $0x40] sm:$0xff]  ;;  %v2560_v29 = vld [vmem:[%s13703_s3 + $0x158] sm:$0xff] }
  0xe7   : > { %1920 = vmatprep.mubr.f32.mxu1 %v9710_v30  ;;  %2595 = vmatpush1.msra.mxu0 %v2529_v12  ;;  %v2524_v30 = vld [vmem:[%s13703_s3 + $0x38] sm:$0xff] }
  0xe8   : > { %2596 = vmatprep.subr.mxu0 %v13610_v58  ;;  %2818 = vmatpush1.msra.mxu1 %v2562_v21  ;;  %v13725_v21 = vld [vmem:[#allocation24_spill] sm:$0xff] }
  0xe9   : > { %1664 = vmatmul.mubr.f32.gmra.mxu0 %v9729_v35  ;;  %2819 = vmatprep.subr.mxu1 %v13610_v58  ;;  %v2559_v35 = vld [vmem:[%s13703_s3 + $0x150] sm:$0xff] }
  0xea   : > { %1921 = vmatmul.mubr.f32.gmra.mxu1 %v9732_v36  ;;  %1669 = vmatprep.mubr.f32.mxu0 %v9735_v37  ;;  %v2523_v36 = vld [vmem:[%s13703_s3 + $0x30] sm:$0xff]  ;;  %v2558_v37 = vld [vmem:[%s13703_s3 + $0x148] sm:$0xff] }
  0xeb   : > { %1926 = vmatprep.mubr.f32.mxu1 %v9738_v38  ;;  %2597 = vmatpush1.msra.mxu0 %v2528_v14  ;;  %v2522_v38 = vld [vmem:[%s13703_s3 + $0x28] sm:$0xff] }
  0xec   : > { %2598 = vmatprep.subr.mxu0 %v13610_v58  ;;  %2820 = vmatpush1.msra.mxu1 %v2561_v27  ;;  %v13724_v14 = vld [vmem:[#allocation23_spill] sm:$0xff] }
  0xed   : > { %1670 = vmatmul.mubr.f32.gmra.mxu0 %v9757_v43  ;;  %2821 = vmatprep.subr.mxu1 %v13610_v58  ;;  %v2557_v43 = vld [vmem:[%s13703_s3 + $0x140] sm:$0xff] }
  0xee   : > { %1927 = vmatmul.mubr.f32.gmra.mxu1 %v9760_v44  ;;  %1675 = vmatprep.mubr.f32.mxu0 %v9763_v45  ;;  %v2521_v44 = vld [vmem:[%s13703_s3 + $0x20] sm:$0xff]  ;;  %v2556_v45 = vld [vmem:[%s13703_s3 + $0x138] sm:$0xff] }
  0xef   : > { %1932 = vmatprep.mubr.f32.mxu1 %v9766_v46  ;;  %2599 = vmatpush1.msra.mxu0 %v2527_v20  ;;  %v2520_v46 = vld [vmem:[%s13703_s3 + $0x18] sm:$0xff]  ;;  %v2549_v20 = vld [vmem:[%s13703_s3 + $0x100] sm:$0xff] }
  0xf0   : > { %2600 = vmatprep.subr.mxu0 %v13610_v58  ;;  %2822 = vmatpush1.msra.mxu1 %v2560_v29 }
  0xf1   : > { %1676 = vmatmul.mubr.f32.gmra.mxu0 %v9785_v51  ;;  %2823 = vmatprep.subr.mxu1 %v13610_v58  ;;  %v2555_v51 = vld [vmem:[%s13703_s3 + $0x130] sm:$0xff] }
  0xf2   : > { %1933 = vmatmul.mubr.f32.gmra.mxu1 %v9788_v52  ;;  %1681 = vmatprep.mubr.f32.mxu0 %v9791_v53  ;;  %v2519_v52 = vld [vmem:[%s13703_s3 + $0x10] sm:$0xff]  ;;  %v2554_v53 = vld [vmem:[%s13703_s3 + $0x128] sm:$0xff] }
  0xf3   : > { %1938 = vmatprep.mubr.f32.mxu1 %v9794_v54  ;;  %2601 = vmatpush1.msra.mxu0 %v2526_v22  ;;  %v13704_v54 = vld [vmem:[#allocation3_spill] sm:$0xff] }
  0xf4   : > { %2602 = vmatprep.subr.mxu0 %v13610_v58  ;;  %2824 = vmatpush1.msra.mxu1 %v2559_v35  ;;  %v13727_v35 = vld [vmem:[#allocation26_spill] sm:$0xff] }
  0xf5   : > { %1682 = vmatmul.mubr.f32.gmra.mxu0 %v9813_v59  ;;  %2825 = vmatprep.subr.mxu1 %v13610_v58  ;;  %v2518_v59 = vld [vmem:[%s13703_s3 + $0x8] sm:$0xff] }
  0xf6   : > { %1939 = vmatmul.mubr.f32.gmra.mxu1 %v9816_v60  ;;  %1687 = vmatprep.mubr.f32.mxu0 %v9819_v61  ;;  %v13705_v60 = vld [vmem:[#allocation4_spill] sm:$0xff]  ;;  %v13706_v61 = vld [vmem:[#allocation5_spill] sm:$0xff] }
  0xf7   : > { %1944 = vmatprep.mubr.f32.mxu1 %v9822_v62  ;;  %2603 = vmatpush1.msra.mxu0 %v2525_v28  ;;  %v2553_v62 = vld [vmem:[%s13703_s3 + $0x120] sm:$0xff]  ;;  %v13726_v28 = vld [vmem:[#allocation25_spill] sm:$0xff] }
  0xf8   : > { %2604 = vmatprep.subr.mxu0 %v13610_v58  ;;  %2826 = vmatpush1.msra.mxu1 %v2558_v37  ;;  %v2544_v37 = vld [vmem:[%s13703_s3 + $0xd8] sm:$0xff] }
  0xf9   : > { %1688 = vmatmul.mubr.f32.gmra.mxu0 %v9841_v3  ;;  %2827 = vmatprep.subr.mxu1 %v13610_v58  ;;  %v13707_v3 = vld [vmem:[#allocation6_spill] sm:$0xff] }
  0xfa   : > { %1945 = vmatmul.mubr.f32.gmra.mxu1 %v9844_v4  ;;  %1693 = vmatprep.mubr.f32.mxu0 %v9847_v5  ;;  %v13708_v4 = vld [vmem:[#allocation7_spill] sm:$0xff] }
  0xfb   : > { %1950 = vmatprep.mubr.f32.mxu1 %v9850_v6  ;;  %2605 = vmatpush1.msra.mxu0 %v2524_v30  ;;  %v2517_v5 = vld [vmem:[%s13703_s3] sm:$0xff]  ;;  %v13709_v6 = vld [vmem:[#allocation8_spill] sm:$0xff] }
  0xfc   : > { %2606 = vmatprep.subr.mxu0 %v13610_v58  ;;  %2828 = vmatpush1.msra.mxu1 %v2557_v43  ;;  %v13729_v43 = vld [vmem:[#allocation28_spill] sm:$0xff] }
  0xfd   : > { %1694 = vmatmul.mubr.f32.gmra.mxu0 %v9869_v15  ;;  %2829 = vmatprep.subr.mxu1 %v13610_v58  ;;  %v13710_v15 = vld [vmem:[#allocation9_spill] sm:$0xff] }
  0xfe   : > { %1951 = vmatmul.mubr.f32.gmra.mxu1 %v9872_v16  ;;  %1699 = vmatprep.mubr.f32.mxu0 %v9875_v17  ;;  %v2552_v16 = vld [vmem:[%s13703_s3 + $0x118] sm:$0xff] }
  0xff   : > { %1956 = vmatprep.mubr.f32.mxu1 %v9878_v18  ;;  %2607 = vmatpush1.msra.mxu0 %v2523_v36  ;;  %v13728_v36 = vld [vmem:[#allocation27_spill] sm:$0xff] }
 0x100   : > { %2608 = vmatprep.subr.mxu0 %v13610_v58  ;;  %2830 = vmatpush1.msra.mxu1 %v2556_v45 }
 0x101   : > { %1700 = vmatmul.mubr.f32.gmra.mxu0 %v9897_v31  ;;  %2831 = vmatprep.subr.mxu1 %v13610_v58  ;;  %v13711_v31 = vld [vmem:[#allocation10_spill] sm:$0xff] }
 0x102   : > { %1957 = vmatmul.mubr.f32.gmra.mxu1 %v9900_v32  ;;  %1705 = vmatprep.mubr.f32.mxu0 %v9903_v33  ;;  %v13712_v32 = vld [vmem:[#allocation11_spill] sm:$0xff]  ;;  %v2548_v33 = vld [vmem:[%s13703_s3 + $0xf8] sm:$0xff] }
 0x103   : > { %1962 = vmatprep.mubr.f32.mxu1 %v9906_v34  ;;  %2609 = vmatpush1.msra.mxu0 %v2522_v38  ;;  %v13713_v34 = vld [vmem:[#allocation12_spill] sm:$0xff]  ;;  %v2580_v38 = vld [vmem:[%s13703_s3 + $0x1f8] sm:$0xff] }
 0x104   : > { %2610 = vmatprep.subr.mxu0 %v13610_v58  ;;  %2832 = vmatpush1.msra.mxu1 %v2555_v51 }
 0x105   : > { %1706 = vmatmul.mubr.f32.gmra.mxu0 %v9925_v47  ;;  %2833 = vmatprep.subr.mxu1 %v13610_v58  ;;  %v13714_v47 = vld [vmem:[#allocation13_spill] sm:$0xff] }
 0x106   : > { %1963 = vmatmul.mubr.f32.gmra.mxu1 %v9928_v48  ;;  %1711 = vmatprep.mubr.f32.mxu0 %v9931_v49 }
 0x107   : > { %1968 = vmatprep.mubr.f32.mxu1 %v9934_v50  ;;  %2611 = vmatpush1.msra.mxu0 %v2521_v44  ;;  %v2551_v50 = vld [vmem:[%s13703_s3 + $0x110] sm:$0xff] }
 0x108   : > { %2612 = vmatprep.subr.mxu0 %v13610_v58  ;;  %2834 = vmatpush1.msra.mxu1 %v2554_v53  ;;  %v13730_v44 = vld [vmem:[#allocation29_spill] sm:$0xff]  ;;  %v13731_v53 = vld [vmem:[#allocation30_spill] sm:$0xff] }
 0x109   : > { %1712 = vmatmul.mubr.f32.gmra.mxu0 %v9953_v63  ;;  %2835 = vmatprep.subr.mxu1 %v13610_v58 }
 0x10a   : > { %1969 = vmatmul.mubr.f32.gmra.mxu1 %v9956_v0  ;;  %1717 = vmatprep.mubr.f32.mxu0 %v9959_v1  ;;  %v13715_v1 = vld [vmem:[#allocation14_spill] sm:$0xff] }
 0x10b   : > { %1974 = vmatprep.mubr.f32.mxu1 %v9962_v2  ;;  %2613 = vmatpush1.msra.mxu0 %v2520_v46  ;;  %v13716_v2 = vld [vmem:[#allocation15_spill] sm:$0xff] }
 0x10c   : > { %2614 = vmatprep.subr.mxu0 %v13610_v58  ;;  %2836 = vmatpush1.msra.mxu1 %v2553_v62  ;;  %v13734_v62 = vld [vmem:[#allocation33_spill] sm:$0xff] }
 0x10d   : > { %1718 = vmatmul.mubr.f32.gmra.mxu0 %v9981_v23  ;;  %2837 = vmatprep.subr.mxu1 %v13610_v58  ;;  %v2547_v23 = vld [vmem:[%s13703_s3 + $0xf0] sm:$0xff] }
 0x10e   : > { %1975 = vmatmul.mubr.f32.gmra.mxu1 %v9984_v24  ;;  %1723 = vmatprep.mubr.f32.mxu0 %v9987_v25  ;;  %v13717_v24 = vld [vmem:[#allocation16_spill] sm:$0xff]  ;;  %v13718_v25 = vld [vmem:[#allocation17_spill] sm:$0xff] }
 0x10f   : > { %1980 = vmatprep.mubr.f32.mxu1 %v9990_v26  ;;  %2615 = vmatpush1.msra.mxu0 %v2519_v52 }
 0x110   : > { %2616 = vmatprep.subr.mxu0 %v13610_v58  ;;  %2838 = vmatpush1.msra.mxu1 %v2552_v16  ;;  %v13736_v16 = vld [vmem:[#allocation35_spill] sm:$0xff] }
 0x111   : > { %1724 = vmatmul.mubr.f32.gmra.mxu0 %v10009_v55  ;;  %2839 = vmatprep.subr.mxu1 %v13610_v58 }
 0x112   : > { %1981 = vmatmul.mubr.f32.gmra.mxu1 %v13704_v54  ;;  %1729 = vmatprep.mubr.f32.mxu0 %v13705_v60  ;;  %v13732_v54 = vld [vmem:[#allocation31_spill] sm:$0xff]  ;;  %v2579_v60 = vld [vmem:[%s13703_s3 + $0x1f0] sm:$0xff] }
 0x113   : > { %1986 = vmatprep.mubr.f32.mxu1 %v13706_v61  ;;  %2617 = vmatpush1.msra.mxu0 %v2518_v59  ;;  %v2543_v59 = vld [vmem:[%s13703_s3 + $0xd0] sm:$0xff] }
 0x114   : > { %2618 = vmatprep.subr.mxu0 %v13610_v58  ;;  %2840 = vmatpush1.msra.mxu1 %v2551_v50  ;;  %v13733_v61 = vld [vmem:[#allocation32_spill] sm:$0xff] }
 0x115   : > { %1730 = vmatmul.mubr.f32.gmra.mxu0 %v13707_v3  ;;  %2841 = vmatprep.subr.mxu1 %v13610_v58  ;;  %v2578_v50 = vld [vmem:[%s13703_s3 + $0x1e8] sm:$0xff] }
 0x116   : > { %1987 = vmatmul.mubr.f32.gmra.mxu1 %v13708_v4  ;;  %1735 = vmatprep.mubr.f32.mxu0 %v13709_v6 }
 0x117   : > { %1992 = vmatprep.mubr.f32.mxu1 %v13710_v15  ;;  %2619 = vmatpush1.msra.mxu0 %v2517_v5  ;;  %v13735_v15 = vld [vmem:[#allocation34_spill] sm:$0xff] }
 0x118   : > { %2620 = vmatprep.subr.mxu0 %v13610_v58  ;;  %2842 = vmatpush1.msra.mxu1 %v2550_v8  ;;  %v13609_v8 = vlaneseq }
 0x119   : > { %v10686_v17 = vpop.f32.mrf.mxu0  ;;  %1736 = vmatmul.mubr.f32.gmra.mxu0 %v13711_v31  ;;  %2843 = vmatprep.subr.mxu1 %v13610_v58  ;;  %v2542_v31 = vld [vmem:[%s13703_s3 + $0xc8] sm:$0xff] }
 0x11a   : > { %v10688_v18 = vpop.f32.mrf.mxu1  ;;  %1993 = vmatmul.mubr.f32.gmra.mxu1 %v13712_v32  ;;  %1741 = vmatprep.mubr.f32.mxu0 %v13713_v34  ;;  %v13737_v32 = vld [vmem:[#allocation36_spill] sm:$0xff] }
 0x11b   : > { %1998 = vmatprep.mubr.f32.mxu1 %v13714_v47  ;;  %v10697_v48 = vpop.f32.mrf.mxu0  ;;  %2621 = vmatpush2.msra.mxu0 %v2548_v33  ;;  %v13738_v47 = vld [vmem:[#allocation37_spill] sm:$0xff] }
 0x11c   : > { %v10699_v49 = vpop.f32.mrf.mxu1  ;;  %2622 = vmatprep.subr.mxu0 %v13610_v58  ;;  %2844 = vmatpush1.msra.mxu1 %v2549_v20  ;;  %v13744_v20 = vld [vmem:[#allocation43_spill] sm:$0xff] }
 0x11d   : > { %v10706_v63 = vpop.f32.mrf.mxu0  ;;  %1742 = vmatmul.mubr.f32.gmra.mxu0 %v13715_v1  ;;  %2845 = vmatprep.subr.mxu1 %v13610_v58 }
 0x11e   : > { %v10708_v0 = vpop.f32.mrf.mxu1  ;;  %1999 = vmatmul.mubr.f32.gmra.mxu1 %v13716_v2  ;;  %1747 = vmatprep.mubr.f32.mxu0 %v13717_v24  ;;  %v13740_v24 = vld [vmem:[#allocation39_spill] sm:$0xff] }
 0x11f   : > { %2004 = vmatprep.mubr.f32.mxu1 %v13718_v25  ;;  %v10717_v26 = vpop.f32.mrf.mxu0  ;;  %2623 = vmatpush2.msra.mxu0 %v2547_v23  ;;  %v13739_v23 = vld [vmem:[#allocation38_spill] sm:$0xff] }
 0x120   : > { %v10719_v55 = vpop.f32.mrf.mxu1  ;;  %2624 = vmatprep.subr.mxu0 %v13610_v58  ;;  %2846 = vmatpush2.msra.mxu1 %v2580_v38  ;;  %v2541_v25 = vld [vmem:[%s13703_s3 + $0xc0] sm:$0xff] }
 0x121   : > { %v10726_v56 = vpop.f32.mrf.mxu0  ;;  %1748 = vmatmul.mubr.f32.gmra.mxu0 %v13719_v42  ;;  %2847 = vmatprep.subr.mxu1 %v13610_v58  ;;  %v13741_v42 = vld [vmem:[#allocation40_spill] sm:$0xff] }
 0x122   : > { %v10728_v39 = vpop.f32.mrf.mxu1  ;;  %2005 = vmatmul.mubr.f32.gmra.mxu1 %v13720_v41  ;;  %1753 = vmatprep.mubr.f32.mxu0 %v13721_v9  ;;  %v13742_v41 = vld [vmem:[#allocation41_spill] sm:$0xff] }
 0x123   : > { %2010 = vmatprep.mubr.f32.mxu1 %v13722_v10  ;;  %v10737_v40 = vpop.f32.mrf.mxu0  ;;  %2625 = vmatpush2.msra.mxu0 %v2546_v7  ;;  %v2577_v10 = vld [vmem:[%s13703_s3 + $0x1e0] sm:$0xff] }
 0x124   : > { %v10739_v57 = vpop.f32.mrf.mxu1  ;;  %2626 = vmatprep.subr.mxu0 %v13610_v58  ;;  %2848 = vmatpush2.msra.mxu1 %v2579_v60  ;;  %v2539_v60 = vld [vmem:[%s13703_s3 + $0xb0] sm:$0xff] }
 0x125   : > { %v10743_v11 = vpop.f32.mrf.mxu0  ;;  %1754 = vmatmul.mubr.f32.gmra.mxu0 %v13723_v13  ;;  %2849 = vmatprep.subr.mxu1 %v13610_v58 }
 0x126   : > { %v10745_v12 = vpop.f32.mrf.mxu1  ;;  %2011 = vmatmul.mubr.f32.gmra.mxu1 %v13724_v14  ;;  %1759 = vmatprep.mubr.f32.mxu0 %v13725_v21  ;;  %v2540_v21 = vld [vmem:[%s13703_s3 + $0xb8] sm:$0xff] }
 0x127   : > { %v10756_v22 = vpop.f32.mrf.mxu0  ;;  %2016 = vmatprep.mubr.f32.mxu1 %v13726_v28  ;;  %2627 = vmatpush2.msra.mxu0 %v2545_v19  ;;  %v13743_v19 = vld [vmem:[#allocation42_spill] sm:$0xff]  ;;  %v10852_v28 = vshrl.u32 %v13609_v8, 7 }
 0x128   : > { %v10758_v27 = vpop.f32.mrf.mxu1  ;;  %2628 = vmatprep.subr.mxu0 %v13610_v58  ;;  %2850 = vmatpush2.msra.mxu1 %v2578_v50  ;;  %v2536_v8 = vld [vmem:[%s13703_s3 + $0x98] sm:$0xff] }
 0x129   : > { %v10762_v29 = vpop.f32.mrf.mxu0  ;;  %1760 = vmatmul.mubr.f32.gmra.mxu0 %v13727_v35  ;;  %2851 = vmatprep.subr.mxu1 %v13610_v58  ;;  %13745 = vst [vmem:[#allocation3_spill] sm:$0xff] %v10852_v28  ;;  %v13746_v35 = vld [vmem:[#allocation44_spill] sm:$0xff] }
 0x12a   : > { %v10764_v30 = vpop.f32.mrf.mxu1  ;;  %2017 = vmatmul.mubr.f32.gmra.mxu1 %v13728_v36  ;;  %1765 = vmatprep.mubr.f32.mxu0 %v13729_v43  ;;  %v13747_v36 = vld [vmem:[#allocation45_spill] sm:$0xff]  ;;  %v10862_v43 = vsub.s32 1, %v10852_v28 }
 0x12b   : > { %2022 = vmatprep.mubr.f32.mxu1 %v13730_v44  ;;  %v10776_v45 = vpop.f32.mrf.mxu0  ;;  %2629 = vmatpush2.msra.mxu0 %v2544_v37 }
 0x12c   : > { %v10778_v46 = vpop.f32.mrf.mxu1  ;;  %2630 = vmatprep.subr.mxu0 %v13610_v58  ;;  %2852 = vmatpush2.msra.mxu1 %v2577_v10  ;;  %13748 = vst [vmem:[#allocation4_spill] sm:$0xff] %v10862_v43  ;;  %v2575_v10 = vld [vmem:[%s13703_s3 + $0x1d0] sm:$0xff] }
 0x12d   : > { %v10782_v51 = vpop.f32.mrf.mxu0  ;;  %1766 = vmatmul.mubr.f32.gmra.mxu0 %v13731_v53  ;;  %2853 = vmatprep.subr.mxu1 %v13610_v58 }
 0x12e   : > { %v10784_v52 = vpop.f32.mrf.mxu1  ;;  %2023 = vmatmul.mubr.f32.gmra.mxu1 %v13732_v54  ;;  %1771 = vmatprep.mubr.f32.mxu0 %v13733_v61  ;;  %v13749_v54 = vld [vmem:[#allocation46_spill] sm:$0xff] }
 0x12f   : > { %2028 = vmatprep.mubr.f32.mxu1 %v13734_v62  ;;  %v10796_v3 = vpop.f32.mrf.mxu0  ;;  %2631 = vmatpush2.msra.mxu0 %v2543_v59  ;;  %v13750_v59 = vld [vmem:[#allocation47_spill] sm:$0xff]  ;;  %v2576_v61 = vld [vmem:[%s13703_s3 + $0x1d8] sm:$0xff]  ;;  %v10878_v62 = vsub.s32 0, %v10852_v28 }
 0x130   : > { %v10798_v4 = vpop.f32.mrf.mxu1  ;;  %2632 = vmatprep.subr.mxu0 %v13610_v58  ;;  %2854 = vmatpush2.msra.mxu1 %v2576_v61  ;;  %v13761_v61 = vld [vmem:[#allocation54_spill] sm:$0xff] }
 0x131   : > { %v10802_v5 = vpop.f32.mrf.mxu0  ;;  %1772 = vmatmul.mubr.f32.gmra.mxu0 %v13735_v15  ;;  %13751 = vst [vmem:[#allocation5_spill] sm:$0xff] %v10878_v62  ;;  %v13752_v15 = vld [vmem:[#allocation48_spill] sm:$0xff]  ;;  %2855 = vmatprep.subr.mxu1 %v13610_v58 }
 0x132   : > { %v10804_v6 = vpop.f32.mrf.mxu1  ;;  %2029 = vmatmul.mubr.f32.gmra.mxu1 %v13736_v16  ;;  %1777 = vmatprep.mubr.f32.mxu0 %v13737_v32  ;;  %v10884_v16 = vld [vmem:[%s13753_s1] sm:$0xf] }
 0x133   : > { %v10812_v33 = vpop.f32.mrf.mxu0  ;;  %2034 = vmatprep.mubr.f32.mxu1 %v13738_v47  ;;  %2633 = vmatpush2.msra.mxu0 %v2542_v31  ;;  %13754 = vst [vmem:[#allocation6_spill] sm:$0xff] %v10884_v16  ;;  %v13755_v47 = vld [vmem:[#allocation49_spill] sm:$0xff]  ;;  %v10894_v50 = vrot.slane %v10884_v16, %v10862_v43 }
 0x134   : > { %v10814_v34 = vpop.f32.mrf.mxu1  ;;  %2634 = vmatprep.subr.mxu0 %v13610_v58  ;;  %2856 = vmatpush2.msra.mxu1 %v2575_v10 }
 0x135   : > { %v10822_v1 = vpop.f32.mrf.mxu0  ;;  %1778 = vmatmul.mubr.f32.gmra.mxu0 %v13739_v23  ;;  %2857 = vmatprep.subr.mxu1 %v13610_v58 }
 0x136   : > { %v10824_v2 = vpop.f32.mrf.mxu1  ;;  %2035 = vmatmul.mubr.f32.gmra.mxu1 %v13740_v24  ;;  %1783 = vmatprep.mubr.f32.mxu0 %v13741_v42  ;;  %v13757_v42 = vld [vmem:[#allocation51_spill] sm:$0xff] }
 0x137   : > { %2040 = vmatprep.mubr.f32.mxu1 %v13742_v41  ;;  %v10833_v7 = vpop.f32.mrf.mxu0  ;;  %2635 = vmatpush2.msra.mxu0 %v2541_v25  ;;  %v13756_v25 = vld [vmem:[#allocation50_spill] sm:$0xff]  ;;  %v2538_v41 = vld [vmem:[%s13703_s3 + $0xa8] sm:$0xff] }
 0x138   : > { %v10835_v9 = vpop.f32.mrf.mxu1  ;;  %2636 = vmatprep.subr.mxu0 %v13610_v58 }
 0x139   : > { %v10842_v13 = vpop.f32.mrf.mxu0  ;;  %1784 = vmatmul.mubr.f32.gmra.mxu0 %v13743_v19  ;;  %v10910_v19 = vrot.slane %v10884_v16, %v10878_v62 }
 0x13a   : > { %v10844_v14 = vpop.f32.mrf.mxu1  ;;  %2041 = vmatmul.mubr.f32.gmra.mxu1 %v13744_v20  ;;  %1789 = vmatprep.mubr.f32.mxu0 %v13746_v35  ;;  %v13758_v20 = vld [vmem:[#allocation52_spill] sm:$0xff] }
 0x13b   : > { %2046 = vmatprep.mubr.f32.mxu1 %v13747_v36  ;;  %v10856_v37 = vpop.f32.mrf.mxu0  ;;  %2637 = vmatpush2.msra.mxu0 %v2540_v21  ;;  %v13759_v21 = vld [vmem:[#allocation53_spill] sm:$0xff] }
 0x13c   : > { %v10858_v38 = vpop.f32.mrf.mxu1  ;;  %2638 = vmatprep.subr.mxu0 %v13610_v58 }
 0x13d   : > { %v10865_v44 = vpop.f32.mrf.mxu0  ;;  %1790 = vmatmul.mubr.f32.gmra.mxu0 %v13749_v54  ;;  %v1130_v54 = vadd.f32 %v10697_v48, %v10894_v50  ;;  %v1128_v48 = vadd.f32 %v10686_v17, %v10910_v19 }
 0x13e   : > { %v10867_v53 = vpop.f32.mrf.mxu1  ;;  %2047 = vmatmul.mubr.f32.gmra.mxu1 %v13750_v59  ;;  %1795 = vmatprep.mubr.f32.mxu0 %v13752_v15  ;;  %v13762_v15 = vld [vmem:[#allocation55_spill] sm:$0xff] }
 0x13f   : > { %v10886_v31 = vpop.f32.mrf.mxu0  ;;  %2052 = vmatprep.mubr.f32.mxu1 %v13755_v47  ;;  %2639 = vmatpush2.msra.mxu0 %v2539_v60  ;;  %v2537_v47 = vld [vmem:[%s13703_s3 + $0xa0] sm:$0xff] }
 0x140   : > { %v10888_v32 = vpop.f32.mrf.mxu1  ;;  %2640 = vmatprep.subr.mxu0 %v13610_v58 }
 0x141   : > { %v10896_v23 = vpop.f32.mrf.mxu0  ;;  %1796 = vmatmul.mubr.f32.gmra.mxu0 %v13756_v25  ;;  %v2574_v25 = vld [vmem:[%s13703_s3 + $0x1c8] sm:$0xff] }
 0x142   : > { %v10898_v24 = vpop.f32.mrf.mxu1  ;;  %2053 = vmatmul.mubr.f32.gmra.mxu1 %v13757_v42  ;;  %1801 = vmatprep.mubr.f32.mxu0 %v13758_v20  ;;  %v13763_v42 = vld [vmem:[#allocation56_spill] sm:$0xff] }
 0x143   : > { %2058 = vmatprep.mubr.f32.mxu1 %v13759_v21  ;;  %v10914_v35 = vpop.f32.mrf.mxu0  ;;  %2641 = vmatpush2.msra.mxu0 %v2538_v41  ;;  %v13764_v41 = vld [vmem:[#allocation57_spill] sm:$0xff]  ;;  %v1387_v21 = vadd.f32 %v10699_v49, %v1130_v54  ;;  %v13768_v49 = vld [vmem:[#allocation60_spill] sm:$0xff]  ;;  %v1134_v54 = vadd.f32 %v10706_v63, %v10910_v19  ;;  %v2573_v63 = vld [vmem:[%s13703_s3 + $0x1c0] sm:$0xff] }
 0x144   : > { %v10916_v36 = vpop.f32.mrf.mxu1  ;;  %2642 = vmatprep.subr.mxu0 %v13610_v58  ;;  %2858 = vmatpush2.msra.mxu1 %v2574_v25  ;;  %v1385_v58 = vadd.f32 %v10688_v18, %v1128_v48 }
 0x145   : > { %v10922_v59 = vpop.f32.mrf.mxu0  ;;  %1802 = vmatmul.mubr.f32.gmra.mxu0 %v13761_v61  ;;  %v1136_v61 = vadd.f32 %v10717_v26, %v10894_v50  ;;  %v10961_v26 = vld [vmem:[%s13769_s24] sm:$0xf]  ;;  %v2090_v16 = vmax.f32 %v1387_v21, 0.0 }
 0x146   : > { %v10924_v60 = vpop.f32.mrf.mxu1  ;;  %2059 = vmatmul.mubr.f32.gmra.mxu1 %v13762_v15  ;;  %1807 = vmatprep.mubr.f32.mxu0 %v13763_v42  ;;  %v13766_v42 = vld [vmem:[#allocation58_spill] sm:$0xff]  ;;  %13770 = vst [vmem:[#allocation9_spill] sm:$0xff] %v10961_v26  ;;  %v10973_v18 = vrot.slane %v10961_v26, %v10862_v43 }
 0x147   : > { %13760 = vst [vmem:[#allocation7_spill] sm:$0xff] %v10924_v60  ;;  %2064 = vmatprep.mubr.f32.mxu1 %v13764_v41  ;;  %v10938_v10 = vpop.f32.mrf.mxu0  ;;  %2643 = vmatpush2.msra.mxu0 %v2537_v47  ;;  %v13767_v41 = vld [vmem:[#allocation59_spill] sm:$0xff]  ;;  %v1393_v48 = vadd.f32 %v10719_v55, %v1136_v61  ;;  %v13776_v21 = vld [vmem:[#allocation62_spill] sm:$0xff]  ;;  %v2535_v55 = vld [vmem:[%s13703_s3 + $0x90] sm:$0xff] }
 0x148   : > { %v10940_v20 = vpop.f32.mrf.mxu1  ;;  %v10998_v61 = vld [vmem:[%s13778_s4] sm:$0xf]  ;;  %v2240_v60 = vmul.f32 %v10973_v18, %v2090_v16 }
 0x149   : > { %v10947_v17 = vpop.f32.mrf.mxu0  ;;  %1808 = vmatmul.mubr.f32.gmra.mxu0 %v13766_v42  ;;  %v13772_v42 = vld [vmem:[#allocation61_spill] sm:$0xff]  ;;  %13779 = vst [vmem:[#allocation13_spill] sm:$0xff] %v10998_v61 }
 0x14a   : > { %v10949_v15 = vpop.f32.mrf.mxu1  ;;  %2065 = vmatmul.mubr.f32.gmra.mxu1 %v13767_v41  ;;  %1813 = vmatprep.mubr.f32.mxu0 %v13768_v49  ;;  %v13773_v41 = vmov 0.0   ;;  %v1142_v49 = vadd.f32 %v10737_v40, %v10894_v50  ;;  %v2089_v40 = vmax.f32 %v1385_v58, 0.0 }
 0x14b   : > { %13765 = vst [vmem:[#allocation8_spill] sm:$0xff] %v10949_v15  ;;  %v10965_v47 = vpop.f32.mrf.mxu0  ;;  %2070 = vmatprep.mubr.f32.mxu1 %v13772_v42  ;;  %2644 = vmatprep.subr.mxu0 %v13773_v41  ;;  %v13777_v15 = vld [vmem:[#allocation63_spill] sm:$0xff] }
 0x14c   : > { %v10967_v25 = vpop.f32.mrf.mxu1  ;;  %2645 = vmatpush2.msra.mxu0 %v2536_v8  ;;  %2859 = vmatprep.subr.mxu1 %v13773_v41  ;;  %v10993_v8 = vrot.slane %v10961_v26, %v10878_v62  ;;  %v11012_v26 = vrot.slane %v10998_v61, %v10862_v43  ;;  %v1146_v43 = vadd.f32 %v10743_v11, %v10910_v19 }
 0x14d   : > { %13771 = vst [vmem:[#allocation10_spill] sm:$0xff] %v10967_v25  ;;  %v10982_v42 = vpop.f32.mrf.mxu0  ;;  %1814 = vmatmul.mubr.f32.gmra.mxu0 %v13776_v21  ;;  %v13780_v21 = vld [vmem:[#allocation64_spill] sm:$0xff]  ;;  %2646 = vmatprep.subr.mxu0 %v13773_v41 }
 0x14e   : > { %13774 = vst [vmem:[#allocation11_spill] sm:$0xff] %v10982_v42  ;;  %v10984_v28 = vpop.f32.mrf.mxu1  ;;  %2071 = vmatmul.mubr.f32.gmra.mxu1 %v13777_v15  ;;  %1819 = vmatprep.mubr.f32.mxu0 %v13780_v21  ;;  %v13781_v15 = vld [vmem:[#allocation65_spill] sm:$0xff]  ;;  %v1391_v42 = vadd.f32 %v10708_v0, %v1134_v54  ;;  %v1399_v21 = vadd.f32 %v10739_v57, %v1142_v49  ;;  %v13785_v57 = vld [vmem:[#allocation67_spill] sm:$0xff] }
 0x14f   : > { %13775 = vst [vmem:[#allocation12_spill] sm:$0xff] %v10984_v28  ;;  %v1140_v28 = vadd.f32 %v10726_v56, %v10910_v19  ;;  %2076 = vmatprep.mubr.f32.mxu1 %v13781_v15  ;;  %v11005_v25 = vpop.f32.mrf.mxu0  ;;  %2860 = vmatpush2.msra.mxu1 %v2573_v63  ;;  %v2094_v56 = vmax.f32 %v1393_v48, 0.0  ;;  %v1148_v15 = vadd.f32 %v10756_v22, %v10894_v50  ;;  %v2572_v0 = vld [vmem:[%s13703_s3 + $0x1b8] sm:$0xff]  ;;  %v2534_v22 = vld [vmem:[%s13703_s3 + $0x88] sm:$0xff] }
 0x150   : > { %v11007_v58 = vpop.f32.mrf.mxu1  ;;  %2647 = vmatpush2.msra.mxu0 %v2535_v55  ;;  %2861 = vmatprep.subr.mxu1 %v13773_v41  ;;  %v11024_v54 = vrot.slane %v10998_v61, %v10878_v62  ;;  %v13784_v48 = vld [vmem:[#allocation66_spill] sm:$0xff]  ;;  %v2239_v49 = vmul.f32 %v10993_v8, %v2089_v40  ;;  %v13786_v62 = vld [vmem:[#allocation68_spill] sm:$0xff]  ;;  %v13787_v61 = vld [vmem:[#allocation69_spill] sm:$0xff] }
 0x151   : > { %13782 = vst [vmem:[#allocation14_spill] sm:$0xff] %v11007_v58  ;;  %v11026_v63 = vpop.f32.mrf.mxu0  ;;  %1820 = vmatmul.mubr.f32.gmra.mxu0 %v13784_v48  ;;  %v1397_v55 = vadd.f32 %v10728_v39, %v1140_v28  ;;  %v1154_v48 = vadd.f32 %v10776_v45, %v10894_v50  ;;  %2648 = vmatprep.subr.mxu0 %v13773_v41  ;;  %v2098_v28 = vmax.f32 %v1399_v21, 0.0  ;;  %v2571_v45 = vld [vmem:[%s13703_s3 + $0x1b0] sm:$0xff] }
 0x152   : > { %v11028_v16 = vpop.f32.mrf.mxu1  ;;  %2077 = vmatmul.mubr.f32.gmra.mxu1 %v13785_v57  ;;  %1825 = vmatprep.mubr.f32.mxu0 %v13786_v62  ;;  %v2244_v39 = vmul.f32 %v10973_v18, %v2094_v56  ;;  %v1405_v11 = vadd.f32 %v10758_v27, %v1148_v15  ;;  %v2390_v62 = vadd.f32 %v11012_v26, %v2240_v60  ;;  %v2533_v27 = vld [vmem:[%s13703_s3 + $0x80] sm:$0xff]  ;;  %v2570_v15 = vld [vmem:[%s13703_s3 + $0x1a8] sm:$0xff] }
 0x153   : > { %13783 = vst [vmem:[#allocation15_spill] sm:$0xff] %v11028_v16  ;;  %2082 = vmatprep.mubr.f32.mxu1 %v13787_v61  ;;  %v2093_v16 = vmax.f32 %v1391_v42, 0.0  ;;  %v11043_v57 = vpop.f32.mrf.mxu0  ;;  %2862 = vmatpush2.msra.mxu1 %v2572_v0  ;;  %v13790_v61 = vld [vmem:[#allocation70_spill] sm:$0xff]  ;;  %v13791_v0 = vld [vmem:[#allocation71_spill] sm:$0xff]  ;;  %v2389_v60 = vadd.f32 %v11024_v54, %v2239_v49  ;;  %v2097_v56 = vmax.f32 %v1397_v55, 0.0  ;;  %v1403_v21 = vadd.f32 %v10745_v12, %v1146_v43 }
 0x154   : > { %v11045_v58 = vpop.f32.mrf.mxu1  ;;  %2649 = vmatpush2.msra.mxu0 %v2534_v22  ;;  %2863 = vmatprep.subr.mxu1 %v13773_v41  ;;  %v2248_v12 = vmul.f32 %v10973_v18, %v2098_v28  ;;  %v2102_v43 = vmax.f32 %v1405_v11, 0.0  ;;  %v1160_v49 = vadd.f32 %v10796_v3, %v10894_v50  ;;  %v2568_v3 = vld [vmem:[%s13703_s3 + $0x198] sm:$0xff] }
 0x155   : > { %13788 = vst [vmem:[#allocation16_spill] sm:$0xff] %v11045_v58  ;;  %v11055_v42 = vpop.f32.mrf.mxu0  ;;  %1826 = vmatmul.mubr.f32.gmra.mxu0 %v13790_v61  ;;  %v2243_v22 = vmul.f32 %v10993_v8, %v2093_v16  ;;  %v1152_v61 = vadd.f32 %v10762_v29, %v10910_v19  ;;  %2650 = vmatprep.subr.mxu0 %v13773_v41  ;;  %v2569_v29 = vld [vmem:[%s13703_s3 + $0x1a0] sm:$0xff]  ;;  %v2101_v28 = vmax.f32 %v1403_v21, 0.0 }
 0x156   : > { %v11057_v40 = vpop.f32.mrf.mxu1  ;;  %2083 = vmatmul.mubr.f32.gmra.mxu1 %v13791_v0  ;;  %2652 = vmatprep.mubr.f32.mxu0 %v2390_v62  ;;  %v1411_v0 = vadd.f32 %v10778_v46, %v1154_v48  ;;  %v2394_v16 = vadd.f32 %v11012_v26, %v2244_v39  ;;  %v2247_v48 = vmul.f32 %v10993_v8, %v2097_v56 }
 0x157   : > { %13789 = vst [vmem:[#allocation17_spill] sm:$0xff] %v11057_v40  ;;  %v11073_v40 = vpop.f32.mrf.mxu0  ;;  %2864 = vmatpush2.msra.mxu1 %v2571_v45  ;;  %2651 = vmatpush2.msra.mxu0 %v2533_v27  ;;  %v2393_v39 = vadd.f32 %v11024_v54, %v2243_v22  ;;  %v1409_v11 = vadd.f32 %v10764_v30, %v1152_v61  ;;  %v2567_v30 = vld [vmem:[%s13703_s3 + $0x190] sm:$0xff] }
 0x158   : > { %v11075_v58 = vpop.f32.mrf.mxu1  ;;  %2865 = vmatprep.subr.mxu1 %v13773_v41  ;;  %v2106_v62 = vmax.f32 %v1411_v0, 0.0  ;;  %v1158_v45 = vadd.f32 %v10782_v51, %v10910_v19  ;;  %v2252_v56 = vmul.f32 %v10973_v18, %v2102_v43  ;;  %v1417_v21 = vadd.f32 %v10798_v4, %v1160_v49 }
 0x159   : > { %v11086_v46 = vpop.f32.mrf.mxu0  ;;  %2653 = vmatmul.mubr.f32.vlgmr.msra.gmra.mxu0 %v2389_v60  ;;  %2866 = vmatpush2.msra.mxu1 %v2570_v15  ;;  %v1166_v15 = vadd.f32 %v10812_v33, %v10894_v50  ;;  %v2398_v22 = vadd.f32 %v11012_v26, %v2248_v12  ;;  %v2397_v0 = vadd.f32 %v11024_v54, %v2247_v48  ;;  %v2566_v33 = vld [vmem:[%s13703_s3 + $0x188] sm:$0xff]  ;;  %v2105_v12 = vmax.f32 %v1409_v11, 0.0 }
 0x15a   : > { %v11088_v55 = vpop.f32.mrf.mxu1  ;;  %2657 = vmatprep.mubr.f32.mxu0 %v2394_v16  ;;  %2867 = vmatprep.subr.mxu1 %v13773_v41  ;;  %v2251_v4 = vmul.f32 %v10993_v8, %v2101_v28  ;;  %v2256_v43 = vmul.f32 %v10973_v18, %v2106_v62  ;;  %v1415_v49 = vadd.f32 %v10784_v52, %v1158_v45  ;;  %v2110_v28 = vmax.f32 %v1417_v21, 0.0 }
 0x15b   : > { %v11099_v27 = vpop.f32.mrf.mxu0  ;;  %2868 = vmatpush2.msra.mxu1 %v2569_v29  ;;  %v1164_v16 = vadd.f32 %v10802_v5, %v10910_v19  ;;  %v2402_v11 = vadd.f32 %v11012_v26, %v2252_v56  ;;  %v2565_v5 = vld [vmem:[%s13703_s3 + $0x180] sm:$0xff] }
 0x15c   : > { %v11101_v60 = vpop.f32.mrf.mxu1  ;;  %2869 = vmatprep.subr.mxu1 %v13773_v41  ;;  %v2401_v45 = vadd.f32 %v11024_v54, %v2251_v4  ;;  %v2109_v56 = vmax.f32 %v1415_v49, 0.0 }
 0x15d   : > { %v11112_v51 = vpop.f32.mrf.mxu0  ;;  %2658 = vmatmul.mubr.f32.gmra.mxu0 %v2393_v39  ;;  %2870 = vmatpush2.msra.mxu1 %v2568_v3  ;;  %v1423_v3 = vadd.f32 %v10814_v34, %v1166_v15  ;;  %v1172_v39 = vadd.f32 %v10833_v7, %v10894_v50  ;;  %v1170_v34 = vadd.f32 %v10822_v1, %v10910_v19 }
 0x15e   : > { %v11114_v61 = vpop.f32.mrf.mxu1  ;;  %2662 = vmatprep.mubr.f32.mxu0 %v2398_v22  ;;  %2871 = vmatprep.subr.mxu1 %v13773_v41  ;;  %v2255_v7 = vmul.f32 %v10993_v8, %v2105_v12  ;;  %v1421_v21 = vadd.f32 %v10804_v6, %v1164_v16  ;;  %v1178_v1 = vadd.f32 %v10856_v37, %v10894_v50 }
 0x15f   : > { %v11126_v29 = vpop.f32.mrf.mxu0  ;;  %2872 = vmatpush2.msra.mxu1 %v2567_v30  ;;  %v2406_v30 = vadd.f32 %v11012_v26, %v2256_v43  ;;  %v2114_v4 = vmax.f32 %v1423_v3, 0.0  ;;  %v1427_v49 = vadd.f32 %v10824_v2, %v1170_v34  ;;  %v1176_v43 = vadd.f32 %v10842_v13, %v10910_v19 }
 0x160   : > { %v11128_v48 = vpop.f32.mrf.mxu1  ;;  %2873 = vmatprep.subr.mxu1 %v13773_v41  ;;  %v2405_v16 = vadd.f32 %v11024_v54, %v2255_v7  ;;  %v1184_v37 = vadd.f32 %v10886_v31, %v10894_v50  ;;  %v1435_v2 = vadd.f32 %v10858_v38, %v1178_v1 }
 0x161   : > { %v11135_v62 = vpop.f32.mrf.mxu0  ;;  %2663 = vmatmul.mubr.f32.gmra.mxu0 %v2397_v0  ;;  %2874 = vmatpush2.msra.mxu1 %v2566_v33  ;;  %v2260_v0 = vmul.f32 %v10973_v18, %v2110_v28  ;;  %v1429_v33 = vadd.f32 %v10835_v9, %v1172_v39  ;;  %v2259_v28 = vmul.f32 %v10993_v8, %v2109_v56  ;;  %v2113_v9 = vmax.f32 %v1421_v21, 0.0 }
 0x162   : > { %v11137_v52 = vpop.f32.mrf.mxu1  ;;  %2667 = vmatprep.mubr.f32.mxu0 %v2402_v11  ;;  %2875 = vmatprep.subr.mxu1 %v13773_v41  ;;  %v2264_v11 = vmul.f32 %v10973_v18, %v2114_v4  ;;  %v2117_v7 = vmax.f32 %v1427_v49, 0.0  ;;  %v1433_v56 = vadd.f32 %v10844_v14, %v1176_v43  ;;  %v1441_v38 = vadd.f32 %v10888_v32, %v1184_v37  ;;  %v13795_v41 = vld [vmem:[#allocation10_spill] sm:$0xff] }
 0x163   : > { %v11147_v15 = vpop.f32.mrf.mxu0  ;;  %2876 = vmatpush2.msra.mxu1 %v2565_v5  ;;  %v2118_v5 = vmax.f32 %v1429_v33, 0.0  ;;  %v2410_v13 = vadd.f32 %v11012_v26, %v2260_v0  ;;  %v2409_v31 = vadd.f32 %v11024_v54, %v2259_v28  ;;  %v2263_v21 = vmul.f32 %v10993_v8, %v2113_v9 }
 0x164   : > { %v11149_v22 = vpop.f32.mrf.mxu1  ;;  %v2122_v1 = vmax.f32 %v1435_v2, 0.0  ;;  %v1190_v14 = vadd.f32 %v10914_v35, %v10894_v50  ;;  %v2414_v49 = vadd.f32 %v11012_v26, %v2264_v11  ;;  %v2121_v32 = vmax.f32 %v1433_v56, 0.0 }
 0x165   : > { %v11157_v12 = vpop.f32.mrf.mxu0  ;;  %2668 = vmatmul.mubr.f32.gmra.mxu0 %v2401_v45  ;;  %v2268_v33 = vmul.f32 %v10973_v18, %v2118_v5  ;;  %v2413_v28 = vadd.f32 %v11024_v54, %v2263_v21  ;;  %v2126_v37 = vmax.f32 %v1441_v38, 0.0  ;;  %v1188_v5 = vadd.f32 %v10896_v23, %v10910_v19 }
 0x166   : > { %v11159_v6 = vpop.f32.mrf.mxu1  ;;  %2672 = vmatprep.mubr.f32.mxu0 %v2406_v30  ;;  %v1182_v30 = vadd.f32 %v10865_v44, %v10910_v19  ;;  %v2267_v44 = vmul.f32 %v10993_v8, %v2117_v7  ;;  %v2272_v2 = vmul.f32 %v10973_v18, %v2122_v1  ;;  %v1196_v7 = vadd.f32 %v10938_v10, %v10894_v50 }
 0x167   : > { %v11168_v3 = vpop.f32.mrf.mxu0  ;;  %v2418_v56 = vadd.f32 %v11012_v26, %v2268_v33  ;;  %v2271_v21 = vmul.f32 %v10993_v8, %v2121_v32  ;;  %v2276_v38 = vmul.f32 %v10973_v18, %v2126_v37  ;;  %v1194_v10 = vadd.f32 %v10922_v59, %v10910_v19 }
 0x168   : > { %v11170_v39 = vpop.f32.mrf.mxu1  ;;  %v1439_v9 = vadd.f32 %v10867_v53, %v1182_v30  ;;  %v2417_v23 = vadd.f32 %v11024_v54, %v2267_v44  ;;  %v1202_v44 = vadd.f32 %v10965_v47, %v10894_v50  ;;  %v2422_v32 = vadd.f32 %v11012_v26, %v2272_v2 }
 0x169   : > { %v11175_v45 = vpop.f32.mrf.mxu0  ;;  %2673 = vmatmul.mubr.f32.gmra.mxu0 %v2405_v16  ;;  %v1200_v59 = vadd.f32 %v10947_v17, %v10910_v19  ;;  %v2426_v2 = vadd.f32 %v11012_v26, %v2276_v38  ;;  %v1208_v17 = vadd.f32 %v11005_v25, %v10894_v50  ;;  %v1212_v38 = vadd.f32 %v11026_v63, %v10910_v19  ;;  %v13802_v63 = vld [vmem:[#allocation14_spill] sm:$0xff] }
 0x16a   : > { %v11177_v34 = vpop.f32.mrf.mxu1  ;;  %2677 = vmatprep.mubr.f32.mxu0 %v2410_v13  ;;  %v1447_v13 = vadd.f32 %v10916_v36, %v1190_v14  ;;  %v2125_v30 = vmax.f32 %v1439_v9, 0.0  ;;  %v1445_v36 = vadd.f32 %v10898_v24, %v1188_v5  ;;  %v2421_v24 = vadd.f32 %v11024_v54, %v2271_v21 }
 0x16b   : > { %v11185_v4 = vpop.f32.mrf.mxu0  ;;  %v1459_v21 = vadd.f32 %v13795_v41, %v1202_v44  ;;  %v1218_v44 = vadd.f32 %v11055_v42, %v10910_v19 }
 0x16c   : > { %v11187_v0 = vpop.f32.mrf.mxu1  ;;  %v2130_v14 = vmax.f32 %v1447_v13, 0.0  ;;  %v2275_v37 = vmul.f32 %v10993_v8, %v2125_v30  ;;  %v2129_v5 = vmax.f32 %v1445_v36, 0.0 }
 0x16d   : > { %v11193_v43 = vpop.f32.mrf.mxu0  ;;  %2678 = vmatmul.mubr.f32.gmra.mxu0 %v2409_v31 }
 0x16e   : > { %v11195_v16 = vpop.f32.mrf.mxu1  ;;  %2682 = vmatprep.mubr.f32.mxu0 %v2414_v49  ;;  %v1453_v49 = vadd.f32 %v10940_v20, %v1196_v7  ;;  %v13793_v20 = vld [vmem:[#allocation7_spill] sm:$0xff]  ;;  %v2425_v41 = vadd.f32 %v11024_v54, %v2275_v37  ;;  %v2279_v25 = vmul.f32 %v10993_v8, %v2129_v5  ;;  %v1220_v37 = vadd.f32 %v11073_v40, %v10894_v50 }
 0x16f   : > { %v11202_v35 = vpop.f32.mrf.mxu0  ;;  %v1451_v13 = vadd.f32 %v13793_v20, %v1194_v10  ;;  %v13799_v20 = vld [vmem:[#allocation8_spill] sm:$0xff]  ;;  %v1224_v40 = vadd.f32 %v11086_v46, %v10910_v19 }
 0x170   : > { %v11204_v11 = vpop.f32.mrf.mxu1 }
 0x171   : > { %v11211_v31 = vpop.f32.mrf.mxu0  ;;  %2683 = vmatmul.mubr.f32.gmra.mxu0 %v2413_v28 }
 0x172   : > { %v11213_v53 = vpop.f32.mrf.mxu1  ;;  %2687 = vmatprep.mubr.f32.mxu0 %v2418_v56  ;;  %v2280_v56 = vmul.f32 %v10973_v18, %v2130_v14  ;;  %v1214_v14 = vadd.f32 %v11043_v57, %v10894_v50 }
 0x173   : > { %v11221_v1 = vpop.f32.mrf.mxu0 }
 0x174   : > { %v11223_v33 = vpop.f32.mrf.mxu1  ;;  %v2430_v57 = vadd.f32 %v11012_v26, %v2280_v56  ;;  %v2429_v56 = vadd.f32 %v11024_v54, %v2279_v25  ;;  %v1477_v25 = vadd.f32 %v11075_v58, %v1220_v37  ;;  %v13811_v58 = vld [vmem:[#allocation6_spill] sm:$0xff] }
 0x175   : > { %v11229_v28 = vpop.f32.mrf.mxu0  ;;  %2688 = vmatmul.mubr.f32.gmra.mxu0 %v2417_v23  ;;  %v2134_v23 = vmax.f32 %v1453_v49, 0.0  ;;  %v2133_v49 = vmax.f32 %v1451_v13, 0.0 }
 0x176   : > { %v11231_v9 = vpop.f32.mrf.mxu1  ;;  %2692 = vmatprep.mubr.f32.mxu0 %v2422_v32  ;;  %v13796_v32 = vld [vmem:[#allocation11_spill] sm:$0xff] }
 0x177   : > { %13792 = vst [vmem:[#allocation18_spill] sm:$0xff] %v11231_v9  ;;  %v11238_v7 = vpop.f32.mrf.mxu0  ;;  %v1206_v30 = vadd.f32 %v13796_v32, %v10910_v19  ;;  %v13806_v9 = vld [vmem:[#allocation16_spill] sm:$0xff] }
 0x178   : > { %v11240_v47 = vpop.f32.mrf.mxu1 }
 0x179   : > { %13794 = vst [vmem:[#allocation19_spill] sm:$0xff] %v11240_v47  ;;  %v11249_v36 = vpop.f32.mrf.mxu0  ;;  %2693 = vmatmul.mubr.f32.gmra.mxu0 %v2421_v24  ;;  %v1457_v47 = vadd.f32 %v13799_v20, %v1200_v59  ;;  %v2284_v59 = vmul.f32 %v10973_v18, %v2134_v23  ;;  %v2138_v20 = vmax.f32 %v1459_v21, 0.0  ;;  %v1471_v23 = vadd.f32 %v13806_v9, %v1214_v14  ;;  %v13807_v21 = vld [vmem:[#allocation3_spill] sm:$0xff] }
 0x17a   : > { %13797 = vst [vmem:[#allocation20_spill] sm:$0xff] %v11249_v36  ;;  %v11251_v10 = vpop.f32.mrf.mxu1  ;;  %2697 = vmatprep.mubr.f32.mxu0 %v2426_v2  ;;  %v13803_v2 = vld [vmem:[#allocation12_spill] sm:$0xff]  ;;  %v1055_v14 = vsub.s32 3, %v13807_v21 }
 0x17b   : > { %13798 = vst [vmem:[#allocation21_spill] sm:$0xff] %v11251_v10  ;;  %v11262_v32 = vpop.f32.mrf.mxu0  ;;  %v1465_v10 = vadd.f32 %v13802_v63, %v1208_v17  ;;  %v1463_v36 = vadd.f32 %v13803_v2, %v1206_v30  ;;  %v2137_v42 = vmax.f32 %v1457_v47, 0.0  ;;  %v1051_v17 = vsub.s32 2, %v13807_v21  ;;  %v13808_v63 = vld [vmem:[#allocation17_spill] sm:$0xff] }
 0x17c   : > { %13800 = vst [vmem:[#allocation22_spill] sm:$0xff] %v11262_v32  ;;  %v11264_v24 = vpop.f32.mrf.mxu1  ;;  %v13805_v32 = vld [vmem:[#allocation15_spill] sm:$0xff]  ;;  %v2283_v30 = vmul.f32 %v10993_v8, %v2133_v49  ;;  %v1475_v2 = vadd.f32 %v13808_v63, %v1218_v44  ;;  %v2288_v47 = vmul.f32 %v10973_v18, %v2138_v20  ;;  %v2434_v9 = vadd.f32 %v11012_v26, %v2284_v59 }
 0x17d   : > { %13801 = vst [vmem:[#allocation23_spill] sm:$0xff] %v11264_v24  ;;  %v11272_v5 = vpop.f32.mrf.mxu0  ;;  %2698 = vmatmul.mubr.f32.gmra.mxu0 %v2425_v41  ;;  %v1469_v24 = vadd.f32 %v13805_v32, %v1212_v38  ;;  %v2142_v38 = vmax.f32 %v1465_v10, 0.0  ;;  %v2141_v32 = vmax.f32 %v1463_v36, 0.0  ;;  %v2287_v46 = vmul.f32 %v10993_v8, %v2137_v42 }
 0x17e   : > { %13804 = vst [vmem:[#allocation24_spill] sm:$0xff] %v11272_v5  ;;  %v11274_v13 = vpop.f32.mrf.mxu1  ;;  %2702 = vmatprep.mubr.f32.mxu0 %v2430_v57  ;;  %v2146_v63 = vmax.f32 %v1471_v23, 0.0  ;;  %v2433_v20 = vadd.f32 %v11024_v54, %v2283_v30  ;;  %v2149_v10 = vmax.f32 %v1475_v2, 0.0  ;;  %v1481_v59 = vadd.f32 %v11088_v55, %v1224_v40  ;;  %v13813_v40 = vld [vmem:[#allocation9_spill] sm:$0xff] }
 0x17f   : > { %v11284_v5 = vpop.f32.mrf.mxu0  ;;  %v2145_v57 = vmax.f32 %v1469_v24, 0.0  ;;  %v11304_v37 = vrot.slane %v13811_v58, %v1051_v17  ;;  %v2292_v21 = vmul.f32 %v10973_v18, %v2142_v38  ;;  %v1226_v42 = vadd.f32 %v11099_v27, %v10894_v50  ;;  %v13814_v38 = vld [vmem:[#allocation13_spill] sm:$0xff] }
 0x180   : > { %v11286_v41 = vpop.f32.mrf.mxu1  ;;  %v2438_v24 = vadd.f32 %v11012_v26, %v2288_v47  ;;  %v11311_v23 = vrot.slane %v13811_v58, %v1055_v14  ;;  %v2150_v55 = vmax.f32 %v1477_v25, 0.0  ;;  %v2437_v27 = vadd.f32 %v11024_v54, %v2287_v46 }
 0x181   : > { %13809 = vst [vmem:[#allocation25_spill] sm:$0xff] %v11286_v41  ;;  %v11292_v49 = vpop.f32.mrf.mxu0  ;;  %2703 = vmatmul.mubr.f32.gmra.mxu0 %v2429_v56  ;;  %v2291_v56 = vmul.f32 %v10993_v8, %v2141_v32  ;;  %v2295_v47 = vmul.f32 %v10993_v8, %v2145_v57  ;;  %v2296_v58 = vmul.f32 %v10973_v18, %v2146_v63 }
 0x182   : > { %v11294_v44 = vpop.f32.mrf.mxu1  ;;  %2707 = vmatprep.mubr.f32.mxu0 %v2434_v9  ;;  %v11319_v9 = vrot.slane %v13813_v40, %v1051_v17  ;;  %v11328_v32 = vrot.slane %v13813_v40, %v1055_v14  ;;  %v2299_v25 = vmul.f32 %v10993_v8, %v2149_v10  ;;  %v1483_v57 = vadd.f32 %v11101_v60, %v1226_v42 }
 0x183   : > { %v11299_v41 = vpop.f32.mrf.mxu0  ;;  %v1236_v63 = vadd.f32 %v11135_v62, %v10910_v19  ;;  %v11344_v10 = vrot.slane %v13814_v38, %v1055_v14  ;;  %v1242_v40 = vadd.f32 %v11157_v12, %v10910_v19  ;;  %v2445_v62 = vadd.f32 %v11024_v54, %v2295_v47 }
 0x184   : > { %v11301_v36 = vpop.f32.mrf.mxu1  ;;  %v1248_v14 = vadd.f32 %v11175_v45, %v10910_v19  ;;  %v2446_v42 = vadd.f32 %v11012_v26, %v2296_v58  ;;  %v2154_v47 = vmax.f32 %v1483_v57, 0.0  ;;  %v1250_v45 = vadd.f32 %v11185_v4, %v10894_v50 }
 0x185   : > { %13810 = vst [vmem:[#allocation26_spill] sm:$0xff] %v11301_v36  ;;  %v11314_v30 = vpop.f32.mrf.mxu0  ;;  %2708 = vmatmul.mubr.f32.gmra.mxu0 %v2433_v20  ;;  %v11322_v36 = vrot.slane %v13814_v38, %v1051_v17  ;;  %v1230_v20 = vadd.f32 %v11112_v51, %v10910_v19  ;;  %v1232_v17 = vadd.f32 %v11126_v29, %v10894_v50 }
 0x186   : > { %v11316_v2 = vpop.f32.mrf.mxu1  ;;  %2712 = vmatprep.mubr.f32.mxu0 %v2438_v24  ;;  %v2442_v24 = vadd.f32 %v11012_v26, %v2292_v21  ;;  %v2300_v51 = vmul.f32 %v10973_v18, %v2150_v55  ;;  %v1238_v29 = vadd.f32 %v11147_v15, %v10894_v50  ;;  %v1244_v21 = vadd.f32 %v11168_v3, %v10894_v50 }
 0x187   : > { %13812 = vst [vmem:[#allocation27_spill] sm:$0xff] %v11316_v2  ;;  %13815 = vst [vmem:[#allocation28_spill] sm:$0xff] %v11322_v36  ;;  %v2153_v2 = vmax.f32 %v1481_v59, 0.0  ;;  %v11335_v36 = vpop.f32.mrf.mxu0  ;;  %v2441_v59 = vadd.f32 %v11024_v54, %v2291_v56  ;;  %v2449_v15 = vadd.f32 %v11024_v54, %v2299_v25  ;;  %v1487_v56 = vadd.f32 %v11114_v61, %v1230_v20 }
 0x188   : > { %v11337_v46 = vpop.f32.mrf.mxu1  ;;  %v1489_v55 = vadd.f32 %v11128_v48, %v1232_v17  ;;  %v1493_v3 = vadd.f32 %v11137_v52, %v1236_v63  ;;  %v1254_v58 = vadd.f32 %v11193_v43, %v10910_v19  ;;  %v1495_v25 = vadd.f32 %v11149_v22, %v1238_v29 }
 0x189   : > { %13816 = vst [vmem:[#allocation29_spill] sm:$0xff] %v11337_v46  ;;  %v11352_v46 = vpop.f32.mrf.mxu0  ;;  %2713 = vmatmul.mubr.f32.gmra.mxu0 %v2437_v27  ;;  %v2303_v12 = vmul.f32 %v10993_v8, %v2153_v2  ;;  %v1499_v2 = vadd.f32 %v11159_v6, %v1242_v40  ;;  %v1256_v61 = vadd.f32 %v11202_v35, %v10894_v50  ;;  %v2157_v35 = vmax.f32 %v1487_v56, 0.0 }
 0x18a   : > { %v11354_v60 = vpop.f32.mrf.mxu1  ;;  %2717 = vmatprep.mubr.f32.mxu0 %v2442_v24  ;;  %v2450_v52 = vadd.f32 %v11012_v26, %v2300_v51  ;;  %v1501_v17 = vadd.f32 %v11170_v39, %v1244_v21  ;;  %v1505_v4 = vadd.f32 %v11177_v34, %v1248_v14  ;;  %v1260_v43 = vadd.f32 %v11211_v31, %v10910_v19 }
 0x18b   : > { %v11366_v38 = vpop.f32.mrf.mxu0  ;;  %v1262_v22 = vadd.f32 %v11221_v1, %v10894_v50  ;;  %v2453_v6 = vadd.f32 %v11024_v54, %v2303_v12  ;;  %v2158_v57 = vmax.f32 %v1489_v55, 0.0  ;;  %v1266_v63 = vadd.f32 %v11229_v28, %v10910_v19 }
 0x18c   : > { %v11368_v27 = vpop.f32.mrf.mxu1  ;;  %v2304_v39 = vmul.f32 %v10973_v18, %v2154_v47  ;;  %v2161_v34 = vmax.f32 %v1493_v3, 0.0  ;;  %v1507_v31 = vadd.f32 %v11187_v0, %v1250_v45  ;;  %v1511_v51 = vadd.f32 %v11195_v16, %v1254_v58 }
 0x18d   : > { %v11379_v48 = vpop.f32.mrf.mxu0  ;;  %2718 = vmatmul.mubr.f32.gmra.mxu0 %v2441_v59  ;;  %v2162_v1 = vmax.f32 %v1495_v25, 0.0  ;;  %v2165_v29 = vmax.f32 %v1499_v2, 0.0  ;;  %v1513_v40 = vadd.f32 %v11204_v11, %v1256_v61  ;;  %v1268_v21 = vadd.f32 %v11238_v7, %v10894_v50  ;;  %v13817_v11 = vld [vmem:[#allocation18_spill] sm:$0xff]  ;;  %v13818_v7 = vld [vmem:[#allocation20_spill] sm:$0xff] }
 0x18e   : > { %v11381_v20 = vpop.f32.mrf.mxu1  ;;  %2722 = vmatprep.mubr.f32.mxu0 %v2446_v42  ;;  %v2166_v42 = vmax.f32 %v1501_v17, 0.0  ;;  %v2169_v12 = vmax.f32 %v1505_v4, 0.0  ;;  %v1517_v56 = vadd.f32 %v11213_v53, %v1260_v43  ;;  %v1519_v0 = vadd.f32 %v11223_v33, %v1262_v22  ;;  %v13819_v17 = vld [vmem:[#allocation19_spill] sm:$0xff] }
 0x18f   : > { %v11393_v24 = vpop.f32.mrf.mxu0  ;;  %v2307_v16 = vmul.f32 %v10993_v8, %v2157_v35  ;;  %v2308_v55 = vmul.f32 %v10973_v18, %v2158_v57  ;;  %v1523_v47 = vadd.f32 %v13817_v11, %v1266_v63  ;;  %v1272_v3 = vadd.f32 %v13818_v7, %v10910_v19 }
 0x190   : > { %v11395_v59 = vpop.f32.mrf.mxu1  ;;  %v2170_v25 = vmax.f32 %v1507_v31, 0.0  ;;  %v2173_v53 = vmax.f32 %v1511_v51, 0.0  ;;  %v2454_v33 = vadd.f32 %v11012_v26, %v2304_v39  ;;  %v2312_v2 = vmul.f32 %v10973_v18, %v2162_v1  ;;  %v13822_v51 = vld [vmem:[#allocation21_spill] sm:$0xff] }
 0x191   : > { %v11403_v14 = vpop.f32.mrf.mxu0  ;;  %2723 = vmatmul.mubr.f32.gmra.mxu0 %v2445_v62  ;;  %v2311_v62 = vmul.f32 %v10993_v8, %v2161_v34  ;;  %v2315_v61 = vmul.f32 %v10993_v8, %v2165_v29  ;;  %v1525_v4 = vadd.f32 %v13819_v17, %v1268_v21  ;;  %v2316_v35 = vmul.f32 %v10973_v18, %v2166_v42 }
 0x192   : > { %v11405_v28 = vpop.f32.mrf.mxu1  ;;  %2727 = vmatprep.mubr.f32.mxu0 %v2450_v52  ;;  %v2174_v52 = vmax.f32 %v1513_v40, 0.0  ;;  %v2319_v57 = vmul.f32 %v10993_v8, %v2169_v12  ;;  %v2177_v63 = vmax.f32 %v1517_v56, 0.0  ;;  %v2178_v34 = vmax.f32 %v1519_v0, 0.0  ;;  %v13824_v56 = vld [vmem:[#allocation22_spill] sm:$0xff] }
 0x193   : > { %v11414_v45 = vpop.f32.mrf.mxu0  ;;  %v2457_v39 = vadd.f32 %v11024_v54, %v2307_v16  ;;  %v2181_v31 = vmax.f32 %v1523_v47, 0.0  ;;  %v1529_v1 = vadd.f32 %v13822_v51, %v1272_v3  ;;  %v2458_v21 = vadd.f32 %v11012_v26, %v2308_v55 }
 0x194   : > { %v11416_v58 = vpop.f32.mrf.mxu1  ;;  %v2320_v42 = vmul.f32 %v10973_v18, %v2170_v25  ;;  %v2323_v12 = vmul.f32 %v10993_v8, %v2173_v53  ;;  %v1274_v0 = vadd.f32 %v13824_v56, %v10894_v50  ;;  %v11442_v16 = vadd.f32 %v11024_v54, %v2315_v61  ;;  %v13826_v56 = vld [vmem:[#allocation23_spill] sm:$0xff] }
 0x195   : > { %v11423_v43 = vpop.f32.mrf.mxu0  ;;  %2728 = vmatmul.mubr.f32.gmra.mxu0 %v2449_v15  ;;  %v2461_v15 = vadd.f32 %v11024_v54, %v2311_v62  ;;  %v2324_v11 = vmul.f32 %v10973_v18, %v2174_v52  ;;  %v2182_v47 = vmax.f32 %v1525_v4, 0.0  ;;  %v2462_v55 = vadd.f32 %v11012_v26, %v2312_v2  ;;  %v13825_v52 = vld [vmem:[#allocation24_spill] sm:$0xff] }
 0x196   : > { %13820 = vst [vmem:[#allocation30_spill] sm:$0xff] %v11423_v43  ;;  %v11425_v22 = vpop.f32.mrf.mxu1  ;;  %2732 = vmatprep.mubr.f32.mxu0 %v2454_v33  ;;  %v11447_v62 = vadd.f32 %v11024_v54, %v2319_v57  ;;  %v2327_v25 = vmul.f32 %v10993_v8, %v2177_v63  ;;  %v2328_v53 = vmul.f32 %v10973_v18, %v2178_v34  ;;  %v2185_v17 = vmax.f32 %v1529_v1, 0.0 }
 0x197   : > { %13821 = vst [vmem:[#allocation31_spill] sm:$0xff] %v11425_v22  ;;  %v11431_v29 = vpop.f32.mrf.mxu0  ;;  %v2466_v33 = vadd.f32 %v11012_v26, %v2316_v35  ;;  %v2331_v61 = vmul.f32 %v10993_v8, %v2181_v31  ;;  %v1278_v4 = vadd.f32 %v13825_v52, %v10910_v19  ;;  %v11457_v57 = vadd.f32 %v11024_v54, %v2323_v12 }
 0x198   : > { %v11433_v40 = vpop.f32.mrf.mxu1  ;;  %v1531_v63 = vadd.f32 %v13826_v56, %v1274_v0  ;;  %v2332_v35 = vmul.f32 %v10973_v18, %v2182_v47  ;;  %v1280_v31 = vadd.f32 %v11284_v5, %v10894_v50  ;;  %v11469_v12 = vadd.f32 %v11024_v54, %v2327_v25 }
 0x199   : > { %13823 = vst [vmem:[#allocation32_spill] sm:$0xff] %v11433_v40  ;;  %v1641_v7 = vpop.f32.mrf.mxu0  ;;  %2733 = vmatmul.mubr.f32.gmra.mxu0 %v2453_v6  ;;  %v11476_v47 = vadd.f32 %v11024_v54, %v2331_v61  ;;  %v2335_v5 = vmul.f32 %v10993_v8, %v2185_v17 }
 0x19a   : > { %v1898_v3 = vpop.f32.mrf.mxu1  ;;  %2737 = vmatprep.mubr.f32.mxu0 %v2458_v21  ;;  %v1642_v6 = vadd.f32 %v1641_v7, %v11304_v37  ;;  %v2470_v21 = vadd.f32 %v11012_v26, %v2320_v42  ;;  %v11466_v7 = vadd.f32 %v11012_v26, %v2324_v11  ;;  %v11473_v42 = vadd.f32 %v11012_v26, %v2328_v53 }
 0x19b   : > { %v1643_v51 = vpop.f32.mrf.mxu0  ;;  %v2186_v56 = vmax.f32 %v1531_v63, 0.0  ;;  %v1284_v53 = vadd.f32 %v11292_v49, %v10910_v19  ;;  %v1286_v49 = vadd.f32 %v11299_v41, %v10894_v50 }
 0x19c   : > { %v1900_v2 = vpop.f32.mrf.mxu1  ;;  %v1644_v34 = vadd.f32 %v1643_v51, %v11311_v23  ;;  %v1899_v1 = vadd.f32 %v1898_v3, %v1642_v6 }
 0x19d   : > { %v1647_v52 = vpop.f32.mrf.mxu0  ;;  %2738 = vmatmul.mubr.f32.gmra.mxu0 %v2457_v39  ;;  %v1535_v39 = vadd.f32 %v11274_v13, %v1278_v4  ;;  %v11486_v13 = vadd.f32 %v11012_v26, %v2332_v35 }
 0x19e   : > { %v1904_v22 = vpop.f32.mrf.mxu1  ;;  %v1901_v0 = vadd.f32 %v1900_v2, %v1644_v34  ;;  %v1648_v51 = vadd.f32 %v1647_v52, %v11304_v37  ;;  %2742 = vmatprep.mubr.f32.mxu0 %v2462_v55  ;;  %v2091_v3 = vmax.f32 %v1899_v1, 0.0  ;;  %v13827_v34 = vld [vmem:[#allocation25_spill] sm:$0xff] }
 0x19f   : > { %v1649_v11 = vpop.f32.mrf.mxu0  ;;  %v1537_v55 = vadd.f32 %v13827_v34, %v1280_v31  ;;  %v11491_v31 = vadd.f32 %v11024_v54, %v2335_v5  ;;  %v2189_v1 = vmax.f32 %v1535_v39, 0.0  ;;  %v13828_v5 = vld [vmem:[#allocation28_spill] sm:$0xff] }
 0x1a0   : > { %v1906_v6 = vpop.f32.mrf.mxu1  ;;  %v2092_v25 = vmax.f32 %v1901_v0, 0.0  ;;  %v1905_v40 = vadd.f32 %v1904_v22, %v1648_v51  ;;  %v1650_v2 = vadd.f32 %v1649_v11, %v11311_v23  ;;  %v2241_v61 = vmul.f32 %v11319_v9, %v2091_v3 }
 0x1a1   : > { %v1653_v52 = vpop.f32.mrf.mxu0  ;;  %2743 = vmatmul.mubr.f32.gmra.mxu0 %v2461_v15  ;;  %v1290_v15 = vadd.f32 %v11314_v30, %v10910_v19  ;;  %v2336_v51 = vmul.f32 %v10973_v18, %v2186_v56 }
 0x1a2   : > { %v1910_v43 = vpop.f32.mrf.mxu1  ;;  %v2242_v17 = vmul.f32 %v11328_v32, %v2092_v25  ;;  %v2095_v4 = vmax.f32 %v1905_v40, 0.0  ;;  %v1907_v63 = vadd.f32 %v1906_v6, %v1650_v2  ;;  %v1654_v22 = vadd.f32 %v1653_v52, %v11304_v37  ;;  %2747 = vmatprep.mubr.f32.mxu0 %v2466_v33 }
 0x1a3   : > { %v1655_v0 = vpop.f32.mrf.mxu0  ;;  %v2190_v6 = vmax.f32 %v1537_v55, 0.0  ;;  %v1541_v33 = vadd.f32 %v11294_v44, %v1284_v53  ;;  %v2391_v25 = vadd.f32 %v13828_v5, %v2241_v61  ;;  %v13829_v55 = vld [vmem:[#allocation26_spill] sm:$0xff]  ;;  %v13830_v44 = vld [vmem:[#allocation27_spill] sm:$0xff] }
 0x1a4   : > { %v1912_v35 = vpop.f32.mrf.mxu1  ;;  %v2096_v3 = vmax.f32 %v1907_v63, 0.0  ;;  %v1911_v40 = vadd.f32 %v1910_v43, %v1654_v22  ;;  %v1656_v11 = vadd.f32 %v1655_v0, %v11311_v23  ;;  %v2392_v41 = vadd.f32 %v11344_v10, %v2242_v17 }
 0x1a5   : > { %v1659_v39 = vpop.f32.mrf.mxu0  ;;  %2748 = vmatmul.mubr.f32.gmra.mxu0 %v11442_v16  ;;  %v2245_v30 = vmul.f32 %v11319_v9, %v2095_v4  ;;  %v2339_v43 = vmul.f32 %v10993_v8, %v2189_v1  ;;  %v1543_v63 = vadd.f32 %v13829_v55, %v1286_v49  ;;  %v1547_v53 = vadd.f32 %v13830_v44, %v1290_v15 }
 0x1a6   : > { %v1916_v2 = vpop.f32.mrf.mxu1  ;;  %v2246_v34 = vmul.f32 %v11328_v32, %v2096_v3  ;;  %v2099_v56 = vmax.f32 %v1911_v40, 0.0  ;;  %v1913_v52 = vadd.f32 %v1912_v35, %v1656_v11  ;;  %2752 = vmatprep.mubr.f32.mxu0 %v2470_v21  ;;  %v1660_v61 = vadd.f32 %v1659_v39, %v11304_v37  ;;  %2877 = vmatprep.mubr.f32.mxu1 %v2392_v41 }
 0x1a7   : > { %v1661_v22 = vpop.f32.mrf.mxu0  ;;  %2878 = vmatmul.mubr.f32.vlgmr.msra.gmra.mxu1 %v2391_v25  ;;  %v11512_v35 = vadd.f32 %v11012_v26, %v2336_v51  ;;  %v2340_v21 = vmul.f32 %v10973_v18, %v2190_v6  ;;  %v2193_v1 = vmax.f32 %v1541_v33, 0.0  ;;  %v2395_v11 = vadd.f32 %v13828_v5, %v2245_v30 }
 0x1a8   : > { %v1918_v16 = vpop.f32.mrf.mxu1  ;;  %v2100_v0 = vmax.f32 %v1913_v52, 0.0  ;;  %v1662_v17 = vadd.f32 %v1661_v22, %v11311_v23  ;;  %v2396_v4 = vadd.f32 %v11344_v10, %v2246_v34  ;;  %v2249_v49 = vmul.f32 %v11319_v9, %v2099_v56 }
 0x1a9   : > { %v1917_v15 = vadd.f32 %v1916_v2, %v1660_v61  ;;  %v1665_v3 = vpop.f32.mrf.mxu0  ;;  %2753 = vmatmul.mubr.f32.gmra.mxu0 %v11447_v62  ;;  %v2194_v51 = vmax.f32 %v1543_v63, 0.0  ;;  %v2197_v34 = vmax.f32 %v1547_v53, 0.0  ;;  %v1292_v6 = vadd.f32 %v11335_v36, %v10894_v50 }
 0x1aa   : > { %v1922_v40 = vpop.f32.mrf.mxu1  ;;  %v2250_v39 = vmul.f32 %v11328_v32, %v2100_v0  ;;  %v1919_v25 = vadd.f32 %v1918_v16, %v1662_v17  ;;  %v1666_v41 = vadd.f32 %v1665_v3, %v11304_v37  ;;  %2757 = vmatprep.mubr.f32.mxu0 %v11466_v7  ;;  %2882 = vmatprep.mubr.f32.mxu1 %v2396_v4  ;;  %v13831_v4 = vld [vmem:[#allocation29_spill] sm:$0xff] }
 0x1ab   : > { %v2103_v33 = vmax.f32 %v1917_v15, 0.0  ;;  %v1667_v2 = vpop.f32.mrf.mxu0  ;;  %2883 = vmatmul.mubr.f32.gmra.mxu1 %v2395_v11  ;;  %v11526_v44 = vadd.f32 %v11024_v54, %v2339_v43  ;;  %v2343_v7 = vmul.f32 %v10993_v8, %v2193_v1  ;;  %v2399_v63 = vadd.f32 %v13828_v5, %v2249_v49 }
 0x1ac   : > { %v1924_v56 = vpop.f32.mrf.mxu1  ;;  %v2104_v52 = vmax.f32 %v1919_v25, 0.0  ;;  %v1923_v62 = vadd.f32 %v1922_v40, %v1666_v41  ;;  %v1668_v30 = vadd.f32 %v1667_v2, %v11311_v23  ;;  %v2400_v55 = vadd.f32 %v11344_v10, %v2250_v39 }
 0x1ad   : > { %v2253_v36 = vmul.f32 %v11319_v9, %v2103_v33  ;;  %v1671_v53 = vpop.f32.mrf.mxu0  ;;  %2758 = vmatmul.mubr.f32.gmra.mxu0 %v11457_v57  ;;  %v2344_v43 = vmul.f32 %v10973_v18, %v2194_v51  ;;  %v1549_v1 = vadd.f32 %v13831_v4, %v1292_v6  ;;  %v1296_v49 = vadd.f32 %v11352_v46, %v10910_v19 }
 0x1ae   : > { %v1928_v61 = vpop.f32.mrf.mxu1  ;;  %v2254_v22 = vmul.f32 %v11328_v32, %v2104_v52  ;;  %v2107_v16 = vmax.f32 %v1923_v62, 0.0  ;;  %v1925_v0 = vadd.f32 %v1924_v56, %v1668_v30  ;;  %v1672_v17 = vadd.f32 %v1671_v53, %v11304_v37  ;;  %2762 = vmatprep.mubr.f32.mxu0 %v11473_v42  ;;  %2887 = vmatprep.mubr.f32.mxu1 %v2400_v55 }
 0x1af   : > { %v1673_v15 = vpop.f32.mrf.mxu0  ;;  %v11540_v57 = vadd.f32 %v11012_v26, %v2340_v21  ;;  %v2347_v40 = vmul.f32 %v10993_v8, %v2197_v34  ;;  %2888 = vmatmul.mubr.f32.gmra.mxu1 %v2399_v63  ;;  %v11545_v42 = vadd.f32 %v11024_v54, %v2343_v7  ;;  %v1298_v41 = vadd.f32 %v11366_v38, %v10894_v50 }
 0x1b0   : > { %v1930_v3 = vpop.f32.mrf.mxu1  ;;  %v2108_v11 = vmax.f32 %v1925_v0, 0.0  ;;  %v1929_v39 = vadd.f32 %v1928_v61, %v1672_v17  ;;  %v1674_v25 = vadd.f32 %v1673_v15, %v11311_v23  ;;  %v2403_v46 = vadd.f32 %v13828_v5, %v2253_v36 }
 0x1b1   : > { %v1677_v51 = vpop.f32.mrf.mxu0  ;;  %2763 = vmatmul.mubr.f32.gmra.mxu0 %v11469_v12  ;;  %v2404_v21 = vadd.f32 %v11344_v10, %v2254_v22  ;;  %v2257_v34 = vmul.f32 %v11319_v9, %v2107_v16  ;;  %v2198_v52 = vmax.f32 %v1549_v1, 0.0  ;;  %v1553_v62 = vadd.f32 %v11354_v60, %v1296_v49 }
 0x1b2   : > { %v1934_v6 = vpop.f32.mrf.mxu1  ;;  %v2258_v33 = vmul.f32 %v11328_v32, %v2108_v11  ;;  %v2111_v2 = vmax.f32 %v1929_v39, 0.0  ;;  %v1931_v56 = vadd.f32 %v1930_v3, %v1674_v25  ;;  %2767 = vmatprep.mubr.f32.mxu0 %v11486_v13  ;;  %v1678_v38 = vadd.f32 %v1677_v51, %v11304_v37 }
 0x1b3   : > { %2892 = vmatprep.mubr.f32.mxu1 %v2404_v21  ;;  %v1679_v30 = vpop.f32.mrf.mxu0  ;;  %v11558_v12 = vadd.f32 %v11012_v26, %v2344_v43  ;;  %v11561_v7 = vadd.f32 %v11024_v54, %v2347_v40  ;;  %v1555_v53 = vadd.f32 %v11368_v27, %v1298_v41  ;;  %v1304_v60 = vadd.f32 %v11393_v24, %v10894_v50 }
 0x1b4   : > { %v1936_v55 = vpop.f32.mrf.mxu1  ;;  %v2112_v63 = vmax.f32 %v1931_v56, 0.0  ;;  %v1680_v36 = vadd.f32 %v1679_v30, %v11311_v23  ;;  %2893 = vmatmul.mubr.f32.gmra.mxu1 %v2403_v46  ;;  %v2408_v13 = vadd.f32 %v11344_v10, %v2258_v33  ;;  %v2261_v61 = vmul.f32 %v11319_v9, %v2111_v2 }
 0x1b5   : > { %v1935_v22 = vadd.f32 %v1934_v6, %v1678_v38  ;;  %v1683_v16 = vpop.f32.mrf.mxu0  ;;  %2768 = vmatmul.mubr.f32.gmra.mxu0 %v11476_v47  ;;  %v2407_v17 = vadd.f32 %v13828_v5, %v2257_v34  ;;  %v2348_v27 = vmul.f32 %v10973_v18, %v2198_v52  ;;  %v2201_v49 = vmax.f32 %v1553_v62, 0.0 }
 0x1b6   : > { %v1940_v0 = vpop.f32.mrf.mxu1  ;;  %v2262_v43 = vmul.f32 %v11328_v32, %v2112_v63  ;;  %v1937_v4 = vadd.f32 %v1936_v55, %v1680_v36  ;;  %v1684_v1 = vadd.f32 %v1683_v16, %v11304_v37  ;;  %2772 = vmatprep.mubr.f32.mxu0 %v11512_v35  ;;  %v1302_v24 = vadd.f32 %v11379_v48, %v10910_v19 }
 0x1b7   : > { %v2115_v15 = vmax.f32 %v1935_v22, 0.0  ;;  %2897 = vmatprep.mubr.f32.mxu1 %v2408_v13  ;;  %v1685_v3 = vpop.f32.mrf.mxu0  ;;  %v2202_v41 = vmax.f32 %v1555_v53, 0.0  ;;  %v1561_v35 = vadd.f32 %v11395_v59, %v1304_v60  ;;  %v2411_v46 = vadd.f32 %v13828_v5, %v2261_v61 }
 0x1b8   : > { %v1942_v40 = vpop.f32.mrf.mxu1  ;;  %v2116_v47 = vmax.f32 %v1937_v4, 0.0  ;;  %v1941_v11 = vadd.f32 %v1940_v0, %v1684_v1  ;;  %v1686_v39 = vadd.f32 %v1685_v3, %v11311_v23  ;;  %2898 = vmatmul.mubr.f32.gmra.mxu1 %v2407_v17  ;;  %v2412_v25 = vadd.f32 %v11344_v10, %v2262_v43 }
 0x1b9   : > { %v2265_v51 = vmul.f32 %v11319_v9, %v2115_v15  ;;  %v1689_v6 = vpop.f32.mrf.mxu0  ;;  %2773 = vmatmul.mubr.f32.gmra.mxu0 %v11491_v31  ;;  %v2351_v56 = vmul.f32 %v10993_v8, %v2201_v49  ;;  %v1559_v59 = vadd.f32 %v11381_v20, %v1302_v24  ;;  %v1310_v52 = vadd.f32 %v11414_v45, %v10894_v50 }
 0x1ba   : > { %v1946_v48 = vpop.f32.mrf.mxu1  ;;  %v2266_v21 = vmul.f32 %v11328_v32, %v2116_v47  ;;  %v2119_v34 = vmax.f32 %v1941_v11, 0.0  ;;  %v1943_v33 = vadd.f32 %v1942_v40, %v1686_v39  ;;  %v1690_v2 = vadd.f32 %v1689_v6, %v11304_v37  ;;  %2777 = vmatprep.mubr.f32.mxu0 %v11540_v57  ;;  %2902 = vmatprep.mubr.f32.mxu1 %v2412_v25 }
 0x1bb   : > { %v1691_v62 = vpop.f32.mrf.mxu0  ;;  %v2498_v31 = vadd.f32 %v11012_v26, %v2348_v27  ;;  %v1308_v30 = vadd.f32 %v11403_v14, %v10910_v19  ;;  %v2352_v57 = vmul.f32 %v10973_v18, %v2202_v41  ;;  %v2206_v13 = vmax.f32 %v1561_v35, 0.0  ;;  %v13832_v41 = vld [vmem:[#allocation30_spill] sm:$0xff] }
 0x1bc   : > { %v1948_v38 = vpop.f32.mrf.mxu1  ;;  %v2120_v55 = vmax.f32 %v1943_v33, 0.0  ;;  %v1947_v63 = vadd.f32 %v1946_v48, %v1690_v2  ;;  %v1692_v36 = vadd.f32 %v1691_v62, %v11311_v23  ;;  %2903 = vmatmul.mubr.f32.gmra.mxu1 %v2411_v46  ;;  %v2415_v20 = vadd.f32 %v13828_v5, %v2265_v51  ;;  %v13833_v46 = vld [vmem:[#allocation32_spill] sm:$0xff] }
 0x1bd   : > { %v1695_v53 = vpop.f32.mrf.mxu0  ;;  %2778 = vmatmul.mubr.f32.gmra.mxu0 %v11526_v44  ;;  %v2416_v45 = vadd.f32 %v11344_v10, %v2266_v21  ;;  %v2269_v61 = vmul.f32 %v11319_v9, %v2119_v34  ;;  %v2205_v0 = vmax.f32 %v1559_v59, 0.0  ;;  %v1567_v17 = vadd.f32 %v11416_v58, %v1310_v52 }
 0x1be   : > { %v1952_v60 = vpop.f32.mrf.mxu1  ;;  %v2270_v14 = vmul.f32 %v11328_v32, %v2120_v55  ;;  %v2123_v22 = vmax.f32 %v1947_v63, 0.0  ;;  %v1949_v16 = vadd.f32 %v1948_v38, %v1692_v36  ;;  %2782 = vmatprep.mubr.f32.mxu0 %v11558_v12  ;;  %v1316_v43 = vadd.f32 %v11431_v29, %v10894_v50 }
 0x1bf   : > { %v1696_v4 = vadd.f32 %v1695_v53, %v11304_v37  ;;  %2907 = vmatprep.mubr.f32.mxu1 %v2416_v45  ;;  %v1697_v44 = vpop.f32.mrf.mxu0  ;;  %v11606_v27 = vadd.f32 %v11405_v28, %v1308_v30  ;;  %v2356_v15 = vmul.f32 %v10973_v18, %v2206_v13  ;;  %v2502_v40 = vadd.f32 %v11012_v26, %v2352_v57  ;;  %v13834_v57 = vld [vmem:[#allocation31_spill] sm:$0xff] }
 0x1c0   : > { %v1954_v1 = vpop.f32.mrf.mxu1  ;;  %v2124_v49 = vmax.f32 %v1949_v16, 0.0  ;;  %v1698_v24 = vadd.f32 %v1697_v44, %v11311_v23  ;;  %2908 = vmatmul.mubr.f32.gmra.mxu1 %v2415_v20  ;;  %v2420_v12 = vadd.f32 %v11344_v10, %v2270_v14  ;;  %v2273_v58 = vmul.f32 %v11319_v9, %v2123_v22 }
 0x1c1   : > { %v1953_v3 = vadd.f32 %v1952_v60, %v1696_v4  ;;  %v1701_v50 = vpop.f32.mrf.mxu0  ;;  %2783 = vmatmul.mubr.f32.gmra.mxu0 %v11545_v42  ;;  %v2419_v28 = vadd.f32 %v13828_v5, %v2269_v61  ;;  %v2210_v25 = vmax.f32 %v1567_v17, 0.0  ;;  %v1314_v35 = vadd.f32 %v13832_v41, %v10910_v19 }
 0x1c2   : > { %v1958_v29 = vpop.f32.mrf.mxu1  ;;  %v2274_v47 = vmul.f32 %v11328_v32, %v2124_v49  ;;  %v1955_v11 = vadd.f32 %v1954_v1, %v1698_v24  ;;  %v1702_v39 = vadd.f32 %v1701_v50, %v11304_v37  ;;  %2787 = vmatprep.mubr.f32.mxu0 %v2498_v31  ;;  %v1573_v51 = vadd.f32 %v13833_v46, %v1316_v43 }
 0x1c3   : > { %v2127_v6 = vmax.f32 %v1953_v3, 0.0  ;;  %2912 = vmatprep.mubr.f32.mxu1 %v2420_v12  ;;  %v1703_v48 = vpop.f32.mrf.mxu0  ;;  %v2501_v59 = vadd.f32 %v11024_v54, %v2351_v56  ;;  %v2355_v52 = vmul.f32 %v10993_v8, %v2205_v0  ;;  %v2423_v62 = vadd.f32 %v13828_v5, %v2273_v58 }
 0x1c4   : > { %v1960_v42 = vpop.f32.mrf.mxu1  ;;  %v2128_v21 = vmax.f32 %v1955_v11, 0.0  ;;  %v1959_v34 = vadd.f32 %v1958_v29, %v1702_v39  ;;  %v1704_v33 = vadd.f32 %v1703_v48, %v11311_v23  ;;  %2913 = vmatmul.mubr.f32.gmra.mxu1 %v2419_v28  ;;  %v2424_v2 = vadd.f32 %v11344_v10, %v2274_v47 }
 0x1c5   : > { %v2277_v19 = vmul.f32 %v11319_v9, %v2127_v6  ;;  %v1707_v38 = vpop.f32.mrf.mxu0  ;;  %2788 = vmatmul.mubr.f32.gmra.mxu0 %v11561_v7  ;;  %v2209_v56 = vmax.f32 %v11606_v27, 0.0  ;;  %v1571_v13 = vadd.f32 %v13834_v57, %v1314_v35  ;;  %v2214_v20 = vmax.f32 %v1573_v51, 0.0 }
 0x1c6   : > { %v1964_v31 = vpop.f32.mrf.mxu1  ;;  %v2278_v30 = vmul.f32 %v11328_v32, %v2128_v21  ;;  %v2131_v55 = vmax.f32 %v1959_v34, 0.0  ;;  %v1961_v63 = vadd.f32 %v1960_v42, %v1704_v33  ;;  %v1708_v36 = vadd.f32 %v1707_v38, %v11304_v37  ;;  %2792 = vmatprep.mubr.f32.mxu0 %v2502_v40  ;;  %2917 = vmatprep.mubr.f32.mxu1 %v2424_v2 }
 0x1c7   : > { %v1709_v53 = vpop.f32.mrf.mxu0  ;;  %v2506_v45 = vadd.f32 %v11012_v26, %v2356_v15  ;;  %v2360_v61 = vmul.f32 %v10973_v18, %v2210_v25  ;;  %v2505_v16 = vadd.f32 %v11024_v54, %v2355_v52  ;;  %v2427_v0 = vadd.f32 %v13828_v5, %v2277_v19 }
 0x1c8   : > { %v1966_v60 = vpop.f32.mrf.mxu1  ;;  %v2132_v7 = vmax.f32 %v1961_v63, 0.0  ;;  %v1965_v14 = vadd.f32 %v1964_v31, %v1708_v36  ;;  %v1710_v22 = vadd.f32 %v1709_v53, %v11311_v23  ;;  %2918 = vmatmul.mubr.f32.gmra.mxu1 %v2423_v62  ;;  %v2428_v4 = vadd.f32 %v11344_v10, %v2278_v30 }
 0x1c9   : > { %v1713_v17 = vpop.f32.mrf.mxu0  ;;  %2793 = vmatmul.mubr.f32.gmra.mxu0 %v2501_v59  ;;  %v2281_v44 = vmul.f32 %v11319_v9, %v2131_v55  ;;  %v2359_v24 = vmul.f32 %v10993_v8, %v2209_v56  ;;  %v2213_v12 = vmax.f32 %v1571_v13, 0.0  ;;  %v2364_v15 = vmul.f32 %v10973_v18, %v2214_v20 }
 0x1ca   : > { %v1970_v43 = vpop.f32.mrf.mxu1  ;;  %v2282_v1 = vmul.f32 %v11328_v32, %v2132_v7  ;;  %v2135_v27 = vmax.f32 %v1965_v14, 0.0  ;;  %v1967_v49 = vadd.f32 %v1966_v60, %v1710_v22  ;;  %2797 = vmatprep.mubr.f32.mxu0 %v2506_v45  ;;  %v1714_v58 = vadd.f32 %v1713_v17, %v11304_v37  ;;  %2922 = vmatprep.mubr.f32.mxu1 %v2428_v4 }
 0x1cb   : > { %v1715_v3 = vpop.f32.mrf.mxu0  ;;  %v2510_v28 = vadd.f32 %v11012_v26, %v2360_v61  ;;  %v2431_v18 = vadd.f32 %v13828_v5, %v2281_v44  ;;  %v2509_v6 = vadd.f32 %v11024_v54, %v2359_v24  ;;  %v2363_v48 = vmul.f32 %v10993_v8, %v2213_v12 }
 0x1cc   : > { %v1972_v50 = vpop.f32.mrf.mxu1  ;;  %v2136_v29 = vmax.f32 %v1967_v49, 0.0  ;;  %v1716_v40 = vadd.f32 %v1715_v3, %v11311_v23  ;;  %2923 = vmatmul.mubr.f32.gmra.mxu1 %v2427_v0  ;;  %v2432_v47 = vadd.f32 %v11344_v10, %v2282_v1  ;;  %v2285_v11 = vmul.f32 %v11319_v9, %v2135_v27 }
 0x1cd   : > { %v1971_v39 = vadd.f32 %v1970_v43, %v1714_v58  ;;  %v1719_v25 = vpop.f32.mrf.mxu0  ;;  %2798 = vmatmul.mubr.f32.gmra.mxu0 %v2505_v16  ;;  %v2514_v33 = vadd.f32 %v11012_v26, %v2364_v15  ;;  %v2513_v36 = vadd.f32 %v11024_v54, %v2363_v48 }
 0x1ce   : > { %v1976_v41 = vpop.f32.mrf.mxu1  ;;  %v2286_v35 = vmul.f32 %v11328_v32, %v2136_v29  ;;  %v1973_v46 = vadd.f32 %v1972_v50, %v1716_v40  ;;  %v1720_v51 = vadd.f32 %v1719_v25, %v11304_v37  ;;  %2802 = vmatprep.mubr.f32.mxu0 %v2510_v28  ;;  %2927 = vmatprep.mubr.f32.mxu1 %v2432_v47 }
 0x1cf   : > { %v2139_v42 = vmax.f32 %v1971_v39, 0.0  ;;  %v1721_v21 = vpop.f32.mrf.mxu0  ;;  %v2435_v19 = vadd.f32 %v13828_v5, %v2285_v11 }
 0x1d0   : > { %v1978_v34 = vpop.f32.mrf.mxu1  ;;  %v2140_v2 = vmax.f32 %v1973_v46, 0.0  ;;  %v1977_v59 = vadd.f32 %v1976_v41, %v1720_v51  ;;  %v1722_v52 = vadd.f32 %v1721_v21, %v11311_v23  ;;  %2928 = vmatmul.mubr.f32.gmra.mxu1 %v2431_v18  ;;  %v2436_v62 = vadd.f32 %v11344_v10, %v2286_v35 }
 0x1d1   : > { %v2289_v38 = vmul.f32 %v11319_v9, %v2139_v42  ;;  %v1725_v31 = vpop.f32.mrf.mxu0  ;;  %2803 = vmatmul.mubr.f32.gmra.mxu0 %v2509_v6 }
 0x1d2   : > { %v1982_v30 = vpop.f32.mrf.mxu1  ;;  %v2290_v8 = vmul.f32 %v11328_v32, %v2140_v2  ;;  %v2143_v55 = vmax.f32 %v1977_v59, 0.0  ;;  %v1979_v63 = vadd.f32 %v1978_v34, %v1722_v52  ;;  %v1726_v26 = vadd.f32 %v1725_v31, %v11304_v37  ;;  %2807 = vmatprep.mubr.f32.mxu0 %v2514_v33  ;;  %2932 = vmatprep.mubr.f32.mxu1 %v2436_v62 }
 0x1d3   : > { %v1727_v56 = vpop.f32.mrf.mxu0  ;;  %v2439_v60 = vadd.f32 %v13828_v5, %v2289_v38 }
 0x1d4   : > { %v1984_v57 = vpop.f32.mrf.mxu1  ;;  %v2144_v13 = vmax.f32 %v1979_v63, 0.0  ;;  %v1983_v20 = vadd.f32 %v1982_v30, %v1726_v26  ;;  %v1728_v53 = vadd.f32 %v1727_v56, %v11311_v23  ;;  %2933 = vmatmul.mubr.f32.gmra.mxu1 %v2435_v19  ;;  %v2440_v7 = vadd.f32 %v11344_v10, %v2290_v8 }
 0x1d5   : > { %v1731_v45 = vpop.f32.mrf.mxu0  ;;  %2808 = vmatmul.mubr.f32.gmra.mxu0 %v2513_v36  ;;  %v2293_v14 = vmul.f32 %v11319_v9, %v2143_v55 }
 0x1d6   : > { %v1988_v61 = vpop.f32.mrf.mxu1  ;;  %v2294_v22 = vmul.f32 %v11328_v32, %v2144_v13  ;;  %v2147_v16 = vmax.f32 %v1983_v20, 0.0  ;;  %v1985_v54 = vadd.f32 %v1984_v57, %v1728_v53  ;;  %v1732_v0 = vadd.f32 %v1731_v45, %v11304_v37  ;;  %2937 = vmatprep.mubr.f32.mxu1 %v2440_v7 }
 0x1d7   : > { %v1733_v17 = vpop.f32.mrf.mxu0  ;;  %v2443_v15 = vadd.f32 %v13828_v5, %v2293_v14 }
 0x1d8   : > { %v1990_v43 = vpop.f32.mrf.mxu1  ;;  %v2148_v4 = vmax.f32 %v1985_v54, 0.0  ;;  %v1734_v44 = vadd.f32 %v1733_v17, %v11311_v23  ;;  %2938 = vmatmul.mubr.f32.gmra.mxu1 %v2439_v60  ;;  %v2444_v1 = vadd.f32 %v11344_v10, %v2294_v22  ;;  %v2297_v27 = vmul.f32 %v11319_v9, %v2147_v16 }
 0x1d9   : > { %v1989_v49 = vadd.f32 %v1988_v61, %v1732_v0  ;;  %v1737_v24 = vpop.f32.mrf.mxu0 }
 0x1da   : > { %v1994_v12 = vpop.f32.mrf.mxu1  ;;  %v2298_v58 = vmul.f32 %v11328_v32, %v2148_v4  ;;  %v1991_v3 = vadd.f32 %v1990_v43, %v1734_v44  ;;  %v1738_v50 = vadd.f32 %v1737_v24, %v11304_v37  ;;  %2942 = vmatprep.mubr.f32.mxu1 %v2444_v1  ;;  %v2447_v41 = vadd.f32 %v13828_v5, %v2297_v27 }
 0x1db   : > { %v2151_v29 = vmax.f32 %v1989_v49, 0.0  ;;  %v1739_v40 = vpop.f32.mrf.mxu0 }
 0x1dc   : > { %v1996_v28 = vpop.f32.mrf.mxu1  ;;  %v2152_v47 = vmax.f32 %v1991_v3, 0.0  ;;  %v1995_v11 = vadd.f32 %v1994_v12, %v1738_v50  ;;  %v1740_v39 = vadd.f32 %v1739_v40, %v11311_v23  ;;  %2943 = vmatmul.mubr.f32.gmra.mxu1 %v2443_v15  ;;  %v2448_v25 = vadd.f32 %v11344_v10, %v2298_v58 }
 0x1dd   : > { %v2301_v18 = vmul.f32 %v11319_v9, %v2151_v29  ;;  %v1743_v35 = vpop.f32.mrf.mxu0 }
 0x1de   : > { %v2000_v46 = vpop.f32.mrf.mxu1  ;;  %v2302_v51 = vmul.f32 %v11328_v32, %v2152_v47  ;;  %v2155_v6 = vmax.f32 %v1995_v11, 0.0  ;;  %v1997_v48 = vadd.f32 %v1996_v28, %v1740_v39  ;;  %v1744_v42 = vadd.f32 %v1743_v35, %v11304_v37  ;;  %2947 = vmatprep.mubr.f32.mxu1 %v2448_v25 }
 0x1df   : > { %v1745_v21 = vpop.f32.mrf.mxu0  ;;  %v2451_v52 = vadd.f32 %v13828_v5, %v2301_v18 }
 0x1e0   : > { %v2002_v34 = vpop.f32.mrf.mxu1  ;;  %v2156_v33 = vmax.f32 %v1997_v48, 0.0  ;;  %v2001_v2 = vadd.f32 %v2000_v46, %v1744_v42  ;;  %v1746_v59 = vadd.f32 %v1745_v21, %v11311_v23  ;;  %2948 = vmatmul.mubr.f32.gmra.mxu1 %v2447_v41  ;;  %v2452_v38 = vadd.f32 %v11344_v10, %v2302_v51 }
 0x1e1   : > { %v1749_v62 = vpop.f32.mrf.mxu0  ;;  %v2305_v31 = vmul.f32 %v11319_v9, %v2155_v6 }
 0x1e2   : > { %v2006_v19 = vpop.f32.mrf.mxu1  ;;  %v2306_v30 = vmul.f32 %v11328_v32, %v2156_v33  ;;  %v2159_v8 = vmax.f32 %v2001_v2, 0.0  ;;  %v2003_v55 = vadd.f32 %v2002_v34, %v1746_v59  ;;  %v1750_v63 = vadd.f32 %v1749_v62, %v11304_v37  ;;  %2952 = vmatprep.mubr.f32.mxu1 %v2452_v38 }
 0x1e3   : > { %v1751_v26 = vpop.f32.mrf.mxu0  ;;  %v2455_v61 = vadd.f32 %v13828_v5, %v2305_v31 }
 0x1e4   : > { %v2008_v36 = vpop.f32.mrf.mxu1  ;;  %v2160_v56 = vmax.f32 %v2003_v55, 0.0  ;;  %v1752_v57 = vadd.f32 %v1751_v26, %v11311_v23  ;;  %2953 = vmatmul.mubr.f32.gmra.mxu1 %v2451_v52  ;;  %v2456_v13 = vadd.f32 %v11344_v10, %v2306_v30  ;;  %v2309_v20 = vmul.f32 %v11319_v9, %v2159_v8 }
 0x1e5   : > { %v2007_v53 = vadd.f32 %v2006_v19, %v1750_v63  ;;  %v1755_v60 = vpop.f32.mrf.mxu0 }
 0x1e6   : > { %v2012_v45 = vpop.f32.mrf.mxu1  ;;  %v2310_v7 = vmul.f32 %v11328_v32, %v2160_v56  ;;  %v2009_v14 = vadd.f32 %v2008_v36, %v1752_v57  ;;  %v1756_v22 = vadd.f32 %v1755_v60, %v11304_v37  ;;  %2957 = vmatprep.mubr.f32.mxu1 %v2456_v13  ;;  %v2459_v1 = vadd.f32 %v13828_v5, %v2309_v20 }
 0x1e7   : > { %v2163_v16 = vmax.f32 %v2007_v53, 0.0  ;;  %v1757_v54 = vpop.f32.mrf.mxu0 }
 0x1e8   : > { %v2014_v0 = vpop.f32.mrf.mxu1  ;;  %v2164_v17 = vmax.f32 %v2009_v14, 0.0  ;;  %v2013_v43 = vadd.f32 %v2012_v45, %v1756_v22  ;;  %v1758_v4 = vadd.f32 %v1757_v54, %v11311_v23  ;;  %2958 = vmatmul.mubr.f32.gmra.mxu1 %v2455_v61  ;;  %v2460_v44 = vadd.f32 %v11344_v10, %v2310_v7 }
 0x1e9   : > { %v2313_v27 = vmul.f32 %v11319_v9, %v2163_v16  ;;  %v1761_v49 = vpop.f32.mrf.mxu0 }
 0x1ea   : > { %v2018_v24 = vpop.f32.mrf.mxu1  ;;  %v2314_v12 = vmul.f32 %v11328_v32, %v2164_v17  ;;  %v2167_v15 = vmax.f32 %v2013_v43, 0.0  ;;  %v2015_v58 = vadd.f32 %v2014_v0, %v1758_v4  ;;  %v1762_v3 = vadd.f32 %v1761_v49, %v11304_v37  ;;  %2962 = vmatprep.mubr.f32.mxu1 %v2460_v44 }
 0x1eb   : > { %v1763_v50 = vpop.f32.mrf.mxu0  ;;  %v2463_v11 = vadd.f32 %v13828_v5, %v2313_v27 }
 0x1ec   : > { %v2020_v29 = vpop.f32.mrf.mxu1  ;;  %v2168_v40 = vmax.f32 %v2015_v58, 0.0  ;;  %v2019_v28 = vadd.f32 %v2018_v24, %v1762_v3  ;;  %v1764_v47 = vadd.f32 %v1763_v50, %v11311_v23  ;;  %2963 = vmatmul.mubr.f32.gmra.mxu1 %v2459_v1  ;;  %v2464_v41 = vadd.f32 %v11344_v10, %v2314_v12 }
 0x1ed   : > { %v1767_v39 = vpop.f32.mrf.mxu0  ;;  %v2317_v18 = vmul.f32 %v11319_v9, %v2167_v15 }
 0x1ee   : > { %v2024_v25 = vpop.f32.mrf.mxu1  ;;  %v2318_v35 = vmul.f32 %v11328_v32, %v2168_v40  ;;  %v2171_v46 = vmax.f32 %v2019_v28, 0.0  ;;  %v2021_v51 = vadd.f32 %v2020_v29, %v1764_v47  ;;  %v1768_v6 = vadd.f32 %v1767_v39, %v11304_v37  ;;  %2967 = vmatprep.mubr.f32.mxu1 %v2464_v41 }
 0x1ef   : > { %v1769_v48 = vpop.f32.mrf.mxu0  ;;  %v2467_v19 = vadd.f32 %v13828_v5, %v2317_v18 }
 0x1f0   : > { %v2026_v42 = vpop.f32.mrf.mxu1  ;;  %v2172_v21 = vmax.f32 %v2021_v51, 0.0  ;;  %v1770_v34 = vadd.f32 %v1769_v48, %v11311_v23  ;;  %2968 = vmatmul.mubr.f32.gmra.mxu1 %v2463_v11  ;;  %v2468_v33 = vadd.f32 %v11344_v10, %v2318_v35  ;;  %v2321_v2 = vmul.f32 %v11319_v9, %v2171_v46 }
 0x1f1   : > { %v2025_v59 = vadd.f32 %v2024_v25, %v1768_v6  ;;  %v1773_v52 = vpop.f32.mrf.mxu0 }
 0x1f2   : > { %v2030_v62 = vpop.f32.mrf.mxu1  ;;  %v2322_v38 = vmul.f32 %v11328_v32, %v2172_v21  ;;  %v2027_v31 = vadd.f32 %v2026_v42, %v1770_v34  ;;  %v1774_v30 = vadd.f32 %v1773_v52, %v11304_v37  ;;  %2972 = vmatprep.mubr.f32.mxu1 %v2468_v33  ;;  %v2471_v13 = vadd.f32 %v13828_v5, %v2321_v2 }
 0x1f3   : > { %v2175_v8 = vmax.f32 %v2025_v59, 0.0  ;;  %v1775_v55 = vpop.f32.mrf.mxu0 }
 0x1f4   : > { %v2032_v63 = vpop.f32.mrf.mxu1  ;;  %v2176_v26 = vmax.f32 %v2027_v31, 0.0  ;;  %v2031_v36 = vadd.f32 %v2030_v62, %v1774_v30  ;;  %v1776_v56 = vadd.f32 %v1775_v55, %v11311_v23  ;;  %2973 = vmatmul.mubr.f32.gmra.mxu1 %v2467_v19  ;;  %v2472_v57 = vadd.f32 %v11344_v10, %v2322_v38 }
 0x1f5   : > { %v2325_v20 = vmul.f32 %v11319_v9, %v2175_v8  ;;  %v1779_v53 = vpop.f32.mrf.mxu0 }
 0x1f6   : > { %v2036_v60 = vpop.f32.mrf.mxu1  ;;  %v2326_v45 = vmul.f32 %v11328_v32, %v2176_v26  ;;  %v2179_v61 = vmax.f32 %v2031_v36, 0.0  ;;  %v2033_v7 = vadd.f32 %v2032_v63, %v1776_v56  ;;  %v1780_v14 = vadd.f32 %v1779_v53, %v11304_v37  ;;  %2977 = vmatprep.mubr.f32.mxu1 %v2472_v57 }
 0x1f7   : > { %v1781_v22 = vpop.f32.mrf.mxu0  ;;  %v2475_v43 = vadd.f32 %v13828_v5, %v2325_v20 }
 0x1f8   : > { %v2038_v16 = vpop.f32.mrf.mxu1  ;;  %v2180_v54 = vmax.f32 %v2033_v7, 0.0  ;;  %v2037_v0 = vadd.f32 %v2036_v60, %v1780_v14  ;;  %v1782_v17 = vadd.f32 %v1781_v22, %v11311_v23  ;;  %2978 = vmatmul.mubr.f32.gmra.mxu1 %v2471_v13  ;;  %v2476_v1 = vadd.f32 %v11344_v10, %v2326_v45 }
 0x1f9   : > { %v1785_v4 = vpop.f32.mrf.mxu0  ;;  %v2329_v27 = vmul.f32 %v11319_v9, %v2179_v61 }
 0x1fa   : > { %v2042_v44 = vpop.f32.mrf.mxu1  ;;  %v2330_v49 = vmul.f32 %v11328_v32, %v2180_v54  ;;  %v2183_v24 = vmax.f32 %v2037_v0, 0.0  ;;  %v2039_v12 = vadd.f32 %v2038_v16, %v1782_v17  ;;  %v1786_v15 = vadd.f32 %v1785_v4, %v11304_v37  ;;  %2982 = vmatprep.mubr.f32.mxu1 %v2476_v1 }
 0x1fb   : > { %v1787_v58 = vpop.f32.mrf.mxu0  ;;  %v2479_v25 = vadd.f32 %v13828_v5, %v2329_v27 }
 0x1fc   : > { %v2044_v3 = vpop.f32.mrf.mxu1  ;;  %v2184_v50 = vmax.f32 %v2039_v12, 0.0  ;;  %v1788_v29 = vadd.f32 %v1787_v58, %v11311_v23  ;;  %2983 = vmatmul.mubr.f32.gmra.mxu1 %v2475_v43  ;;  %v2480_v40 = vadd.f32 %v11344_v10, %v2330_v49  ;;  %v2333_v28 = vmul.f32 %v11319_v9, %v2183_v24 }
 0x1fd   : > { %v2043_v47 = vadd.f32 %v2042_v44, %v1786_v15  ;;  %v1791_v11 = vpop.f32.mrf.mxu0 }
 0x1fe   : > { %v2048_v39 = vpop.f32.mrf.mxu1  ;;  %v2334_v41 = vmul.f32 %v11328_v32, %v2184_v50  ;;  %v2045_v18 = vadd.f32 %v2044_v3, %v1788_v29  ;;  %v1792_v35 = vadd.f32 %v1791_v11, %v11304_v37  ;;  %2987 = vmatprep.mubr.f32.mxu1 %v2480_v40  ;;  %v2483_v33 = vadd.f32 %v13828_v5, %v2333_v28 }
 0x1ff   : > { %v2187_v46 = vmax.f32 %v2043_v47, 0.0  ;;  %v1793_v51 = vpop.f32.mrf.mxu0 }
 0x200   : > { %v2050_v6 = vpop.f32.mrf.mxu1  ;;  %v2188_v48 = vmax.f32 %v2045_v18, 0.0  ;;  %v2049_v42 = vadd.f32 %v2048_v39, %v1792_v35  ;;  %v1794_v21 = vadd.f32 %v1793_v51, %v11311_v23  ;;  %2988 = vmatmul.mubr.f32.gmra.mxu1 %v2479_v25  ;;  %v2484_v34 = vadd.f32 %v11344_v10, %v2334_v41 }
 0x201   : > { %v2337_v2 = vmul.f32 %v11319_v9, %v2187_v46  ;;  %v1797_v59 = vpop.f32.mrf.mxu0 }
 0x202   : > { %v2054_v52 = vpop.f32.mrf.mxu1  ;;  %v2338_v62 = vmul.f32 %v11328_v32, %v2188_v48  ;;  %v2191_v19 = vmax.f32 %v2049_v42, 0.0  ;;  %v2051_v38 = vadd.f32 %v2050_v6, %v1794_v21  ;;  %v1798_v31 = vadd.f32 %v1797_v59, %v11304_v37  ;;  %2992 = vmatprep.mubr.f32.mxu1 %v2484_v34 }
 0x203   : > { %v1799_v30 = vpop.f32.mrf.mxu0  ;;  %v2487_v36 = vadd.f32 %v13828_v5, %v2337_v2 }
 0x204   : > { %v2056_v8 = vpop.f32.mrf.mxu1  ;;  %v2192_v55 = vmax.f32 %v2051_v38, 0.0  ;;  %v2055_v63 = vadd.f32 %v2054_v52, %v1798_v31  ;;  %v1800_v26 = vadd.f32 %v1799_v30, %v11311_v23  ;;  %2993 = vmatmul.mubr.f32.gmra.mxu1 %v2483_v33  ;;  %v2488_v13 = vadd.f32 %v11344_v10, %v2338_v62 }
 0x205   : > { %v1803_v56 = vpop.f32.mrf.mxu0  ;;  %v2341_v20 = vmul.f32 %v11319_v9, %v2191_v19 }
 0x206   : > { %v2060_v57 = vpop.f32.mrf.mxu1  ;;  %v2342_v53 = vmul.f32 %v11328_v32, %v2192_v55  ;;  %v2195_v60 = vmax.f32 %v2055_v63, 0.0  ;;  %v2057_v45 = vadd.f32 %v2056_v8, %v1800_v26  ;;  %v1804_v61 = vadd.f32 %v1803_v56, %v11304_v37  ;;  %2997 = vmatprep.mubr.f32.mxu1 %v2488_v13 }
 0x207   : > { %v1805_v7 = vpop.f32.mrf.mxu0  ;;  %v2491_v44 = vadd.f32 %v13828_v5, %v2341_v20 }
 0x208   : > { %v2062_v14 = vpop.f32.mrf.mxu1  ;;  %v2196_v22 = vmax.f32 %v2057_v45, 0.0  ;;  %v1806_v16 = vadd.f32 %v1805_v7, %v11311_v23  ;;  %2998 = vmatmul.mubr.f32.gmra.mxu1 %v2487_v36  ;;  %v2492_v54 = vadd.f32 %v11344_v10, %v2342_v53  ;;  %v2345_v0 = vmul.f32 %v11319_v9, %v2195_v60 }
 0x209   : > { %v2061_v17 = vadd.f32 %v2060_v57, %v1804_v61  ;;  %v1809_v43 = vpop.f32.mrf.mxu0 }
 0x20a   : > { %v2066_v4 = vpop.f32.mrf.mxu1  ;;  %v2346_v1 = vmul.f32 %v11328_v32, %v2196_v22  ;;  %v2063_v27 = vadd.f32 %v2062_v14, %v1806_v16  ;;  %v1810_v49 = vadd.f32 %v1809_v43, %v11304_v37  ;;  %3002 = vmatprep.mubr.f32.mxu1 %v2492_v54  ;;  %v2495_v40 = vadd.f32 %v13828_v5, %v2345_v0 }
 0x20b   : > { %v2199_v24 = vmax.f32 %v2061_v17, 0.0  ;;  %v1811_v12 = vpop.f32.mrf.mxu0 }
 0x20c   : > { %v2068_v15 = vpop.f32.mrf.mxu1  ;;  %v2200_v58 = vmax.f32 %v2063_v27, 0.0  ;;  %v2067_v3 = vadd.f32 %v2066_v4, %v1810_v49  ;;  %v1812_v50 = vadd.f32 %v1811_v12, %v11311_v23  ;;  %3003 = vmatmul.mubr.f32.gmra.mxu1 %v2491_v44  ;;  %v2496_v29 = vadd.f32 %v11344_v10, %v2346_v1 }
 0x20d   : > { %v2349_v28 = vmul.f32 %v11319_v9, %v2199_v24  ;;  %v1815_v47 = vpop.f32.mrf.mxu0 }
 0x20e   : > { %v2072_v11 = vpop.f32.mrf.mxu1  ;;  %v2350_v39 = vmul.f32 %v11328_v32, %v2200_v58  ;;  %v2203_v25 = vmax.f32 %v2067_v3, 0.0  ;;  %v2069_v41 = vadd.f32 %v2068_v15, %v1812_v50  ;;  %v1816_v18 = vadd.f32 %v1815_v47, %v11304_v37  ;;  %3007 = vmatprep.mubr.f32.mxu1 %v2496_v29 }
 0x20f   : > { %v1817_v35 = vpop.f32.mrf.mxu0  ;;  %v2499_v42 = vadd.f32 %v13828_v5, %v2349_v28 }
 0x210   : > { %v2074_v46 = vpop.f32.mrf.mxu1  ;;  %v2204_v51 = vmax.f32 %v2069_v41, 0.0  ;;  %v2073_v6 = vadd.f32 %v2072_v11, %v1816_v18  ;;  %v1818_v48 = vadd.f32 %v1817_v35, %v11311_v23  ;;  %3008 = vmatmul.mubr.f32.gmra.mxu1 %v2495_v40  ;;  %v2500_v33 = vadd.f32 %v11344_v10, %v2350_v39 }
 0x211   : > { %v1821_v21 = vpop.f32.mrf.mxu0  ;;  %v2353_v2 = vmul.f32 %v11319_v9, %v2203_v25 }
 0x212   : > { %v2078_v34 = vpop.f32.mrf.mxu1  ;;  %v2354_v59 = vmul.f32 %v11328_v32, %v2204_v51  ;;  %v2207_v52 = vmax.f32 %v2073_v6, 0.0  ;;  %v2075_v62 = vadd.f32 %v2074_v46, %v1818_v48  ;;  %v1822_v19 = vadd.f32 %v1821_v21, %v11304_v37  ;;  %3012 = vmatprep.mubr.f32.mxu1 %v2500_v33 }
 0x213   : > { %v1823_v38 = vpop.f32.mrf.mxu0  ;;  %v2503_v57 = vadd.f32 %v13828_v5, %v2353_v2 }
 0x214   : > { %v2080_v31 = vpop.f32.mrf.mxu1  ;;  %v2208_v30 = vmax.f32 %v2075_v62, 0.0  ;;  %v1824_v8 = vadd.f32 %v1823_v38, %v11311_v23  ;;  %3013 = vmatmul.mubr.f32.gmra.mxu1 %v2499_v42  ;;  %v2504_v55 = vadd.f32 %v11344_v10, %v2354_v59  ;;  %v2357_v63 = vmul.f32 %v11319_v9, %v2207_v52 }
 0x215   : > { %v2079_v26 = vadd.f32 %v2078_v34, %v1822_v19  ;;  %v1827_v36 = vpop.f32.mrf.mxu0 }
 0x216   : > { %v2084_v56 = vpop.f32.mrf.mxu1  ;;  %v2358_v13 = vmul.f32 %v11328_v32, %v2208_v30  ;;  %v2081_v20 = vadd.f32 %v2080_v31, %v1824_v8  ;;  %v1828_v53 = vadd.f32 %v1827_v36, %v11304_v37  ;;  %3017 = vmatprep.mubr.f32.mxu1 %v2504_v55  ;;  %v2507_v16 = vadd.f32 %v13828_v5, %v2357_v63 }
 0x217   : > { %v2211_v60 = vmax.f32 %v2079_v26, 0.0  ;;  %v1829_v45 = vpop.f32.mrf.mxu0  ;;  %v11801_v26 = vld [vmem:[%s13522_s6] ss:$0 sm:$0xff] }
 0x218   : > { %v2212_v61 = vmax.f32 %v2081_v20, 0.0  ;;  %v2085_v7 = vadd.f32 %v2084_v56, %v1828_v53  ;;  %v1830_v14 = vadd.f32 %v1829_v45, %v11311_v23  ;;  %3018 = vmatmul.mubr.f32.gmra.mxu1 %v2503_v57  ;;  %v2508_v22 = vadd.f32 %v11344_v10, %v2358_v13  ;;  %v2086_v54 = vpop.f32.mrf.mxu1 }
 0x219   : > { %v2654_v0 = vpop.f32.mrf.mxu0  ;;  %v2361_v17 = vmul.f32 %v11319_v9, %v2211_v60 }
 0x21a   : > { %v2362_v43 = vmul.f32 %v11328_v32, %v2212_v61  ;;  %v2215_v4 = vmax.f32 %v2085_v7, 0.0  ;;  %v2087_v37 = vadd.f32 %v2086_v54, %v1830_v14  ;;  %3022 = vmatprep.mubr.f32.mxu1 %v2508_v22  ;;  %v2655_v56 = vadd.f32 %v11801_v26, %v2654_v0 }
 0x21b   : > { %v2656_v44 = vpop.f32.mrf.mxu0  ;;  %v2511_v49 = vadd.f32 %v13828_v5, %v2361_v17 }
 0x21c   : > { %v2216_v1 = vmax.f32 %v2087_v37, 0.0  ;;  %3023 = vmatmul.mubr.f32.gmra.mxu1 %v2507_v16  ;;  %v2512_v27 = vadd.f32 %v11344_v10, %v2362_v43  ;;  %v2365_v24 = vmul.f32 %v11319_v9, %v2215_v4 }
 0x21d   : > { %v2659_v23 = vpop.f32.mrf.mxu0 }
 0x21e   : > { %v2366_v12 = vmul.f32 %v11328_v32, %v2216_v1  ;;  %3027 = vmatprep.mubr.f32.mxu1 %v2512_v27  ;;  %v2515_v50 = vadd.f32 %v13828_v5, %v2365_v24  ;;  %v2660_v45 = vadd.f32 %v11801_v26, %v2659_v23 }
 0x21f   : > { %v2661_v15 = vpop.f32.mrf.mxu0 }
 0x220   : > { %3028 = vmatmul.mubr.f32.gmra.mxu1 %v2511_v49  ;;  %v2516_v58 = vadd.f32 %v11344_v10, %v2366_v12 }
 0x221   : > { %v2664_v3 = vpop.f32.mrf.mxu0 }
 0x222   : > { %3032 = vmatprep.mubr.f32.mxu1 %v2516_v58  ;;  %v2665_v54 = vadd.f32 %v11801_v26, %v2664_v3 }
 0x223   : > { %v2666_v29 = vpop.f32.mrf.mxu0 }
 0x224   : > { %3033 = vmatmul.mubr.f32.gmra.mxu1 %v2515_v50 }
 0x225   : > { %v2669_v40 = vpop.f32.mrf.mxu0 }
 0x226   : > { %v2670_v44 = vadd.f32 %v11801_v26, %v2669_v40 }
 0x227   : > { %v2671_v28 = vpop.f32.mrf.mxu0 }
 0x229   : > { %v2674_v47 = vpop.f32.mrf.mxu0 }
 0x22a   : > { %v2675_v12 = vadd.f32 %v11801_v26, %v2674_v47 }
 0x22b   : > { %v2676_v11 = vpop.f32.mrf.mxu0 }
 0x22d   : > { %v2679_v39 = vpop.f32.mrf.mxu0 }
 0x22e   : > { %v2680_v28 = vadd.f32 %v11801_v26, %v2679_v39 }
 0x22f   : > { %v2681_v25 = vpop.f32.mrf.mxu0 }
 0x231   : > { %v11772_v9 = vpop.f32.mrf.mxu0 }
 0x233   : > { %v2686_v32 = vpop.f32.mrf.mxu0 }
 0x235   : > { %v11774_v41 = vpop.f32.mrf.mxu0 }
 0x236   : > { %v2690_v39 = vadd.f32 %v11801_v26, %v11774_v41 }
 0x237   : > { %v2691_v18 = vpop.f32.mrf.mxu0 }
 0x239   : > { %v11776_v35 = vpop.f32.mrf.mxu0 }
 0x23b   : > { %v2696_v10 = vpop.f32.mrf.mxu0 }
 0x23c   : > { %v2685_v10 = vadd.f32 %v11801_v26, %v11772_v9 }
 0x23d   : > { %v11778_v46 = vpop.f32.mrf.mxu0 }
 0x23f   : > { %v2701_v5 = vpop.f32.mrf.mxu0 }
 0x241   : > { %v11780_v51 = vpop.f32.mrf.mxu0 }
 0x243   : > { %v2706_v6 = vpop.f32.mrf.mxu0 }
 0x245   : > { %v11782_v48 = vpop.f32.mrf.mxu0 }
 0x247   : > { %v2711_v42 = vpop.f32.mrf.mxu0 }
 0x249   : > { %v11784_v21 = vpop.f32.mrf.mxu0 }
 0x24b   : > { %v2716_v34 = vpop.f32.mrf.mxu0 }
 0x24d   : > { %v11786_v33 = vpop.f32.mrf.mxu0 }
 0x24f   : > { %v2721_v2 = vpop.f32.mrf.mxu0 }
 0x251   : > { %v11788_v59 = vpop.f32.mrf.mxu0 }
 0x253   : > { %v2726_v52 = vpop.f32.mrf.mxu0 }
 0x255   : > { %v11790_v62 = vpop.f32.mrf.mxu0 }
 0x257   : > { %v2731_v19 = vpop.f32.mrf.mxu0 }
 0x259   : > { %v11792_v38 = vpop.f32.mrf.mxu0 }
 0x25b   : > { %v2736_v31 = vpop.f32.mrf.mxu0 }
 0x25d   : > { %v11794_v30 = vpop.f32.mrf.mxu0 }
 0x25f   : > { %v2741_v8 = vpop.f32.mrf.mxu0 }
 0x260   : > { %v13835_v8 = vlaneseq }
 0x261   : > { %v11796_v55 = vpop.f32.mrf.mxu0 }
 0x263   : > { %v2746_v63 = vpop.f32.mrf.mxu0 }
 0x264   : > { %v11848_v63 = vand.u32 127, %v13835_v8  ;;  %v2720_v8 = vadd.f32 %v11801_v26, %v11786_v33  ;;  %v2735_v33 = vadd.f32 %v11801_v26, %v11792_v38 }
 0x265   : > { %v11803_v36 = vpop.f32.mrf.mxu0 }
 0x266   : > { %v2750_v38 = vadd.f32 %v11801_v26, %v11803_v36 }
 0x267   : > { %v2751_v57 = vpop.f32.mrf.mxu0  ;;  %v2879_v13 = vpop.f32.mrf.mxu1 }
 0x268   : > { %v11806_v20 = vadd.f32 %v2879_v13, %v2655_v56  ;;  %v2695_v56 = vadd.f32 %v11801_v26, %v11776_v35  ;;  %v11853_v13 = vadd.s32 128, %v11848_v63  ;;  %v2700_v35 = vadd.f32 %v11801_v26, %v11778_v46 }
 0x269   : > { %v11808_v53 = vpop.f32.mrf.mxu0  ;;  %v2881_v60 = vpop.f32.mrf.mxu1 }
 0x26a   : > { %v13836_v60 = vld [vmem:[#allocation3_spill] sm:$0xff] }
 0x26b   : > { %v2756_v61 = vpop.f32.mrf.mxu0  ;;  %v2884_v7 = vpop.f32.mrf.mxu1 }
 0x26c   : > { %v11811_v14 = vadd.f32 %v2884_v7, %v2660_v45  ;;  %v3154_v45 = vmul.u32 16, %v13836_v60 }
 0x26d   : > { %v11813_v22 = vpop.f32.mrf.mxu0  ;;  %v2886_v16 = vpop.f32.mrf.mxu1 }
 0x26e   : > { %v11861_v16 = vsub.s32 %v11853_v13, %v3154_v45 }
 0x26f   : > { %v2761_v17 = vpop.f32.mrf.mxu0  ;;  %v2889_v0 = vpop.f32.mrf.mxu1 }
 0x270   : > { %v11816_v43 = vadd.f32 %v2889_v0, %v2665_v54  ;;  %v11864_v17 = vsub.s32 %v11848_v63, %v3154_v45  ;;  %vm3248_vm0 = vcmp.eq.s32.totalorder %v11861_v16, 1  ;;  %vm3161_vm1 = vcmp.eq.s32.totalorder %v11861_v16, 0 }
 0x271   : > { %v11818_v4 = vpop.f32.mrf.mxu0  ;;  %v2891_v37 = vpop.f32.mrf.mxu1  ;;  %vm3498_vm8 = vcmp.eq.s32.totalorder %v11861_v16, 2  ;;  %vm3668_vm13 = vcmp.eq.s32.totalorder %v11861_v16, 3 }
 0x272   : > { %vm3247_vm2 = vcmp.eq.s32.totalorder %v11864_v17, 1  ;;  %vm3160_vm3 = vcmp.eq.s32.totalorder %v11864_v17, 0  ;;  %vm3497_vm9 = vcmp.eq.s32.totalorder %v11864_v17, 2  ;;  %vm3667_vm14 = vcmp.eq.s32.totalorder %v11864_v17, 3 }
 0x273   : > { %v2766_v1 = vpop.f32.mrf.mxu0 }
 0x274   : > { %v2894_v27 = vpop.f32.mrf.mxu1 }
 0x275   : > { %v11821_v23 = vadd.f32 %v2894_v27, %v2670_v44  ;;  %v11823_v49 = vpop.f32.mrf.mxu0  ;;  %v9101_v44 = vmov 1.0  }
 0x276   : > { %v2896_v24 = vpop.f32.mrf.mxu1  ;;  %7714 = vmatprep.mubr.msk.f32.mxu1 %vm3248_vm0, %v9101_v44  ;;  %7710 = vmatprep.mubr.msk.f32.mxu0 %vm3161_vm1, %v9101_v44  ;;  %vm3838_vm1 = vcmp.eq.s32.totalorder %v11861_v16, 4 }
 0x277   : > { %v2771_v15 = vpop.f32.mrf.mxu0 }
 0x278   : > { %v2899_v58 = vpop.f32.mrf.mxu1 }
 0x279   : > { %v11826_v3 = vadd.f32 %v2899_v58, %v2675_v12  ;;  %v11828_v50 = vpop.f32.mrf.mxu0  ;;  %v2705_v12 = vadd.f32 %v11801_v26, %v11780_v51  ;;  %v2715_v51 = vadd.f32 %v11801_v26, %v11784_v21  ;;  %v2730_v21 = vadd.f32 %v11801_v26, %v11790_v62 }
 0x27a   : > { %v2901_v29 = vpop.f32.mrf.mxu1  ;;  %v2745_v62 = vadd.f32 %v11801_v26, %v11796_v55 }
 0x27b   : > { %v2776_v11 = vpop.f32.mrf.mxu0 }
 0x27c   : > { %v2904_v40 = vpop.f32.mrf.mxu1  ;;  %v2710_v11 = vadd.f32 %v11801_v26, %v11782_v48 }
 0x27d   : > { %v11831_v25 = vadd.f32 %v2904_v40, %v2680_v28  ;;  %v11833_v32 = vpop.f32.mrf.mxu0 }
 0x27e   : > { %v2906_v18 = vpop.f32.mrf.mxu1 }
 0x27f   : > { %v2781_v47 = vpop.f32.mrf.mxu0 }
 0x280   : > { %v2909_v5 = vpop.f32.mrf.mxu1 }
 0x281   : > { %v11837_v6 = vadd.f32 %v2909_v5, %v2685_v10  ;;  %v11839_v42 = vpop.f32.mrf.mxu0 }
 0x282   : > { %v2911_v34 = vpop.f32.mrf.mxu1 }
 0x283   : > { %v2786_v2 = vpop.f32.mrf.mxu0 }
 0x284   : > { %v2914_v52 = vpop.f32.mrf.mxu1 }
 0x285   : > { %v11843_v19 = vadd.f32 %v2914_v52, %v2690_v39  ;;  %v11845_v31 = vpop.f32.mrf.mxu0 }
 0x286   : > { %v2916_v9 = vpop.f32.mrf.mxu1 }
 0x287   : > { %v2791_v57 = vpop.f32.mrf.mxu0 }
 0x288   : > { %v2919_v41 = vpop.f32.mrf.mxu1  ;;  %v2725_v57 = vadd.f32 %v11801_v26, %v11788_v59  ;;  %v2740_v59 = vadd.f32 %v11801_v26, %v11794_v30  ;;  %v2755_v30 = vadd.f32 %v11801_v26, %v11808_v53 }
 0x289   : > { %v11856_v61 = vadd.f32 %v2919_v41, %v2695_v56  ;;  %v11858_v7 = vpop.f32.mrf.mxu0 }
 0x28a   : > { %v2921_v54 = vpop.f32.mrf.mxu1 }
 0x28b   : > { %v2796_v0 = vpop.f32.mrf.mxu0 }
 0x28c   : > { %v2924_v37 = vpop.f32.mrf.mxu1 }
 0x28d   : > { %v11871_v1 = vadd.f32 %v2924_v37, %v2700_v35  ;;  %v11873_v27 = vpop.f32.mrf.mxu0 }
 0x28e   : > { %v2926_v24 = vpop.f32.mrf.mxu1 }
 0x28f   : > { %v2801_v46 = vpop.f32.mrf.mxu0 }
 0x290   : > { %v2929_v15 = vpop.f32.mrf.mxu1 }
 0x291   : > { %v11878_v58 = vadd.f32 %v2929_v15, %v2705_v12  ;;  %v11880_v29 = vpop.f32.mrf.mxu0 }
 0x292   : > { %v2931_v28 = vpop.f32.mrf.mxu1 }
 0x293   : > { %v2806_v40 = vpop.f32.mrf.mxu0 }
 0x294   : > { %v2934_v18 = vpop.f32.mrf.mxu1 }
 0x295   : > { %v11884_v10 = vadd.f32 %v2934_v18, %v2710_v11  ;;  %v11886_v47 = vpop.f32.mrf.mxu0 }
 0x296   : > { %v2936_v5 = vpop.f32.mrf.mxu1 }
 0x297   : > { %v2811_v34 = vpop.f32.mrf.mxu0 }
 0x298   : > { %v2939_v39 = vpop.f32.mrf.mxu1 }
 0x299   : > { %v11890_v2 = vadd.f32 %v2939_v39, %v2715_v51 }
 0x29a   : > { %v2941_v52 = vpop.f32.mrf.mxu1 }
 0x29c   : > { %v2944_v9 = vpop.f32.mrf.mxu1 }
 0x29d   : > { %v11894_v48 = vadd.f32 %v2944_v9, %v2720_v8 }
 0x29e   : > { %v2946_v56 = vpop.f32.mrf.mxu1 }
 0x2a0   : > { %v2949_v45 = vpop.f32.mrf.mxu1 }
 0x2a1   : > { %v11898_v41 = vadd.f32 %v2949_v45, %v2725_v57 }
 0x2a2   : > { %v2951_v54 = vpop.f32.mrf.mxu1 }
 0x2a4   : > { %v2954_v35 = vpop.f32.mrf.mxu1 }
 0x2a5   : > { %v11902_v0 = vadd.f32 %v2954_v35, %v2730_v21 }
 0x2a6   : > { %v2956_v37 = vpop.f32.mrf.mxu1 }
 0x2a8   : > { %v2959_v24 = vpop.f32.mrf.mxu1 }
 0x2a9   : > { %v11906_v12 = vadd.f32 %v2959_v24, %v2735_v33 }
 0x2aa   : > { %v2961_v46 = vpop.f32.mrf.mxu1 }
 0x2ac   : > { %v2964_v15 = vpop.f32.mrf.mxu1 }
 0x2ad   : > { %v11910_v28 = vadd.f32 %v2964_v15, %v2740_v59 }
 0x2ae   : > { %v2966_v11 = vpop.f32.mrf.mxu1 }
 0x2b0   : > { %v2969_v40 = vpop.f32.mrf.mxu1 }
 0x2b1   : > { %v11914_v18 = vadd.f32 %v2969_v40, %v2745_v62 }
 0x2b2   : > { %v2971_v5 = vpop.f32.mrf.mxu1 }
 0x2b3   : > { %v2805_v5 = vadd.f32 %v11801_v26, %v11880_v29 }
 0x2b4   : > { %v2974_v51 = vpop.f32.mrf.mxu1 }
 0x2b5   : > { %v11918_v34 = vadd.f32 %v2974_v51, %v2750_v38  ;;  %v2800_v51 = vadd.f32 %v11801_v26, %v11873_v27  ;;  %v3052_v27 = vmax.f32 %v11898_v41, 0.0 }
 0x2b6   : > { %v2976_v39 = vpop.f32.mrf.mxu1 }
 0x2b8   : > { %v2979_v52 = vpop.f32.mrf.mxu1 }
 0x2b9   : > { %v11922_v8 = vadd.f32 %v2979_v52, %v2755_v30  ;;  %v2795_v52 = vadd.f32 %v11801_v26, %v11858_v7  ;;  %v11945_v7 = vld [vmem:[%s13523_s7] ss:$0 sm:$0xff] }
 0x2ba   : > { %v2981_v9 = vpop.f32.mrf.mxu1 }
 0x2bb   : > { %v2810_v9 = vadd.f32 %v11801_v26, %v11886_v47  ;;  %v2785_v47 = vadd.f32 %v11801_v26, %v11839_v42  ;;  %v11958_v42 = vld [vmem:[%s13524_s8] ss:$0 sm:$0xff] }
 0x2bc   : > { %v11924_v56 = vpop.f32.mrf.mxu1 }
 0x2be   : > { %v2986_v55 = vpop.f32.mrf.mxu1 }
 0x2c0   : > { %v11926_v57 = vpop.f32.mrf.mxu1 }
 0x2c2   : > { %v2991_v45 = vpop.f32.mrf.mxu1 }
 0x2c3   : > { %v3053_v45 = vmax.f32 %v11902_v0, 0.0 }
 0x2c4   : > { %v11928_v54 = vpop.f32.mrf.mxu1 }
 0x2c6   : > { %v2996_v36 = vpop.f32.mrf.mxu1 }
 0x2c8   : > { %v2999_v21 = vpop.f32.mrf.mxu1 }
 0x2ca   : > { %v3001_v35 = vpop.f32.mrf.mxu1 }
 0x2cb   : > { %v2790_v35 = vadd.f32 %v11801_v26, %v11845_v31  ;;  %v2780_v31 = vadd.f32 %v11801_v26, %v11833_v32  ;;  %v3050_v32 = vmax.f32 %v11890_v2, 0.0 }
 0x2cc   : > { %v3004_v37 = vpop.f32.mrf.mxu1 }
 0x2ce   : > { %v3006_v33 = vpop.f32.mrf.mxu1 }
 0x2d0   : > { %v3009_v24 = vpop.f32.mrf.mxu1 }
 0x2d1   : > { %v3010_v41 = vadd.f32 %v3009_v24, %v2785_v47 }
 0x2d2   : > { %v3011_v46 = vpop.f32.mrf.mxu1 }
 0x2d4   : > { %v3014_v53 = vpop.f32.mrf.mxu1 }
 0x2d6   : > { %v3016_v59 = vpop.f32.mrf.mxu1 }
 0x2d8   : > { %v3019_v15 = vpop.f32.mrf.mxu1 }
 0x2d9   : > { %v3020_v29 = vadd.f32 %v3019_v15, %v2795_v52  ;;  %v3051_v15 = vmax.f32 %v11894_v48, 0.0  ;;  %v3091_v48 = vmul.f32 %v11945_v7, %v3052_v27 }
 0x2da   : > { %v3021_v11 = vpop.f32.mrf.mxu1 }
 0x2db   : > { %v3015_v11 = vadd.f32 %v3014_v53, %v2790_v35  ;;  %v2775_v53 = vadd.f32 %v11801_v26, %v11828_v50 }
 0x2dc   : > { %v3024_v62 = vpop.f32.mrf.mxu1 }
 0x2dd   : > { %v3025_v55 = vadd.f32 %v3024_v62, %v2800_v51  ;;  %v3000_v2 = vadd.f32 %v2999_v21, %v2775_v53 }
 0x2de   : > { %v3026_v40 = vpop.f32.mrf.mxu1 }
 0x2df   : > { %v3067_v0 = vmax.f32 %v3025_v55, 0.0  ;;  %v3092_v40 = vmul.f32 %v11945_v7, %v3053_v45  ;;  %v3049_v55 = vmax.f32 %v11884_v10, 0.0  ;;  %v3090_v45 = vmul.f32 %v11945_v7, %v3051_v15 }
 0x2e0   : > { %v3029_v38 = vpop.f32.mrf.mxu1  ;;  %v3048_v10 = vmax.f32 %v11878_v58, 0.0  ;;  %v3047_v58 = vmax.f32 %v11871_v1, 0.0 }
 0x2e1   : > { %v3030_v39 = vadd.f32 %v3029_v38, %v2805_v5  ;;  %v3066_v5 = vmax.f32 %v3020_v29, 0.0  ;;  %v3106_v24 = vmul.f32 %v11945_v7, %v3067_v0  ;;  %v11973_v50 = vadd.f32 %v11958_v42, %v3092_v40 }
 0x2e2   : > { %v3031_v30 = vpop.f32.mrf.mxu1  ;;  %v3089_v29 = vmul.f32 %v11945_v7, %v3050_v32  ;;  %v3088_v47 = vmul.f32 %v11945_v7, %v3049_v55  ;;  %v3062_v0 = vmax.f32 %v3000_v2, 0.0 }
 0x2e3   : > { %v3068_v33 = vmax.f32 %v3030_v39, 0.0  ;;  %v3005_v39 = vadd.f32 %v3004_v37, %v2780_v31  ;;  %v3065_v30 = vmax.f32 %v3015_v11, 0.0  ;;  %v3105_v37 = vmul.f32 %v11945_v7, %v3066_v5 }
 0x2e4   : > { %v3034_v36 = vpop.f32.mrf.mxu1  ;;  %v12002_v11 = vadd.f32 %v11958_v42, %v3090_v45  ;;  %v12016_v1 = vadd.f32 %v11958_v42, %v3089_v29  ;;  %v3086_v5 = vmul.f32 %v11945_v7, %v3047_v58  ;;  %v3058_v45 = vmax.f32 %v11922_v8, 0.0 }
 0x2e5   : > { %v3035_v46 = vadd.f32 %v3034_v36, %v2810_v9  ;;  %v3107_v38 = vmul.f32 %v11945_v7, %v3068_v33  ;;  %v2770_v9 = vadd.f32 %v11801_v26, %v11823_v49  ;;  %v3064_v36 = vmax.f32 %v3010_v41, 0.0 }
 0x2e6   : > { %v3036_v59 = vpop.f32.mrf.mxu1  ;;  %v2765_v49 = vadd.f32 %v11801_v26, %v11818_v4  ;;  %v11986_v33 = vadd.f32 %v11958_v42, %v3091_v48  ;;  %v3104_v27 = vmul.f32 %v11945_v7, %v3065_v30  ;;  %v2760_v4 = vadd.f32 %v11801_v26, %v11813_v22 }
 0x2e7   : > { %v3069_v62 = vmax.f32 %v3035_v46, 0.0  ;;  %v11977_v35 = vadd.f32 %v11958_v42, %v3107_v38  ;;  %v2995_v21 = vadd.f32 %v11928_v54, %v2770_v9  ;;  %v3063_v46 = vmax.f32 %v3005_v39, 0.0 }
 0x2e8   : > { %v11993_v59 = vadd.f32 %v11958_v42, %v3106_v24  ;;  %v2990_v54 = vadd.f32 %v11926_v57, %v2765_v49  ;;  %v12009_v31 = vadd.f32 %v11958_v42, %v3105_v37  ;;  %v3046_v26 = vmax.f32 %v11856_v61, 0.0 }
 0x2e9   : > { %v3108_v51 = vmul.f32 %v11945_v7, %v3069_v62  ;;  %v3103_v62 = vmul.f32 %v11945_v7, %v3064_v36  ;;  %v3087_v22 = vmul.f32 %v11945_v7, %v3048_v10  ;;  %v2985_v57 = vadd.f32 %v11924_v56, %v2760_v4 }
 0x2ea   : > { %v3061_v15 = vmax.f32 %v2995_v21, 0.0  ;;  %v3102_v40 = vmul.f32 %v11945_v7, %v3063_v46  ;;  %v12023_v41 = vadd.f32 %v11958_v42, %v3104_v27  ;;  %v3045_v61 = vmax.f32 %v11843_v19, 0.0 }
 0x2eb   : > { %v11966_v52 = vadd.f32 %v11958_v42, %v3108_v51  ;;  %v12030_v38 = vadd.f32 %v11958_v42, %v3088_v47  ;;  %v3060_v56 = vmax.f32 %v2990_v54, 0.0  ;;  %v3101_v51 = vmul.f32 %v11945_v7, %v3062_v0 }
 0x2ec   : > { %v12036_v53 = vadd.f32 %v11958_v42, %v3103_v62  ;;  %v3044_v19 = vmax.f32 %v11837_v6, 0.0  ;;  %v3085_v32 = vmul.f32 %v11945_v7, %v3046_v26  ;;  %v12043_v48 = vadd.f32 %v11958_v42, %v3087_v22 }
 0x2ed   : > { %7850 = vmatprep.subr.mxu0 %v11966_v52  ;;  %7888 = vmatprep.subr.mxu1 %v11966_v52  ;;  %v3059_v39 = vmax.f32 %v2985_v57, 0.0  ;;  %v3100_v30 = vmul.f32 %v11945_v7, %v3061_v15  ;;  %v12049_v24 = vadd.f32 %v11958_v42, %v3102_v40  ;;  %v3043_v6 = vmax.f32 %v11831_v25, 0.0 }
 0x2ee   : > { %7851 = vmatpush3.msra.mxu0 %v11973_v50  ;;  %7889 = vmatpush3.msra.mxu1 %v11973_v50  ;;  %v3084_v9 = vmul.f32 %v11945_v7, %v3045_v61  ;;  %v12056_v55 = vadd.f32 %v11958_v42, %v3086_v5  ;;  %v3099_v2 = vmul.f32 %v11945_v7, %v3060_v56  ;;  %v3042_v25 = vmax.f32 %v11826_v3, 0.0 }
 0x2ef   : > { %7852 = vmatprep.subr.mxu0 %v11977_v35  ;;  %7890 = vmatprep.subr.mxu1 %v11977_v35  ;;  %v12063_v36 = vadd.f32 %v11958_v42, %v3101_v51  ;;  %v3083_v37 = vmul.f32 %v11945_v7, %v3044_v19  ;;  %v12070_v49 = vadd.f32 %v11958_v42, %v3085_v32  ;;  %v3057_v8 = vmax.f32 %v11918_v34, 0.0 }
 0x2f0   : > { %7853 = vmatpush3.msra.mxu0 %v11986_v33  ;;  %7891 = vmatpush3.msra.mxu1 %v11986_v33  ;;  %v3098_v10 = vmul.f32 %v11945_v7, %v3059_v39  ;;  %v12077_v29 = vadd.f32 %v11958_v42, %v3100_v30  ;;  %v3041_v3 = vmax.f32 %v11821_v23, 0.0  ;;  %v3082_v21 = vmul.f32 %v11945_v7, %v3043_v6 }
 0x2f1   : > { %7854 = vmatprep.subr.mxu0 %v11993_v59  ;;  %7892 = vmatprep.subr.mxu1 %v11993_v59  ;;  %v12084_v46 = vadd.f32 %v11958_v42, %v3084_v9  ;;  %v3056_v34 = vmax.f32 %v11914_v18, 0.0  ;;  %v3097_v27 = vmul.f32 %v11945_v7, %v3058_v45  ;;  %v12091_v4 = vadd.f32 %v11958_v42, %v3099_v2 }
 0x2f2   : > { %7855 = vmatpush3.msra.mxu0 %v12002_v11  ;;  %7893 = vmatpush3.msra.mxu1 %v12002_v11  ;;  %v3040_v23 = vmax.f32 %v11816_v43, 0.0  ;;  %v3081_v58 = vmul.f32 %v11945_v7, %v3042_v25  ;;  %v12098_v47 = vadd.f32 %v11958_v42, %v3083_v37  ;;  %v3055_v18 = vmax.f32 %v11910_v28, 0.0  ;;  %v3751_v25 = vld [vmem:[%s13525_s9 + $0x68] sm:$0xff]  ;;  %v3750_v37 = vld [vmem:[%s13525_s9 + $0x60] sm:$0xff] }
 0x2f3   : > { %7856 = vmatprep.subr.mxu0 %v12009_v31  ;;  %7894 = vmatprep.subr.mxu1 %v12009_v31  ;;  %v3096_v54 = vmul.f32 %v11945_v7, %v3057_v8  ;;  %v12105_v0 = vadd.f32 %v11958_v42, %v3098_v10  ;;  %v12110_v43 = vadd.s32 8, %v13836_v60  ;;  %v3039_v62 = vmax.f32 %v11811_v14, 0.0  ;;  %v3333_v8 = vld [vmem:[%s13525_s9 + $0x38] sm:$0xff]  ;;  %v3332_v10 = vld [vmem:[%s13525_s9 + $0x30] sm:$0xff] }
 0x2f4   : > { %7857 = vmatpush3.msra.mxu0 %v12016_v1  ;;  %7895 = vmatpush3.msra.mxu1 %v12016_v1  ;;  %v3080_v26 = vmul.f32 %v11945_v7, %v3041_v3  ;;  %v12115_v22 = vadd.f32 %v11958_v42, %v3082_v21  ;;  %v3054_v28 = vmax.f32 %v11906_v12, 0.0  ;;  %v3095_v57 = vmul.f32 %v11945_v7, %v3056_v34  ;;  %v3331_v3 = vld [vmem:[%s13525_s9 + $0x28] sm:$0xff]  ;;  %v3330_v21 = vld [vmem:[%s13525_s9 + $0x20] sm:$0xff]  ;;  %v3246_v34 = vld [vmem:[%s13525_s9 + $0x18] sm:$0xff] }
 0x2f5   : > { %7858 = vmatprep.subr.mxu0 %v12023_v41  ;;  %7896 = vmatprep.subr.mxu1 %v12023_v41  ;;  %v12122_v15 = vadd.f32 %v11958_v42, %v3097_v27  ;;  %v3038_v14 = vmax.f32 %v11806_v20, 0.0  ;;  %v3079_v40 = vmul.f32 %v11945_v7, %v3040_v23  ;;  %v12129_v61 = vadd.f32 %v11958_v42, %v3081_v58 }
 0x2f6   : > { %7859 = vmatpush3.msra.mxu0 %v12030_v38  ;;  %7897 = vmatpush3.msra.mxu1 %v12030_v38  ;;  %v3094_v12 = vmul.f32 %v11945_v7, %v3055_v18  ;;  %v12135_v5 = vadd.f32 %v11958_v42, %v3096_v54  ;;  %v3155_v20 = vmul.u32 16, %v12110_v43  ;;  %v3078_v56 = vmul.f32 %v11945_v7, %v3039_v62 }
 0x2f7   : > { %7860 = vmatprep.subr.mxu0 %v12036_v53  ;;  %7898 = vmatprep.subr.mxu1 %v12036_v53  ;;  %v12142_v51 = vadd.f32 %v11958_v42, %v3080_v26  ;;  %v3093_v19 = vmul.f32 %v11945_v7, %v3054_v28  ;;  %v12148_v32 = vadd.f32 %v11958_v42, %v3095_v57 }
 0x2f8   : > { %7861 = vmatpush3.msra.mxu0 %v12043_v48  ;;  %7899 = vmatpush3.msra.mxu1 %v12043_v48  ;;  %v3077_v39 = vmul.f32 %v11945_v7, %v3038_v14  ;;  %v12154_v30 = vadd.f32 %v11958_v42, %v3079_v40  ;;  %v12159_v6 = vadd.f32 %v11958_v42, %v3094_v12  ;;  %v3245_v40 = vld [vmem:[%s13525_s9 + $0x10] sm:$0xff]  ;;  %v3244_v12 = vld [vmem:[%s13525_s9 + $0x8] sm:$0xff] }
 0x2f9   : > { %7862 = vmatprep.subr.mxu0 %v12049_v24  ;;  %7900 = vmatprep.subr.mxu1 %v12049_v24  ;;  %v12164_v9 = vsub.s32 %v11853_v13, %v3155_v20  ;;  %v12167_v45 = vadd.f32 %v11958_v42, %v3078_v56  ;;  %v12172_v7 = vadd.f32 %v11958_v42, %v3093_v19  ;;  %v3243_v56 = vld [vmem:[%s13525_s9] sm:$0xff] }
 0x2fa   : > { %7863 = vmatpush3.msra.mxu0 %v12056_v55  ;;  %7901 = vmatpush3.msra.mxu1 %v12056_v55  ;;  %v12177_v2 = vadd.f32 %v11958_v42, %v3077_v39  ;;  %v12183_v13 = vsub.s32 %v11848_v63, %v3155_v20  ;;  %v3753_v63 = vld [vmem:[%s13525_s9 + $0x78] sm:$0xff]  ;;  %v3752_v42 = vld [vmem:[%s13525_s9 + $0x70] sm:$0xff] }
 0x2fb   : > { %7864 = vmatprep.subr.mxu0 %v12063_v36  ;;  %7902 = vmatprep.subr.mxu1 %v12063_v36  ;;  %vm3250_vm4 = vcmp.eq.s32.totalorder %v12164_v9, 1  ;;  %vm3163_vm5 = vcmp.eq.s32.totalorder %v12164_v9, 0  ;;  %vm3500_vm10 = vcmp.eq.s32.totalorder %v12164_v9, 2  ;;  %v3583_v39 = vld [vmem:[%s13525_s9 + $0x58] sm:$0xff]  ;;  %vm3670_vm15 = vcmp.eq.s32.totalorder %v12164_v9, 3 }
 0x2fc   : > { %7865 = vmatpush3.msra.mxu0 %v12070_v49  ;;  %7903 = vmatpush3.msra.mxu1 %v12070_v49  ;;  %vm3249_vm6 = vcmp.eq.s32.totalorder %v12183_v13, 1  ;;  %vm3162_vm7 = vcmp.eq.s32.totalorder %v12183_v13, 0  ;;  %vm3499_vm11 = vcmp.eq.s32.totalorder %v12183_v13, 2  ;;  %vm3669_vm0 = vcmp.eq.s32.totalorder %v12183_v13, 3 }
 0x2fd   : > { %7866 = vmatprep.subr.mxu0 %v12077_v29  ;;  %7904 = vmatprep.subr.mxu1 %v12077_v29 }
 0x2fe   : > { %7867 = vmatpush3.msra.mxu0 %v12084_v46  ;;  %7905 = vmatpush3.msra.mxu1 %v12084_v46 }
 0x2ff   : > { %7868 = vmatprep.subr.mxu0 %v12091_v4  ;;  %7906 = vmatprep.subr.mxu1 %v12091_v4 }
 0x300   : > { %7869 = vmatpush3.msra.mxu0 %v12098_v47  ;;  %7907 = vmatpush3.msra.mxu1 %v12098_v47 }
 0x301   : > { %7870 = vmatprep.subr.mxu0 %v12105_v0  ;;  %7908 = vmatprep.subr.mxu1 %v12105_v0 }
 0x302   : > { %7871 = vmatpush3.msra.mxu0 %v12115_v22  ;;  %7909 = vmatpush3.msra.mxu1 %v12115_v22 }
 0x303   : > { %7872 = vmatprep.subr.mxu0 %v12122_v15  ;;  %7910 = vmatprep.subr.mxu1 %v12122_v15 }
 0x304   : > { %7873 = vmatpush3.msra.mxu0 %v12129_v61  ;;  %7911 = vmatpush3.msra.mxu1 %v12129_v61 }
 0x305   : > { %7874 = vmatprep.subr.mxu0 %v12135_v5  ;;  %7912 = vmatprep.subr.mxu1 %v12135_v5 }
 0x306   : > { %7875 = vmatpush3.msra.mxu0 %v12142_v51  ;;  %7913 = vmatpush3.msra.mxu1 %v12142_v51 }
 0x307   : > { %7876 = vmatprep.subr.mxu0 %v12148_v32  ;;  %7914 = vmatprep.subr.mxu1 %v12148_v32 }
 0x308   : > { %7877 = vmatpush3.msra.mxu0 %v12154_v30  ;;  %7915 = vmatpush3.msra.mxu1 %v12154_v30 }
 0x309   : > { %7878 = vmatprep.subr.mxu0 %v12159_v6  ;;  %7916 = vmatprep.subr.mxu1 %v12159_v6 }
 0x30a   : > { %7879 = vmatpush3.msra.mxu0 %v12167_v45  ;;  %7917 = vmatpush3.msra.mxu1 %v12167_v45 }
 0x30b   : > { %7880 = vmatprep.subr.mxu0 %v12172_v7  ;;  %7918 = vmatprep.subr.mxu1 %v12172_v7 }
 0x30c   : > { %7881 = vmatpush3.msra.mxu0 %v12177_v2  ;;  %7919 = vmatpush3.msra.mxu1 %v12177_v2 }
 0x30d   : > { %7715 = vmatmul.mubr.msk.f32.vlgmr.msra.gmra.mxu1 %vm3247_vm2, %v9101_v44  ;;  %7938 = vmatprep.subr.mxu0 %v11966_v52  ;;  %vm3837_vm2 = vcmp.eq.s32.totalorder %v11864_v17, 4 }
 0x30e   : > { %7711 = vmatmul.mubr.msk.f32.vlgmr.msra.gmra.mxu0 %vm3160_vm3, %v9101_v44  ;;  %7716 = vmatprep.mubr.msk.f32.mxu1 %vm3250_vm4, %v9101_v44  ;;  %vm3840_vm3 = vcmp.eq.s32.totalorder %v12164_v9, 4  ;;  %vm3839_vm4 = vcmp.eq.s32.totalorder %v12183_v13, 4 }
 0x30f   : > { %7939 = vmatpush3.msra.mxu0 %v11973_v50  ;;  %7712 = vmatprep.mubr.msk.f32.mxu0 %vm3163_vm5, %v9101_v44  ;;  %vm4008_vm5 = vcmp.eq.s32.totalorder %v11861_v16, 5 }
 0x310   : > { %7940 = vmatprep.subr.mxu0 %v11977_v35  ;;  %8697 = vmatprep.subr.mxu1 %v3333_v8 }
 0x311   : > { %7941 = vmatpush3.msra.mxu0 %v11986_v33  ;;  %7717 = vmatmul.mubr.msk.f32.gmra.mxu1 %vm3249_vm6, %v9101_v44  ;;  %vm4007_vm6 = vcmp.eq.s32.totalorder %v11864_v17, 5 }
 0x312   : > { %7942 = vmatprep.subr.mxu0 %v11993_v59  ;;  %7713 = vmatmul.mubr.msk.f32.gmra.mxu0 %vm3162_vm7, %v9101_v44  ;;  %vm4010_vm7 = vcmp.eq.s32.totalorder %v12164_v9, 5 }
 0x313   : > { %7943 = vmatpush3.msra.mxu0 %v12002_v11  ;;  %7722 = vmatprep.mubr.msk.f32.mxu0 %vm3498_vm8, %v9101_v44  ;;  %vm4009_vm8 = vcmp.eq.s32.totalorder %v12183_v13, 5 }
 0x314   : > { %7944 = vmatprep.subr.mxu0 %v12009_v31  ;;  %8698 = vmatpush3.msra.mxu1 %v3333_v8 }
 0x315   : > { %7945 = vmatpush3.msra.mxu0 %v12016_v1  ;;  %8699 = vmatprep.subr.mxu1 %v3332_v10 }
 0x316   : > { %7946 = vmatprep.subr.mxu0 %v12023_v41  ;;  %8700 = vmatpush3.msra.mxu1 %v3332_v10 }
 0x317   : > { %7947 = vmatpush3.msra.mxu0 %v12030_v38  ;;  %8701 = vmatprep.subr.mxu1 %v3331_v3 }
 0x318   : > { %7948 = vmatprep.subr.mxu0 %v12036_v53  ;;  %8702 = vmatpush3.msra.mxu1 %v3331_v3 }
 0x319   : > { %7949 = vmatpush3.msra.mxu0 %v12043_v48  ;;  %8703 = vmatprep.subr.mxu1 %v3330_v21 }
 0x31a   : > { %7950 = vmatprep.subr.mxu0 %v12049_v24  ;;  %8704 = vmatpush3.msra.mxu1 %v3330_v21 }
 0x31b   : > { %7951 = vmatpush3.msra.mxu0 %v12056_v55  ;;  %8708 = vmatprep.subr.mxu1 %v3246_v34 }
 0x31c   : > { %7952 = vmatprep.subr.mxu0 %v12063_v36 }
 0x31d   : > { %7953 = vmatpush3.msra.mxu0 %v12070_v49 }
 0x31e   : > { %7954 = vmatprep.subr.mxu0 %v12077_v29 }
 0x31f   : > { %7955 = vmatpush3.msra.mxu0 %v12084_v46 }
 0x320   : > { %7956 = vmatprep.subr.mxu0 %v12091_v4 }
 0x321   : > { %7957 = vmatpush3.msra.mxu0 %v12098_v47 }
 0x322   : > { %7958 = vmatprep.subr.mxu0 %v12105_v0 }
 0x323   : > { %7959 = vmatpush3.msra.mxu0 %v12115_v22 }
 0x324   : > { %7960 = vmatprep.subr.mxu0 %v12122_v15 }
 0x325   : > { %7961 = vmatpush3.msra.mxu0 %v12129_v61 }
 0x326   : > { %7962 = vmatprep.subr.mxu0 %v12135_v5 }
 0x327   : > { %7963 = vmatpush3.msra.mxu0 %v12142_v51 }
 0x328   : > { %7964 = vmatprep.subr.mxu0 %v12148_v32 }
 0x329   : > { %7965 = vmatpush3.msra.mxu0 %v12154_v30 }
 0x32a   : > { %7966 = vmatprep.subr.mxu0 %v12159_v6 }
 0x32b   : > { %7967 = vmatpush3.msra.mxu0 %v12167_v45 }
 0x32c   : > { %7968 = vmatprep.subr.mxu0 %v12172_v7 }
 0x32d   : > { %7969 = vmatpush3.msra.mxu0 %v12177_v2 }
 0x32e   : > { %7723 = vmatmul.mubr.msk.f32.vlgmr.msra.gmra.mxu0 %vm3497_vm9, %v9101_v44  ;;  %8730 = vmatprep.subr.mxu0 %v3753_v63  ;;  %vm4178_vm9 = vcmp.eq.s32.totalorder %v11861_v16, 6 }
 0x32f   : > { %8731 = vmatpush3.msra.mxu0 %v3753_v63  ;;  %7724 = vmatprep.mubr.msk.f32.mxu0 %vm3500_vm10, %v9101_v44  ;;  %v3582_v63 = vld [vmem:[%s13525_s9 + $0x50] sm:$0xff]  ;;  %vm4177_vm10 = vcmp.eq.s32.totalorder %v11864_v17, 6 }
 0x330   : > { %8732 = vmatprep.subr.mxu0 %v3752_v42 }
 0x331   : > { %8733 = vmatpush3.msra.mxu0 %v3752_v42  ;;  %v3581_v42 = vld [vmem:[%s13525_s9 + $0x48] sm:$0xff] }
 0x332   : > { %7725 = vmatmul.mubr.msk.f32.gmra.mxu0 %vm3499_vm11, %v9101_v44  ;;  %8734 = vmatprep.subr.mxu0 %v3751_v25  ;;  %vm4180_vm11 = vcmp.eq.s32.totalorder %v12164_v9, 6 }
 0x333   : > { %8735 = vmatpush3.msra.mxu0 %v3751_v25  ;;  %v3580_v25 = vld [vmem:[%s13525_s9 + $0x40] sm:$0xff] }
 0x334   : > { %8736 = vmatprep.subr.mxu0 %v3750_v37 }
 0x335   : > { %8737 = vmatpush3.msra.mxu0 %v3750_v37 }
 0x336   : > { %8026 = vmatprep.subr.mxu0 %v11966_v52 }
 0x3cd   : > { %v7920_v27 = vpop.f32.mrf.mxu1 }
 0x3ce   : > { %v7882_v23 = vpop.f32.mrf.mxu0 }
 0x3cf   : > { %v7921_v58 = vpop.f32.mrf.mxu1 }
 0x3d0   : > { %v7922_v18 = vadd.f32 %v7921_v58, %v7920_v27  ;;  %v7883_v62 = vpop.f32.mrf.mxu0  ;;  %v3923_v27 = vld [vmem:[%s13525_s9 + $0x98] sm:$0xff]  ;;  %v3921_v58 = vld [vmem:[%s13525_s9 + $0x88] sm:$0xff] }
 0x3d1   : > { %v7923_v54 = vpop.f32.mrf.mxu1  ;;  %v7884_v14 = vadd.f32 %v7883_v62, %v7882_v23  ;;  %v3922_v23 = vld [vmem:[%s13525_s9 + $0x90] sm:$0xff] }
 0x3d2   : > { %8705 = vmatprep.mubr.msk.f32.mxu1 %vm3334_vm12, %v7922_v18  ;;  %v7885_v28 = vpop.f32.mrf.mxu0  ;;  %v3920_v18 = vld [vmem:[%s13525_s9 + $0x80] sm:$0xff] }
 0x3d3   : > { %v7924_v26 = vpop.f32.mrf.mxu1 }
 0x3d4   : > { %v7925_v57 = vadd.f32 %v7924_v26, %v7923_v54  ;;  %v7886_v20 = vpop.f32.mrf.mxu0 }
 0x3d5   : > { %v7887_v19 = vadd.f32 %v7886_v20, %v7885_v28 }
 0x3d6   : > { %8706 = vmatmul.mubr.msk.f32.vlgmr.msra.gmra.mxu1 %vm3334_vm12, %v7925_v57 }
 0x3d7   : > { %8709 = vmatpush3.msra.mxu1 %v3246_v34  ;;  %8716 = vmatprep.mubr.msk.f32.mxu1 %vm3334_vm12, %v7884_v14 }
 0x3d8   : > { %8710 = vmatprep.subr.mxu1 %v3245_v40 }
 0x3d9   : > { %8711 = vmatpush3.msra.mxu1 %v3245_v40 }
 0x3da   : > { %8712 = vmatprep.subr.mxu1 %v3244_v12 }
 0x3db   : > { %8713 = vmatpush3.msra.mxu1 %v3244_v12 }
 0x3dc   : > { %8714 = vmatprep.subr.mxu1 %v3243_v56 }
 0x3dd   : > { %8715 = vmatpush3.msra.mxu1 %v3243_v56 }
 0x3de   : > { %8719 = vmatprep.subr.mxu1 %v3583_v39  ;;  %8717 = vmatmul.mubr.msk.f32.vlgmr.msra.gmra.mxu1 %vm3334_vm12, %v7887_v19 }
 0x3df   : > { %8720 = vmatpush3.msra.mxu1 %v3583_v39 }
 0x3e0   : > { %8721 = vmatprep.subr.mxu1 %v3582_v63 }
 0x3e1   : > { %8722 = vmatpush3.msra.mxu1 %v3582_v63 }
 0x3e2   : > { %8723 = vmatprep.subr.mxu1 %v3581_v42 }
 0x3e3   : > { %8724 = vmatpush3.msra.mxu1 %v3581_v42 }
 0x3e4   : > { %8725 = vmatprep.subr.mxu1 %v3580_v25 }
 0x3e5   : > { %8726 = vmatpush3.msra.mxu1 %v3580_v25 }
 0x3e6   : > { %7982 = vmatprep.subr.mxu1 %v11966_v52 }
 0x3ee   : > { %v7970_v37 = vpop.f32.mrf.mxu0 }
 0x3f0   : > { %v7971_v8 = vpop.f32.mrf.mxu0 }
 0x3f1   : > { %v7972_v10 = vadd.f32 %v7971_v8, %v7970_v37  ;;  %v4093_v8 = vld [vmem:[%s13525_s9 + $0xb8] sm:$0xff] }
 0x3f2   : > { %v7973_v3 = vpop.f32.mrf.mxu0 }
 0x3f3   : > { %8727 = vmatprep.mubr.msk.f32.mxu1 %vm3334_vm12, %v7972_v10  ;;  %v4092_v10 = vld [vmem:[%s13525_s9 + $0xb0] sm:$0xff] }
 0x3f4   : > { %v7974_v21 = vpop.f32.mrf.mxu0 }
 0x3f5   : > { %v7975_v34 = vadd.f32 %v7974_v21, %v7973_v3  ;;  %v4091_v3 = vld [vmem:[%s13525_s9 + $0xa8] sm:$0xff]  ;;  %v4090_v21 = vld [vmem:[%s13525_s9 + $0xa0] sm:$0xff] }
 0x3f7   : > { %8728 = vmatmul.mubr.msk.f32.vlgmr.msra.gmra.mxu1 %vm3334_vm12, %v7975_v34 }
 0x3f8   : > { %7983 = vmatpush3.msra.mxu1 %v11973_v50  ;;  %7728 = vmatprep.mubr.msk.f32.mxu1 %vm3668_vm13, %v9101_v44  ;;  %vm4179_vm13 = vcmp.eq.s32.totalorder %v12183_v13, 6 }
 0x3f9   : > { %7984 = vmatprep.subr.mxu1 %v11977_v35 }
 0x3fa   : > { %7985 = vmatpush3.msra.mxu1 %v11986_v33 }
 0x3fb   : > { %7986 = vmatprep.subr.mxu1 %v11993_v59 }
 0x3fc   : > { %7987 = vmatpush3.msra.mxu1 %v12002_v11 }
 0x3fd   : > { %7988 = vmatprep.subr.mxu1 %v12009_v31 }
 0x3fe   : > { %7989 = vmatpush3.msra.mxu1 %v12016_v1 }
 0x3ff   : > { %7990 = vmatprep.subr.mxu1 %v12023_v41 }
 0x400   : > { %7991 = vmatpush3.msra.mxu1 %v12030_v38 }
 0x401   : > { %7992 = vmatprep.subr.mxu1 %v12036_v53 }
 0x402   : > { %7993 = vmatpush3.msra.mxu1 %v12043_v48 }
 0x403   : > { %7994 = vmatprep.subr.mxu1 %v12049_v24 }
 0x404   : > { %7995 = vmatpush3.msra.mxu1 %v12056_v55 }
 0x405   : > { %7996 = vmatprep.subr.mxu1 %v12063_v36 }
 0x406   : > { %7997 = vmatpush3.msra.mxu1 %v12070_v49 }
 0x407   : > { %7998 = vmatprep.subr.mxu1 %v12077_v29 }
 0x408   : > { %7999 = vmatpush3.msra.mxu1 %v12084_v46 }
 0x409   : > { %8000 = vmatprep.subr.mxu1 %v12091_v4 }
 0x40a   : > { %8001 = vmatpush3.msra.mxu1 %v12098_v47 }
 0x40b   : > { %8002 = vmatprep.subr.mxu1 %v12105_v0 }
 0x40c   : > { %8003 = vmatpush3.msra.mxu1 %v12115_v22 }
 0x40d   : > { %8004 = vmatprep.subr.mxu1 %v12122_v15 }
 0x40e   : > { %8005 = vmatpush3.msra.mxu1 %v12129_v61 }
 0x40f   : > { %8006 = vmatprep.subr.mxu1 %v12135_v5 }
 0x410   : > { %8007 = vmatpush3.msra.mxu1 %v12142_v51 }
 0x411   : > { %8008 = vmatprep.subr.mxu1 %v12148_v32 }
 0x412   : > { %8009 = vmatpush3.msra.mxu1 %v12154_v30 }
 0x413   : > { %8010 = vmatprep.subr.mxu1 %v12159_v6 }
 0x414   : > { %8011 = vmatpush3.msra.mxu1 %v12167_v45 }
 0x415   : > { %8012 = vmatprep.subr.mxu1 %v12172_v7 }
 0x416   : > { %8013 = vmatpush3.msra.mxu1 %v12177_v2 }
 0x417   : > { %7729 = vmatmul.mubr.msk.f32.vlgmr.msra.gmra.mxu1 %vm3667_vm14, %v9101_v44  ;;  %8741 = vmatprep.subr.mxu1 %v3923_v27  ;;  %vm4348_vm14 = vcmp.eq.s32.totalorder %v11861_v16, 7 }
 0x418   : > { %8742 = vmatpush3.msra.mxu1 %v3923_v27  ;;  %7730 = vmatprep.mubr.msk.f32.mxu1 %vm3670_vm15, %v9101_v44  ;;  %vm4347_vm15 = vcmp.eq.s32.totalorder %v11864_v17, 7 }
 0x419   : > { %8743 = vmatprep.subr.mxu1 %v3922_v23 }
 0x41a   : > { %8744 = vmatpush3.msra.mxu1 %v3922_v23 }
 0x41b   : > { %7731 = vmatmul.mubr.msk.f32.gmra.mxu1 %vm3669_vm0, %v9101_v44  ;;  %8745 = vmatprep.subr.mxu1 %v3921_v58  ;;  %vm4350_vm0 = vcmp.eq.s32.totalorder %v12164_v9, 7 }
 0x41c   : > { %8746 = vmatpush3.msra.mxu1 %v3921_v58 }
 0x41d   : > { %8747 = vmatprep.subr.mxu1 %v3920_v18 }
 0x41e   : > { %8748 = vmatpush3.msra.mxu1 %v3920_v18 }
 0x41f   : > { %8070 = vmatprep.subr.mxu1 %v11966_v52 }
 0x496   : > { %v8707_v54 = vpop.f32.mrf.mxu1 }
 0x498   : > { %v3407_v62 = vpop.f32.mrf.mxu1 }
 0x49e   : > { %v8718_v26 = vpop.f32.mrf.mxu1 }
 0x49f   : > { %v3494_v28 = vadd.f32 %v8718_v26, %v8707_v54 }
 0x4a0   : > { %v3488_v57 = vpop.f32.mrf.mxu1 }
 0x4a1   : > { %v3489_v14 = vadd.f32 %v3488_v57, %v3407_v62 }
 0x4b7   : > { %v8729_v40 = vpop.f32.mrf.mxu1 }
 0x4b8   : > { %v12348_v12 = vadd.f32 %v8729_v40, %v3494_v28  ;;  %v4262_v40 = vld [vmem:[%s13525_s9 + $0xd0] sm:$0xff] }
 0x4b9   : > { %v3656_v20 = vpop.f32.mrf.mxu1 }
 0x4ba   : > { %v12350_v56 = vadd.f32 %v3656_v20, %v3489_v14  ;;  %v4263_v14 = vld [vmem:[%s13525_s9 + $0xd8] sm:$0xff]  ;;  %v4260_v20 = vld [vmem:[%s13525_s9 + $0xc0] sm:$0xff] }
 0x4d7   : > { %v8014_v19 = vpop.f32.mrf.mxu1 }
 0x4d9   : > { %v8015_v39 = vpop.f32.mrf.mxu1 }
 0x4da   : > { %v8016_v63 = vadd.f32 %v8015_v39, %v8014_v19 }
 0x4db   : > { %v8017_v42 = vpop.f32.mrf.mxu1 }
 0x4dc   : > { %8738 = vmatprep.mubr.msk.f32.mxu0 %vm3334_vm12, %v8016_v63 }
 0x4dd   : > { %v8018_v25 = vpop.f32.mrf.mxu1 }
 0x4de   : > { %v8019_v37 = vadd.f32 %v8018_v25, %v8017_v42 }
 0x4e0   : > { %8739 = vmatmul.mubr.msk.f32.vlgmr.msra.gmra.mxu0 %vm3334_vm12, %v8019_v37 }
 0x4e1   : > { %8027 = vmatpush3.msra.mxu0 %v11973_v50  ;;  %7734 = vmatprep.mubr.msk.f32.mxu0 %vm3838_vm1, %v9101_v44  ;;  %vm4349_vm1 = vcmp.eq.s32.totalorder %v12183_v13, 7 }
 0x4e2   : > { %8028 = vmatprep.subr.mxu0 %v11977_v35 }
 0x4e3   : > { %8029 = vmatpush3.msra.mxu0 %v11986_v33 }
 0x4e4   : > { %8030 = vmatprep.subr.mxu0 %v11993_v59 }
 0x4e5   : > { %8031 = vmatpush3.msra.mxu0 %v12002_v11 }
 0x4e6   : > { %8032 = vmatprep.subr.mxu0 %v12009_v31 }
 0x4e7   : > { %8033 = vmatpush3.msra.mxu0 %v12016_v1 }
 0x4e8   : > { %8034 = vmatprep.subr.mxu0 %v12023_v41 }
 0x4e9   : > { %8035 = vmatpush3.msra.mxu0 %v12030_v38 }
 0x4ea   : > { %8036 = vmatprep.subr.mxu0 %v12036_v53 }
 0x4eb   : > { %8037 = vmatpush3.msra.mxu0 %v12043_v48 }
 0x4ec   : > { %8038 = vmatprep.subr.mxu0 %v12049_v24 }
 0x4ed   : > { %8039 = vmatpush3.msra.mxu0 %v12056_v55 }
 0x4ee   : > { %8040 = vmatprep.subr.mxu0 %v12063_v36 }
 0x4ef   : > { %8041 = vmatpush3.msra.mxu0 %v12070_v49 }
 0x4f0   : > { %8042 = vmatprep.subr.mxu0 %v12077_v29 }
 0x4f1   : > { %8043 = vmatpush3.msra.mxu0 %v12084_v46 }
 0x4f2   : > { %8044 = vmatprep.subr.mxu0 %v12091_v4 }
 0x4f3   : > { %8045 = vmatpush3.msra.mxu0 %v12098_v47 }
 0x4f4   : > { %8046 = vmatprep.subr.mxu0 %v12105_v0 }
 0x4f5   : > { %8047 = vmatpush3.msra.mxu0 %v12115_v22 }
 0x4f6   : > { %8048 = vmatprep.subr.mxu0 %v12122_v15 }
 0x4f7   : > { %8049 = vmatpush3.msra.mxu0 %v12129_v61 }
 0x4f8   : > { %8050 = vmatprep.subr.mxu0 %v12135_v5 }
 0x4f9   : > { %8051 = vmatpush3.msra.mxu0 %v12142_v51 }
 0x4fa   : > { %8052 = vmatprep.subr.mxu0 %v12148_v32 }
 0x4fb   : > { %8053 = vmatpush3.msra.mxu0 %v12154_v30 }
 0x4fc   : > { %8054 = vmatprep.subr.mxu0 %v12159_v6 }
 0x4fd   : > { %8055 = vmatpush3.msra.mxu0 %v12167_v45 }
 0x4fe   : > { %8056 = vmatprep.subr.mxu0 %v12172_v7 }
 0x4ff   : > { %8057 = vmatpush3.msra.mxu0 %v12177_v2 }
 0x500   : > { %7735 = vmatmul.mubr.msk.f32.vlgmr.msra.gmra.mxu0 %vm3837_vm2, %v9101_v44  ;;  %8752 = vmatprep.subr.mxu0 %v4093_v8  ;;  %vm4518_vm2 = vcmp.eq.s32.totalorder %v11861_v16, 8 }
 0x501   : > { %8753 = vmatpush3.msra.mxu0 %v4093_v8  ;;  %7736 = vmatprep.mubr.msk.f32.mxu0 %vm3840_vm3, %v9101_v44  ;;  %vm4517_vm3 = vcmp.eq.s32.totalorder %v11864_v17, 8 }
 0x502   : > { %8754 = vmatprep.subr.mxu0 %v4092_v10 }
 0x503   : > { %8755 = vmatpush3.msra.mxu0 %v4092_v10 }
 0x504   : > { %7737 = vmatmul.mubr.msk.f32.gmra.mxu0 %vm3839_vm4, %v9101_v44  ;;  %8756 = vmatprep.subr.mxu0 %v4091_v3  ;;  %vm4520_vm4 = vcmp.eq.s32.totalorder %v12164_v9, 8 }
 0x505   : > { %8757 = vmatpush3.msra.mxu0 %v4091_v3 }
 0x506   : > { %8758 = vmatprep.subr.mxu0 %v4090_v21 }
 0x507   : > { %8759 = vmatpush3.msra.mxu0 %v4090_v21  ;;  %v4433_v21 = vld [vmem:[%s13525_s9 + $0xf8] sm:$0xff] }
 0x508   : > { %8114 = vmatprep.subr.mxu0 %v11966_v52 }
 0x5a0   : > { %v8740_v34 = vpop.f32.mrf.mxu0 }
 0x5a1   : > { %v12407_v27 = vadd.f32 %v8740_v34, %v12348_v12  ;;  %v4261_v12 = vld [vmem:[%s13525_s9 + $0xc8] sm:$0xff]  ;;  %v4432_v34 = vld [vmem:[%s13525_s9 + $0xf0] sm:$0xff] }
 0x5a2   : > { %v3826_v23 = vpop.f32.mrf.mxu0 }
 0x5a3   : > { %v12410_v58 = vadd.f32 %v3826_v23, %v12350_v56  ;;  %v4430_v23 = vld [vmem:[%s13525_s9 + $0xe0] sm:$0xff] }
 0x5c0   : > { %v8058_v18 = vpop.f32.mrf.mxu0 }
 0x5c2   : > { %v8059_v54 = vpop.f32.mrf.mxu0 }
 0x5c3   : > { %v8060_v62 = vadd.f32 %v8059_v54, %v8058_v18 }
 0x5c4   : > { %v8061_v26 = vpop.f32.mrf.mxu0 }
 0x5c5   : > { %8749 = vmatprep.mubr.msk.f32.mxu1 %vm3334_vm12, %v8060_v62 }
 0x5c6   : > { %v8062_v28 = vpop.f32.mrf.mxu0 }
 0x5c7   : > { %v8063_v57 = vadd.f32 %v8062_v28, %v8061_v26 }
 0x5c9   : > { %8750 = vmatmul.mubr.msk.f32.vlgmr.msra.gmra.mxu1 %vm3334_vm12, %v8063_v57 }
 0x5ca   : > { %8071 = vmatpush3.msra.mxu1 %v11973_v50  ;;  %7740 = vmatprep.mubr.msk.f32.mxu1 %vm4008_vm5, %v9101_v44  ;;  %vm4519_vm5 = vcmp.eq.s32.totalorder %v12183_v13, 8 }
 0x5cb   : > { %8072 = vmatprep.subr.mxu1 %v11977_v35 }
 0x5cc   : > { %8073 = vmatpush3.msra.mxu1 %v11986_v33 }
 0x5cd   : > { %8074 = vmatprep.subr.mxu1 %v11993_v59 }
 0x5ce   : > { %8075 = vmatpush3.msra.mxu1 %v12002_v11 }
 0x5cf   : > { %8076 = vmatprep.subr.mxu1 %v12009_v31 }
 0x5d0   : > { %8077 = vmatpush3.msra.mxu1 %v12016_v1 }
 0x5d1   : > { %8078 = vmatprep.subr.mxu1 %v12023_v41 }
 0x5d2   : > { %8079 = vmatpush3.msra.mxu1 %v12030_v38 }
 0x5d3   : > { %8080 = vmatprep.subr.mxu1 %v12036_v53 }
 0x5d4   : > { %8081 = vmatpush3.msra.mxu1 %v12043_v48 }
 0x5d5   : > { %8082 = vmatprep.subr.mxu1 %v12049_v24 }
 0x5d6   : > { %8083 = vmatpush3.msra.mxu1 %v12056_v55 }
 0x5d7   : > { %8084 = vmatprep.subr.mxu1 %v12063_v36 }
 0x5d8   : > { %8085 = vmatpush3.msra.mxu1 %v12070_v49 }
 0x5d9   : > { %8086 = vmatprep.subr.mxu1 %v12077_v29 }
 0x5da   : > { %8087 = vmatpush3.msra.mxu1 %v12084_v46 }
 0x5db   : > { %8088 = vmatprep.subr.mxu1 %v12091_v4 }
 0x5dc   : > { %8089 = vmatpush3.msra.mxu1 %v12098_v47 }
 0x5dd   : > { %8090 = vmatprep.subr.mxu1 %v12105_v0 }
 0x5de   : > { %8091 = vmatpush3.msra.mxu1 %v12115_v22 }
 0x5df   : > { %8092 = vmatprep.subr.mxu1 %v12122_v15 }
 0x5e0   : > { %8093 = vmatpush3.msra.mxu1 %v12129_v61 }
 0x5e1   : > { %8094 = vmatprep.subr.mxu1 %v12135_v5 }
 0x5e2   : > { %8095 = vmatpush3.msra.mxu1 %v12142_v51 }
 0x5e3   : > { %8096 = vmatprep.subr.mxu1 %v12148_v32 }
 0x5e4   : > { %8097 = vmatpush3.msra.mxu1 %v12154_v30 }
 0x5e5   : > { %8098 = vmatprep.subr.mxu1 %v12159_v6 }
 0x5e6   : > { %8099 = vmatpush3.msra.mxu1 %v12167_v45 }
 0x5e7   : > { %8100 = vmatprep.subr.mxu1 %v12172_v7 }
 0x5e8   : > { %8101 = vmatpush3.msra.mxu1 %v12177_v2 }
 0x5e9   : > { %7741 = vmatmul.mubr.msk.f32.vlgmr.msra.gmra.mxu1 %vm4007_vm6, %v9101_v44  ;;  %8763 = vmatprep.subr.mxu1 %v4263_v14  ;;  %vm4688_vm6 = vcmp.eq.s32.totalorder %v11861_v16, 9 }
 0x5ea   : > { %8764 = vmatpush3.msra.mxu1 %v4263_v14  ;;  %7742 = vmatprep.mubr.msk.f32.mxu1 %vm4010_vm7, %v9101_v44  ;;  %vm4687_vm7 = vcmp.eq.s32.totalorder %v11864_v17, 9 }
 0x5eb   : > { %8765 = vmatprep.subr.mxu1 %v4262_v40 }
 0x5ec   : > { %8766 = vmatpush3.msra.mxu1 %v4262_v40 }
 0x5ed   : > { %7743 = vmatmul.mubr.msk.f32.gmra.mxu1 %vm4009_vm8, %v9101_v44  ;;  %8767 = vmatprep.subr.mxu1 %v4261_v12  ;;  %vm4690_vm8 = vcmp.eq.s32.totalorder %v12164_v9, 9 }
 0x5ee   : > { %8768 = vmatpush3.msra.mxu1 %v4261_v12 }
 0x5ef   : > { %8769 = vmatprep.subr.mxu1 %v4260_v20 }
 0x5f0   : > { %8770 = vmatpush3.msra.mxu1 %v4260_v20  ;;  %v4603_v20 = vld [vmem:[%s13525_s9 + $0x118] sm:$0xff] }
 0x5f1   : > { %8158 = vmatprep.subr.mxu1 %v11966_v52 }
 0x689   : > { %v8751_v56 = vpop.f32.mrf.mxu1 }
 0x68a   : > { %v12467_v19 = vadd.f32 %v8751_v56, %v12407_v27  ;;  %v4431_v27 = vld [vmem:[%s13525_s9 + $0xe8] sm:$0xff]  ;;  %v4602_v56 = vld [vmem:[%s13525_s9 + $0x110] sm:$0xff] }
 0x68b   : > { %v3996_v39 = vpop.f32.mrf.mxu1 }
 0x68c   : > { %v12470_v63 = vadd.f32 %v3996_v39, %v12410_v58  ;;  %v4600_v39 = vld [vmem:[%s13525_s9 + $0x100] sm:$0xff] }
 0x6a9   : > { %v8102_v42 = vpop.f32.mrf.mxu1 }
 0x6ab   : > { %v8103_v25 = vpop.f32.mrf.mxu1 }
 0x6ac   : > { %v8104_v37 = vadd.f32 %v8103_v25, %v8102_v42 }
 0x6ad   : > { %v8105_v8 = vpop.f32.mrf.mxu1 }
 0x6ae   : > { %8760 = vmatprep.mubr.msk.f32.mxu0 %vm3334_vm12, %v8104_v37 }
 0x6af   : > { %v8106_v10 = vpop.f32.mrf.mxu1 }
 0x6b0   : > { %v8107_v3 = vadd.f32 %v8106_v10, %v8105_v8 }
 0x6b2   : > { %8761 = vmatmul.mubr.msk.f32.vlgmr.msra.gmra.mxu0 %vm3334_vm12, %v8107_v3 }
 0x6b3   : > { %8115 = vmatpush3.msra.mxu0 %v11973_v50  ;;  %7746 = vmatprep.mubr.msk.f32.mxu0 %vm4178_vm9, %v9101_v44  ;;  %vm4689_vm9 = vcmp.eq.s32.totalorder %v12183_v13, 9 }
 0x6b4   : > { %8116 = vmatprep.subr.mxu0 %v11977_v35 }
 0x6b5   : > { %8117 = vmatpush3.msra.mxu0 %v11986_v33 }
 0x6b6   : > { %8118 = vmatprep.subr.mxu0 %v11993_v59 }
 0x6b7   : > { %8119 = vmatpush3.msra.mxu0 %v12002_v11 }
 0x6b8   : > { %8120 = vmatprep.subr.mxu0 %v12009_v31 }
 0x6b9   : > { %8121 = vmatpush3.msra.mxu0 %v12016_v1 }
 0x6ba   : > { %8122 = vmatprep.subr.mxu0 %v12023_v41 }
 0x6bb   : > { %8123 = vmatpush3.msra.mxu0 %v12030_v38 }
 0x6bc   : > { %8124 = vmatprep.subr.mxu0 %v12036_v53 }
 0x6bd   : > { %8125 = vmatpush3.msra.mxu0 %v12043_v48 }
 0x6be   : > { %8126 = vmatprep.subr.mxu0 %v12049_v24 }
 0x6bf   : > { %8127 = vmatpush3.msra.mxu0 %v12056_v55 }
 0x6c0   : > { %8128 = vmatprep.subr.mxu0 %v12063_v36 }
 0x6c1   : > { %8129 = vmatpush3.msra.mxu0 %v12070_v49 }
 0x6c2   : > { %8130 = vmatprep.subr.mxu0 %v12077_v29 }
 0x6c3   : > { %8131 = vmatpush3.msra.mxu0 %v12084_v46 }
 0x6c4   : > { %8132 = vmatprep.subr.mxu0 %v12091_v4 }
 0x6c5   : > { %8133 = vmatpush3.msra.mxu0 %v12098_v47 }
 0x6c6   : > { %8134 = vmatprep.subr.mxu0 %v12105_v0 }
 0x6c7   : > { %8135 = vmatpush3.msra.mxu0 %v12115_v22 }
 0x6c8   : > { %8136 = vmatprep.subr.mxu0 %v12122_v15 }
 0x6c9   : > { %8137 = vmatpush3.msra.mxu0 %v12129_v61 }
 0x6ca   : > { %8138 = vmatprep.subr.mxu0 %v12135_v5 }
 0x6cb   : > { %8139 = vmatpush3.msra.mxu0 %v12142_v51 }
 0x6cc   : > { %8140 = vmatprep.subr.mxu0 %v12148_v32 }
 0x6cd   : > { %8141 = vmatpush3.msra.mxu0 %v12154_v30 }
 0x6ce   : > { %8142 = vmatprep.subr.mxu0 %v12159_v6 }
 0x6cf   : > { %8143 = vmatpush3.msra.mxu0 %v12167_v45 }
 0x6d0   : > { %8144 = vmatprep.subr.mxu0 %v12172_v7 }
 0x6d1   : > { %8145 = vmatpush3.msra.mxu0 %v12177_v2 }
 0x6d2   : > { %7747 = vmatmul.mubr.msk.f32.vlgmr.msra.gmra.mxu0 %vm4177_vm10, %v9101_v44  ;;  %8774 = vmatprep.subr.mxu0 %v4433_v21  ;;  %vm4858_vm10 = vcmp.eq.s32.totalorder %v11861_v16, 10 }
 0x6d3   : > { %8775 = vmatpush3.msra.mxu0 %v4433_v21  ;;  %7748 = vmatprep.mubr.msk.f32.mxu0 %vm4180_vm11, %v9101_v44  ;;  %vm4857_vm11 = vcmp.eq.s32.totalorder %v11864_v17, 10 }
 0x6d4   : > { %8776 = vmatprep.subr.mxu0 %v4432_v34 }
 0x6d5   : > { %8777 = vmatpush3.msra.mxu0 %v4432_v34 }
 0x6d6   : > { %7749 = vmatmul.mubr.msk.f32.gmra.mxu0 %vm4179_vm13, %v9101_v44  ;;  %8778 = vmatprep.subr.mxu0 %v4431_v27  ;;  %vm4860_vm13 = vcmp.eq.s32.totalorder %v12164_v9, 10 }
 0x6d7   : > { %8779 = vmatpush3.msra.mxu0 %v4431_v27 }
 0x6d8   : > { %8780 = vmatprep.subr.mxu0 %v4430_v23 }
 0x6d9   : > { %8781 = vmatpush3.msra.mxu0 %v4430_v23  ;;  %v4773_v23 = vld [vmem:[%s13525_s9 + $0x138] sm:$0xff] }
 0x6da   : > { %8202 = vmatprep.subr.mxu0 %v11966_v52 }
 0x772   : > { %v8762_v58 = vpop.f32.mrf.mxu0 }
 0x773   : > { %v12527_v18 = vadd.f32 %v8762_v58, %v12467_v19  ;;  %v4601_v19 = vld [vmem:[%s13525_s9 + $0x108] sm:$0xff]  ;;  %v4772_v58 = vld [vmem:[%s13525_s9 + $0x130] sm:$0xff] }
 0x774   : > { %v4166_v54 = vpop.f32.mrf.mxu0 }
 0x775   : > { %v12530_v62 = vadd.f32 %v4166_v54, %v12470_v63  ;;  %v4770_v54 = vld [vmem:[%s13525_s9 + $0x120] sm:$0xff] }
 0x792   : > { %v8146_v26 = vpop.f32.mrf.mxu0 }
 0x794   : > { %v8147_v28 = vpop.f32.mrf.mxu0 }
 0x795   : > { %v8148_v57 = vadd.f32 %v8147_v28, %v8146_v26 }
 0x796   : > { %v8149_v14 = vpop.f32.mrf.mxu0 }
 0x797   : > { %8771 = vmatprep.mubr.msk.f32.mxu1 %vm3334_vm12, %v8148_v57 }
 0x798   : > { %v8150_v40 = vpop.f32.mrf.mxu0 }
 0x799   : > { %v8151_v12 = vadd.f32 %v8150_v40, %v8149_v14 }
 0x79b   : > { %8772 = vmatmul.mubr.msk.f32.vlgmr.msra.gmra.mxu1 %vm3334_vm12, %v8151_v12 }
 0x79c   : > { %8159 = vmatpush3.msra.mxu1 %v11973_v50  ;;  %7752 = vmatprep.mubr.msk.f32.mxu1 %vm4348_vm14, %v9101_v44  ;;  %vm4859_vm14 = vcmp.eq.s32.totalorder %v12183_v13, 10 }
 0x79d   : > { %8160 = vmatprep.subr.mxu1 %v11977_v35 }
 0x79e   : > { %8161 = vmatpush3.msra.mxu1 %v11986_v33 }
 0x79f   : > { %8162 = vmatprep.subr.mxu1 %v11993_v59 }
 0x7a0   : > { %8163 = vmatpush3.msra.mxu1 %v12002_v11 }
 0x7a1   : > { %8164 = vmatprep.subr.mxu1 %v12009_v31 }
 0x7a2   : > { %8165 = vmatpush3.msra.mxu1 %v12016_v1 }
 0x7a3   : > { %8166 = vmatprep.subr.mxu1 %v12023_v41 }
 0x7a4   : > { %8167 = vmatpush3.msra.mxu1 %v12030_v38 }
 0x7a5   : > { %8168 = vmatprep.subr.mxu1 %v12036_v53 }
 0x7a6   : > { %8169 = vmatpush3.msra.mxu1 %v12043_v48 }
 0x7a7   : > { %8170 = vmatprep.subr.mxu1 %v12049_v24 }
 0x7a8   : > { %8171 = vmatpush3.msra.mxu1 %v12056_v55 }
 0x7a9   : > { %8172 = vmatprep.subr.mxu1 %v12063_v36 }
 0x7aa   : > { %8173 = vmatpush3.msra.mxu1 %v12070_v49 }
 0x7ab   : > { %8174 = vmatprep.subr.mxu1 %v12077_v29 }
 0x7ac   : > { %8175 = vmatpush3.msra.mxu1 %v12084_v46 }
 0x7ad   : > { %8176 = vmatprep.subr.mxu1 %v12091_v4 }
 0x7ae   : > { %8177 = vmatpush3.msra.mxu1 %v12098_v47 }
 0x7af   : > { %8178 = vmatprep.subr.mxu1 %v12105_v0 }
 0x7b0   : > { %8179 = vmatpush3.msra.mxu1 %v12115_v22 }
 0x7b1   : > { %8180 = vmatprep.subr.mxu1 %v12122_v15 }
 0x7b2   : > { %8181 = vmatpush3.msra.mxu1 %v12129_v61 }
 0x7b3   : > { %8182 = vmatprep.subr.mxu1 %v12135_v5 }
 0x7b4   : > { %8183 = vmatpush3.msra.mxu1 %v12142_v51 }
 0x7b5   : > { %8184 = vmatprep.subr.mxu1 %v12148_v32 }
 0x7b6   : > { %8185 = vmatpush3.msra.mxu1 %v12154_v30 }
 0x7b7   : > { %8186 = vmatprep.subr.mxu1 %v12159_v6 }
 0x7b8   : > { %8187 = vmatpush3.msra.mxu1 %v12167_v45 }
 0x7b9   : > { %8188 = vmatprep.subr.mxu1 %v12172_v7 }
 0x7ba   : > { %8189 = vmatpush3.msra.mxu1 %v12177_v2 }
 0x7bb   : > { %7753 = vmatmul.mubr.msk.f32.vlgmr.msra.gmra.mxu1 %vm4347_vm15, %v9101_v44  ;;  %8785 = vmatprep.subr.mxu1 %v4603_v20  ;;  %vm5028_vm15 = vcmp.eq.s32.totalorder %v11861_v16, 11 }
 0x7bc   : > { %8786 = vmatpush3.msra.mxu1 %v4603_v20  ;;  %7754 = vmatprep.mubr.msk.f32.mxu1 %vm4350_vm0, %v9101_v44  ;;  %vm5027_vm0 = vcmp.eq.s32.totalorder %v11864_v17, 11 }
 0x7bd   : > { %8787 = vmatprep.subr.mxu1 %v4602_v56 }
 0x7be   : > { %8788 = vmatpush3.msra.mxu1 %v4602_v56 }
 0x7bf   : > { %7755 = vmatmul.mubr.msk.f32.gmra.mxu1 %vm4349_vm1, %v9101_v44  ;;  %8789 = vmatprep.subr.mxu1 %v4601_v19  ;;  %vm5030_vm1 = vcmp.eq.s32.totalorder %v12164_v9, 11 }
 0x7c0   : > { %8790 = vmatpush3.msra.mxu1 %v4601_v19 }
 0x7c1   : > { %8791 = vmatprep.subr.mxu1 %v4600_v39 }
 0x7c2   : > { %8792 = vmatpush3.msra.mxu1 %v4600_v39  ;;  %v4943_v39 = vld [vmem:[%s13525_s9 + $0x158] sm:$0xff] }
 0x7c3   : > { %8246 = vmatprep.subr.mxu1 %v11966_v52 }
 0x85b   : > { %v8773_v63 = vpop.f32.mrf.mxu1 }
 0x85c   : > { %v12587_v42 = vadd.f32 %v8773_v63, %v12527_v18  ;;  %v4771_v18 = vld [vmem:[%s13525_s9 + $0x128] sm:$0xff]  ;;  %v4942_v63 = vld [vmem:[%s13525_s9 + $0x150] sm:$0xff] }
 0x85d   : > { %v4336_v25 = vpop.f32.mrf.mxu1 }
 0x85e   : > { %v12590_v37 = vadd.f32 %v4336_v25, %v12530_v62  ;;  %v4940_v25 = vld [vmem:[%s13525_s9 + $0x140] sm:$0xff] }
 0x87b   : > { %v8190_v8 = vpop.f32.mrf.mxu1 }
 0x87d   : > { %v8191_v10 = vpop.f32.mrf.mxu1 }
 0x87e   : > { %v8192_v3 = vadd.f32 %v8191_v10, %v8190_v8 }
 0x87f   : > { %v8193_v21 = vpop.f32.mrf.mxu1 }
 0x880   : > { %8782 = vmatprep.mubr.msk.f32.mxu0 %vm3334_vm12, %v8192_v3 }
 0x881   : > { %v8194_v34 = vpop.f32.mrf.mxu1 }
 0x882   : > { %v8195_v27 = vadd.f32 %v8194_v34, %v8193_v21 }
 0x884   : > { %8783 = vmatmul.mubr.msk.f32.vlgmr.msra.gmra.mxu0 %vm3334_vm12, %v8195_v27 }
 0x885   : > { %8203 = vmatpush3.msra.mxu0 %v11973_v50  ;;  %7758 = vmatprep.mubr.msk.f32.mxu0 %vm4518_vm2, %v9101_v44  ;;  %vm5029_vm2 = vcmp.eq.s32.totalorder %v12183_v13, 11 }
 0x886   : > { %8204 = vmatprep.subr.mxu0 %v11977_v35 }
 0x887   : > { %8205 = vmatpush3.msra.mxu0 %v11986_v33 }
 0x888   : > { %8206 = vmatprep.subr.mxu0 %v11993_v59 }
 0x889   : > { %8207 = vmatpush3.msra.mxu0 %v12002_v11 }
 0x88a   : > { %8208 = vmatprep.subr.mxu0 %v12009_v31 }
 0x88b   : > { %8209 = vmatpush3.msra.mxu0 %v12016_v1 }
 0x88c   : > { %8210 = vmatprep.subr.mxu0 %v12023_v41 }
 0x88d   : > { %8211 = vmatpush3.msra.mxu0 %v12030_v38 }
 0x88e   : > { %8212 = vmatprep.subr.mxu0 %v12036_v53 }
 0x88f   : > { %8213 = vmatpush3.msra.mxu0 %v12043_v48 }
 0x890   : > { %8214 = vmatprep.subr.mxu0 %v12049_v24 }
 0x891   : > { %8215 = vmatpush3.msra.mxu0 %v12056_v55 }
 0x892   : > { %8216 = vmatprep.subr.mxu0 %v12063_v36 }
 0x893   : > { %8217 = vmatpush3.msra.mxu0 %v12070_v49 }
 0x894   : > { %8218 = vmatprep.subr.mxu0 %v12077_v29 }
 0x895   : > { %8219 = vmatpush3.msra.mxu0 %v12084_v46 }
 0x896   : > { %8220 = vmatprep.subr.mxu0 %v12091_v4 }
 0x897   : > { %8221 = vmatpush3.msra.mxu0 %v12098_v47 }
 0x898   : > { %8222 = vmatprep.subr.mxu0 %v12105_v0 }
 0x899   : > { %8223 = vmatpush3.msra.mxu0 %v12115_v22 }
 0x89a   : > { %8224 = vmatprep.subr.mxu0 %v12122_v15 }
 0x89b   : > { %8225 = vmatpush3.msra.mxu0 %v12129_v61 }
 0x89c   : > { %8226 = vmatprep.subr.mxu0 %v12135_v5 }
 0x89d   : > { %8227 = vmatpush3.msra.mxu0 %v12142_v51 }
 0x89e   : > { %8228 = vmatprep.subr.mxu0 %v12148_v32 }
 0x89f   : > { %8229 = vmatpush3.msra.mxu0 %v12154_v30 }
 0x8a0   : > { %8230 = vmatprep.subr.mxu0 %v12159_v6 }
 0x8a1   : > { %8231 = vmatpush3.msra.mxu0 %v12167_v45 }
 0x8a2   : > { %8232 = vmatprep.subr.mxu0 %v12172_v7 }
 0x8a3   : > { %8233 = vmatpush3.msra.mxu0 %v12177_v2 }
 0x8a4   : > { %7759 = vmatmul.mubr.msk.f32.vlgmr.msra.gmra.mxu0 %vm4517_vm3, %v9101_v44  ;;  %8796 = vmatprep.subr.mxu0 %v4773_v23  ;;  %vm5198_vm3 = vcmp.eq.s32.totalorder %v11861_v16, 12 }
 0x8a5   : > { %8797 = vmatpush3.msra.mxu0 %v4773_v23  ;;  %7760 = vmatprep.mubr.msk.f32.mxu0 %vm4520_vm4, %v9101_v44  ;;  %vm5197_vm4 = vcmp.eq.s32.totalorder %v11864_v17, 12 }
 0x8a6   : > { %8798 = vmatprep.subr.mxu0 %v4772_v58 }
 0x8a7   : > { %8799 = vmatpush3.msra.mxu0 %v4772_v58 }
 0x8a8   : > { %7761 = vmatmul.mubr.msk.f32.gmra.mxu0 %vm4519_vm5, %v9101_v44  ;;  %8800 = vmatprep.subr.mxu0 %v4771_v18  ;;  %vm5200_vm5 = vcmp.eq.s32.totalorder %v12164_v9, 12 }
 0x8a9   : > { %8801 = vmatpush3.msra.mxu0 %v4771_v18 }
 0x8aa   : > { %8802 = vmatprep.subr.mxu0 %v4770_v54 }
 0x8ab   : > { %8803 = vmatpush3.msra.mxu0 %v4770_v54  ;;  %v5113_v54 = vld [vmem:[%s13525_s9 + $0x178] sm:$0xff] }
 0x8ac   : > { %8290 = vmatprep.subr.mxu0 %v11966_v52 }
 0x944   : > { %v8784_v62 = vpop.f32.mrf.mxu0 }
 0x945   : > { %v12647_v26 = vadd.f32 %v8784_v62, %v12587_v42  ;;  %v4941_v42 = vld [vmem:[%s13525_s9 + $0x148] sm:$0xff]  ;;  %v5112_v62 = vld [vmem:[%s13525_s9 + $0x170] sm:$0xff] }
 0x946   : > { %v4506_v28 = vpop.f32.mrf.mxu0 }
 0x947   : > { %v12650_v57 = vadd.f32 %v4506_v28, %v12590_v37  ;;  %v5110_v28 = vld [vmem:[%s13525_s9 + $0x160] sm:$0xff] }
 0x964   : > { %v8234_v14 = vpop.f32.mrf.mxu0 }
 0x966   : > { %v8235_v40 = vpop.f32.mrf.mxu0 }
 0x967   : > { %v8236_v12 = vadd.f32 %v8235_v40, %v8234_v14 }
 0x968   : > { %v8237_v20 = vpop.f32.mrf.mxu0 }
 0x969   : > { %8793 = vmatprep.mubr.msk.f32.mxu1 %vm3334_vm12, %v8236_v12 }
 0x96a   : > { %v8238_v56 = vpop.f32.mrf.mxu0 }
 0x96b   : > { %v8239_v19 = vadd.f32 %v8238_v56, %v8237_v20 }
 0x96d   : > { %8794 = vmatmul.mubr.msk.f32.vlgmr.msra.gmra.mxu1 %vm3334_vm12, %v8239_v19 }
 0x96e   : > { %8247 = vmatpush3.msra.mxu1 %v11973_v50  ;;  %7764 = vmatprep.mubr.msk.f32.mxu1 %vm4688_vm6, %v9101_v44  ;;  %vm5199_vm6 = vcmp.eq.s32.totalorder %v12183_v13, 12 }
 0x96f   : > { %8248 = vmatprep.subr.mxu1 %v11977_v35 }
 0x970   : > { %8249 = vmatpush3.msra.mxu1 %v11986_v33 }
 0x971   : > { %8250 = vmatprep.subr.mxu1 %v11993_v59 }
 0x972   : > { %8251 = vmatpush3.msra.mxu1 %v12002_v11 }
 0x973   : > { %8252 = vmatprep.subr.mxu1 %v12009_v31 }
 0x974   : > { %8253 = vmatpush3.msra.mxu1 %v12016_v1 }
 0x975   : > { %8254 = vmatprep.subr.mxu1 %v12023_v41 }
 0x976   : > { %8255 = vmatpush3.msra.mxu1 %v12030_v38 }
 0x977   : > { %8256 = vmatprep.subr.mxu1 %v12036_v53 }
 0x978   : > { %8257 = vmatpush3.msra.mxu1 %v12043_v48 }
 0x979   : > { %8258 = vmatprep.subr.mxu1 %v12049_v24 }
 0x97a   : > { %8259 = vmatpush3.msra.mxu1 %v12056_v55 }
 0x97b   : > { %8260 = vmatprep.subr.mxu1 %v12063_v36 }
 0x97c   : > { %8261 = vmatpush3.msra.mxu1 %v12070_v49 }
 0x97d   : > { %8262 = vmatprep.subr.mxu1 %v12077_v29 }
 0x97e   : > { %8263 = vmatpush3.msra.mxu1 %v12084_v46 }
 0x97f   : > { %8264 = vmatprep.subr.mxu1 %v12091_v4 }
 0x980   : > { %8265 = vmatpush3.msra.mxu1 %v12098_v47 }
 0x981   : > { %8266 = vmatprep.subr.mxu1 %v12105_v0 }
 0x982   : > { %8267 = vmatpush3.msra.mxu1 %v12115_v22 }
 0x983   : > { %8268 = vmatprep.subr.mxu1 %v12122_v15 }
 0x984   : > { %8269 = vmatpush3.msra.mxu1 %v12129_v61 }
 0x985   : > { %8270 = vmatprep.subr.mxu1 %v12135_v5 }
 0x986   : > { %8271 = vmatpush3.msra.mxu1 %v12142_v51 }
 0x987   : > { %8272 = vmatprep.subr.mxu1 %v12148_v32 }
 0x988   : > { %8273 = vmatpush3.msra.mxu1 %v12154_v30 }
 0x989   : > { %8274 = vmatprep.subr.mxu1 %v12159_v6 }
 0x98a   : > { %8275 = vmatpush3.msra.mxu1 %v12167_v45 }
 0x98b   : > { %8276 = vmatprep.subr.mxu1 %v12172_v7 }
 0x98c   : > { %8277 = vmatpush3.msra.mxu1 %v12177_v2 }
 0x98d   : > { %7765 = vmatmul.mubr.msk.f32.vlgmr.msra.gmra.mxu1 %vm4687_vm7, %v9101_v44  ;;  %8807 = vmatprep.subr.mxu1 %v4943_v39  ;;  %vm5368_vm7 = vcmp.eq.s32.totalorder %v11861_v16, 13 }
 0x98e   : > { %8808 = vmatpush3.msra.mxu1 %v4943_v39  ;;  %7766 = vmatprep.mubr.msk.f32.mxu1 %vm4690_vm8, %v9101_v44  ;;  %vm5367_vm8 = vcmp.eq.s32.totalorder %v11864_v17, 13 }
 0x98f   : > { %8809 = vmatprep.subr.mxu1 %v4942_v63 }
 0x990   : > { %8810 = vmatpush3.msra.mxu1 %v4942_v63 }
 0x991   : > { %7767 = vmatmul.mubr.msk.f32.gmra.mxu1 %vm4689_vm9, %v9101_v44  ;;  %8811 = vmatprep.subr.mxu1 %v4941_v42  ;;  %vm5370_vm9 = vcmp.eq.s32.totalorder %v12164_v9, 13 }
 0x992   : > { %8812 = vmatpush3.msra.mxu1 %v4941_v42 }
 0x993   : > { %8813 = vmatprep.subr.mxu1 %v4940_v25 }
 0x994   : > { %8814 = vmatpush3.msra.mxu1 %v4940_v25  ;;  %v5283_v25 = vld [vmem:[%s13525_s9 + $0x198] sm:$0xff] }
 0x995   : > { %8334 = vmatprep.subr.mxu1 %v11966_v52 }
 0xa2d   : > { %v8795_v37 = vpop.f32.mrf.mxu1 }
 0xa2e   : > { %v12707_v8 = vadd.f32 %v8795_v37, %v12647_v26  ;;  %v5111_v26 = vld [vmem:[%s13525_s9 + $0x168] sm:$0xff]  ;;  %v5282_v37 = vld [vmem:[%s13525_s9 + $0x190] sm:$0xff] }
 0xa2f   : > { %v4676_v10 = vpop.f32.mrf.mxu1 }
 0xa30   : > { %v12710_v3 = vadd.f32 %v4676_v10, %v12650_v57  ;;  %v5280_v10 = vld [vmem:[%s13525_s9 + $0x180] sm:$0xff] }
 0xa4d   : > { %v8278_v21 = vpop.f32.mrf.mxu1 }
 0xa4f   : > { %v8279_v34 = vpop.f32.mrf.mxu1 }
 0xa50   : > { %v8280_v27 = vadd.f32 %v8279_v34, %v8278_v21 }
 0xa51   : > { %v8281_v23 = vpop.f32.mrf.mxu1 }
 0xa52   : > { %8804 = vmatprep.mubr.msk.f32.mxu0 %vm3334_vm12, %v8280_v27 }
 0xa53   : > { %v8282_v58 = vpop.f32.mrf.mxu1 }
 0xa54   : > { %v8283_v18 = vadd.f32 %v8282_v58, %v8281_v23 }
 0xa56   : > { %8805 = vmatmul.mubr.msk.f32.vlgmr.msra.gmra.mxu0 %vm3334_vm12, %v8283_v18 }
 0xa57   : > { %8291 = vmatpush3.msra.mxu0 %v11973_v50  ;;  %7770 = vmatprep.mubr.msk.f32.mxu0 %vm4858_vm10, %v9101_v44  ;;  %vm5369_vm10 = vcmp.eq.s32.totalorder %v12183_v13, 13 }
 0xa58   : > { %8292 = vmatprep.subr.mxu0 %v11977_v35 }
 0xa59   : > { %8293 = vmatpush3.msra.mxu0 %v11986_v33 }
 0xa5a   : > { %8294 = vmatprep.subr.mxu0 %v11993_v59 }
 0xa5b   : > { %8295 = vmatpush3.msra.mxu0 %v12002_v11 }
 0xa5c   : > { %8296 = vmatprep.subr.mxu0 %v12009_v31 }
 0xa5d   : > { %8297 = vmatpush3.msra.mxu0 %v12016_v1 }
 0xa5e   : > { %8298 = vmatprep.subr.mxu0 %v12023_v41 }
 0xa5f   : > { %8299 = vmatpush3.msra.mxu0 %v12030_v38 }
 0xa60   : > { %8300 = vmatprep.subr.mxu0 %v12036_v53 }
 0xa61   : > { %8301 = vmatpush3.msra.mxu0 %v12043_v48 }
 0xa62   : > { %8302 = vmatprep.subr.mxu0 %v12049_v24 }
 0xa63   : > { %8303 = vmatpush3.msra.mxu0 %v12056_v55 }
 0xa64   : > { %8304 = vmatprep.subr.mxu0 %v12063_v36 }
 0xa65   : > { %8305 = vmatpush3.msra.mxu0 %v12070_v49 }
 0xa66   : > { %8306 = vmatprep.subr.mxu0 %v12077_v29 }
 0xa67   : > { %8307 = vmatpush3.msra.mxu0 %v12084_v46 }
 0xa68   : > { %8308 = vmatprep.subr.mxu0 %v12091_v4 }
 0xa69   : > { %8309 = vmatpush3.msra.mxu0 %v12098_v47 }
 0xa6a   : > { %8310 = vmatprep.subr.mxu0 %v12105_v0 }
 0xa6b   : > { %8311 = vmatpush3.msra.mxu0 %v12115_v22 }
 0xa6c   : > { %8312 = vmatprep.subr.mxu0 %v12122_v15 }
 0xa6d   : > { %8313 = vmatpush3.msra.mxu0 %v12129_v61 }
 0xa6e   : > { %8314 = vmatprep.subr.mxu0 %v12135_v5 }
 0xa6f   : > { %8315 = vmatpush3.msra.mxu0 %v12142_v51 }
 0xa70   : > { %8316 = vmatprep.subr.mxu0 %v12148_v32 }
 0xa71   : > { %8317 = vmatpush3.msra.mxu0 %v12154_v30 }
 0xa72   : > { %8318 = vmatprep.subr.mxu0 %v12159_v6 }
 0xa73   : > { %8319 = vmatpush3.msra.mxu0 %v12167_v45 }
 0xa74   : > { %8320 = vmatprep.subr.mxu0 %v12172_v7 }
 0xa75   : > { %8321 = vmatpush3.msra.mxu0 %v12177_v2 }
 0xa76   : > { %7771 = vmatmul.mubr.msk.f32.vlgmr.msra.gmra.mxu0 %vm4857_vm11, %v9101_v44  ;;  %8818 = vmatprep.subr.mxu0 %v5113_v54  ;;  %vm5538_vm11 = vcmp.eq.s32.totalorder %v11861_v16, 14 }
 0xa77   : > { %8819 = vmatpush3.msra.mxu0 %v5113_v54  ;;  %7772 = vmatprep.mubr.msk.f32.mxu0 %vm4860_vm13, %v9101_v44  ;;  %vm5537_vm13 = vcmp.eq.s32.totalorder %v11864_v17, 14 }
 0xa78   : > { %8820 = vmatprep.subr.mxu0 %v5112_v62 }
 0xa79   : > { %8821 = vmatpush3.msra.mxu0 %v5112_v62 }
 0xa7a   : > { %7773 = vmatmul.mubr.msk.f32.gmra.mxu0 %vm4859_vm14, %v9101_v44  ;;  %8822 = vmatprep.subr.mxu0 %v5111_v26  ;;  %vm5540_vm14 = vcmp.eq.s32.totalorder %v12164_v9, 14 }
 0xa7b   : > { %8823 = vmatpush3.msra.mxu0 %v5111_v26 }
 0xa7c   : > { %8824 = vmatprep.subr.mxu0 %v5110_v28 }
 0xa7d   : > { %8825 = vmatpush3.msra.mxu0 %v5110_v28  ;;  %v5453_v28 = vld [vmem:[%s13525_s9 + $0x1b8] sm:$0xff] }
 0xa7e   : > { %8378 = vmatprep.subr.mxu0 %v11966_v52 }
 0xb16   : > { %v8806_v57 = vpop.f32.mrf.mxu0 }
 0xb17   : > { %v12767_v14 = vadd.f32 %v8806_v57, %v12707_v8  ;;  %v5281_v8 = vld [vmem:[%s13525_s9 + $0x188] sm:$0xff]  ;;  %v5452_v57 = vld [vmem:[%s13525_s9 + $0x1b0] sm:$0xff] }
 0xb18   : > { %v4846_v40 = vpop.f32.mrf.mxu0 }
 0xb19   : > { %v12770_v12 = vadd.f32 %v4846_v40, %v12710_v3  ;;  %v5450_v40 = vld [vmem:[%s13525_s9 + $0x1a0] sm:$0xff] }
 0xb36   : > { %v8322_v20 = vpop.f32.mrf.mxu0 }
 0xb38   : > { %v8323_v56 = vpop.f32.mrf.mxu0 }
 0xb39   : > { %v8324_v19 = vadd.f32 %v8323_v56, %v8322_v20 }
 0xb3a   : > { %v8325_v39 = vpop.f32.mrf.mxu0 }
 0xb3b   : > { %8815 = vmatprep.mubr.msk.f32.mxu1 %vm3334_vm12, %v8324_v19 }
 0xb3c   : > { %v8326_v63 = vpop.f32.mrf.mxu0 }
 0xb3d   : > { %v8327_v42 = vadd.f32 %v8326_v63, %v8325_v39 }
 0xb3f   : > { %8816 = vmatmul.mubr.msk.f32.vlgmr.msra.gmra.mxu1 %vm3334_vm12, %v8327_v42 }
 0xb40   : > { %8335 = vmatpush3.msra.mxu1 %v11973_v50  ;;  %7776 = vmatprep.mubr.msk.f32.mxu1 %vm5028_vm15, %v9101_v44  ;;  %vm5539_vm15 = vcmp.eq.s32.totalorder %v12183_v13, 14 }
 0xb41   : > { %8336 = vmatprep.subr.mxu1 %v11977_v35 }
 0xb42   : > { %8337 = vmatpush3.msra.mxu1 %v11986_v33 }
 0xb43   : > { %8338 = vmatprep.subr.mxu1 %v11993_v59 }
 0xb44   : > { %8339 = vmatpush3.msra.mxu1 %v12002_v11 }
 0xb45   : > { %8340 = vmatprep.subr.mxu1 %v12009_v31 }
 0xb46   : > { %8341 = vmatpush3.msra.mxu1 %v12016_v1 }
 0xb47   : > { %8342 = vmatprep.subr.mxu1 %v12023_v41 }
 0xb48   : > { %8343 = vmatpush3.msra.mxu1 %v12030_v38 }
 0xb49   : > { %8344 = vmatprep.subr.mxu1 %v12036_v53 }
 0xb4a   : > { %8345 = vmatpush3.msra.mxu1 %v12043_v48 }
 0xb4b   : > { %8346 = vmatprep.subr.mxu1 %v12049_v24 }
 0xb4c   : > { %8347 = vmatpush3.msra.mxu1 %v12056_v55 }
 0xb4d   : > { %8348 = vmatprep.subr.mxu1 %v12063_v36 }
 0xb4e   : > { %8349 = vmatpush3.msra.mxu1 %v12070_v49 }
 0xb4f   : > { %8350 = vmatprep.subr.mxu1 %v12077_v29 }
 0xb50   : > { %8351 = vmatpush3.msra.mxu1 %v12084_v46 }
 0xb51   : > { %8352 = vmatprep.subr.mxu1 %v12091_v4 }
 0xb52   : > { %8353 = vmatpush3.msra.mxu1 %v12098_v47 }
 0xb53   : > { %8354 = vmatprep.subr.mxu1 %v12105_v0 }
 0xb54   : > { %8355 = vmatpush3.msra.mxu1 %v12115_v22 }
 0xb55   : > { %8356 = vmatprep.subr.mxu1 %v12122_v15 }
 0xb56   : > { %8357 = vmatpush3.msra.mxu1 %v12129_v61 }
 0xb57   : > { %8358 = vmatprep.subr.mxu1 %v12135_v5 }
 0xb58   : > { %8359 = vmatpush3.msra.mxu1 %v12142_v51 }
 0xb59   : > { %8360 = vmatprep.subr.mxu1 %v12148_v32 }
 0xb5a   : > { %8361 = vmatpush3.msra.mxu1 %v12154_v30 }
 0xb5b   : > { %8362 = vmatprep.subr.mxu1 %v12159_v6 }
 0xb5c   : > { %8363 = vmatpush3.msra.mxu1 %v12167_v45 }
 0xb5d   : > { %8364 = vmatprep.subr.mxu1 %v12172_v7 }
 0xb5e   : > { %8365 = vmatpush3.msra.mxu1 %v12177_v2 }
 0xb5f   : > { %7777 = vmatmul.mubr.msk.f32.vlgmr.msra.gmra.mxu1 %vm5027_vm0, %v9101_v44  ;;  %8829 = vmatprep.subr.mxu1 %v5283_v25  ;;  %vm5708_vm0 = vcmp.eq.s32.totalorder %v11861_v16, 15  ;;  %v5793_v16 = vld [vmem:[%s13525_s9 + $0x1f8] sm:$0xff] }
 0xb60   : > { %8830 = vmatpush3.msra.mxu1 %v5283_v25  ;;  %7778 = vmatprep.mubr.msk.f32.mxu1 %vm5030_vm1, %v9101_v44  ;;  %vm5707_vm1 = vcmp.eq.s32.totalorder %v11864_v17, 15  ;;  %v5792_v17 = vld [vmem:[%s13525_s9 + $0x1f0] sm:$0xff] }
 0xb61   : > { %8831 = vmatprep.subr.mxu1 %v5282_v37 }
 0xb62   : > { %8832 = vmatpush3.msra.mxu1 %v5282_v37 }
 0xb63   : > { %7779 = vmatmul.mubr.msk.f32.gmra.mxu1 %vm5029_vm2, %v9101_v44  ;;  %8833 = vmatprep.subr.mxu1 %v5281_v8  ;;  %vm5710_vm2 = vcmp.eq.s32.totalorder %v12164_v9, 15 }
 0xb64   : > { %8834 = vmatpush3.msra.mxu1 %v5281_v8 }
 0xb65   : > { %8835 = vmatprep.subr.mxu1 %v5280_v10 }
 0xb66   : > { %8836 = vmatpush3.msra.mxu1 %v5280_v10  ;;  %v5623_v10 = vld [vmem:[%s13525_s9 + $0x1d8] sm:$0xff] }
 0xb67   : > { %8422 = vmatprep.subr.mxu1 %v11966_v52 }
 0xbff   : > { %v8817_v3 = vpop.f32.mrf.mxu1 }
 0xc00   : > { %v12827_v21 = vadd.f32 %v8817_v3, %v12767_v14  ;;  %v5451_v14 = vld [vmem:[%s13525_s9 + $0x1a8] sm:$0xff]  ;;  %v5622_v3 = vld [vmem:[%s13525_s9 + $0x1d0] sm:$0xff] }
 0xc01   : > { %v5016_v34 = vpop.f32.mrf.mxu1 }
 0xc02   : > { %v12830_v27 = vadd.f32 %v5016_v34, %v12770_v12  ;;  %v5620_v34 = vld [vmem:[%s13525_s9 + $0x1c0] sm:$0xff] }
 0xc1f   : > { %v8366_v23 = vpop.f32.mrf.mxu1 }
 0xc21   : > { %v8367_v58 = vpop.f32.mrf.mxu1 }
 0xc22   : > { %v8368_v18 = vadd.f32 %v8367_v58, %v8366_v23 }
 0xc23   : > { %v8369_v54 = vpop.f32.mrf.mxu1 }
 0xc24   : > { %8826 = vmatprep.mubr.msk.f32.mxu0 %vm3334_vm12, %v8368_v18 }
 0xc25   : > { %v8370_v62 = vpop.f32.mrf.mxu1 }
 0xc26   : > { %v8371_v26 = vadd.f32 %v8370_v62, %v8369_v54 }
 0xc28   : > { %8827 = vmatmul.mubr.msk.f32.vlgmr.msra.gmra.mxu0 %vm3334_vm12, %v8371_v26 }
 0xc29   : > { %8379 = vmatpush3.msra.mxu0 %v11973_v50  ;;  %7782 = vmatprep.mubr.msk.f32.mxu0 %vm5198_vm3, %v9101_v44  ;;  %vm5709_vm3 = vcmp.eq.s32.totalorder %v12183_v13, 15  ;;  %v6151_v13 = vld [vmem:[%s13527_s11 + $0x70] sm:$0xff] }
 0xc2a   : > { %8380 = vmatprep.subr.mxu0 %v11977_v35 }
 0xc2b   : > { %8381 = vmatpush3.msra.mxu0 %v11986_v33 }
 0xc2c   : > { %8382 = vmatprep.subr.mxu0 %v11993_v59 }
 0xc2d   : > { %8383 = vmatpush3.msra.mxu0 %v12002_v11 }
 0xc2e   : > { %8384 = vmatprep.subr.mxu0 %v12009_v31 }
 0xc2f   : > { %8385 = vmatpush3.msra.mxu0 %v12016_v1 }
 0xc30   : > { %8386 = vmatprep.subr.mxu0 %v12023_v41 }
 0xc31   : > { %8387 = vmatpush3.msra.mxu0 %v12030_v38 }
 0xc32   : > { %8388 = vmatprep.subr.mxu0 %v12036_v53 }
 0xc33   : > { %8389 = vmatpush3.msra.mxu0 %v12043_v48 }
 0xc34   : > { %8390 = vmatprep.subr.mxu0 %v12049_v24 }
 0xc35   : > { %8391 = vmatpush3.msra.mxu0 %v12056_v55 }
 0xc36   : > { %8392 = vmatprep.subr.mxu0 %v12063_v36 }
 0xc37   : > { %8393 = vmatpush3.msra.mxu0 %v12070_v49 }
 0xc38   : > { %8394 = vmatprep.subr.mxu0 %v12077_v29 }
 0xc39   : > { %8395 = vmatpush3.msra.mxu0 %v12084_v46 }
 0xc3a   : > { %8396 = vmatprep.subr.mxu0 %v12091_v4 }
 0xc3b   : > { %8397 = vmatpush3.msra.mxu0 %v12098_v47 }
 0xc3c   : > { %8398 = vmatprep.subr.mxu0 %v12105_v0 }
 0xc3d   : > { %8399 = vmatpush3.msra.mxu0 %v12115_v22 }
 0xc3e   : > { %8400 = vmatprep.subr.mxu0 %v12122_v15 }
 0xc3f   : > { %8401 = vmatpush3.msra.mxu0 %v12129_v61 }
 0xc40   : > { %8402 = vmatprep.subr.mxu0 %v12135_v5 }
 0xc41   : > { %8403 = vmatpush3.msra.mxu0 %v12142_v51 }
 0xc42   : > { %8404 = vmatprep.subr.mxu0 %v12148_v32 }
 0xc43   : > { %8405 = vmatpush3.msra.mxu0 %v12154_v30 }
 0xc44   : > { %8406 = vmatprep.subr.mxu0 %v12159_v6 }
 0xc45   : > { %8407 = vmatpush3.msra.mxu0 %v12167_v45 }
 0xc46   : > { %8408 = vmatprep.subr.mxu0 %v12172_v7 }
 0xc47   : > { %8409 = vmatpush3.msra.mxu0 %v12177_v2 }
 0xc48   : > { %7783 = vmatmul.mubr.msk.f32.vlgmr.msra.gmra.mxu0 %vm5197_vm4, %v9101_v44  ;;  %8840 = vmatprep.subr.mxu0 %v5453_v28  ;;  %vm9102_vm4 = vmmov 0  }
 0xc49   : > { %8841 = vmatpush3.msra.mxu0 %v5453_v28  ;;  %7784 = vmatprep.mubr.msk.f32.mxu0 %vm5200_vm5, %v9101_v44  ;;  %vm5973_vm5 = vcmp.eq.s32.totalorder %v13836_v60, 0 }
 0xc4a   : > { %8842 = vmatprep.subr.mxu0 %v5452_v57 }
 0xc4b   : > { %8843 = vmatpush3.msra.mxu0 %v5452_v57 }
 0xc4c   : > { %7785 = vmatmul.mubr.msk.f32.gmra.mxu0 %vm5199_vm6, %v9101_v44  ;;  %8844 = vmatprep.subr.mxu0 %v5451_v14  ;;  %vm6058_vm6 = vcmp.eq.s32.totalorder %v13836_v60, 1 }
 0xc4d   : > { %8845 = vmatpush3.msra.mxu0 %v5451_v14 }
 0xc4e   : > { %8846 = vmatprep.subr.mxu0 %v5450_v40 }
 0xc4f   : > { %8847 = vmatpush3.msra.mxu0 %v5450_v40 }
 0xc50   : > { %8466 = vmatprep.subr.mxu0 %v11966_v52 }
 0xce8   : > { %v8828_v12 = vpop.f32.mrf.mxu0 }
 0xce9   : > { %v12887_v20 = vadd.f32 %v8828_v12, %v12827_v21  ;;  %v5621_v21 = vld [vmem:[%s13525_s9 + $0x1c8] sm:$0xff] }
 0xcea   : > { %v5186_v56 = vpop.f32.mrf.mxu0 }
 0xceb   : > { %v12890_v19 = vadd.f32 %v5186_v56, %v12830_v27 }
 0xd08   : > { %v8410_v39 = vpop.f32.mrf.mxu0 }
 0xd0a   : > { %v8411_v63 = vpop.f32.mrf.mxu0 }
 0xd0b   : > { %v8412_v42 = vadd.f32 %v8411_v63, %v8410_v39 }
 0xd0c   : > { %v8413_v25 = vpop.f32.mrf.mxu0 }
 0xd0d   : > { %8837 = vmatprep.mubr.msk.f32.mxu1 %vm3334_vm12, %v8412_v42 }
 0xd0e   : > { %v8414_v37 = vpop.f32.mrf.mxu0 }
 0xd0f   : > { %v8415_v8 = vadd.f32 %v8414_v37, %v8413_v25  ;;  %v6065_v37 = vld [vmem:[%s13527_s11 + $0x48] sm:$0xff] }
 0xd11   : > { %8838 = vmatmul.mubr.msk.f32.vlgmr.msra.gmra.mxu1 %vm3334_vm12, %v8415_v8  ;;  %v6150_v8 = vld [vmem:[%s13527_s11 + $0x68] sm:$0xff] }
 0xd12   : > { %8423 = vmatpush3.msra.mxu1 %v11973_v50  ;;  %7788 = vmatprep.mubr.msk.f32.mxu1 %vm5368_vm7, %v9101_v44  ;;  %vm6654_vm7 = vcmp.eq.s32.totalorder %v12110_v43, 8 }
 0xd13   : > { %8424 = vmatprep.subr.mxu1 %v11977_v35 }
 0xd14   : > { %8425 = vmatpush3.msra.mxu1 %v11986_v33 }
 0xd15   : > { %8426 = vmatprep.subr.mxu1 %v11993_v59 }
 0xd16   : > { %8427 = vmatpush3.msra.mxu1 %v12002_v11 }
 0xd17   : > { %8428 = vmatprep.subr.mxu1 %v12009_v31 }
 0xd18   : > { %8429 = vmatpush3.msra.mxu1 %v12016_v1 }
 0xd19   : > { %8430 = vmatprep.subr.mxu1 %v12023_v41 }
 0xd1a   : > { %8431 = vmatpush3.msra.mxu1 %v12030_v38 }
 0xd1b   : > { %8432 = vmatprep.subr.mxu1 %v12036_v53 }
 0xd1c   : > { %8433 = vmatpush3.msra.mxu1 %v12043_v48 }
 0xd1d   : > { %8434 = vmatprep.subr.mxu1 %v12049_v24 }
 0xd1e   : > { %8435 = vmatpush3.msra.mxu1 %v12056_v55 }
 0xd1f   : > { %8436 = vmatprep.subr.mxu1 %v12063_v36 }
 0xd20   : > { %8437 = vmatpush3.msra.mxu1 %v12070_v49 }
 0xd21   : > { %8438 = vmatprep.subr.mxu1 %v12077_v29 }
 0xd22   : > { %8439 = vmatpush3.msra.mxu1 %v12084_v46 }
 0xd23   : > { %8440 = vmatprep.subr.mxu1 %v12091_v4 }
 0xd24   : > { %8441 = vmatpush3.msra.mxu1 %v12098_v47 }
 0xd25   : > { %8442 = vmatprep.subr.mxu1 %v12105_v0 }
 0xd26   : > { %8443 = vmatpush3.msra.mxu1 %v12115_v22 }
 0xd27   : > { %8444 = vmatprep.subr.mxu1 %v12122_v15 }
 0xd28   : > { %8445 = vmatpush3.msra.mxu1 %v12129_v61 }
 0xd29   : > { %8446 = vmatprep.subr.mxu1 %v12135_v5 }
 0xd2a   : > { %8447 = vmatpush3.msra.mxu1 %v12142_v51 }
 0xd2b   : > { %8448 = vmatprep.subr.mxu1 %v12148_v32 }
 0xd2c   : > { %8449 = vmatpush3.msra.mxu1 %v12154_v30 }
 0xd2d   : > { %8450 = vmatprep.subr.mxu1 %v12159_v6 }
 0xd2e   : > { %8451 = vmatpush3.msra.mxu1 %v12167_v45 }
 0xd2f   : > { %8452 = vmatprep.subr.mxu1 %v12172_v7 }
 0xd30   : > { %8453 = vmatpush3.msra.mxu1 %v12177_v2 }
 0xd31   : > { %7789 = vmatmul.mubr.msk.f32.vlgmr.msra.gmra.mxu1 %vm5367_vm8, %v9101_v44  ;;  %8851 = vmatprep.subr.mxu1 %v5623_v10  ;;  %vm6739_vm8 = vcmp.eq.s32.totalorder %v12110_v43, 9 }
 0xd32   : > { %8852 = vmatpush3.msra.mxu1 %v5623_v10  ;;  %7790 = vmatprep.mubr.msk.f32.mxu1 %vm5370_vm9, %v9101_v44  ;;  %v6064_v10 = vld [vmem:[%s13527_s11 + $0x40] sm:$0xff]  ;;  %vm6143_vm9 = vcmp.eq.s32.totalorder %v13836_v60, 2 }
 0xd33   : > { %8853 = vmatprep.subr.mxu1 %v5622_v3 }
 0xd34   : > { %8854 = vmatpush3.msra.mxu1 %v5622_v3  ;;  %v6149_v3 = vld [vmem:[%s13527_s11 + $0x60] sm:$0xff] }
 0xd35   : > { %7791 = vmatmul.mubr.msk.f32.gmra.mxu1 %vm5369_vm10, %v9101_v44  ;;  %8855 = vmatprep.subr.mxu1 %v5621_v21  ;;  %vm6824_vm10 = vcmp.eq.s32.totalorder %v12110_v43, 10 }
 0xd36   : > { %8856 = vmatpush3.msra.mxu1 %v5621_v21  ;;  %v6237_v21 = vld [vmem:[%s13527_s11 + $0x98] sm:$0xff] }
 0xd37   : > { %8857 = vmatprep.subr.mxu1 %v5620_v34 }
 0xd38   : > { %8858 = vmatpush3.msra.mxu1 %v5620_v34  ;;  %v6322_v34 = vld [vmem:[%s13527_s11 + $0xb8] sm:$0xff] }
 0xd39   : > { %8510 = vmatprep.subr.mxu1 %v11966_v52 }
 0xdd1   : > { %v8839_v27 = vpop.f32.mrf.mxu1 }
 0xdd2   : > { %v5366_v23 = vadd.f32 %v8839_v27, %v12887_v20  ;;  %v6236_v27 = vld [vmem:[%s13527_s11 + $0x90] sm:$0xff] }
 0xdd3   : > { %v5356_v58 = vpop.f32.mrf.mxu1 }
 0xdd4   : > { %v5365_v18 = vadd.f32 %v5356_v58, %v12890_v19  ;;  %v6235_v58 = vld [vmem:[%s13527_s11 + $0x88] sm:$0xff] }
 0xdf1   : > { %v8454_v54 = vpop.f32.mrf.mxu1 }
 0xdf3   : > { %v8455_v62 = vpop.f32.mrf.mxu1 }
 0xdf4   : > { %v8456_v26 = vadd.f32 %v8455_v62, %v8454_v54  ;;  %v6234_v54 = vld [vmem:[%s13527_s11 + $0x80] sm:$0xff] }
 0xdf5   : > { %v8457_v28 = vpop.f32.mrf.mxu1  ;;  %v6319_v62 = vld [vmem:[%s13527_s11 + $0xa0] sm:$0xff] }
 0xdf6   : > { %8848 = vmatprep.mubr.msk.f32.mxu0 %vm3334_vm12, %v8456_v26  ;;  %v6407_v26 = vld [vmem:[%s13527_s11 + $0xd8] sm:$0xff] }
 0xdf7   : > { %v8458_v57 = vpop.f32.mrf.mxu1 }
 0xdf8   : > { %v8459_v14 = vadd.f32 %v8458_v57, %v8457_v28  ;;  %v6492_v28 = vld [vmem:[%s13527_s11 + $0xf8] sm:$0xff]  ;;  %v6406_v57 = vld [vmem:[%s13527_s11 + $0xd0] sm:$0xff] }
 0xdfa   : > { %8849 = vmatmul.mubr.msk.f32.vlgmr.msra.gmra.mxu0 %vm3334_vm12, %v8459_v14  ;;  %v6491_v14 = vld [vmem:[%s13527_s11 + $0xf0] sm:$0xff] }
 0xdfb   : > { %8467 = vmatpush3.msra.mxu0 %v11973_v50  ;;  %7794 = vmatprep.mubr.msk.f32.mxu0 %vm5538_vm11, %v9101_v44  ;;  %vm6228_vm11 = vcmp.eq.s32.totalorder %v13836_v60, 3 }
 0xdfc   : > { %8468 = vmatprep.subr.mxu0 %v11977_v35 }
 0xdfd   : > { %8469 = vmatpush3.msra.mxu0 %v11986_v33 }
 0xdfe   : > { %8470 = vmatprep.subr.mxu0 %v11993_v59 }
 0xdff   : > { %8471 = vmatpush3.msra.mxu0 %v12002_v11 }
 0xe00   : > { %8472 = vmatprep.subr.mxu0 %v12009_v31 }
 0xe01   : > { %8473 = vmatpush3.msra.mxu0 %v12016_v1 }
 0xe02   : > { %8474 = vmatprep.subr.mxu0 %v12023_v41 }
 0xe03   : > { %8475 = vmatpush3.msra.mxu0 %v12030_v38 }
 0xe04   : > { %8476 = vmatprep.subr.mxu0 %v12036_v53 }
 0xe05   : > { %8477 = vmatpush3.msra.mxu0 %v12043_v48 }
 0xe06   : > { %8478 = vmatprep.subr.mxu0 %v12049_v24 }
 0xe07   : > { %8479 = vmatpush3.msra.mxu0 %v12056_v55 }
 0xe08   : > { %8480 = vmatprep.subr.mxu0 %v12063_v36 }
 0xe09   : > { %8481 = vmatpush3.msra.mxu0 %v12070_v49 }
 0xe0a   : > { %8482 = vmatprep.subr.mxu0 %v12077_v29 }
 0xe0b   : > { %8483 = vmatpush3.msra.mxu0 %v12084_v46 }
 0xe0c   : > { %8484 = vmatprep.subr.mxu0 %v12091_v4 }
 0xe0d   : > { %8485 = vmatpush3.msra.mxu0 %v12098_v47 }
 0xe0e   : > { %8486 = vmatprep.subr.mxu0 %v12105_v0 }
 0xe0f   : > { %8487 = vmatpush3.msra.mxu0 %v12115_v22 }
 0xe10   : > { %8488 = vmatprep.subr.mxu0 %v12122_v15 }
 0xe11   : > { %8489 = vmatpush3.msra.mxu0 %v12129_v61 }
 0xe12   : > { %8490 = vmatprep.subr.mxu0 %v12135_v5 }
 0xe13   : > { %8491 = vmatpush3.msra.mxu0 %v12142_v51 }
 0xe14   : > { %8492 = vmatprep.subr.mxu0 %v12148_v32 }
 0xe15   : > { %8493 = vmatpush3.msra.mxu0 %v12154_v30 }
 0xe16   : > { %8494 = vmatprep.subr.mxu0 %v12159_v6 }
 0xe17   : > { %8495 = vmatpush3.msra.mxu0 %v12167_v45 }
 0xe18   : > { %8496 = vmatprep.subr.mxu0 %v12172_v7 }
 0xe19   : > { %8497 = vmatpush3.msra.mxu0 %v12177_v2 }
 0xe1a   : > { %7795 = vmatmul.mubr.msk.f32.vlgmr.msra.gmra.mxu0 %vm5537_vm13, %v9101_v44  ;;  %8862 = vmatprep.subr.mxu0 %v5793_v16  ;;  %vm6313_vm13 = vcmp.eq.s32.totalorder %v13836_v60, 4 }
 0xe1b   : > { %7796 = vmatprep.mubr.msk.f32.mxu0 %vm5540_vm14, %v9101_v44  ;;  %8863 = vmatpush3.msra.mxu0 %v5793_v16  ;;  %v6574_v16 = vld [vmem:[%s13527_s11 + $0x100] sm:$0xff]  ;;  %vm6909_vm14 = vcmp.eq.s32.totalorder %v12110_v43, 11 }
 0xe1c   : > { %8864 = vmatprep.subr.mxu0 %v5792_v17 }
 0xe1d   : > { %8865 = vmatpush3.msra.mxu0 %v5792_v17  ;;  %v6659_v17 = vld [vmem:[%s13527_s11 + $0x120] sm:$0xff] }
 0xe1e   : > { %7797 = vmatmul.mubr.msk.f32.gmra.mxu0 %vm5539_vm15, %v9101_v44  ;;  %vm6994_vm15 = vcmp.eq.s32.totalorder %v12110_v43, 12 }
 0xeba   : > { %v8850_v52 = vpop.f32.mrf.mxu0 }
 0xebb   : > { %v12989_v40 = vadd.f32 %v8850_v52, %v5366_v23  ;;  %v6321_v23 = vld [vmem:[%s13527_s11 + $0xb0] sm:$0xff]  ;;  %v6405_v52 = vld [vmem:[%s13527_s11 + $0xc8] sm:$0xff] }
 0xebc   : > { %v5526_v12 = vpop.f32.mrf.mxu0 }
 0xebd   : > { %v12991_v20 = vadd.f32 %v5526_v12, %v5365_v18  ;;  %v6320_v18 = vld [vmem:[%s13527_s11 + $0xa8] sm:$0xff]  ;;  %v6404_v12 = vld [vmem:[%s13527_s11 + $0xc0] sm:$0xff] }
 0xeda   : > { %v8498_v56 = vpop.f32.mrf.mxu0 }
 0xedc   : > { %v8499_v19 = vpop.f32.mrf.mxu0 }
 0xedd   : > { %v8500_v39 = vadd.f32 %v8499_v19, %v8498_v56  ;;  %v6577_v56 = vld [vmem:[%s13527_s11 + $0x118] sm:$0xff] }
 0xede   : > { %v8501_v63 = vpop.f32.mrf.mxu0  ;;  %v6662_v19 = vld [vmem:[%s13527_s11 + $0x138] sm:$0xff] }
 0xedf   : > { %8859 = vmatprep.mubr.msk.f32.mxu1 %vm3334_vm12, %v8500_v39  ;;  %v6576_v39 = vld [vmem:[%s13527_s11 + $0x110] sm:$0xff] }
 0xee0   : > { %v8502_v42 = vpop.f32.mrf.mxu0 }
 0xee1   : > { %v8503_v25 = vadd.f32 %v8502_v42, %v8501_v63  ;;  %v6661_v63 = vld [vmem:[%s13527_s11 + $0x130] sm:$0xff]  ;;  %v6575_v42 = vld [vmem:[%s13527_s11 + $0x108] sm:$0xff] }
 0xee3   : > { %8860 = vmatmul.mubr.msk.f32.vlgmr.msra.gmra.mxu1 %vm3334_vm12, %v8503_v25  ;;  %v6660_v25 = vld [vmem:[%s13527_s11 + $0x128] sm:$0xff] }
 0xee4   : > { %8511 = vmatpush3.msra.mxu1 %v11973_v50  ;;  %7800 = vmatprep.mubr.msk.f32.mxu1 %vm5708_vm0, %v9101_v44  ;;  %v5791_v50 = vld [vmem:[%s13525_s9 + $0x1e8] sm:$0xff]  ;;  %vm6398_vm0 = vcmp.eq.s32.totalorder %v13836_v60, 5 }
 0xee5   : > { %8512 = vmatprep.subr.mxu1 %v11977_v35  ;;  %8866 = vmatprep.subr.mxu0 %v5791_v50  ;;  %v5790_v35 = vld [vmem:[%s13525_s9 + $0x1e0] sm:$0xff] }
 0xee6   : > { %8513 = vmatpush3.msra.mxu1 %v11986_v33  ;;  %8867 = vmatpush3.msra.mxu0 %v5791_v50  ;;  %v6747_v50 = vld [vmem:[%s13527_s11 + $0x158] sm:$0xff] }
 0xee7   : > { %8514 = vmatprep.subr.mxu1 %v11993_v59  ;;  %8868 = vmatprep.subr.mxu0 %v5790_v35 }
 0xee8   : > { %8515 = vmatpush3.msra.mxu1 %v12002_v11  ;;  %8869 = vmatpush3.msra.mxu0 %v5790_v35  ;;  %v6832_v35 = vld [vmem:[%s13527_s11 + $0x178] sm:$0xff] }
 0xee9   : > { %8516 = vmatprep.subr.mxu1 %v12009_v31 }
 0xeea   : > { %8517 = vmatpush3.msra.mxu1 %v12016_v1 }
 0xeeb   : > { %8518 = vmatprep.subr.mxu1 %v12023_v41 }
 0xeec   : > { %8519 = vmatpush3.msra.mxu1 %v12030_v38 }
 0xeed   : > { %8520 = vmatprep.subr.mxu1 %v12036_v53 }
 0xeee   : > { %8521 = vmatpush3.msra.mxu1 %v12043_v48 }
 0xeef   : > { %8522 = vmatprep.subr.mxu1 %v12049_v24 }
 0xef0   : > { %8523 = vmatpush3.msra.mxu1 %v12056_v55  ;;  %v5891_v55 = vld [vmem:[%s13527_s11 + $0x18] sm:$0xff] }
 0xef1   : > { %8524 = vmatprep.subr.mxu1 %v12063_v36  ;;  %v5982_v36 = vld [vmem:[%s13527_s11 + $0x38] sm:$0xff]  ;;  %8873 = vmatprep.subr.mxu0 %v5891_v55 }
 0xef2   : > { %8525 = vmatpush3.msra.mxu1 %v12070_v49  ;;  %v5890_v49 = vld [vmem:[%s13527_s11 + $0x10] sm:$0xff] }
 0xef3   : > { %8526 = vmatprep.subr.mxu1 %v12077_v29  ;;  %v5981_v29 = vld [vmem:[%s13527_s11 + $0x30] sm:$0xff] }
 0xef4   : > { %8527 = vmatpush3.msra.mxu1 %v12084_v46  ;;  %v5889_v46 = vld [vmem:[%s13527_s11 + $0x8] sm:$0xff] }
 0xef5   : > { %8528 = vmatprep.subr.mxu1 %v12091_v4  ;;  %v5980_v4 = vld [vmem:[%s13527_s11 + $0x28] sm:$0xff] }
 0xef6   : > { %8529 = vmatpush3.msra.mxu1 %v12098_v47  ;;  %v5888_v47 = vld [vmem:[%s13527_s11] sm:$0xff] }
 0xef7   : > { %8530 = vmatprep.subr.mxu1 %v12105_v0  ;;  %v5979_v0 = vld [vmem:[%s13527_s11 + $0x20] sm:$0xff] }
 0xef8   : > { %8531 = vmatpush3.msra.mxu1 %v12115_v22  ;;  %v6067_v22 = vld [vmem:[%s13527_s11 + $0x58] sm:$0xff] }
 0xef9   : > { %8532 = vmatprep.subr.mxu1 %v12122_v15  ;;  %v6152_v15 = vld [vmem:[%s13527_s11 + $0x78] sm:$0xff] }
 0xefa   : > { %8533 = vmatpush3.msra.mxu1 %v12129_v61 }
 0xefb   : > { %8534 = vmatprep.subr.mxu1 %v12135_v5 }
 0xefc   : > { %8535 = vmatpush3.msra.mxu1 %v12142_v51  ;;  %v7806_v51 = vld [vmem:[%s13526_s10] ss:$0 sm:$0xff] }
 0xefd   : > { %8536 = vmatprep.subr.mxu1 %v12148_v32 }
 0xefe   : > { %8537 = vmatpush3.msra.mxu1 %v12154_v30 }
 0xeff   : > { %8538 = vmatprep.subr.mxu1 %v12159_v6 }
 0xf00   : > { %8539 = vmatpush3.msra.mxu1 %v12167_v45 }
 0xf01   : > { %8540 = vmatprep.subr.mxu1 %v12172_v7 }
 0xf02   : > { %8541 = vmatpush3.msra.mxu1 %v12177_v2  ;;  %v6066_v2 = vld [vmem:[%s13527_s11 + $0x50] sm:$0xff] }
 0xf03   : > { %7801 = vmatmul.mubr.msk.f32.vlgmr.msra.gmra.mxu1 %vm5707_vm1, %v9101_v44  ;;  %8884 = vmatprep.subr.mxu1 %v5982_v36  ;;  %vm6483_vm1 = vcmp.eq.s32.totalorder %v13836_v60, 6 }
 0xf04   : > { %7802 = vmatprep.mubr.msk.f32.mxu1 %vm5710_vm2, %v9101_v44  ;;  %8885 = vmatpush3.msra.mxu1 %v5982_v36  ;;  %v7000_v36 = vld [vmem:[%s13527_s11 + $0x1a8] sm:$0xff]  ;;  %vm7079_vm2 = vcmp.eq.s32.totalorder %v12110_v43, 13 }
 0xf05   : > { %8886 = vmatprep.subr.mxu1 %v5981_v29 }
 0xf06   : > { %8887 = vmatpush3.msra.mxu1 %v5981_v29  ;;  %v6999_v29 = vld [vmem:[%s13527_s11 + $0x1a0] sm:$0xff] }
 0xf07   : > { %7803 = vmatmul.mubr.msk.f32.gmra.mxu1 %vm5709_vm3, %v9101_v44  ;;  %8888 = vmatprep.subr.mxu1 %v5980_v4  ;;  %vm7164_vm3 = vcmp.eq.s32.totalorder %v12110_v43, 14 }
 0xf08   : > { %8889 = vmatpush3.msra.mxu1 %v5980_v4  ;;  %v7172_v4 = vld [vmem:[%s13527_s11 + $0x1f8] sm:$0xff] }
 0xf09   : > { %8890 = vmatprep.subr.mxu1 %v5979_v0 }
 0xf0a   : > { %8891 = vmatpush3.msra.mxu1 %v5979_v0  ;;  %v7171_v0 = vld [vmem:[%s13527_s11 + $0x1f0] sm:$0xff] }
 0xf0b   : > { %8906 = vmatprep.subr.mxu1 %v6152_v15 }
 0xfa3   : > { %v8861_v33 = vpop.f32.mrf.mxu1 }
 0xfa4   : > { %v5706_v59 = vadd.f32 %v8861_v33, %v12989_v40  ;;  %v6490_v40 = vld [vmem:[%s13527_s11 + $0xe8] sm:$0xff]  ;;  %v6746_v33 = vld [vmem:[%s13527_s11 + $0x150] sm:$0xff] }
 0xfa5   : > { %v5696_v11 = vpop.f32.mrf.mxu1 }
 0xfa6   : > { %v5705_v31 = vadd.f32 %v5696_v11, %v12991_v20  ;;  %v6489_v20 = vld [vmem:[%s13527_s11 + $0xe0] sm:$0xff]  ;;  %v6745_v11 = vld [vmem:[%s13527_s11 + $0x148] sm:$0xff] }
 0xfc3   : > { %v8542_v1 = vpop.f32.mrf.mxu1 }
 0xfc5   : > { %v8543_v41 = vpop.f32.mrf.mxu1 }
 0xfc6   : > { %v8544_v38 = vadd.f32 %v8543_v41, %v8542_v1  ;;  %v6744_v1 = vld [vmem:[%s13527_s11 + $0x140] sm:$0xff] }
 0xfc7   : > { %v8545_v53 = vpop.f32.mrf.mxu1  ;;  %v6829_v41 = vld [vmem:[%s13527_s11 + $0x160] sm:$0xff] }
 0xfc8   : > { %8870 = vmatprep.mubr.msk.f32.mxu0 %vm3334_vm12, %v8544_v38  ;;  %v6917_v38 = vld [vmem:[%s13527_s11 + $0x198] sm:$0xff] }
 0xfc9   : > { %v8546_v48 = vpop.f32.mrf.mxu1 }
 0xfca   : > { %v8547_v24 = vadd.f32 %v8546_v48, %v8545_v53  ;;  %v7002_v53 = vld [vmem:[%s13527_s11 + $0x1b8] sm:$0xff]  ;;  %v6916_v48 = vld [vmem:[%s13527_s11 + $0x190] sm:$0xff] }
 0xfcc   : > { %8871 = vmatmul.mubr.msk.f32.vlgmr.msra.gmra.mxu0 %vm3334_vm12, %v8547_v24  ;;  %v7001_v24 = vld [vmem:[%s13527_s11 + $0x1b0] sm:$0xff] }
 0xfcd   : > { %8874 = vmatpush3.msra.mxu0 %v5891_v55  ;;  %v6915_v55 = vld [vmem:[%s13527_s11 + $0x188] sm:$0xff] }
 0xfce   : > { %8875 = vmatprep.subr.mxu0 %v5890_v49 }
 0xfcf   : > { %8876 = vmatpush3.msra.mxu0 %v5890_v49  ;;  %v6914_v49 = vld [vmem:[%s13527_s11 + $0x180] sm:$0xff] }
 0xfd0   : > { %8877 = vmatprep.subr.mxu0 %v5889_v46 }
 0xfd1   : > { %8878 = vmatpush3.msra.mxu0 %v5889_v46  ;;  %v7087_v46 = vld [vmem:[%s13527_s11 + $0x1d8] sm:$0xff] }
 0xfd2   : > { %8879 = vmatprep.subr.mxu0 %v5888_v47 }
 0xfd3   : > { %8880 = vmatpush3.msra.mxu0 %v5888_v47  ;;  %v7086_v47 = vld [vmem:[%s13527_s11 + $0x1d0] sm:$0xff] }
 0xfd4   : > { %8895 = vmatprep.subr.mxu0 %v6067_v22 }
0x108c   : > { %v8872_v61 = vpop.f32.mrf.mxu0 }
0x108d   : > { %v5876_v5 = vadd.f32 %v8872_v61, %v5706_v59  ;;  %v6831_v59 = vld [vmem:[%s13527_s11 + $0x170] sm:$0xff]  ;;  %v7084_v61 = vld [vmem:[%s13527_s11 + $0x1c0] sm:$0xff] }
0x108e   : > { %v5866_v32 = vpop.f32.mrf.mxu0 }
0x108f   : > { %v5875_v30 = vadd.f32 %v5866_v32, %v5705_v31  ;;  %v5885_v6 = vadd.f32 %v7806_v51, %v5876_v5  ;;  %v6830_v31 = vld [vmem:[%s13527_s11 + $0x168] sm:$0xff]  ;;  %v7169_v5 = vld [vmem:[%s13527_s11 + $0x1e0] sm:$0xff]  ;;  %v7343_v32 = vld [vmem:[%s13529_s13 + $0x38] sm:$0xff] }
0x1091   : > { %v5884_v9 = vadd.f32 %v7806_v51, %v5875_v30  ;;  %v13085_v7 = vmax.f32 %v5885_v6, 0.0  ;;  %v13837_v51 = vmov 0.0   ;;  %v7342_v30 = vld [vmem:[%s13529_s13 + $0x30] sm:$0xff]  ;;  %v7341_v6 = vld [vmem:[%s13529_s13 + $0x28] sm:$0xff] }
0x1093   : > { %v13083_v45 = vmax.f32 %v5884_v9, 0.0 }
0x1095   : > { %8881 = vmatprep.mubr.msk.f32.mxu0 %vm3334_vm12, %v13083_v45  ;;  %8892 = vmatprep.mubr.msk.f32.mxu1 %vm3334_vm12, %v13083_v45 }
0x1096   : > { %8882 = vmatmul.mubr.msk.f32.vlgmr.msra.gmra.mxu0 %vm3334_vm12, %v13085_v7  ;;  %8893 = vmatmul.mubr.msk.f32.vlgmr.msra.gmra.mxu1 %vm3334_vm12, %v13085_v7 }
0x1097   : > { %8896 = vmatpush3.msra.mxu0 %v6067_v22  ;;  %8907 = vmatpush3.msra.mxu1 %v6152_v15  ;;  %v7085_v22 = vld [vmem:[%s13527_s11 + $0x1c8] sm:$0xff] }
0x1098   : > { %8897 = vmatprep.subr.mxu0 %v6066_v2  ;;  %8903 = vmatprep.mubr.msk.f32.mxu0 %vm3334_vm12, %v13083_v45  ;;  %v7170_v15 = vld [vmem:[%s13527_s11 + $0x1e8] sm:$0xff] }
0x1099   : > { %8908 = vmatprep.subr.mxu1 %v6151_v13  ;;  %8914 = vmatprep.mubr.msk.f32.mxu1 %vm3334_vm12, %v13083_v45 }
0x109a   : > { %8898 = vmatpush3.msra.mxu0 %v6066_v2  ;;  %8909 = vmatpush3.msra.mxu1 %v6151_v13 }
0x109b   : > { %8899 = vmatprep.subr.mxu0 %v6065_v37  ;;  %8910 = vmatprep.subr.mxu1 %v6150_v8 }
0x109c   : > { %8900 = vmatpush3.msra.mxu0 %v6065_v37  ;;  %8911 = vmatpush3.msra.mxu1 %v6150_v8 }
0x109d   : > { %8901 = vmatprep.subr.mxu0 %v6064_v10  ;;  %8912 = vmatprep.subr.mxu1 %v6149_v3 }
0x109e   : > { %8902 = vmatpush3.msra.mxu0 %v6064_v10  ;;  %8913 = vmatpush3.msra.mxu1 %v6149_v3 }
0x109f   : > { %8904 = vmatmul.mubr.msk.f32.vlgmr.msra.gmra.mxu0 %vm3334_vm12, %v13085_v7  ;;  %8915 = vmatmul.mubr.msk.f32.vlgmr.msra.gmra.mxu1 %vm3334_vm12, %v13085_v7 }
0x10a0   : > { %8917 = vmatprep.subr.mxu0 %v6237_v21  ;;  %8928 = vmatprep.subr.mxu1 %v6322_v34 }
0x10a1   : > { %8918 = vmatpush3.msra.mxu0 %v6237_v21  ;;  %8925 = vmatprep.mubr.msk.f32.mxu0 %vm3334_vm12, %v13083_v45 }
0x10a2   : > { %8929 = vmatpush3.msra.mxu1 %v6322_v34  ;;  %8936 = vmatprep.mubr.msk.f32.mxu1 %vm3334_vm12, %v13083_v45 }
0x10a3   : > { %8919 = vmatprep.subr.mxu0 %v6236_v27  ;;  %8930 = vmatprep.subr.mxu1 %v6321_v23 }
0x10a4   : > { %8920 = vmatpush3.msra.mxu0 %v6236_v27  ;;  %8931 = vmatpush3.msra.mxu1 %v6321_v23 }
0x10a5   : > { %8921 = vmatprep.subr.mxu0 %v6235_v58  ;;  %8932 = vmatprep.subr.mxu1 %v6320_v18 }
0x10a6   : > { %8922 = vmatpush3.msra.mxu0 %v6235_v58  ;;  %8933 = vmatpush3.msra.mxu1 %v6320_v18 }
0x10a7   : > { %8923 = vmatprep.subr.mxu0 %v6234_v54  ;;  %8934 = vmatprep.subr.mxu1 %v6319_v62 }
0x10a8   : > { %8924 = vmatpush3.msra.mxu0 %v6234_v54  ;;  %8935 = vmatpush3.msra.mxu1 %v6319_v62 }
0x10a9   : > { %8926 = vmatmul.mubr.msk.f32.vlgmr.msra.gmra.mxu0 %vm3334_vm12, %v13085_v7  ;;  %8937 = vmatmul.mubr.msk.f32.vlgmr.msra.gmra.mxu1 %vm3334_vm12, %v13085_v7 }
0x10aa   : > { %8939 = vmatprep.subr.mxu0 %v6407_v26  ;;  %8950 = vmatprep.subr.mxu1 %v6492_v28 }
0x10ab   : > { %8940 = vmatpush3.msra.mxu0 %v6407_v26  ;;  %8947 = vmatprep.mubr.msk.f32.mxu0 %vm3334_vm12, %v13083_v45 }
0x10ac   : > { %8951 = vmatpush3.msra.mxu1 %v6492_v28  ;;  %8958 = vmatprep.mubr.msk.f32.mxu1 %vm3334_vm12, %v13083_v45 }
0x10ad   : > { %8941 = vmatprep.subr.mxu0 %v6406_v57  ;;  %8952 = vmatprep.subr.mxu1 %v6491_v14 }
0x10ae   : > { %8942 = vmatpush3.msra.mxu0 %v6406_v57  ;;  %8953 = vmatpush3.msra.mxu1 %v6491_v14 }
0x10af   : > { %8943 = vmatprep.subr.mxu0 %v6405_v52  ;;  %8954 = vmatprep.subr.mxu1 %v6490_v40 }
0x10b0   : > { %8944 = vmatpush3.msra.mxu0 %v6405_v52  ;;  %8955 = vmatpush3.msra.mxu1 %v6490_v40 }
0x10b1   : > { %8945 = vmatprep.subr.mxu0 %v6404_v12  ;;  %8956 = vmatprep.subr.mxu1 %v6489_v20 }
0x10b2   : > { %8946 = vmatpush3.msra.mxu0 %v6404_v12  ;;  %8957 = vmatpush3.msra.mxu1 %v6489_v20 }
0x10b3   : > { %8948 = vmatmul.mubr.msk.f32.vlgmr.msra.gmra.mxu0 %vm3334_vm12, %v13085_v7  ;;  %8959 = vmatmul.mubr.msk.f32.vlgmr.msra.gmra.mxu1 %vm3334_vm12, %v13085_v7 }
0x10b4   : > { %8961 = vmatprep.subr.mxu0 %v6577_v56  ;;  %8972 = vmatprep.subr.mxu1 %v6662_v19 }
0x10b5   : > { %8962 = vmatpush3.msra.mxu0 %v6577_v56  ;;  %8969 = vmatprep.mubr.msk.f32.mxu0 %vm3334_vm12, %v13083_v45 }
0x10b6   : > { %8973 = vmatpush3.msra.mxu1 %v6662_v19  ;;  %8980 = vmatprep.mubr.msk.f32.mxu1 %vm3334_vm12, %v13083_v45 }
0x10b7   : > { %8963 = vmatprep.subr.mxu0 %v6576_v39  ;;  %8974 = vmatprep.subr.mxu1 %v6661_v63 }
0x10b8   : > { %8964 = vmatpush3.msra.mxu0 %v6576_v39  ;;  %8975 = vmatpush3.msra.mxu1 %v6661_v63 }
0x10b9   : > { %8965 = vmatprep.subr.mxu0 %v6575_v42  ;;  %8976 = vmatprep.subr.mxu1 %v6660_v25 }
0x10ba   : > { %8966 = vmatpush3.msra.mxu0 %v6575_v42  ;;  %8977 = vmatpush3.msra.mxu1 %v6660_v25 }
0x10bb   : > { %8967 = vmatprep.subr.mxu0 %v6574_v16  ;;  %8978 = vmatprep.subr.mxu1 %v6659_v17 }
0x10bc   : > { %8968 = vmatpush3.msra.mxu0 %v6574_v16  ;;  %8979 = vmatpush3.msra.mxu1 %v6659_v17 }
0x10bd   : > { %8970 = vmatmul.mubr.msk.f32.vlgmr.msra.gmra.mxu0 %vm3334_vm12, %v13085_v7  ;;  %8981 = vmatmul.mubr.msk.f32.vlgmr.msra.gmra.mxu1 %vm3334_vm12, %v13085_v7 }
0x10be   : > { %8983 = vmatprep.subr.mxu0 %v6747_v50  ;;  %8994 = vmatprep.subr.mxu1 %v6832_v35 }
0x10bf   : > { %8984 = vmatpush3.msra.mxu0 %v6747_v50  ;;  %8991 = vmatprep.mubr.msk.f32.mxu0 %vm3334_vm12, %v13083_v45 }
0x10c0   : > { %8995 = vmatpush3.msra.mxu1 %v6832_v35  ;;  %9002 = vmatprep.mubr.msk.f32.mxu1 %vm3334_vm12, %v13083_v45 }
0x10c1   : > { %8985 = vmatprep.subr.mxu0 %v6746_v33  ;;  %8996 = vmatprep.subr.mxu1 %v6831_v59 }
0x10c2   : > { %8986 = vmatpush3.msra.mxu0 %v6746_v33  ;;  %8997 = vmatpush3.msra.mxu1 %v6831_v59 }
0x10c3   : > { %8987 = vmatprep.subr.mxu0 %v6745_v11  ;;  %8998 = vmatprep.subr.mxu1 %v6830_v31 }
0x10c4   : > { %8988 = vmatpush3.msra.mxu0 %v6745_v11  ;;  %8999 = vmatpush3.msra.mxu1 %v6830_v31 }
0x10c5   : > { %8989 = vmatprep.subr.mxu0 %v6744_v1  ;;  %9000 = vmatprep.subr.mxu1 %v6829_v41 }
0x10c6   : > { %8990 = vmatpush3.msra.mxu0 %v6744_v1  ;;  %9001 = vmatpush3.msra.mxu1 %v6829_v41 }
0x10c7   : > { %8992 = vmatmul.mubr.msk.f32.vlgmr.msra.gmra.mxu0 %vm3334_vm12, %v13085_v7  ;;  %9003 = vmatmul.mubr.msk.f32.vlgmr.msra.gmra.mxu1 %vm3334_vm12, %v13085_v7 }
0x10c8   : > { %9005 = vmatprep.subr.mxu0 %v6917_v38  ;;  %9016 = vmatprep.subr.mxu1 %v7002_v53 }
0x10c9   : > { %9006 = vmatpush3.msra.mxu0 %v6917_v38  ;;  %9013 = vmatprep.mubr.msk.f32.mxu0 %vm3334_vm12, %v13083_v45 }
0x10ca   : > { %9017 = vmatpush3.msra.mxu1 %v7002_v53  ;;  %9024 = vmatprep.mubr.msk.f32.mxu1 %vm3334_vm12, %v13083_v45 }
0x10cb   : > { %9007 = vmatprep.subr.mxu0 %v6916_v48  ;;  %9018 = vmatprep.subr.mxu1 %v7001_v24 }
0x10cc   : > { %9008 = vmatpush3.msra.mxu0 %v6916_v48  ;;  %9019 = vmatpush3.msra.mxu1 %v7001_v24 }
0x10cd   : > { %9009 = vmatprep.subr.mxu0 %v6915_v55  ;;  %9020 = vmatprep.subr.mxu1 %v7000_v36 }
0x10ce   : > { %9010 = vmatpush3.msra.mxu0 %v6915_v55  ;;  %9021 = vmatpush3.msra.mxu1 %v7000_v36 }
0x10cf   : > { %9011 = vmatprep.subr.mxu0 %v6914_v49  ;;  %9022 = vmatprep.subr.mxu1 %v6999_v29 }
0x10d0   : > { %9012 = vmatpush3.msra.mxu0 %v6914_v49  ;;  %9023 = vmatpush3.msra.mxu1 %v6999_v29 }
0x10d1   : > { %9014 = vmatmul.mubr.msk.f32.vlgmr.msra.gmra.mxu0 %vm3334_vm12, %v13085_v7  ;;  %9025 = vmatmul.mubr.msk.f32.vlgmr.msra.gmra.mxu1 %vm3334_vm12, %v13085_v7 }
0x10d2   : > { %9027 = vmatprep.subr.mxu0 %v7087_v46  ;;  %9038 = vmatprep.subr.mxu1 %v7172_v4 }
0x10d3   : > { %9028 = vmatpush3.msra.mxu0 %v7087_v46  ;;  %9035 = vmatprep.mubr.msk.f32.mxu0 %vm3334_vm12, %v13083_v45 }
0x10d4   : > { %9039 = vmatpush3.msra.mxu1 %v7172_v4  ;;  %9046 = vmatprep.mubr.msk.f32.mxu1 %vm3334_vm12, %v13083_v45 }
0x10d5   : > { %9029 = vmatprep.subr.mxu0 %v7086_v47  ;;  %9040 = vmatprep.subr.mxu1 %v7171_v0 }
0x10d6   : > { %9030 = vmatpush3.msra.mxu0 %v7086_v47  ;;  %9041 = vmatpush3.msra.mxu1 %v7171_v0 }
0x10d7   : > { %9031 = vmatprep.subr.mxu0 %v7085_v22  ;;  %9042 = vmatprep.subr.mxu1 %v7170_v15 }
0x10d8   : > { %9032 = vmatpush3.msra.mxu0 %v7085_v22  ;;  %9043 = vmatpush3.msra.mxu1 %v7170_v15 }
0x10d9   : > { %9033 = vmatprep.subr.mxu0 %v7084_v61  ;;  %9044 = vmatprep.subr.mxu1 %v7169_v5 }
0x10da   : > { %9034 = vmatpush3.msra.mxu0 %v7084_v61  ;;  %9045 = vmatpush3.msra.mxu1 %v7169_v5 }
0x10db   : > { %9036 = vmatmul.mubr.msk.f32.vlgmr.msra.gmra.mxu0 %vm3334_vm12, %v13085_v7  ;;  %9047 = vmatmul.mubr.msk.f32.vlgmr.msra.gmra.mxu1 %vm3334_vm12, %v13085_v7 }
0x10dc   : > { %9049 = vmatprep.subr.mxu0 %v13837_v51  ;;  %7423 = vmatprep.mubr.f32.mxu1 %v13837_v51 }
0x10dd   : > { %9053 = vmatprep.mubr.msk.f32.mxu0 %vm9102_vm4, %v13837_v51  ;;  %7383 = vmatprep.subr.mxu1 %v7343_v32 }
0x10de   : > { %7384 = vmatpush1.msra.mxu1 %v7342_v30 }
0x10df   : > { %7385 = vmatprep.subr.mxu1 %v7341_v6 }
0x1156   : > { %v8883_v9 = vpop.f32.mrf.mxu0  ;;  %v8894_v45 = vpop.f32.mrf.mxu1 }
0x1158   : > { %v5964_v7 = vpop.f32.mrf.mxu0  ;;  %v6049_v2 = vpop.f32.mrf.mxu1 }
0x1159   : > { %v5975_v20 = vsel %vm5973_vm5, %v5964_v7, 0.0  ;;  %v6060_v56 = vsel %vm6058_vm6, %v6049_v2, 0.0  ;;  %vm7249_vm5 = vcmp.eq.s32.totalorder %v12110_v43, 15  ;;  %vm6568_vm6 = vcmp.eq.s32.totalorder %v13836_v60, 7  ;;  %v7340_v43 = vld [vmem:[%s13529_s13 + $0x20] sm:$0xff]  ;;  %v7339_v60 = vld [vmem:[%s13529_s13 + $0x18] sm:$0xff] }
0x115a   : > { %v6062_v25 = vadd.f32 %v6060_v56, %v5975_v20  ;;  %7386 = vmatpush1.msra.mxu1 %v7340_v43  ;;  %v7338_v7 = vld [vmem:[%s13529_s13 + $0x10] sm:$0xff]  ;;  %v7337_v2 = vld [vmem:[%s13529_s13 + $0x8] sm:$0xff] }
0x115b   : > { %7387 = vmatprep.subr.mxu1 %v7339_v60  ;;  %v7453_v20 = vld [vmem:[%s13531_s15 + $0xa8] sm:$0xff] }
0x115c   : > { %7388 = vmatpush1.msra.mxu1 %v7338_v7  ;;  %v7437_v56 = vld [vmem:[%s13531_s15 + $0x28] sm:$0xff] }
0x115d   : > { %7389 = vmatprep.subr.mxu1 %v7337_v2 }
0x115f   : > { %v8905_v13 = vpop.f32.mrf.mxu0  ;;  %v8916_v37 = vpop.f32.mrf.mxu1 }
0x1160   : > { %v7463_v13 = vld [vmem:[%s13531_s15 + $0xf8] sm:$0xff] }
0x1161   : > { %v6134_v8 = vpop.f32.mrf.mxu0  ;;  %v6219_v10 = vpop.f32.mrf.mxu1  ;;  %v7447_v37 = vld [vmem:[%s13531_s15 + $0x78] sm:$0xff] }
0x1162   : > { %v6145_v63 = vsel %vm6143_vm9, %v6134_v8, 0.0  ;;  %v6230_v31 = vsel %vm6228_vm11, %v6219_v10, 0.0  ;;  %v7462_v8 = vld [vmem:[%s13531_s15 + $0xf0] sm:$0xff] }
0x1163   : > { %v6147_v17 = vadd.f32 %v6145_v63, %v6062_v25  ;;  %v7446_v10 = vld [vmem:[%s13531_s15 + $0x70] sm:$0xff]  ;;  %v7839_v63 = vld [vmem:[%s13528_s12] ss:$0 sm:$0xff] }
0x1165   : > { %v6232_v53 = vadd.f32 %v6230_v31, %v6147_v17  ;;  %v7433_v31 = vld [vmem:[%s13531_s15 + $0x8] sm:$0xff] }
0x1169   : > { %v8927_v3 = vpop.f32.mrf.mxu0  ;;  %v8938_v21 = vpop.f32.mrf.mxu1 }
0x116a   : > { %v7461_v3 = vld [vmem:[%s13531_s15 + $0xe8] sm:$0xff] }
0x116b   : > { %v6304_v34 = vpop.f32.mrf.mxu0  ;;  %v6389_v27 = vpop.f32.mrf.mxu1  ;;  %v7445_v21 = vld [vmem:[%s13531_s15 + $0x68] sm:$0xff] }
0x116c   : > { %v6315_v1 = vsel %vm6313_vm13, %v6304_v34, 0.0  ;;  %v6400_v36 = vsel %vm6398_vm0, %v6389_v27, 0.0  ;;  %v7460_v34 = vld [vmem:[%s13531_s15 + $0xe0] sm:$0xff] }
0x116d   : > { %v6317_v24 = vadd.f32 %v6315_v1, %v6232_v53  ;;  %v7444_v27 = vld [vmem:[%s13531_s15 + $0x60] sm:$0xff]  ;;  %v7548_v53 = vld [vmem:[%s13533_s17 + $0x30] sm:$0xff] }
0x116e   : > { %v7448_v1 = vld [vmem:[%s13531_s15 + $0x80] sm:$0xff] }
0x116f   : > { %v6402_v46 = vadd.f32 %v6400_v36, %v6317_v24  ;;  %v7344_v24 = vld [vmem:[%s13530_s14] sm:$0x3] }
0x1173   : > { %v8949_v23 = vpop.f32.mrf.mxu0  ;;  %v8960_v58 = vpop.f32.mrf.mxu1 }
0x1174   : > { %v7459_v23 = vld [vmem:[%s13531_s15 + $0xd8] sm:$0xff] }
0x1175   : > { %v6474_v18 = vpop.f32.mrf.mxu0  ;;  %v6559_v54 = vpop.f32.mrf.mxu1  ;;  %v7443_v58 = vld [vmem:[%s13531_s15 + $0x58] sm:$0xff] }
0x1176   : > { %v6485_v49 = vsel %vm6483_vm1, %v6474_v18, 0.0  ;;  %v6570_v9 = vsel %vm6568_vm6, %v6559_v54, 0.0  ;;  %v7458_v18 = vld [vmem:[%s13531_s15 + $0xd0] sm:$0xff] }
0x1177   : > { %v6487_v15 = vadd.f32 %v6485_v49, %v6402_v46  ;;  %v7442_v54 = vld [vmem:[%s13531_s15 + $0x50] sm:$0xff] }
0x1178   : > { %v13839_v49 = vld [vmem:[#allocation4_spill] sm:$0xff] }
0x1179   : > { %v6572_v45 = vadd.f32 %v6570_v9, %v6487_v15 }
0x117d   : > { %v8971_v62 = vpop.f32.mrf.mxu0  ;;  %v8982_v26 = vpop.f32.mrf.mxu1 }
0x117e   : > { %v6656_v19 = vsel %vm6654_vm7, %v8971_v62, 0.0  ;;  %v6741_v39 = vsel %vm6739_vm8, %v8982_v26, 0.0  ;;  %vm7261_vm7 = vcmask 130048   ;;  %v7457_v62 = vld [vmem:[%s13531_s15 + $0xc8] sm:$0xff] }
0x117f   : > { %v6644_v28 = vpop.f32.mrf.mxu0  ;;  %v6729_v57 = vpop.f32.mrf.mxu1  ;;  %v6743_v16 = vadd.f32 %v6741_v39, %v6656_v19  ;;  %v7441_v26 = vld [vmem:[%s13531_s15 + $0x48] sm:$0xff]  ;;  %v7452_v19 = vld [vmem:[%s13531_s15 + $0xa0] sm:$0xff] }
0x1180   : > { %v7456_v28 = vld [vmem:[%s13531_s15 + $0xc0] sm:$0xff] }
0x1181   : > { %v7440_v57 = vld [vmem:[%s13531_s15 + $0x40] sm:$0xff] }
0x1182   : > { %v7436_v39 = vld [vmem:[%s13531_s15 + $0x20] sm:$0xff] }
0x1187   : > { %v8993_v14 = vpop.f32.mrf.mxu0  ;;  %v9004_v52 = vpop.f32.mrf.mxu1 }
0x1188   : > { %v6826_v42 = vsel %vm6824_vm10, %v8993_v14, 0.0  ;;  %v6911_v41 = vsel %vm6909_vm14, %v9004_v52, 0.0  ;;  %v7455_v14 = vld [vmem:[%s13531_s15 + $0xb8] sm:$0xff] }
0x1189   : > { %v6814_v40 = vpop.f32.mrf.mxu0  ;;  %v6899_v12 = vpop.f32.mrf.mxu1  ;;  %v6828_v50 = vadd.f32 %v6826_v42, %v6743_v16  ;;  %v7439_v52 = vld [vmem:[%s13531_s15 + $0x38] sm:$0xff] }
0x118a   : > { %v7454_v40 = vld [vmem:[%s13531_s15 + $0xb0] sm:$0xff] }
0x118b   : > { %v6913_v48 = vadd.f32 %v6911_v41, %v6828_v50  ;;  %v7438_v12 = vld [vmem:[%s13531_s15 + $0x30] sm:$0xff]  ;;  %v7451_v50 = vld [vmem:[%s13531_s15 + $0x98] sm:$0xff]  ;;  %v7432_v41 = vld [vmem:[%s13531_s15] sm:$0xff] }
0x1191   : > { %v9015_v35 = vpop.f32.mrf.mxu0  ;;  %v9026_v33 = vpop.f32.mrf.mxu1 }
0x1192   : > { %v6996_v38 = vsel %vm6994_vm15, %v9015_v35, 0.0  ;;  %v7081_v29 = vsel %vm7079_vm2, %v9026_v33, 0.0  ;;  %v7435_v35 = vld [vmem:[%s13531_s15 + $0x18] sm:$0xff]  ;;  %v7450_v33 = vld [vmem:[%s13531_s15 + $0x90] sm:$0xff] }
0x1193   : > { %v6984_v59 = vpop.f32.mrf.mxu0  ;;  %v7069_v11 = vpop.f32.mrf.mxu1  ;;  %v6998_v55 = vadd.f32 %v6996_v38, %v6913_v48  ;;  %v7549_v38 = vld [vmem:[%s13533_s17 + $0x38] sm:$0xff]  ;;  %v7547_v48 = vld [vmem:[%s13533_s17 + $0x28] sm:$0xff] }
0x1194   : > { %v7434_v59 = vld [vmem:[%s13531_s15 + $0x10] sm:$0xff]  ;;  %v7449_v11 = vld [vmem:[%s13531_s15 + $0x88] sm:$0xff] }
0x1195   : > { %v7083_v4 = vadd.f32 %v7081_v29, %v6998_v55  ;;  %v13838_v55 = vld [vmem:[#allocation5_spill] sm:$0xff]  ;;  %v7353_v29 = vrot.slane %v7344_v24, %v13839_v49 }
0x1196   : > { %v7349_v36 = vrot.slane %v7344_v24, %v13838_v55 }
0x119b   : > { %v9037_v47 = vpop.f32.mrf.mxu0  ;;  %v9048_v0 = vpop.f32.mrf.mxu1 }
0x119c   : > { %v7166_v22 = vsel %vm7164_vm3, %v9037_v47, 0.0  ;;  %v7251_v30 = vsel %vm7249_vm5, %v9048_v0, 0.0 }
0x119d   : > { %v7168_v61 = vadd.f32 %v7166_v22, %v7083_v4  ;;  %v7154_v5 = vpop.f32.mrf.mxu0  ;;  %v7239_v32 = vpop.f32.mrf.mxu1 }
0x119e   : > { %v7545_v5 = vld [vmem:[%s13533_s17 + $0x18] sm:$0xff]  ;;  %v7544_v32 = vld [vmem:[%s13533_s17 + $0x10] sm:$0xff] }
0x119f   : > { %v7253_v6 = vadd.f32 %v7251_v30, %v7168_v61  ;;  %v7546_v61 = vld [vmem:[%s13533_s17 + $0x20] sm:$0xff]  ;;  %v7543_v30 = vld [vmem:[%s13533_s17 + $0x8] sm:$0xff] }
0x11a1   : > { %9050 = vmatpush3.msra.mxu0 %v7253_v6  ;;  %v7542_v6 = vld [vmem:[%s13533_s17] sm:$0xff] }
0x11a2   : > { %9051 = vmatprep.subr.mxu0 %v13837_v51 }
0x11a3   : > { %9052 = vmatpush3.msra.mxu0 %v6572_v45  ;;  %v7842_v45 = vld [vmem:[%s13532_s16] ss:$0 sm:$0xff] }
0x11a4   : > { %9054 = vmatmul.mubr.msk.f32.vlgmr.msra.gmra.mxu0 %vm7261_vm7, %v9101_v44  ;;  %v7336_v44 = vld [vmem:[%s13529_s13] sm:$0xff]  ;;  %8653 = vmatprep.subr.mxu0 %v7463_v13 }
0x11a5   : > { %7390 = vmatpush1.msra.mxu1 %v7336_v44  ;;  %8654 = vmatpush3.msra.mxu0 %v7447_v37 }
0x11a6   : > { %9056 = vmatprep.subr.mxu1 %v13837_v51  ;;  %8655 = vmatprep.subr.mxu0 %v7462_v8  ;;  %v7845_v8 = vld [vmem:[%s13535_s19] ss:$0 sm:$0xff] }
0x11a7   : > { %8656 = vmatpush3.msra.mxu0 %v7446_v10 }
0x11a8   : > { %8657 = vmatprep.subr.mxu0 %v7461_v3 }
0x11a9   : > { %8658 = vmatpush3.msra.mxu0 %v7445_v21 }
0x11aa   : > { %8659 = vmatprep.subr.mxu0 %v7460_v34  ;;  %v7846_v34 = vld [vmem:[#allocation2] ss:$0 sm:$0xff] }
0x11ab   : > { %8660 = vmatpush3.msra.mxu0 %v7444_v27 }
0x11ac   : > { %8661 = vmatprep.subr.mxu0 %v7459_v23 }
0x11ad   : > { %8662 = vmatpush3.msra.mxu0 %v7443_v58 }
0x11ae   : > { %8663 = vmatprep.subr.mxu0 %v7458_v18 }
0x11af   : > { %8664 = vmatpush3.msra.mxu0 %v7442_v54 }
0x11b0   : > { %8665 = vmatprep.subr.mxu0 %v7457_v62 }
0x11b1   : > { %8666 = vmatpush3.msra.mxu0 %v7441_v26 }
0x11b2   : > { %8667 = vmatprep.subr.mxu0 %v7456_v28 }
0x11b3   : > { %8668 = vmatpush3.msra.mxu0 %v7440_v57 }
0x11b4   : > { %8669 = vmatprep.subr.mxu0 %v7455_v14 }
0x11b5   : > { %8670 = vmatpush3.msra.mxu0 %v7439_v52 }
0x11b6   : > { %8671 = vmatprep.subr.mxu0 %v7454_v40 }
0x11b7   : > { %8672 = vmatpush3.msra.mxu0 %v7438_v12 }
0x11b8   : > { %8673 = vmatprep.subr.mxu0 %v7453_v20 }
0x11b9   : > { %8674 = vmatpush3.msra.mxu0 %v7437_v56 }
0x11ba   : > { %8675 = vmatprep.subr.mxu0 %v7452_v19 }
0x11bb   : > { %8676 = vmatpush3.msra.mxu0 %v7436_v39 }
0x11bc   : > { %8677 = vmatprep.subr.mxu0 %v7451_v50 }
0x11bd   : > { %8678 = vmatpush3.msra.mxu0 %v7435_v35 }
0x11be   : > { %8679 = vmatprep.subr.mxu0 %v7450_v33 }
0x11bf   : > { %8680 = vmatpush3.msra.mxu0 %v7434_v59 }
0x11c0   : > { %8681 = vmatprep.subr.mxu0 %v7449_v11 }
0x11c1   : > { %8682 = vmatpush3.msra.mxu0 %v7433_v31 }
0x11c2   : > { %8683 = vmatprep.subr.mxu0 %v7448_v1 }
0x11c3   : > { %8684 = vmatpush3.msra.mxu0 %v7432_v41 }
0x1264   : > { %v7331_v42 = vpop.f32.mrf.mxu0 }
0x1265   : > { %v7332_v25 = vadd.f32 %v7839_v63, %v7331_v42 }
0x1266   : > { %v9055_v16 = vpop.f32.mrf.mxu0 }
0x1267   : > { %v7335_v17 = vmax.f32 %v7332_v25, 0.0 }
0x1269   : > { %7841 = vmatmul.mubr.msk.f32.vlgmr.msra.gmra.mxu1 %vm3334_vm12, %v7335_v17  ;;  %vm7557_vm12 = vcmask 523264  }
0x126a   : > { %9072 = vmatprep.mubr.msk.f32.mxu1 %vm9102_vm4, %v13837_v51  ;;  %9057 = vmatpush3.msra.mxu1 %v7549_v38  ;;  %vm7651_vm4 = vcmask 0  }
0x126b   : > { %9058 = vmatprep.subr.mxu1 %v13837_v51 }
0x126c   : > { %9059 = vmatpush3.msra.mxu1 %v7548_v53 }
0x126d   : > { %9060 = vmatprep.subr.mxu1 %v13837_v51 }
0x126e   : > { %9061 = vmatpush3.msra.mxu1 %v7547_v48 }
0x126f   : > { %9062 = vmatprep.subr.mxu1 %v13837_v51 }
0x1270   : > { %9063 = vmatpush3.msra.mxu1 %v7546_v61 }
0x1271   : > { %9064 = vmatprep.subr.mxu1 %v13837_v51 }
0x1272   : > { %9065 = vmatpush3.msra.mxu1 %v7545_v5 }
0x1273   : > { %9066 = vmatprep.subr.mxu1 %v13837_v51 }
0x1274   : > { %9067 = vmatpush3.msra.mxu1 %v7544_v32 }
0x1275   : > { %9068 = vmatprep.subr.mxu1 %v13837_v51 }
0x1276   : > { %9069 = vmatpush3.msra.mxu1 %v7543_v30 }
0x1277   : > { %9070 = vmatprep.subr.mxu1 %v13837_v51  ;;  %v7843_v51 = vld [vmem:[%s13534_s18] ss:$0 sm:$0xff] }
0x1278   : > { %9071 = vmatpush3.msra.mxu1 %v7542_v6 }
0x1329   : > { %v7425_v46 = vpop.f32.mrf.mxu1 }
0x132a   : > { %v7426_v4 = vadd.f32 %v7425_v46, %v7349_v36 }
0x132b   : > { %v7427_v47 = vpop.f32.mrf.mxu1 }
0x132c   : > { %v7428_v0 = vadd.f32 %v7427_v47, %v7353_v29  ;;  %v7430_v15 = vmax.f32 %v7426_v4, 0.0 }
0x132e   : > { %v7431_v22 = vmax.f32 %v7428_v0, 0.0 }
0x1330   : > { %7535 = vmatprep.mubr.f32.mxu0 %v7431_v22 }
0x1331   : > { %7536 = vmatmul.mubr.f32.vlgmr.msra.gmra.mxu0 %v7430_v15 }
0x13f1   : > { %v8685_v9 = vpop.f32.mrf.mxu0 }
0x13f3   : > { %v8686_v43 = vpop.f32.mrf.mxu0 }
0x13f4   : > { %v8687_v60 = vadd.f32 %v8686_v43, %v8685_v9 }
0x13f6   : > { %v7538_v7 = vadd.f32 %v8687_v60, %v7842_v45 }
0x13f8   : > { %v7541_v2 = vmax.f32 %v7538_v7, 0.0 }
0x13fa   : > { %9073 = vmatmul.mubr.msk.f32.vlgmr.msra.gmra.mxu1 %vm7557_vm12, %v7541_v2 }
0x14ba   : > { %v7627_v44 = vpop.f32.mrf.mxu1 }
0x14bb   : > { %v7628_v13 = vadd.f32 %v7843_v51, %v7627_v44 }
0x14bc   : > { %v9074_v37 = vpop.f32.mrf.mxu1 }
0x14bd   : > { %v7631_v10 = vmax.f32 %v7628_v13, 0.0 }
0x14bf   : > { %v7639_v3 = vmul.f32 %v7845_v8, %v7631_v10 }
0x14c1   : > { %v7640_v21 = vsel %vm7261_vm7, %v7639_v3, 0.0 }
0x14c2   : > { %7641 = vadd.xlane.f32.xlu0 %v7640_v21 }
0x154b   : > { %v7642_v27 = vpop.xlane.xlu0 %7641 }
0x154c   : > { %v7650_v23 = vadd.f32 %v7846_v34, %v7642_v27 }
0x154e   : > { %7652 = vst.msk [vmem:[%s654_s28] sm:$0x1] %vm7651_vm4, %v7650_v23 }
0x154f PF: > { %s33_s26 = sadd.s32 1, %s9098_s26  }
0x1550   : > { %p30_p4 = scmp.ge.s32.totalorder %s33_s26, 4  }
0x1552   :  { %32 = sbr.rel (!%p30_p4) target bundleno = 7 (0x7), region = 134 }

</bundles_post_ra>
